<compile_context>
chip_gen: v5e
topology: v5e:2x2
jax: 0.10.0
libtpu: 0.0.40
codegen_flags: <defaults>
</compile_context>

<pallas_src>
import jax
import jax.numpy as jnp
from jax import lax
from jax.experimental import pallas as pl
from jax.experimental.pallas import tpu as pltpu


def _round_up(x, m):
    return (x + m - 1) // m * m


def _device_kind():
    try:
        return jax.devices()[0].device_kind.lower()
    except Exception:  # pragma: no cover
        return ""


def _estimate_vmem_bytes(L, S, Tc, Bb, Hp, E_pad):
    f32, bf16 = 4, 2
    est = Tc * Bb * 4 * Hp * f32                       # gx chunk scratch
    est += (S * Bb if L > 1 else 8) * Hp * bf16        # inter-layer activations
    est += 2 * Hp * 4 * Hp * bf16                      # whh double buffer
    est += (2 * Hp * 4 * Hp * bf16) if L > 1 else (2 * 8 * 128 * bf16)  # wih buffer
    est += 2 * S * Bb * E_pad * bf16                   # x block (double-buffered)
    est += 2 * E_pad * 4 * Hp * bf16                   # layer-0 W_ih block
    est += 2 * L * 4 * Hp * f32                        # biases
    est += 2 * 2 * L * Bb * Hp * f32                   # h/c output blocks
    return est


def _make_encoder_kernel(L, S, Tc, Bb, Hp, E_pad):
    """Builds the fused multi-layer LSTM kernel (all shapes static)."""
    n_full = S // Tc
    rem = S - n_full * Tc

    def kernel(x_ref, wih0_ref, b_ref, wih_hbm, whh_hbm,
               h_out_ref, c_out_ref,
               gx_sc, act_sc, wih_buf, whh_buf, sem):
        # x_ref    : (S*Bb, E_pad)   bf16   embedded input, time-major, flattened
        # wih0_ref : (E_pad, 4*Hp)   bf16   layer-0 input weights (gate-blocked)
        # b_ref    : (L, 1, 4*Hp)    f32    combined biases
        # wih_hbm  : (L-1|1, Hp,4Hp) bf16   HBM: input weights layers 1..L-1
        # whh_hbm  : (L, Hp, 4*Hp)   bf16   HBM: recurrent weights
        # h_out/c_out : (L, Bb, Hp)  f32
        # gx_sc    : (Tc*Bb, 4*Hp)   f32    chunked hoisted input gates
        # act_sc   : (S*Bb, Hp)      bf16   previous layer's output sequence
        # wih_buf/whh_buf : (2, Hp, 4*Hp) bf16  streamed-weight double buffers
        # sem      : DMA semaphores (2, 2)

        def whh_dma(layer, slot):
            return pltpu.make_async_copy(whh_hbm.at[layer], whh_buf.at[slot],
                                         sem.at[1, slot])

        def wih_dma(layer, slot):
            # wih_hbm index j holds layer (j+1)'s input weights.
            return pltpu.make_async_copy(wih_hbm.at[layer - 1], wih_buf.at[slot],
                                         sem.at[0, slot])

        whh_dma(0, 0).start()          # prime layer-0 recurrent weights

        for l in range(L):             # static unroll over the (few) layers
            slot = l % 2
            whh_dma(l, slot).wait()
            if l > 0:
                wih_dma(l, slot).wait()
            if l + 1 < L:              # prefetch next layer's weights (hidden
                whh_dma(l + 1, 1 - slot).start()   # behind this layer's loop)
                wih_dma(l + 1, 1 - slot).start()

            write_act = (l + 1 < L)    # last layer's outputs are never read

            def project(row0, nsteps, l=l, slot=slot):
                # One MXU-friendly matmul per time chunk; bias folded in here.
                nrows = nsteps * Bb
                if l == 0:
                    xin = x_ref[pl.ds(row0, nrows), :]
                    w = wih0_ref[...]
                else:
                    xin = act_sc[pl.ds(row0, nrows), :]
                    w = wih_buf[slot]
                gx_sc[0:nrows, :] = (
                    jnp.dot(xin, w, preferred_element_type=jnp.float32)
                    + b_ref[l])

            def make_step(row0, slot=slot, write_act=write_act):
                def step(t, carry):
                    h, c = carry
                    r = pl.multiple_of(t * Bb, Bb)
                    gates = gx_sc[pl.ds(r, Bb), :] + jnp.dot(
                        h.astype(jnp.bfloat16), whh_buf[slot],
                        preferred_element_type=jnp.float32)
                    # PyTorch gate order i, f, g, o; Hp multiple of 128 so every
                    # slice is lane-tile aligned. Nonlinearities kept in f32
                    # (safe on v5e: no bf16 VPU/EUP there).
                    i_g = jax.nn.sigmoid(gates[:, 0 * Hp:1 * Hp])
                    f_g = jax.nn.sigmoid(gates[:, 1 * Hp:2 * Hp])
                    g_g = jnp.tanh(gates[:, 2 * Hp:3 * Hp])
                    o_g = jax.nn.sigmoid(gates[:, 3 * Hp:4 * Hp])
                    c_new = f_g * c + i_g * g_g
                    h_new = o_g * jnp.tanh(c_new)
                    if write_act:
                        act_sc[pl.ds(row0 + r, Bb), :] = h_new.astype(act_sc.dtype)
                    return h_new, c_new
                return step

            h = jnp.zeros((Bb, Hp), jnp.float32)
            c = jnp.zeros((Bb, Hp), jnp.float32)

            if n_full > 0:
                def chunk(ci, carry, project=project, make_step=make_step):
                    row0 = pl.multiple_of(ci * (Tc * Bb), Tc * Bb)
                    project(row0, Tc)
                    return lax.fori_loop(0, Tc, make_step(row0), carry,
                                         unroll=True if Tc <= 8 else 2)
                h, c = lax.fori_loop(0, n_full, chunk, (h, c))

            if rem > 0:                       # static remainder chunk
                row0 = n_full * Tc * Bb
                project(row0, rem)
                h, c = lax.fori_loop(0, rem, make_step(row0), (h, c), unroll=True)

            h_out_ref[l] = h
            c_out_ref[l] = c

    return kernel


@jax.jit
def encoder_forward(x_tokens, emb, layers):
    """x_tokens: (S, B) int32 -> (hidden, cell), each (num_layers, B, H)."""
    S, B = x_tokens.shape
    E = emb.shape[1]
    L = len(layers)
    H = layers[0][1].shape[0]                 # W_hh is (H, 4H)

    Bp = _round_up(B, 8)                      # sublane padding
    Hp = _round_up(H, 128)                    # lane padding
    E_pad = _round_up(E, 128)                 # lane-dense layer-0 K dim
    Tc = min(S, 8)                            # time-chunk for the hoisted proj

    kind = _device_kind()
    multi_core = ("v4" in kind) or ("v7" in kind) or ("7x" in kind)
    n_split = 2 if (multi_core and Bp % 16 == 0) else 1   # both TCs on v7x/v4
    Bb = Bp // n_split

    # Embedding lookup (gather) + identity (eval-mode) dropout: plain-JAX glue.
    x_emb = emb[x_tokens]                                           # (S, B, E) f32
    x_emb = jnp.pad(x_emb, ((0, 0), (0, Bp - B), (0, E_pad - E)))
    x_split = (x_emb.astype(jnp.bfloat16)
               .reshape(S, n_split, Bb, E_pad)
               .transpose(1, 0, 2, 3)
               .reshape(n_split, S * Bb, E_pad))                    # per-core slab

    def pad_gate_cols(w):                     # (In, 4H) -> (In, 4*Hp), gate-blocked
        in_dim = w.shape[0]
        return jnp.pad(w.reshape(in_dim, 4, H),
                       ((0, 0), (0, 0), (0, Hp - H))).reshape(in_dim, 4 * Hp)

    def pad_rows(w, rows):
        return jnp.pad(w, ((0, rows - w.shape[0]), (0, 0)))

    wih0_p = pad_rows(pad_gate_cols(layers[0][0]), E_pad).astype(jnp.bfloat16)
    if L > 1:
        wih_rest_p = jnp.stack([pad_rows(pad_gate_cols(w_ih), Hp)
                                for (w_ih, _, _) in layers[1:]]).astype(jnp.bfloat16)
    else:
        wih_rest_p = jnp.zeros((1, 8, 128), jnp.bfloat16)   # tiny dummy, stays in HBM
    whh_p = jnp.stack([pad_rows(pad_gate_cols(w_hh), Hp)
                       for (_, w_hh, _) in layers]).astype(jnp.bfloat16)
    b_p = jnp.stack([jnp.pad(b.reshape(4, H), ((0, 0), (0, Hp - H))).reshape(1, 4 * Hp)
                     for (_, _, b) in layers]).astype(jnp.float32)

    kernel = _make_encoder_kernel(L, S, Tc, Bb, Hp, E_pad)

    est = _estimate_vmem_bytes(L, S, Tc, Bb, Hp, E_pad)
    cap = (56 if ("v7" in kind or "7x" in kind) else 100) * (1 << 20)
    vmem_limit = int(min(max(2 * est, 32 << 20), cap))

    h_pad, c_pad = pl.pallas_call(
        kernel,
        grid=(n_split,),
        out_shape=(jax.ShapeDtypeStruct((n_split, L, Bb, Hp), jnp.float32),
                   jax.ShapeDtypeStruct((n_split, L, Bb, Hp), jnp.float32)),
        in_specs=[
            pl.BlockSpec((None, S * Bb, E_pad), lambda s: (s, 0, 0)),   # x (VMEM)
            pl.BlockSpec((E_pad, 4 * Hp), lambda s: (0, 0)),            # W_ih layer 0
            pl.BlockSpec((L, 1, 4 * Hp), lambda s: (0, 0, 0)),          # biases
            pl.BlockSpec(memory_space=pl.ANY),    # W_ih layers 1..L-1 (HBM, streamed)
            pl.BlockSpec(memory_space=pl.ANY),    # W_hh all layers     (HBM, streamed)
        ],
        out_specs=(
            pl.BlockSpec((None, L, Bb, Hp), lambda s: (s, 0, 0, 0)),
            pl.BlockSpec((None, L, Bb, Hp), lambda s: (s, 0, 0, 0)),
        ),
        scratch_shapes=[
            pltpu.VMEM((Tc * Bb, 4 * Hp), jnp.float32),                    # gx chunk
            pltpu.VMEM(((S * Bb) if L > 1 else 8, Hp), jnp.bfloat16),      # act seq
            pltpu.VMEM((2, Hp, 4 * Hp) if L > 1 else (2, 8, 128), jnp.bfloat16),
            pltpu.VMEM((2, Hp, 4 * Hp), jnp.bfloat16),                     # W_hh dbuf
            pltpu.SemaphoreType.DMA((2, 2)),
        ],
        compiler_params=pltpu.CompilerParams(
            dimension_semantics=("parallel",),
            vmem_limit_bytes=vmem_limit),
    )(x_split, wih0_p, b_p, wih_rest_p, whh_p)

    h = h_pad.transpose(1, 0, 2, 3).reshape(L, Bp, Hp)[:, :B, :H]
    c = c_pad.transpose(1, 0, 2, 3).reshape(L, Bp, Hp)[:, :B, :H]
    return h, c


def init_encoder_params(key, input_size, embedding_size, hidden_size, num_layers):
    """Deterministic init mirroring PyTorch shapes (weights stored transposed)."""
    k_emb, key = jax.random.split(key)
    emb = jax.random.normal(k_emb, (input_size, embedding_size), jnp.float32)

    bound = 1.0 / float(hidden_size) ** 0.5
    layers = []
    in_dim = embedding_size
    for _ in range(num_layers):
        k1, k2, k3, k4, key = jax.random.split(key, 5)
        w_ih = jax.random.uniform(k1, (in_dim, 4 * hidden_size), jnp.float32,
                                  -bound, bound)
        w_hh = jax.random.uniform(k2, (hidden_size, 4 * hidden_size), jnp.float32,
                                  -bound, bound)
        b_ih = jax.random.uniform(k3, (4 * hidden_size,), jnp.float32, -bound, bound)
        b_hh = jax.random.uniform(k4, (4 * hidden_size,), jnp.float32, -bound, bound)
        layers.append((w_ih, w_hh, b_ih + b_hh))          # combined bias, (4H,)
        in_dim = hidden_size
    return emb, layers


def _encoder_reference(x_tokens, emb, layers):
    """Pure-JAX f32 reference (same semantics as nn.LSTM eval forward)."""
    x = emb[x_tokens]
    S = x.shape[0]
    hs, cs = [], []
    for (w_ih, w_hh, b) in layers:
        H = w_hh.shape[0]
        h = jnp.zeros((x.shape[1], H), jnp.float32)
        c = jnp.zeros((x.shape[1], H), jnp.float32)
        ys = []
        for t in range(S):
            g = x[t] @ w_ih + h @ w_hh + b
            i = jax.nn.sigmoid(g[:, 0 * H:1 * H])
            f = jax.nn.sigmoid(g[:, 1 * H:2 * H])
            gg = jnp.tanh(g[:, 2 * H:3 * H])
            o = jax.nn.sigmoid(g[:, 3 * H:4 * H])
            c = f * c + i * gg
            h = o * jnp.tanh(c)
            ys.append(h)
        x = jnp.stack(ys)
        hs.append(h)
        cs.append(c)
    return jnp.stack(hs), jnp.stack(cs)


def _run_case(key, vocab, E, H, L, S, B):
    k_params, k_tokens = jax.random.split(key)
    emb, layers = init_encoder_params(k_params, vocab, E, H, L)
    x = jax.random.randint(k_tokens, (S, B), 0, vocab, jnp.int32)

    hidden, cell = encoder_forward(x, emb, layers)
    hidden, cell = jax.block_until_ready((hidden, cell))

    assert hidden.shape == (L, B, H) and cell.shape == (L, B, H)
    assert bool(jnp.all(jnp.isfinite(hidden))) and bool(jnp.all(jnp.isfinite(cell)))

    # bf16 weight/activation storage -> loose-tolerance check vs f32 reference.
    h_ref, c_ref = _encoder_reference(x, emb, layers)
    assert bool(jnp.allclose(hidden, h_ref, atol=3e-2, rtol=3e-2))
    assert bool(jnp.allclose(cell, c_ref, atol=3e-2, rtol=3e-2))


if __name__ == "__main__":
    key = jax.random.PRNGKey(0)
    k1, k2 = jax.random.split(key)

    # Main config: vocab=50, E=16, H=32, 2 layers, seq=8, batch=4.
    _run_case(k1, vocab=50, E=16, H=32, L=2, S=8, B=4)
    # Secondary config exercising the remainder time-chunk and L==1 paths.
    _run_case(k2, vocab=50, E=16, H=20, L=1, S=11, B=3)

    print("KERNEL_OK")
</pallas_src>

<mosaic_0001>
module attributes {stable_mosaic.version = 11 : i64} {
  func.func @kernel(%arg0: i32, %arg1: memref<1x64x128xbf16, #tpu.memory_space<vmem>>, %arg2: memref<128x512xbf16, #tpu.memory_space<vmem>>, %arg3: memref<2x1x512xf32, #tpu.memory_space<vmem>>, %arg4: memref<1x128x512xbf16, #tpu.memory_space<any>>, %arg5: memref<2x128x512xbf16, #tpu.memory_space<any>>, %arg6: memref<1x2x8x128xf32, #tpu.memory_space<vmem>>, %arg7: memref<1x2x8x128xf32, #tpu.memory_space<vmem>>, %arg8: memref<64x512xf32, #tpu.memory_space<vmem>>, %arg9: memref<64x128xbf16, #tpu.memory_space<vmem>>, %arg10: memref<2x128x512xbf16, #tpu.memory_space<vmem>>, %arg11: memref<2x128x512xbf16, #tpu.memory_space<vmem>>, %arg12: memref<2x2x!tpu.dma_semaphore, #tpu.memory_space<semaphore_mem>>) attributes {dimension_semantics = [#tpu.dimension_semantics<parallel>], iteration_bounds = array<i64: 1>, scalar_prefetch = 0 : i64, scratch_operands = 5 : i64, tpu.core_type = #tpu.core_type<tc>, window_params = [{transform_indices = @transform_0, window_bounds = array<i64: 1, 64, 128>}, {pipeline_mode = #tpu.pipeline_mode<synchronous>, transform_indices = @transform_1, window_bounds = array<i64: 128, 512>}, {pipeline_mode = #tpu.pipeline_mode<synchronous>, transform_indices = @transform_2, window_bounds = array<i64: 2, 1, 512>}, {}, {}, {transform_indices = @transform_5, window_bounds = array<i64: 1, 2, 8, 128>}, {transform_indices = @transform_6, window_bounds = array<i64: 1, 2, 8, 128>}]} {
    %c0_i32 = arith.constant 0 : i32
    %c0_i32_0 = arith.constant 0 : i32
    %c1_i32 = arith.constant 1 : i32
    %c0_i32_1 = arith.constant 0 : i32
    %c0_i32_2 = arith.constant 0 : i32
    %c0_i32_3 = arith.constant 0 : i32
    %0 = tpu.memref_slice %arg5[%c0_i32, %c0_i32_2, %c0_i32_3] : memref<2x128x512xbf16, #tpu.memory_space<any>> -> memref<1x128x512xbf16, #tpu.memory_space<any>>
    %1 = tpu.memref_squeeze %0 : memref<1x128x512xbf16, #tpu.memory_space<any>> -> memref<128x512xbf16, #tpu.memory_space<any>>
    %c0_i32_4 = arith.constant 0 : i32
    %c0_i32_5 = arith.constant 0 : i32
    %2 = tpu.memref_slice %arg11[%c0_i32_0, %c0_i32_4, %c0_i32_5] : memref<2x128x512xbf16, #tpu.memory_space<vmem>> -> memref<1x128x512xbf16, #tpu.memory_space<vmem>>
    %3 = tpu.memref_squeeze %2 : memref<1x128x512xbf16, #tpu.memory_space<vmem>> -> memref<128x512xbf16, #tpu.memory_space<vmem>>
    %4 = tpu.memref_slice %arg12[%c1_i32, %c0_i32_1] : memref<2x2x!tpu.dma_semaphore, #tpu.memory_space<semaphore_mem>> -> memref<1x1x!tpu.dma_semaphore, #tpu.memory_space<semaphore_mem>>
    %5 = tpu.memref_squeeze %4 : memref<1x1x!tpu.dma_semaphore, #tpu.memory_space<semaphore_mem>> -> memref<!tpu.dma_semaphore, #tpu.memory_space<semaphore_mem>>
    tpu.enqueue_dma source(%1 : memref<128x512xbf16, #tpu.memory_space<any>>) target(%3 : memref<128x512xbf16, #tpu.memory_space<vmem>>) target_semaphore(%5 : memref<!tpu.dma_semaphore, #tpu.memory_space<semaphore_mem>>)
    %c0_i32_6 = arith.constant 0 : i32
    %c0_i32_7 = arith.constant 0 : i32
    %c1_i32_8 = arith.constant 1 : i32
    %c0_i32_9 = arith.constant 0 : i32
    %c0_i32_10 = arith.constant 0 : i32
    %c0_i32_11 = arith.constant 0 : i32
    %6 = tpu.memref_slice %arg5[%c0_i32_6, %c0_i32_10, %c0_i32_11] : memref<2x128x512xbf16, #tpu.memory_space<any>> -> memref<1x128x512xbf16, #tpu.memory_space<any>>
    %7 = tpu.memref_squeeze %6 : memref<1x128x512xbf16, #tpu.memory_space<any>> -> memref<128x512xbf16, #tpu.memory_space<any>>
    %c0_i32_12 = arith.constant 0 : i32
    %c0_i32_13 = arith.constant 0 : i32
    %8 = tpu.memref_slice %arg11[%c0_i32_7, %c0_i32_12, %c0_i32_13] : memref<2x128x512xbf16, #tpu.memory_space<vmem>> -> memref<1x128x512xbf16, #tpu.memory_space<vmem>>
    %9 = tpu.memref_squeeze %8 : memref<1x128x512xbf16, #tpu.memory_space<vmem>> -> memref<128x512xbf16, #tpu.memory_space<vmem>>
    %10 = tpu.memref_slice %arg12[%c1_i32_8, %c0_i32_9] : memref<2x2x!tpu.dma_semaphore, #tpu.memory_space<semaphore_mem>> -> memref<1x1x!tpu.dma_semaphore, #tpu.memory_space<semaphore_mem>>
    %11 = tpu.memref_squeeze %10 : memref<1x1x!tpu.dma_semaphore, #tpu.memory_space<semaphore_mem>> -> memref<!tpu.dma_semaphore, #tpu.memory_space<semaphore_mem>>
    tpu.wait_dma2 semaphore(%11 : memref<!tpu.dma_semaphore, #tpu.memory_space<semaphore_mem>>) src(%7 : memref<128x512xbf16, #tpu.memory_space<any>>) dst(%9 : memref<128x512xbf16, #tpu.memory_space<vmem>>)
    %c1_i32_14 = arith.constant 1 : i32
    %c1_i32_15 = arith.constant 1 : i32
    %c1_i32_16 = arith.constant 1 : i32
    %c1_i32_17 = arith.constant 1 : i32
    %c0_i32_18 = arith.constant 0 : i32
    %c0_i32_19 = arith.constant 0 : i32
    %12 = tpu.memref_slice %arg5[%c1_i32_14, %c0_i32_18, %c0_i32_19] : memref<2x128x512xbf16, #tpu.memory_space<any>> -> memref<1x128x512xbf16, #tpu.memory_space<any>>
    %13 = tpu.memref_squeeze %12 : memref<1x128x512xbf16, #tpu.memory_space<any>> -> memref<128x512xbf16, #tpu.memory_space<any>>
    %c0_i32_20 = arith.constant 0 : i32
    %c0_i32_21 = arith.constant 0 : i32
    %14 = tpu.memref_slice %arg11[%c1_i32_15, %c0_i32_20, %c0_i32_21] : memref<2x128x512xbf16, #tpu.memory_space<vmem>> -> memref<1x128x512xbf16, #tpu.memory_space<vmem>>
    %15 = tpu.memref_squeeze %14 : memref<1x128x512xbf16, #tpu.memory_space<vmem>> -> memref<128x512xbf16, #tpu.memory_space<vmem>>
    %16 = tpu.memref_slice %arg12[%c1_i32_16, %c1_i32_17] : memref<2x2x!tpu.dma_semaphore, #tpu.memory_space<semaphore_mem>> -> memref<1x1x!tpu.dma_semaphore, #tpu.memory_space<semaphore_mem>>
    %17 = tpu.memref_squeeze %16 : memref<1x1x!tpu.dma_semaphore, #tpu.memory_space<semaphore_mem>> -> memref<!tpu.dma_semaphore, #tpu.memory_space<semaphore_mem>>
    tpu.enqueue_dma source(%13 : memref<128x512xbf16, #tpu.memory_space<any>>) target(%15 : memref<128x512xbf16, #tpu.memory_space<vmem>>) target_semaphore(%17 : memref<!tpu.dma_semaphore, #tpu.memory_space<semaphore_mem>>)
    %c0_i32_22 = arith.constant 0 : i32
    %c1_i32_23 = arith.constant 1 : i32
    %c0_i32_24 = arith.constant 0 : i32
    %c1_i32_25 = arith.constant 1 : i32
    %c0_i32_26 = arith.constant 0 : i32
    %c0_i32_27 = arith.constant 0 : i32
    %18 = tpu.memref_slice %arg4[%c0_i32_22, %c0_i32_26, %c0_i32_27] : memref<1x128x512xbf16, #tpu.memory_space<any>> -> memref<1x128x512xbf16, #tpu.memory_space<any>>
    %19 = tpu.memref_squeeze %18 : memref<1x128x512xbf16, #tpu.memory_space<any>> -> memref<128x512xbf16, #tpu.memory_space<any>>
    %c0_i32_28 = arith.constant 0 : i32
    %c0_i32_29 = arith.constant 0 : i32
    %20 = tpu.memref_slice %arg10[%c1_i32_23, %c0_i32_28, %c0_i32_29] : memref<2x128x512xbf16, #tpu.memory_space<vmem>> -> memref<1x128x512xbf16, #tpu.memory_space<vmem>>
    %21 = tpu.memref_squeeze %20 : memref<1x128x512xbf16, #tpu.memory_space<vmem>> -> memref<128x512xbf16, #tpu.memory_space<vmem>>
    %22 = tpu.memref_slice %arg12[%c0_i32_24, %c1_i32_25] : memref<2x2x!tpu.dma_semaphore, #tpu.memory_space<semaphore_mem>> -> memref<1x1x!tpu.dma_semaphore, #tpu.memory_space<semaphore_mem>>
    %23 = tpu.memref_squeeze %22 : memref<1x1x!tpu.dma_semaphore, #tpu.memory_space<semaphore_mem>> -> memref<!tpu.dma_semaphore, #tpu.memory_space<semaphore_mem>>
    tpu.enqueue_dma source(%19 : memref<128x512xbf16, #tpu.memory_space<any>>) target(%21 : memref<128x512xbf16, #tpu.memory_space<vmem>>) target_semaphore(%23 : memref<!tpu.dma_semaphore, #tpu.memory_space<semaphore_mem>>)
    %cst = arith.constant 0.000000e+00 : f32
    %24 = vector.broadcast %cst : f32 to vector<8x128xf32>
    %cst_30 = arith.constant 0.000000e+00 : f32
    %25 = vector.broadcast %cst_30 : f32 to vector<8x128xf32>
    %c0_i32_31 = arith.constant 0 : i32
    %c64_i32 = arith.constant 64 : i32
    %26 = arith.muli %c0_i32_31, %c64_i32 : i32
    %27 = tpu.assume_multiple %26, 64 : i32
    %c0 = arith.constant 0 : index
    %28 = arith.index_cast %27 : i32 to index
    %c0_32 = arith.constant 0 : index
    %29 = vector.load %arg1[%c0, %28, %c0_32] : memref<1x64x128xbf16, #tpu.memory_space<vmem>>, vector<1x64x128xbf16>
    %30 = vector.shape_cast %29 : vector<1x64x128xbf16> to vector<64x128xbf16>
    %c0_33 = arith.constant 0 : index
    %c0_34 = arith.constant 0 : index
    %31 = vector.load %arg2[%c0_33, %c0_34] : memref<128x512xbf16, #tpu.memory_space<vmem>>, vector<128x512xbf16>
    %cst_35 = arith.constant dense<0.000000e+00> : vector<64x512xf32>
    %32 = tpu.matmul %30, %31, %cst_35 {dimension_numbers = #tpu.dot_dimension_numbers<[1], [0], [0], [1], [0, 0, 1, 1], [], []>} : vector<64x128xbf16>, vector<128x512xbf16>, vector<64x512xf32> -> vector<64x512xf32>
    %c0_36 = arith.constant 0 : index
    %c0_37 = arith.constant 0 : index
    %c0_38 = arith.constant 0 : index
    %33 = vector.load %arg3[%c0_36, %c0_37, %c0_38] : memref<2x1x512xf32, #tpu.memory_space<vmem>>, vector<1x1x512xf32>
    %34 = vector.shape_cast %33 : vector<1x1x512xf32> to vector<1x512xf32>
    %35 = vector.broadcast %34 : vector<1x512xf32> to vector<64x512xf32>
    %36 = arith.addf %32, %35 : vector<64x512xf32>
    %c0_39 = arith.constant 0 : index
    %c0_40 = arith.constant 0 : index
    %37 = vector.load %arg8[%c0_39, %c0_40] : memref<64x512xf32, #tpu.memory_space<vmem>>, vector<64x512xf32>
    tpu.vector_store %arg8[%c0_39, %c0_40], %36 {strides = array<i32>} : memref<64x512xf32, #tpu.memory_space<vmem>>, vector<64x512xf32>,
    %c0_i32_41 = arith.constant 0 : i32
    %c8_i32 = arith.constant 8 : i32
    %38 = arith.muli %c0_i32_41, %c8_i32 : i32
    %39 = tpu.assume_multiple %38, 8 : i32
    %40 = arith.index_cast %39 : i32 to index
    %c0_42 = arith.constant 0 : index
    %41 = vector.load %arg8[%40, %c0_42] : memref<64x512xf32, #tpu.memory_space<vmem>>, vector<8x512xf32>
    %42 = arith.truncf %24 : vector<8x128xf32> to vector<8x128xbf16>
    %c0_43 = arith.constant 0 : index
    %c0_44 = arith.constant 0 : index
    %c0_45 = arith.constant 0 : index
    %43 = vector.load %arg11[%c0_43, %c0_44, %c0_45] : memref<2x128x512xbf16, #tpu.memory_space<vmem>>, vector<1x128x512xbf16>
    %44 = vector.shape_cast %43 : vector<1x128x512xbf16> to vector<128x512xbf16>
    %cst_46 = arith.constant dense<0.000000e+00> : vector<8x512xf32>
    %45 = tpu.matmul %42, %44, %cst_46 {dimension_numbers = #tpu.dot_dimension_numbers<[1], [0], [0], [1], [0, 0, 1, 1], [], []>} : vector<8x128xbf16>, vector<128x512xbf16>, vector<8x512xf32> -> vector<8x512xf32>
    %46 = arith.addf %41, %45 : vector<8x512xf32>
    %47 = vector.extract_strided_slice %46 {offsets = [0, 0], sizes = [8, 128], strides = [1, 1]} : vector<8x512xf32> to vector<8x128xf32>
    %48 = arith.negf %47 : vector<8x128xf32>
    %49 = math.exp %48 : vector<8x128xf32>
    %cst_47 = arith.constant 1.000000e+00 : f32
    %50 = vector.broadcast %cst_47 : f32 to vector<8x128xf32>
    %51 = arith.addf %50, %49 : vector<8x128xf32>
    %52 = arith.divf %50, %51 : vector<8x128xf32>
    %53 = vector.extract_strided_slice %46 {offsets = [0, 128], sizes = [8, 128], strides = [1, 1]} : vector<8x512xf32> to vector<8x128xf32>
    %54 = arith.negf %53 : vector<8x128xf32>
    %55 = math.exp %54 : vector<8x128xf32>
    %cst_48 = arith.constant 1.000000e+00 : f32
    %56 = vector.broadcast %cst_48 : f32 to vector<8x128xf32>
    %57 = arith.addf %56, %55 : vector<8x128xf32>
    %58 = arith.divf %56, %57 : vector<8x128xf32>
    %59 = vector.extract_strided_slice %46 {offsets = [0, 256], sizes = [8, 128], strides = [1, 1]} : vector<8x512xf32> to vector<8x128xf32>
    %60 = math.tanh %59 : vector<8x128xf32>
    %61 = vector.extract_strided_slice %46 {offsets = [0, 384], sizes = [8, 128], strides = [1, 1]} : vector<8x512xf32> to vector<8x128xf32>
    %62 = arith.negf %61 : vector<8x128xf32>
    %63 = math.exp %62 : vector<8x128xf32>
    %cst_49 = arith.constant 1.000000e+00 : f32
    %64 = vector.broadcast %cst_49 : f32 to vector<8x128xf32>
    %65 = arith.addf %64, %63 : vector<8x128xf32>
    %66 = arith.divf %64, %65 : vector<8x128xf32>
    %67 = arith.mulf %58, %25 : vector<8x128xf32>
    %68 = arith.mulf %52, %60 : vector<8x128xf32>
    %69 = arith.addf %67, %68 : vector<8x128xf32>
    %70 = math.tanh %69 : vector<8x128xf32>
    %71 = arith.mulf %66, %70 : vector<8x128xf32>
    %72 = arith.truncf %71 : vector<8x128xf32> to vector<8x128xbf16>
    %73 = arith.addi %27, %39 : i32
    %74 = arith.index_cast %73 : i32 to index
    %c0_50 = arith.constant 0 : index
    %75 = vector.load %arg9[%74, %c0_50] : memref<64x128xbf16, #tpu.memory_space<vmem>>, vector<8x128xbf16>
    tpu.vector_store %arg9[%74, %c0_50], %72 {strides = array<i32>} : memref<64x128xbf16, #tpu.memory_space<vmem>>, vector<8x128xbf16>,
    %c1_i32_51 = arith.constant 1 : i32
    %c8_i32_52 = arith.constant 8 : i32
    %76 = arith.muli %c1_i32_51, %c8_i32_52 : i32
    %77 = tpu.assume_multiple %76, 8 : i32
    %78 = arith.index_cast %77 : i32 to index
    %c0_53 = arith.constant 0 : index
    %79 = vector.load %arg8[%78, %c0_53] : memref<64x512xf32, #tpu.memory_space<vmem>>, vector<8x512xf32>
    %80 = arith.truncf %71 : vector<8x128xf32> to vector<8x128xbf16>
    %c0_54 = arith.constant 0 : index
    %c0_55 = arith.constant 0 : index
    %c0_56 = arith.constant 0 : index
    %81 = vector.load %arg11[%c0_54, %c0_55, %c0_56] : memref<2x128x512xbf16, #tpu.memory_space<vmem>>, vector<1x128x512xbf16>
    %82 = vector.shape_cast %81 : vector<1x128x512xbf16> to vector<128x512xbf16>
    %cst_57 = arith.constant dense<0.000000e+00> : vector<8x512xf32>
    %83 = tpu.matmul %80, %82, %cst_57 {dimension_numbers = #tpu.dot_dimension_numbers<[1], [0], [0], [1], [0, 0, 1, 1], [], []>} : vector<8x128xbf16>, vector<128x512xbf16>, vector<8x512xf32> -> vector<8x512xf32>
    %84 = arith.addf %79, %83 : vector<8x512xf32>
    %85 = vector.extract_strided_slice %84 {offsets = [0, 0], sizes = [8, 128], strides = [1, 1]} : vector<8x512xf32> to vector<8x128xf32>
    %86 = arith.negf %85 : vector<8x128xf32>
    %87 = math.exp %86 : vector<8x128xf32>
    %cst_58 = arith.constant 1.000000e+00 : f32
    %88 = vector.broadcast %cst_58 : f32 to vector<8x128xf32>
    %89 = arith.addf %88, %87 : vector<8x128xf32>
    %90 = arith.divf %88, %89 : vector<8x128xf32>
    %91 = vector.extract_strided_slice %84 {offsets = [0, 128], sizes = [8, 128], strides = [1, 1]} : vector<8x512xf32> to vector<8x128xf32>
    %92 = arith.negf %91 : vector<8x128xf32>
    %93 = math.exp %92 : vector<8x128xf32>
    %cst_59 = arith.constant 1.000000e+00 : f32
    %94 = vector.broadcast %cst_59 : f32 to vector<8x128xf32>
    %95 = arith.addf %94, %93 : vector<8x128xf32>
    %96 = arith.divf %94, %95 : vector<8x128xf32>
    %97 = vector.extract_strided_slice %84 {offsets = [0, 256], sizes = [8, 128], strides = [1, 1]} : vector<8x512xf32> to vector<8x128xf32>
    %98 = math.tanh %97 : vector<8x128xf32>
    %99 = vector.extract_strided_slice %84 {offsets = [0, 384], sizes = [8, 128], strides = [1, 1]} : vector<8x512xf32> to vector<8x128xf32>
    %100 = arith.negf %99 : vector<8x128xf32>
    %101 = math.exp %100 : vector<8x128xf32>
    %cst_60 = arith.constant 1.000000e+00 : f32
    %102 = vector.broadcast %cst_60 : f32 to vector<8x128xf32>
    %103 = arith.addf %102, %101 : vector<8x128xf32>
    %104 = arith.divf %102, %103 : vector<8x128xf32>
    %105 = arith.mulf %96, %69 : vector<8x128xf32>
    %106 = arith.mulf %90, %98 : vector<8x128xf32>
    %107 = arith.addf %105, %106 : vector<8x128xf32>
    %108 = math.tanh %107 : vector<8x128xf32>
    %109 = arith.mulf %104, %108 : vector<8x128xf32>
    %110 = arith.truncf %109 : vector<8x128xf32> to vector<8x128xbf16>
    %111 = arith.addi %27, %77 : i32
    %112 = arith.index_cast %111 : i32 to index
    %c0_61 = arith.constant 0 : index
    %113 = vector.load %arg9[%112, %c0_61] : memref<64x128xbf16, #tpu.memory_space<vmem>>, vector<8x128xbf16>
    tpu.vector_store %arg9[%112, %c0_61], %110 {strides = array<i32>} : memref<64x128xbf16, #tpu.memory_space<vmem>>, vector<8x128xbf16>,
    %c2_i32 = arith.constant 2 : i32
    %c8_i32_62 = arith.constant 8 : i32
    %114 = arith.muli %c2_i32, %c8_i32_62 : i32
    %115 = tpu.assume_multiple %114, 8 : i32
    %116 = arith.index_cast %115 : i32 to index
    %c0_63 = arith.constant 0 : index
    %117 = vector.load %arg8[%116, %c0_63] : memref<64x512xf32, #tpu.memory_space<vmem>>, vector<8x512xf32>
    %118 = arith.truncf %109 : vector<8x128xf32> to vector<8x128xbf16>
    %c0_64 = arith.constant 0 : index
    %c0_65 = arith.constant 0 : index
    %c0_66 = arith.constant 0 : index
    %119 = vector.load %arg11[%c0_64, %c0_65, %c0_66] : memref<2x128x512xbf16, #tpu.memory_space<vmem>>, vector<1x128x512xbf16>
    %120 = vector.shape_cast %119 : vector<1x128x512xbf16> to vector<128x512xbf16>
    %cst_67 = arith.constant dense<0.000000e+00> : vector<8x512xf32>
    %121 = tpu.matmul %118, %120, %cst_67 {dimension_numbers = #tpu.dot_dimension_numbers<[1], [0], [0], [1], [0, 0, 1, 1], [], []>} : vector<8x128xbf16>, vector<128x512xbf16>, vector<8x512xf32> -> vector<8x512xf32>
    %122 = arith.addf %117, %121 : vector<8x512xf32>
    %123 = vector.extract_strided_slice %122 {offsets = [0, 0], sizes = [8, 128], strides = [1, 1]} : vector<8x512xf32> to vector<8x128xf32>
    %124 = arith.negf %123 : vector<8x128xf32>
    %125 = math.exp %124 : vector<8x128xf32>
    %cst_68 = arith.constant 1.000000e+00 : f32
    %126 = vector.broadcast %cst_68 : f32 to vector<8x128xf32>
    %127 = arith.addf %126, %125 : vector<8x128xf32>
    %128 = arith.divf %126, %127 : vector<8x128xf32>
    %129 = vector.extract_strided_slice %122 {offsets = [0, 128], sizes = [8, 128], strides = [1, 1]} : vector<8x512xf32> to vector<8x128xf32>
    %130 = arith.negf %129 : vector<8x128xf32>
    %131 = math.exp %130 : vector<8x128xf32>
    %cst_69 = arith.constant 1.000000e+00 : f32
    %132 = vector.broadcast %cst_69 : f32 to vector<8x128xf32>
    %133 = arith.addf %132, %131 : vector<8x128xf32>
    %134 = arith.divf %132, %133 : vector<8x128xf32>
    %135 = vector.extract_strided_slice %122 {offsets = [0, 256], sizes = [8, 128], strides = [1, 1]} : vector<8x512xf32> to vector<8x128xf32>
    %136 = math.tanh %135 : vector<8x128xf32>
    %137 = vector.extract_strided_slice %122 {offsets = [0, 384], sizes = [8, 128], strides = [1, 1]} : vector<8x512xf32> to vector<8x128xf32>
    %138 = arith.negf %137 : vector<8x128xf32>
    %139 = math.exp %138 : vector<8x128xf32>
    %cst_70 = arith.constant 1.000000e+00 : f32
    %140 = vector.broadcast %cst_70 : f32 to vector<8x128xf32>
    %141 = arith.addf %140, %139 : vector<8x128xf32>
    %142 = arith.divf %140, %141 : vector<8x128xf32>
    %143 = arith.mulf %134, %107 : vector<8x128xf32>
    %144 = arith.mulf %128, %136 : vector<8x128xf32>
    %145 = arith.addf %143, %144 : vector<8x128xf32>
    %146 = math.tanh %145 : vector<8x128xf32>
    %147 = arith.mulf %142, %146 : vector<8x128xf32>
    %148 = arith.truncf %147 : vector<8x128xf32> to vector<8x128xbf16>
    %149 = arith.addi %27, %115 : i32
    %150 = arith.index_cast %149 : i32 to index
    %c0_71 = arith.constant 0 : index
    %151 = vector.load %arg9[%150, %c0_71] : memref<64x128xbf16, #tpu.memory_space<vmem>>, vector<8x128xbf16>
    tpu.vector_store %arg9[%150, %c0_71], %148 {strides = array<i32>} : memref<64x128xbf16, #tpu.memory_space<vmem>>, vector<8x128xbf16>,
    %c3_i32 = arith.constant 3 : i32
    %c8_i32_72 = arith.constant 8 : i32
    %152 = arith.muli %c3_i32, %c8_i32_72 : i32
    %153 = tpu.assume_multiple %152, 8 : i32
    %154 = arith.index_cast %153 : i32 to index
    %c0_73 = arith.constant 0 : index
    %155 = vector.load %arg8[%154, %c0_73] : memref<64x512xf32, #tpu.memory_space<vmem>>, vector<8x512xf32>
    %156 = arith.truncf %147 : vector<8x128xf32> to vector<8x128xbf16>
    %c0_74 = arith.constant 0 : index
    %c0_75 = arith.constant 0 : index
    %c0_76 = arith.constant 0 : index
    %157 = vector.load %arg11[%c0_74, %c0_75, %c0_76] : memref<2x128x512xbf16, #tpu.memory_space<vmem>>, vector<1x128x512xbf16>
    %158 = vector.shape_cast %157 : vector<1x128x512xbf16> to vector<128x512xbf16>
    %cst_77 = arith.constant dense<0.000000e+00> : vector<8x512xf32>
    %159 = tpu.matmul %156, %158, %cst_77 {dimension_numbers = #tpu.dot_dimension_numbers<[1], [0], [0], [1], [0, 0, 1, 1], [], []>} : vector<8x128xbf16>, vector<128x512xbf16>, vector<8x512xf32> -> vector<8x512xf32>
    %160 = arith.addf %155, %159 : vector<8x512xf32>
    %161 = vector.extract_strided_slice %160 {offsets = [0, 0], sizes = [8, 128], strides = [1, 1]} : vector<8x512xf32> to vector<8x128xf32>
    %162 = arith.negf %161 : vector<8x128xf32>
    %163 = math.exp %162 : vector<8x128xf32>
    %cst_78 = arith.constant 1.000000e+00 : f32
    %164 = vector.broadcast %cst_78 : f32 to vector<8x128xf32>
    %165 = arith.addf %164, %163 : vector<8x128xf32>
    %166 = arith.divf %164, %165 : vector<8x128xf32>
    %167 = vector.extract_strided_slice %160 {offsets = [0, 128], sizes = [8, 128], strides = [1, 1]} : vector<8x512xf32> to vector<8x128xf32>
    %168 = arith.negf %167 : vector<8x128xf32>
    %169 = math.exp %168 : vector<8x128xf32>
    %cst_79 = arith.constant 1.000000e+00 : f32
    %170 = vector.broadcast %cst_79 : f32 to vector<8x128xf32>
    %171 = arith.addf %170, %169 : vector<8x128xf32>
    %172 = arith.divf %170, %171 : vector<8x128xf32>
    %173 = vector.extract_strided_slice %160 {offsets = [0, 256], sizes = [8, 128], strides = [1, 1]} : vector<8x512xf32> to vector<8x128xf32>
    %174 = math.tanh %173 : vector<8x128xf32>
    %175 = vector.extract_strided_slice %160 {offsets = [0, 384], sizes = [8, 128], strides = [1, 1]} : vector<8x512xf32> to vector<8x128xf32>
    %176 = arith.negf %175 : vector<8x128xf32>
    %177 = math.exp %176 : vector<8x128xf32>
    %cst_80 = arith.constant 1.000000e+00 : f32
    %178 = vector.broadcast %cst_80 : f32 to vector<8x128xf32>
    %179 = arith.addf %178, %177 : vector<8x128xf32>
    %180 = arith.divf %178, %179 : vector<8x128xf32>
    %181 = arith.mulf %172, %145 : vector<8x128xf32>
    %182 = arith.mulf %166, %174 : vector<8x128xf32>
    %183 = arith.addf %181, %182 : vector<8x128xf32>
    %184 = math.tanh %183 : vector<8x128xf32>
    %185 = arith.mulf %180, %184 : vector<8x128xf32>
    %186 = arith.truncf %185 : vector<8x128xf32> to vector<8x128xbf16>
    %187 = arith.addi %27, %153 : i32
    %188 = arith.index_cast %187 : i32 to index
    %c0_81 = arith.constant 0 : index
    %189 = vector.load %arg9[%188, %c0_81] : memref<64x128xbf16, #tpu.memory_space<vmem>>, vector<8x128xbf16>
    tpu.vector_store %arg9[%188, %c0_81], %186 {strides = array<i32>} : memref<64x128xbf16, #tpu.memory_space<vmem>>, vector<8x128xbf16>,
    %c4_i32 = arith.constant 4 : i32
    %c8_i32_82 = arith.constant 8 : i32
    %190 = arith.muli %c4_i32, %c8_i32_82 : i32
    %191 = tpu.assume_multiple %190, 8 : i32
    %192 = arith.index_cast %191 : i32 to index
    %c0_83 = arith.constant 0 : index
    %193 = vector.load %arg8[%192, %c0_83] : memref<64x512xf32, #tpu.memory_space<vmem>>, vector<8x512xf32>
    %194 = arith.truncf %185 : vector<8x128xf32> to vector<8x128xbf16>
    %c0_84 = arith.constant 0 : index
    %c0_85 = arith.constant 0 : index
    %c0_86 = arith.constant 0 : index
    %195 = vector.load %arg11[%c0_84, %c0_85, %c0_86] : memref<2x128x512xbf16, #tpu.memory_space<vmem>>, vector<1x128x512xbf16>
    %196 = vector.shape_cast %195 : vector<1x128x512xbf16> to vector<128x512xbf16>
    %cst_87 = arith.constant dense<0.000000e+00> : vector<8x512xf32>
    %197 = tpu.matmul %194, %196, %cst_87 {dimension_numbers = #tpu.dot_dimension_numbers<[1], [0], [0], [1], [0, 0, 1, 1], [], []>} : vector<8x128xbf16>, vector<128x512xbf16>, vector<8x512xf32> -> vector<8x512xf32>
    %198 = arith.addf %193, %197 : vector<8x512xf32>
    %199 = vector.extract_strided_slice %198 {offsets = [0, 0], sizes = [8, 128], strides = [1, 1]} : vector<8x512xf32> to vector<8x128xf32>
    %200 = arith.negf %199 : vector<8x128xf32>
    %201 = math.exp %200 : vector<8x128xf32>
    %cst_88 = arith.constant 1.000000e+00 : f32
    %202 = vector.broadcast %cst_88 : f32 to vector<8x128xf32>
    %203 = arith.addf %202, %201 : vector<8x128xf32>
    %204 = arith.divf %202, %203 : vector<8x128xf32>
    %205 = vector.extract_strided_slice %198 {offsets = [0, 128], sizes = [8, 128], strides = [1, 1]} : vector<8x512xf32> to vector<8x128xf32>
    %206 = arith.negf %205 : vector<8x128xf32>
    %207 = math.exp %206 : vector<8x128xf32>
    %cst_89 = arith.constant 1.000000e+00 : f32
    %208 = vector.broadcast %cst_89 : f32 to vector<8x128xf32>
    %209 = arith.addf %208, %207 : vector<8x128xf32>
    %210 = arith.divf %208, %209 : vector<8x128xf32>
    %211 = vector.extract_strided_slice %198 {offsets = [0, 256], sizes = [8, 128], strides = [1, 1]} : vector<8x512xf32> to vector<8x128xf32>
    %212 = math.tanh %211 : vector<8x128xf32>
    %213 = vector.extract_strided_slice %198 {offsets = [0, 384], sizes = [8, 128], strides = [1, 1]} : vector<8x512xf32> to vector<8x128xf32>
    %214 = arith.negf %213 : vector<8x128xf32>
    %215 = math.exp %214 : vector<8x128xf32>
    %cst_90 = arith.constant 1.000000e+00 : f32
    %216 = vector.broadcast %cst_90 : f32 to vector<8x128xf32>
    %217 = arith.addf %216, %215 : vector<8x128xf32>
    %218 = arith.divf %216, %217 : vector<8x128xf32>
    %219 = arith.mulf %210, %183 : vector<8x128xf32>
    %220 = arith.mulf %204, %212 : vector<8x128xf32>
    %221 = arith.addf %219, %220 : vector<8x128xf32>
    %222 = math.tanh %221 : vector<8x128xf32>
    %223 = arith.mulf %218, %222 : vector<8x128xf32>
    %224 = arith.truncf %223 : vector<8x128xf32> to vector<8x128xbf16>
    %225 = arith.addi %27, %191 : i32
    %226 = arith.index_cast %225 : i32 to index
    %c0_91 = arith.constant 0 : index
    %227 = vector.load %arg9[%226, %c0_91] : memref<64x128xbf16, #tpu.memory_space<vmem>>, vector<8x128xbf16>
    tpu.vector_store %arg9[%226, %c0_91], %224 {strides = array<i32>} : memref<64x128xbf16, #tpu.memory_space<vmem>>, vector<8x128xbf16>,
    %c5_i32 = arith.constant 5 : i32
    %c8_i32_92 = arith.constant 8 : i32
    %228 = arith.muli %c5_i32, %c8_i32_92 : i32
    %229 = tpu.assume_multiple %228, 8 : i32
    %230 = arith.index_cast %229 : i32 to index
    %c0_93 = arith.constant 0 : index
    %231 = vector.load %arg8[%230, %c0_93] : memref<64x512xf32, #tpu.memory_space<vmem>>, vector<8x512xf32>
    %232 = arith.truncf %223 : vector<8x128xf32> to vector<8x128xbf16>
    %c0_94 = arith.constant 0 : index
    %c0_95 = arith.constant 0 : index
    %c0_96 = arith.constant 0 : index
    %233 = vector.load %arg11[%c0_94, %c0_95, %c0_96] : memref<2x128x512xbf16, #tpu.memory_space<vmem>>, vector<1x128x512xbf16>
    %234 = vector.shape_cast %233 : vector<1x128x512xbf16> to vector<128x512xbf16>
    %cst_97 = arith.constant dense<0.000000e+00> : vector<8x512xf32>
    %235 = tpu.matmul %232, %234, %cst_97 {dimension_numbers = #tpu.dot_dimension_numbers<[1], [0], [0], [1], [0, 0, 1, 1], [], []>} : vector<8x128xbf16>, vector<128x512xbf16>, vector<8x512xf32> -> vector<8x512xf32>
    %236 = arith.addf %231, %235 : vector<8x512xf32>
    %237 = vector.extract_strided_slice %236 {offsets = [0, 0], sizes = [8, 128], strides = [1, 1]} : vector<8x512xf32> to vector<8x128xf32>
    %238 = arith.negf %237 : vector<8x128xf32>
    %239 = math.exp %238 : vector<8x128xf32>
    %cst_98 = arith.constant 1.000000e+00 : f32
    %240 = vector.broadcast %cst_98 : f32 to vector<8x128xf32>
    %241 = arith.addf %240, %239 : vector<8x128xf32>
    %242 = arith.divf %240, %241 : vector<8x128xf32>
    %243 = vector.extract_strided_slice %236 {offsets = [0, 128], sizes = [8, 128], strides = [1, 1]} : vector<8x512xf32> to vector<8x128xf32>
    %244 = arith.negf %243 : vector<8x128xf32>
    %245 = math.exp %244 : vector<8x128xf32>
    %cst_99 = arith.constant 1.000000e+00 : f32
    %246 = vector.broadcast %cst_99 : f32 to vector<8x128xf32>
    %247 = arith.addf %246, %245 : vector<8x128xf32>
    %248 = arith.divf %246, %247 : vector<8x128xf32>
    %249 = vector.extract_strided_slice %236 {offsets = [0, 256], sizes = [8, 128], strides = [1, 1]} : vector<8x512xf32> to vector<8x128xf32>
    %250 = math.tanh %249 : vector<8x128xf32>
    %251 = vector.extract_strided_slice %236 {offsets = [0, 384], sizes = [8, 128], strides = [1, 1]} : vector<8x512xf32> to vector<8x128xf32>
    %252 = arith.negf %251 : vector<8x128xf32>
    %253 = math.exp %252 : vector<8x128xf32>
    %cst_100 = arith.constant 1.000000e+00 : f32
    %254 = vector.broadcast %cst_100 : f32 to vector<8x128xf32>
    %255 = arith.addf %254, %253 : vector<8x128xf32>
    %256 = arith.divf %254, %255 : vector<8x128xf32>
    %257 = arith.mulf %248, %221 : vector<8x128xf32>
    %258 = arith.mulf %242, %250 : vector<8x128xf32>
    %259 = arith.addf %257, %258 : vector<8x128xf32>
    %260 = math.tanh %259 : vector<8x128xf32>
    %261 = arith.mulf %256, %260 : vector<8x128xf32>
    %262 = arith.truncf %261 : vector<8x128xf32> to vector<8x128xbf16>
    %263 = arith.addi %27, %229 : i32
    %264 = arith.index_cast %263 : i32 to index
    %c0_101 = arith.constant 0 : index
    %265 = vector.load %arg9[%264, %c0_101] : memref<64x128xbf16, #tpu.memory_space<vmem>>, vector<8x128xbf16>
    tpu.vector_store %arg9[%264, %c0_101], %262 {strides = array<i32>} : memref<64x128xbf16, #tpu.memory_space<vmem>>, vector<8x128xbf16>,
    %c6_i32 = arith.constant 6 : i32
    %c8_i32_102 = arith.constant 8 : i32
    %266 = arith.muli %c6_i32, %c8_i32_102 : i32
    %267 = tpu.assume_multiple %266, 8 : i32
    %268 = arith.index_cast %267 : i32 to index
    %c0_103 = arith.constant 0 : index
    %269 = vector.load %arg8[%268, %c0_103] : memref<64x512xf32, #tpu.memory_space<vmem>>, vector<8x512xf32>
    %270 = arith.truncf %261 : vector<8x128xf32> to vector<8x128xbf16>
    %c0_104 = arith.constant 0 : index
    %c0_105 = arith.constant 0 : index
    %c0_106 = arith.constant 0 : index
    %271 = vector.load %arg11[%c0_104, %c0_105, %c0_106] : memref<2x128x512xbf16, #tpu.memory_space<vmem>>, vector<1x128x512xbf16>
    %272 = vector.shape_cast %271 : vector<1x128x512xbf16> to vector<128x512xbf16>
    %cst_107 = arith.constant dense<0.000000e+00> : vector<8x512xf32>
    %273 = tpu.matmul %270, %272, %cst_107 {dimension_numbers = #tpu.dot_dimension_numbers<[1], [0], [0], [1], [0, 0, 1, 1], [], []>} : vector<8x128xbf16>, vector<128x512xbf16>, vector<8x512xf32> -> vector<8x512xf32>
    %274 = arith.addf %269, %273 : vector<8x512xf32>
    %275 = vector.extract_strided_slice %274 {offsets = [0, 0], sizes = [8, 128], strides = [1, 1]} : vector<8x512xf32> to vector<8x128xf32>
    %276 = arith.negf %275 : vector<8x128xf32>
    %277 = math.exp %276 : vector<8x128xf32>
    %cst_108 = arith.constant 1.000000e+00 : f32
    %278 = vector.broadcast %cst_108 : f32 to vector<8x128xf32>
    %279 = arith.addf %278, %277 : vector<8x128xf32>
    %280 = arith.divf %278, %279 : vector<8x128xf32>
    %281 = vector.extract_strided_slice %274 {offsets = [0, 128], sizes = [8, 128], strides = [1, 1]} : vector<8x512xf32> to vector<8x128xf32>
    %282 = arith.negf %281 : vector<8x128xf32>
    %283 = math.exp %282 : vector<8x128xf32>
    %cst_109 = arith.constant 1.000000e+00 : f32
    %284 = vector.broadcast %cst_109 : f32 to vector<8x128xf32>
    %285 = arith.addf %284, %283 : vector<8x128xf32>
    %286 = arith.divf %284, %285 : vector<8x128xf32>
    %287 = vector.extract_strided_slice %274 {offsets = [0, 256], sizes = [8, 128], strides = [1, 1]} : vector<8x512xf32> to vector<8x128xf32>
    %288 = math.tanh %287 : vector<8x128xf32>
    %289 = vector.extract_strided_slice %274 {offsets = [0, 384], sizes = [8, 128], strides = [1, 1]} : vector<8x512xf32> to vector<8x128xf32>
    %290 = arith.negf %289 : vector<8x128xf32>
    %291 = math.exp %290 : vector<8x128xf32>
    %cst_110 = arith.constant 1.000000e+00 : f32
    %292 = vector.broadcast %cst_110 : f32 to vector<8x128xf32>
    %293 = arith.addf %292, %291 : vector<8x128xf32>
    %294 = arith.divf %292, %293 : vector<8x128xf32>
    %295 = arith.mulf %286, %259 : vector<8x128xf32>
    %296 = arith.mulf %280, %288 : vector<8x128xf32>
    %297 = arith.addf %295, %296 : vector<8x128xf32>
    %298 = math.tanh %297 : vector<8x128xf32>
    %299 = arith.mulf %294, %298 : vector<8x128xf32>
    %300 = arith.truncf %299 : vector<8x128xf32> to vector<8x128xbf16>
    %301 = arith.addi %27, %267 : i32
    %302 = arith.index_cast %301 : i32 to index
    %c0_111 = arith.constant 0 : index
    %303 = vector.load %arg9[%302, %c0_111] : memref<64x128xbf16, #tpu.memory_space<vmem>>, vector<8x128xbf16>
    tpu.vector_store %arg9[%302, %c0_111], %300 {strides = array<i32>} : memref<64x128xbf16, #tpu.memory_space<vmem>>, vector<8x128xbf16>,
    %c7_i32 = arith.constant 7 : i32
    %c8_i32_112 = arith.constant 8 : i32
    %304 = arith.muli %c7_i32, %c8_i32_112 : i32
    %305 = tpu.assume_multiple %304, 8 : i32
    %306 = arith.index_cast %305 : i32 to index
    %c0_113 = arith.constant 0 : index
    %307 = vector.load %arg8[%306, %c0_113] : memref<64x512xf32, #tpu.memory_space<vmem>>, vector<8x512xf32>
    %308 = arith.truncf %299 : vector<8x128xf32> to vector<8x128xbf16>
    %c0_114 = arith.constant 0 : index
    %c0_115 = arith.constant 0 : index
    %c0_116 = arith.constant 0 : index
    %309 = vector.load %arg11[%c0_114, %c0_115, %c0_116] : memref<2x128x512xbf16, #tpu.memory_space<vmem>>, vector<1x128x512xbf16>
    %310 = vector.shape_cast %309 : vector<1x128x512xbf16> to vector<128x512xbf16>
    %cst_117 = arith.constant dense<0.000000e+00> : vector<8x512xf32>
    %311 = tpu.matmul %308, %310, %cst_117 {dimension_numbers = #tpu.dot_dimension_numbers<[1], [0], [0], [1], [0, 0, 1, 1], [], []>} : vector<8x128xbf16>, vector<128x512xbf16>, vector<8x512xf32> -> vector<8x512xf32>
    %312 = arith.addf %307, %311 : vector<8x512xf32>
    %313 = vector.extract_strided_slice %312 {offsets = [0, 0], sizes = [8, 128], strides = [1, 1]} : vector<8x512xf32> to vector<8x128xf32>
    %314 = arith.negf %313 : vector<8x128xf32>
    %315 = math.exp %314 : vector<8x128xf32>
    %cst_118 = arith.constant 1.000000e+00 : f32
    %316 = vector.broadcast %cst_118 : f32 to vector<8x128xf32>
    %317 = arith.addf %316, %315 : vector<8x128xf32>
    %318 = arith.divf %316, %317 : vector<8x128xf32>
    %319 = vector.extract_strided_slice %312 {offsets = [0, 128], sizes = [8, 128], strides = [1, 1]} : vector<8x512xf32> to vector<8x128xf32>
    %320 = arith.negf %319 : vector<8x128xf32>
    %321 = math.exp %320 : vector<8x128xf32>
    %cst_119 = arith.constant 1.000000e+00 : f32
    %322 = vector.broadcast %cst_119 : f32 to vector<8x128xf32>
    %323 = arith.addf %322, %321 : vector<8x128xf32>
    %324 = arith.divf %322, %323 : vector<8x128xf32>
    %325 = vector.extract_strided_slice %312 {offsets = [0, 256], sizes = [8, 128], strides = [1, 1]} : vector<8x512xf32> to vector<8x128xf32>
    %326 = math.tanh %325 : vector<8x128xf32>
    %327 = vector.extract_strided_slice %312 {offsets = [0, 384], sizes = [8, 128], strides = [1, 1]} : vector<8x512xf32> to vector<8x128xf32>
    %328 = arith.negf %327 : vector<8x128xf32>
    %329 = math.exp %328 : vector<8x128xf32>
    %cst_120 = arith.constant 1.000000e+00 : f32
    %330 = vector.broadcast %cst_120 : f32 to vector<8x128xf32>
    %331 = arith.addf %330, %329 : vector<8x128xf32>
    %332 = arith.divf %330, %331 : vector<8x128xf32>
    %333 = arith.mulf %324, %297 : vector<8x128xf32>
    %334 = arith.mulf %318, %326 : vector<8x128xf32>
    %335 = arith.addf %333, %334 : vector<8x128xf32>
    %336 = math.tanh %335 : vector<8x128xf32>
    %337 = arith.mulf %332, %336 : vector<8x128xf32>
    %338 = arith.truncf %337 : vector<8x128xf32> to vector<8x128xbf16>
    %339 = arith.addi %27, %305 : i32
    %340 = arith.index_cast %339 : i32 to index
    %c0_121 = arith.constant 0 : index
    %341 = vector.load %arg9[%340, %c0_121] : memref<64x128xbf16, #tpu.memory_space<vmem>>, vector<8x128xbf16>
    tpu.vector_store %arg9[%340, %c0_121], %338 {strides = array<i32>} : memref<64x128xbf16, #tpu.memory_space<vmem>>, vector<8x128xbf16>,
    %c8_i32_122 = arith.constant 8 : i32
    %c1_i32_123 = arith.constant 1 : i32
    %c0_124 = arith.constant 0 : index
    %c0_125 = arith.constant 0 : index
    %c0_126 = arith.constant 0 : index
    %c0_127 = arith.constant 0 : index
    %342 = vector.load %arg6[%c0_124, %c0_125, %c0_126, %c0_127] : memref<1x2x8x128xf32, #tpu.memory_space<vmem>>, vector<1x1x8x128xf32>
    %343 = vector.shape_cast %342 : vector<1x1x8x128xf32> to vector<8x128xf32>
    %344 = vector.shape_cast %337 : vector<8x128xf32> to vector<1x1x8x128xf32>
    tpu.vector_store %arg6[%c0_124, %c0_125, %c0_126, %c0_127], %344 {strides = array<i32>} : memref<1x2x8x128xf32, #tpu.memory_space<vmem>>, vector<1x1x8x128xf32>,
    %c0_128 = arith.constant 0 : index
    %c0_129 = arith.constant 0 : index
    %c0_130 = arith.constant 0 : index
    %c0_131 = arith.constant 0 : index
    %345 = vector.load %arg7[%c0_128, %c0_129, %c0_130, %c0_131] : memref<1x2x8x128xf32, #tpu.memory_space<vmem>>, vector<1x1x8x128xf32>
    %346 = vector.shape_cast %345 : vector<1x1x8x128xf32> to vector<8x128xf32>
    %347 = vector.shape_cast %335 : vector<8x128xf32> to vector<1x1x8x128xf32>
    tpu.vector_store %arg7[%c0_128, %c0_129, %c0_130, %c0_131], %347 {strides = array<i32>} : memref<1x2x8x128xf32, #tpu.memory_space<vmem>>, vector<1x1x8x128xf32>,
    %c1_i32_132 = arith.constant 1 : i32
    %c1_i32_133 = arith.constant 1 : i32
    %c1_i32_134 = arith.constant 1 : i32
    %c1_i32_135 = arith.constant 1 : i32
    %c0_i32_136 = arith.constant 0 : i32
    %c0_i32_137 = arith.constant 0 : i32
    %348 = tpu.memref_slice %arg5[%c1_i32_132, %c0_i32_136, %c0_i32_137] : memref<2x128x512xbf16, #tpu.memory_space<any>> -> memref<1x128x512xbf16, #tpu.memory_space<any>>
    %349 = tpu.memref_squeeze %348 : memref<1x128x512xbf16, #tpu.memory_space<any>> -> memref<128x512xbf16, #tpu.memory_space<any>>
    %c0_i32_138 = arith.constant 0 : i32
    %c0_i32_139 = arith.constant 0 : i32
    %350 = tpu.memref_slice %arg11[%c1_i32_133, %c0_i32_138, %c0_i32_139] : memref<2x128x512xbf16, #tpu.memory_space<vmem>> -> memref<1x128x512xbf16, #tpu.memory_space<vmem>>
    %351 = tpu.memref_squeeze %350 : memref<1x128x512xbf16, #tpu.memory_space<vmem>> -> memref<128x512xbf16, #tpu.memory_space<vmem>>
    %352 = tpu.memref_slice %arg12[%c1_i32_134, %c1_i32_135] : memref<2x2x!tpu.dma_semaphore, #tpu.memory_space<semaphore_mem>> -> memref<1x1x!tpu.dma_semaphore, #tpu.memory_space<semaphore_mem>>
    %353 = tpu.memref_squeeze %352 : memref<1x1x!tpu.dma_semaphore, #tpu.memory_space<semaphore_mem>> -> memref<!tpu.dma_semaphore, #tpu.memory_space<semaphore_mem>>
    tpu.wait_dma2 semaphore(%353 : memref<!tpu.dma_semaphore, #tpu.memory_space<semaphore_mem>>) src(%349 : memref<128x512xbf16, #tpu.memory_space<any>>) dst(%351 : memref<128x512xbf16, #tpu.memory_space<vmem>>)
    %c0_i32_140 = arith.constant 0 : i32
    %c1_i32_141 = arith.constant 1 : i32
    %c0_i32_142 = arith.constant 0 : i32
    %c1_i32_143 = arith.constant 1 : i32
    %c0_i32_144 = arith.constant 0 : i32
    %c0_i32_145 = arith.constant 0 : i32
    %354 = tpu.memref_slice %arg4[%c0_i32_140, %c0_i32_144, %c0_i32_145] : memref<1x128x512xbf16, #tpu.memory_space<any>> -> memref<1x128x512xbf16, #tpu.memory_space<any>>
    %355 = tpu.memref_squeeze %354 : memref<1x128x512xbf16, #tpu.memory_space<any>> -> memref<128x512xbf16, #tpu.memory_space<any>>
    %c0_i32_146 = arith.constant 0 : i32
    %c0_i32_147 = arith.constant 0 : i32
    %356 = tpu.memref_slice %arg10[%c1_i32_141, %c0_i32_146, %c0_i32_147] : memref<2x128x512xbf16, #tpu.memory_space<vmem>> -> memref<1x128x512xbf16, #tpu.memory_space<vmem>>
    %357 = tpu.memref_squeeze %356 : memref<1x128x512xbf16, #tpu.memory_space<vmem>> -> memref<128x512xbf16, #tpu.memory_space<vmem>>
    %358 = tpu.memref_slice %arg12[%c0_i32_142, %c1_i32_143] : memref<2x2x!tpu.dma_semaphore, #tpu.memory_space<semaphore_mem>> -> memref<1x1x!tpu.dma_semaphore, #tpu.memory_space<semaphore_mem>>
    %359 = tpu.memref_squeeze %358 : memref<1x1x!tpu.dma_semaphore, #tpu.memory_space<semaphore_mem>> -> memref<!tpu.dma_semaphore, #tpu.memory_space<semaphore_mem>>
    tpu.wait_dma2 semaphore(%359 : memref<!tpu.dma_semaphore, #tpu.memory_space<semaphore_mem>>) src(%355 : memref<128x512xbf16, #tpu.memory_space<any>>) dst(%357 : memref<128x512xbf16, #tpu.memory_space<vmem>>)
    %cst_148 = arith.constant 0.000000e+00 : f32
    %360 = vector.broadcast %cst_148 : f32 to vector<8x128xf32>
    %cst_149 = arith.constant 0.000000e+00 : f32
    %361 = vector.broadcast %cst_149 : f32 to vector<8x128xf32>
    %c0_i32_150 = arith.constant 0 : i32
    %c64_i32_151 = arith.constant 64 : i32
    %362 = arith.muli %c0_i32_150, %c64_i32_151 : i32
    %363 = tpu.assume_multiple %362, 64 : i32
    %364 = arith.index_cast %363 : i32 to index
    %c0_152 = arith.constant 0 : index
    %365 = vector.load %arg9[%364, %c0_152] : memref<64x128xbf16, #tpu.memory_space<vmem>>, vector<64x128xbf16>
    %c1 = arith.constant 1 : index
    %c0_153 = arith.constant 0 : index
    %c0_154 = arith.constant 0 : index
    %366 = vector.load %arg10[%c1, %c0_153, %c0_154] : memref<2x128x512xbf16, #tpu.memory_space<vmem>>, vector<1x128x512xbf16>
    %367 = vector.shape_cast %366 : vector<1x128x512xbf16> to vector<128x512xbf16>
    %cst_155 = arith.constant dense<0.000000e+00> : vector<64x512xf32>
    %368 = tpu.matmul %365, %367, %cst_155 {dimension_numbers = #tpu.dot_dimension_numbers<[1], [0], [0], [1], [0, 0, 1, 1], [], []>} : vector<64x128xbf16>, vector<128x512xbf16>, vector<64x512xf32> -> vector<64x512xf32>
    %c1_156 = arith.constant 1 : index
    %c0_157 = arith.constant 0 : index
    %c0_158 = arith.constant 0 : index
    %369 = vector.load %arg3[%c1_156, %c0_157, %c0_158] : memref<2x1x512xf32, #tpu.memory_space<vmem>>, vector<1x1x512xf32>
    %370 = vector.shape_cast %369 : vector<1x1x512xf32> to vector<1x512xf32>
    %371 = vector.broadcast %370 : vector<1x512xf32> to vector<64x512xf32>
    %372 = arith.addf %368, %371 : vector<64x512xf32>
    %c0_159 = arith.constant 0 : index
    %c0_160 = arith.constant 0 : index
    %373 = vector.load %arg8[%c0_159, %c0_160] : memref<64x512xf32, #tpu.memory_space<vmem>>, vector<64x512xf32>
    tpu.vector_store %arg8[%c0_159, %c0_160], %372 {strides = array<i32>} : memref<64x512xf32, #tpu.memory_space<vmem>>, vector<64x512xf32>,
    %c0_i32_161 = arith.constant 0 : i32
    %c8_i32_162 = arith.constant 8 : i32
    %374 = arith.muli %c0_i32_161, %c8_i32_162 : i32
    %375 = tpu.assume_multiple %374, 8 : i32
    %376 = arith.index_cast %375 : i32 to index
    %c0_163 = arith.constant 0 : index
    %377 = vector.load %arg8[%376, %c0_163] : memref<64x512xf32, #tpu.memory_space<vmem>>, vector<8x512xf32>
    %378 = arith.truncf %360 : vector<8x128xf32> to vector<8x128xbf16>
    %c1_164 = arith.constant 1 : index
    %c0_165 = arith.constant 0 : index
    %c0_166 = arith.constant 0 : index
    %379 = vector.load %arg11[%c1_164, %c0_165, %c0_166] : memref<2x128x512xbf16, #tpu.memory_space<vmem>>, vector<1x128x512xbf16>
    %380 = vector.shape_cast %379 : vector<1x128x512xbf16> to vector<128x512xbf16>
    %cst_167 = arith.constant dense<0.000000e+00> : vector<8x512xf32>
    %381 = tpu.matmul %378, %380, %cst_167 {dimension_numbers = #tpu.dot_dimension_numbers<[1], [0], [0], [1], [0, 0, 1, 1], [], []>} : vector<8x128xbf16>, vector<128x512xbf16>, vector<8x512xf32> -> vector<8x512xf32>
    %382 = arith.addf %377, %381 : vector<8x512xf32>
    %383 = vector.extract_strided_slice %382 {offsets = [0, 0], sizes = [8, 128], strides = [1, 1]} : vector<8x512xf32> to vector<8x128xf32>
    %384 = arith.negf %383 : vector<8x128xf32>
    %385 = math.exp %384 : vector<8x128xf32>
    %cst_168 = arith.constant 1.000000e+00 : f32
    %386 = vector.broadcast %cst_168 : f32 to vector<8x128xf32>
    %387 = arith.addf %386, %385 : vector<8x128xf32>
    %388 = arith.divf %386, %387 : vector<8x128xf32>
    %389 = vector.extract_strided_slice %382 {offsets = [0, 128], sizes = [8, 128], strides = [1, 1]} : vector<8x512xf32> to vector<8x128xf32>
    %390 = arith.negf %389 : vector<8x128xf32>
    %391 = math.exp %390 : vector<8x128xf32>
    %cst_169 = arith.constant 1.000000e+00 : f32
    %392 = vector.broadcast %cst_169 : f32 to vector<8x128xf32>
    %393 = arith.addf %392, %391 : vector<8x128xf32>
    %394 = arith.divf %392, %393 : vector<8x128xf32>
    %395 = vector.extract_strided_slice %382 {offsets = [0, 256], sizes = [8, 128], strides = [1, 1]} : vector<8x512xf32> to vector<8x128xf32>
    %396 = math.tanh %395 : vector<8x128xf32>
    %397 = vector.extract_strided_slice %382 {offsets = [0, 384], sizes = [8, 128], strides = [1, 1]} : vector<8x512xf32> to vector<8x128xf32>
    %398 = arith.negf %397 : vector<8x128xf32>
    %399 = math.exp %398 : vector<8x128xf32>
    %cst_170 = arith.constant 1.000000e+00 : f32
    %400 = vector.broadcast %cst_170 : f32 to vector<8x128xf32>
    %401 = arith.addf %400, %399 : vector<8x128xf32>
    %402 = arith.divf %400, %401 : vector<8x128xf32>
    %403 = arith.mulf %394, %361 : vector<8x128xf32>
    %404 = arith.mulf %388, %396 : vector<8x128xf32>
    %405 = arith.addf %403, %404 : vector<8x128xf32>
    %406 = math.tanh %405 : vector<8x128xf32>
    %407 = arith.mulf %402, %406 : vector<8x128xf32>
    %c1_i32_171 = arith.constant 1 : i32
    %c8_i32_172 = arith.constant 8 : i32
    %408 = arith.muli %c1_i32_171, %c8_i32_172 : i32
    %409 = tpu.assume_multiple %408, 8 : i32
    %410 = arith.index_cast %409 : i32 to index
    %c0_173 = arith.constant 0 : index
    %411 = vector.load %arg8[%410, %c0_173] : memref<64x512xf32, #tpu.memory_space<vmem>>, vector<8x512xf32>
    %412 = arith.truncf %407 : vector<8x128xf32> to vector<8x128xbf16>
    %c1_174 = arith.constant 1 : index
    %c0_175 = arith.constant 0 : index
    %c0_176 = arith.constant 0 : index
    %413 = vector.load %arg11[%c1_174, %c0_175, %c0_176] : memref<2x128x512xbf16, #tpu.memory_space<vmem>>, vector<1x128x512xbf16>
    %414 = vector.shape_cast %413 : vector<1x128x512xbf16> to vector<128x512xbf16>
    %cst_177 = arith.constant dense<0.000000e+00> : vector<8x512xf32>
    %415 = tpu.matmul %412, %414, %cst_177 {dimension_numbers = #tpu.dot_dimension_numbers<[1], [0], [0], [1], [0, 0, 1, 1], [], []>} : vector<8x128xbf16>, vector<128x512xbf16>, vector<8x512xf32> -> vector<8x512xf32>
    %416 = arith.addf %411, %415 : vector<8x512xf32>
    %417 = vector.extract_strided_slice %416 {offsets = [0, 0], sizes = [8, 128], strides = [1, 1]} : vector<8x512xf32> to vector<8x128xf32>
    %418 = arith.negf %417 : vector<8x128xf32>
    %419 = math.exp %418 : vector<8x128xf32>
    %cst_178 = arith.constant 1.000000e+00 : f32
    %420 = vector.broadcast %cst_178 : f32 to vector<8x128xf32>
    %421 = arith.addf %420, %419 : vector<8x128xf32>
    %422 = arith.divf %420, %421 : vector<8x128xf32>
    %423 = vector.extract_strided_slice %416 {offsets = [0, 128], sizes = [8, 128], strides = [1, 1]} : vector<8x512xf32> to vector<8x128xf32>
    %424 = arith.negf %423 : vector<8x128xf32>
    %425 = math.exp %424 : vector<8x128xf32>
    %cst_179 = arith.constant 1.000000e+00 : f32
    %426 = vector.broadcast %cst_179 : f32 to vector<8x128xf32>
    %427 = arith.addf %426, %425 : vector<8x128xf32>
    %428 = arith.divf %426, %427 : vector<8x128xf32>
    %429 = vector.extract_strided_slice %416 {offsets = [0, 256], sizes = [8, 128], strides = [1, 1]} : vector<8x512xf32> to vector<8x128xf32>
    %430 = math.tanh %429 : vector<8x128xf32>
    %431 = vector.extract_strided_slice %416 {offsets = [0, 384], sizes = [8, 128], strides = [1, 1]} : vector<8x512xf32> to vector<8x128xf32>
    %432 = arith.negf %431 : vector<8x128xf32>
    %433 = math.exp %432 : vector<8x128xf32>
    %cst_180 = arith.constant 1.000000e+00 : f32
    %434 = vector.broadcast %cst_180 : f32 to vector<8x128xf32>
    %435 = arith.addf %434, %433 : vector<8x128xf32>
    %436 = arith.divf %434, %435 : vector<8x128xf32>
    %437 = arith.mulf %428, %405 : vector<8x128xf32>
    %438 = arith.mulf %422, %430 : vector<8x128xf32>
    %439 = arith.addf %437, %438 : vector<8x128xf32>
    %440 = math.tanh %439 : vector<8x128xf32>
    %441 = arith.mulf %436, %440 : vector<8x128xf32>
    %c2_i32_181 = arith.constant 2 : i32
    %c8_i32_182 = arith.constant 8 : i32
    %442 = arith.muli %c2_i32_181, %c8_i32_182 : i32
    %443 = tpu.assume_multiple %442, 8 : i32
    %444 = arith.index_cast %443 : i32 to index
    %c0_183 = arith.constant 0 : index
    %445 = vector.load %arg8[%444, %c0_183] : memref<64x512xf32, #tpu.memory_space<vmem>>, vector<8x512xf32>
    %446 = arith.truncf %441 : vector<8x128xf32> to vector<8x128xbf16>
    %c1_184 = arith.constant 1 : index
    %c0_185 = arith.constant 0 : index
    %c0_186 = arith.constant 0 : index
    %447 = vector.load %arg11[%c1_184, %c0_185, %c0_186] : memref<2x128x512xbf16, #tpu.memory_space<vmem>>, vector<1x128x512xbf16>
    %448 = vector.shape_cast %447 : vector<1x128x512xbf16> to vector<128x512xbf16>
    %cst_187 = arith.constant dense<0.000000e+00> : vector<8x512xf32>
    %449 = tpu.matmul %446, %448, %cst_187 {dimension_numbers = #tpu.dot_dimension_numbers<[1], [0], [0], [1], [0, 0, 1, 1], [], []>} : vector<8x128xbf16>, vector<128x512xbf16>, vector<8x512xf32> -> vector<8x512xf32>
    %450 = arith.addf %445, %449 : vector<8x512xf32>
    %451 = vector.extract_strided_slice %450 {offsets = [0, 0], sizes = [8, 128], strides = [1, 1]} : vector<8x512xf32> to vector<8x128xf32>
    %452 = arith.negf %451 : vector<8x128xf32>
    %453 = math.exp %452 : vector<8x128xf32>
    %cst_188 = arith.constant 1.000000e+00 : f32
    %454 = vector.broadcast %cst_188 : f32 to vector<8x128xf32>
    %455 = arith.addf %454, %453 : vector<8x128xf32>
    %456 = arith.divf %454, %455 : vector<8x128xf32>
    %457 = vector.extract_strided_slice %450 {offsets = [0, 128], sizes = [8, 128], strides = [1, 1]} : vector<8x512xf32> to vector<8x128xf32>
    %458 = arith.negf %457 : vector<8x128xf32>
    %459 = math.exp %458 : vector<8x128xf32>
    %cst_189 = arith.constant 1.000000e+00 : f32
    %460 = vector.broadcast %cst_189 : f32 to vector<8x128xf32>
    %461 = arith.addf %460, %459 : vector<8x128xf32>
    %462 = arith.divf %460, %461 : vector<8x128xf32>
    %463 = vector.extract_strided_slice %450 {offsets = [0, 256], sizes = [8, 128], strides = [1, 1]} : vector<8x512xf32> to vector<8x128xf32>
    %464 = math.tanh %463 : vector<8x128xf32>
    %465 = vector.extract_strided_slice %450 {offsets = [0, 384], sizes = [8, 128], strides = [1, 1]} : vector<8x512xf32> to vector<8x128xf32>
    %466 = arith.negf %465 : vector<8x128xf32>
    %467 = math.exp %466 : vector<8x128xf32>
    %cst_190 = arith.constant 1.000000e+00 : f32
    %468 = vector.broadcast %cst_190 : f32 to vector<8x128xf32>
    %469 = arith.addf %468, %467 : vector<8x128xf32>
    %470 = arith.divf %468, %469 : vector<8x128xf32>
    %471 = arith.mulf %462, %439 : vector<8x128xf32>
    %472 = arith.mulf %456, %464 : vector<8x128xf32>
    %473 = arith.addf %471, %472 : vector<8x128xf32>
    %474 = math.tanh %473 : vector<8x128xf32>
    %475 = arith.mulf %470, %474 : vector<8x128xf32>
    %c3_i32_191 = arith.constant 3 : i32
    %c8_i32_192 = arith.constant 8 : i32
    %476 = arith.muli %c3_i32_191, %c8_i32_192 : i32
    %477 = tpu.assume_multiple %476, 8 : i32
    %478 = arith.index_cast %477 : i32 to index
    %c0_193 = arith.constant 0 : index
    %479 = vector.load %arg8[%478, %c0_193] : memref<64x512xf32, #tpu.memory_space<vmem>>, vector<8x512xf32>
    %480 = arith.truncf %475 : vector<8x128xf32> to vector<8x128xbf16>
    %c1_194 = arith.constant 1 : index
    %c0_195 = arith.constant 0 : index
    %c0_196 = arith.constant 0 : index
    %481 = vector.load %arg11[%c1_194, %c0_195, %c0_196] : memref<2x128x512xbf16, #tpu.memory_space<vmem>>, vector<1x128x512xbf16>
    %482 = vector.shape_cast %481 : vector<1x128x512xbf16> to vector<128x512xbf16>
    %cst_197 = arith.constant dense<0.000000e+00> : vector<8x512xf32>
    %483 = tpu.matmul %480, %482, %cst_197 {dimension_numbers = #tpu.dot_dimension_numbers<[1], [0], [0], [1], [0, 0, 1, 1], [], []>} : vector<8x128xbf16>, vector<128x512xbf16>, vector<8x512xf32> -> vector<8x512xf32>
    %484 = arith.addf %479, %483 : vector<8x512xf32>
    %485 = vector.extract_strided_slice %484 {offsets = [0, 0], sizes = [8, 128], strides = [1, 1]} : vector<8x512xf32> to vector<8x128xf32>
    %486 = arith.negf %485 : vector<8x128xf32>
    %487 = math.exp %486 : vector<8x128xf32>
    %cst_198 = arith.constant 1.000000e+00 : f32
    %488 = vector.broadcast %cst_198 : f32 to vector<8x128xf32>
    %489 = arith.addf %488, %487 : vector<8x128xf32>
    %490 = arith.divf %488, %489 : vector<8x128xf32>
    %491 = vector.extract_strided_slice %484 {offsets = [0, 128], sizes = [8, 128], strides = [1, 1]} : vector<8x512xf32> to vector<8x128xf32>
    %492 = arith.negf %491 : vector<8x128xf32>
    %493 = math.exp %492 : vector<8x128xf32>
    %cst_199 = arith.constant 1.000000e+00 : f32
    %494 = vector.broadcast %cst_199 : f32 to vector<8x128xf32>
    %495 = arith.addf %494, %493 : vector<8x128xf32>
    %496 = arith.divf %494, %495 : vector<8x128xf32>
    %497 = vector.extract_strided_slice %484 {offsets = [0, 256], sizes = [8, 128], strides = [1, 1]} : vector<8x512xf32> to vector<8x128xf32>
    %498 = math.tanh %497 : vector<8x128xf32>
    %499 = vector.extract_strided_slice %484 {offsets = [0, 384], sizes = [8, 128], strides = [1, 1]} : vector<8x512xf32> to vector<8x128xf32>
    %500 = arith.negf %499 : vector<8x128xf32>
    %501 = math.exp %500 : vector<8x128xf32>
    %cst_200 = arith.constant 1.000000e+00 : f32
    %502 = vector.broadcast %cst_200 : f32 to vector<8x128xf32>
    %503 = arith.addf %502, %501 : vector<8x128xf32>
    %504 = arith.divf %502, %503 : vector<8x128xf32>
    %505 = arith.mulf %496, %473 : vector<8x128xf32>
    %506 = arith.mulf %490, %498 : vector<8x128xf32>
    %507 = arith.addf %505, %506 : vector<8x128xf32>
    %508 = math.tanh %507 : vector<8x128xf32>
    %509 = arith.mulf %504, %508 : vector<8x128xf32>
    %c4_i32_201 = arith.constant 4 : i32
    %c8_i32_202 = arith.constant 8 : i32
    %510 = arith.muli %c4_i32_201, %c8_i32_202 : i32
    %511 = tpu.assume_multiple %510, 8 : i32
    %512 = arith.index_cast %511 : i32 to index
    %c0_203 = arith.constant 0 : index
    %513 = vector.load %arg8[%512, %c0_203] : memref<64x512xf32, #tpu.memory_space<vmem>>, vector<8x512xf32>
    %514 = arith.truncf %509 : vector<8x128xf32> to vector<8x128xbf16>
    %c1_204 = arith.constant 1 : index
    %c0_205 = arith.constant 0 : index
    %c0_206 = arith.constant 0 : index
    %515 = vector.load %arg11[%c1_204, %c0_205, %c0_206] : memref<2x128x512xbf16, #tpu.memory_space<vmem>>, vector<1x128x512xbf16>
    %516 = vector.shape_cast %515 : vector<1x128x512xbf16> to vector<128x512xbf16>
    %cst_207 = arith.constant dense<0.000000e+00> : vector<8x512xf32>
    %517 = tpu.matmul %514, %516, %cst_207 {dimension_numbers = #tpu.dot_dimension_numbers<[1], [0], [0], [1], [0, 0, 1, 1], [], []>} : vector<8x128xbf16>, vector<128x512xbf16>, vector<8x512xf32> -> vector<8x512xf32>
    %518 = arith.addf %513, %517 : vector<8x512xf32>
    %519 = vector.extract_strided_slice %518 {offsets = [0, 0], sizes = [8, 128], strides = [1, 1]} : vector<8x512xf32> to vector<8x128xf32>
    %520 = arith.negf %519 : vector<8x128xf32>
    %521 = math.exp %520 : vector<8x128xf32>
    %cst_208 = arith.constant 1.000000e+00 : f32
    %522 = vector.broadcast %cst_208 : f32 to vector<8x128xf32>
    %523 = arith.addf %522, %521 : vector<8x128xf32>
    %524 = arith.divf %522, %523 : vector<8x128xf32>
    %525 = vector.extract_strided_slice %518 {offsets = [0, 128], sizes = [8, 128], strides = [1, 1]} : vector<8x512xf32> to vector<8x128xf32>
    %526 = arith.negf %525 : vector<8x128xf32>
    %527 = math.exp %526 : vector<8x128xf32>
    %cst_209 = arith.constant 1.000000e+00 : f32
    %528 = vector.broadcast %cst_209 : f32 to vector<8x128xf32>
    %529 = arith.addf %528, %527 : vector<8x128xf32>
    %530 = arith.divf %528, %529 : vector<8x128xf32>
    %531 = vector.extract_strided_slice %518 {offsets = [0, 256], sizes = [8, 128], strides = [1, 1]} : vector<8x512xf32> to vector<8x128xf32>
    %532 = math.tanh %531 : vector<8x128xf32>
    %533 = vector.extract_strided_slice %518 {offsets = [0, 384], sizes = [8, 128], strides = [1, 1]} : vector<8x512xf32> to vector<8x128xf32>
    %534 = arith.negf %533 : vector<8x128xf32>
    %535 = math.exp %534 : vector<8x128xf32>
    %cst_210 = arith.constant 1.000000e+00 : f32
    %536 = vector.broadcast %cst_210 : f32 to vector<8x128xf32>
    %537 = arith.addf %536, %535 : vector<8x128xf32>
    %538 = arith.divf %536, %537 : vector<8x128xf32>
    %539 = arith.mulf %530, %507 : vector<8x128xf32>
    %540 = arith.mulf %524, %532 : vector<8x128xf32>
    %541 = arith.addf %539, %540 : vector<8x128xf32>
    %542 = math.tanh %541 : vector<8x128xf32>
    %543 = arith.mulf %538, %542 : vector<8x128xf32>
    %c5_i32_211 = arith.constant 5 : i32
    %c8_i32_212 = arith.constant 8 : i32
    %544 = arith.muli %c5_i32_211, %c8_i32_212 : i32
    %545 = tpu.assume_multiple %544, 8 : i32
    %546 = arith.index_cast %545 : i32 to index
    %c0_213 = arith.constant 0 : index
    %547 = vector.load %arg8[%546, %c0_213] : memref<64x512xf32, #tpu.memory_space<vmem>>, vector<8x512xf32>
    %548 = arith.truncf %543 : vector<8x128xf32> to vector<8x128xbf16>
    %c1_214 = arith.constant 1 : index
    %c0_215 = arith.constant 0 : index
    %c0_216 = arith.constant 0 : index
    %549 = vector.load %arg11[%c1_214, %c0_215, %c0_216] : memref<2x128x512xbf16, #tpu.memory_space<vmem>>, vector<1x128x512xbf16>
    %550 = vector.shape_cast %549 : vector<1x128x512xbf16> to vector<128x512xbf16>
    %cst_217 = arith.constant dense<0.000000e+00> : vector<8x512xf32>
    %551 = tpu.matmul %548, %550, %cst_217 {dimension_numbers = #tpu.dot_dimension_numbers<[1], [0], [0], [1], [0, 0, 1, 1], [], []>} : vector<8x128xbf16>, vector<128x512xbf16>, vector<8x512xf32> -> vector<8x512xf32>
    %552 = arith.addf %547, %551 : vector<8x512xf32>
    %553 = vector.extract_strided_slice %552 {offsets = [0, 0], sizes = [8, 128], strides = [1, 1]} : vector<8x512xf32> to vector<8x128xf32>
    %554 = arith.negf %553 : vector<8x128xf32>
    %555 = math.exp %554 : vector<8x128xf32>
    %cst_218 = arith.constant 1.000000e+00 : f32
    %556 = vector.broadcast %cst_218 : f32 to vector<8x128xf32>
    %557 = arith.addf %556, %555 : vector<8x128xf32>
    %558 = arith.divf %556, %557 : vector<8x128xf32>
    %559 = vector.extract_strided_slice %552 {offsets = [0, 128], sizes = [8, 128], strides = [1, 1]} : vector<8x512xf32> to vector<8x128xf32>
    %560 = arith.negf %559 : vector<8x128xf32>
    %561 = math.exp %560 : vector<8x128xf32>
    %cst_219 = arith.constant 1.000000e+00 : f32
    %562 = vector.broadcast %cst_219 : f32 to vector<8x128xf32>
    %563 = arith.addf %562, %561 : vector<8x128xf32>
    %564 = arith.divf %562, %563 : vector<8x128xf32>
    %565 = vector.extract_strided_slice %552 {offsets = [0, 256], sizes = [8, 128], strides = [1, 1]} : vector<8x512xf32> to vector<8x128xf32>
    %566 = math.tanh %565 : vector<8x128xf32>
    %567 = vector.extract_strided_slice %552 {offsets = [0, 384], sizes = [8, 128], strides = [1, 1]} : vector<8x512xf32> to vector<8x128xf32>
    %568 = arith.negf %567 : vector<8x128xf32>
    %569 = math.exp %568 : vector<8x128xf32>
    %cst_220 = arith.constant 1.000000e+00 : f32
    %570 = vector.broadcast %cst_220 : f32 to vector<8x128xf32>
    %571 = arith.addf %570, %569 : vector<8x128xf32>
    %572 = arith.divf %570, %571 : vector<8x128xf32>
    %573 = arith.mulf %564, %541 : vector<8x128xf32>
    %574 = arith.mulf %558, %566 : vector<8x128xf32>
    %575 = arith.addf %573, %574 : vector<8x128xf32>
    %576 = math.tanh %575 : vector<8x128xf32>
    %577 = arith.mulf %572, %576 : vector<8x128xf32>
    %c6_i32_221 = arith.constant 6 : i32
    %c8_i32_222 = arith.constant 8 : i32
    %578 = arith.muli %c6_i32_221, %c8_i32_222 : i32
    %579 = tpu.assume_multiple %578, 8 : i32
    %580 = arith.index_cast %579 : i32 to index
    %c0_223 = arith.constant 0 : index
    %581 = vector.load %arg8[%580, %c0_223] : memref<64x512xf32, #tpu.memory_space<vmem>>, vector<8x512xf32>
    %582 = arith.truncf %577 : vector<8x128xf32> to vector<8x128xbf16>
    %c1_224 = arith.constant 1 : index
    %c0_225 = arith.constant 0 : index
    %c0_226 = arith.constant 0 : index
    %583 = vector.load %arg11[%c1_224, %c0_225, %c0_226] : memref<2x128x512xbf16, #tpu.memory_space<vmem>>, vector<1x128x512xbf16>
    %584 = vector.shape_cast %583 : vector<1x128x512xbf16> to vector<128x512xbf16>
    %cst_227 = arith.constant dense<0.000000e+00> : vector<8x512xf32>
    %585 = tpu.matmul %582, %584, %cst_227 {dimension_numbers = #tpu.dot_dimension_numbers<[1], [0], [0], [1], [0, 0, 1, 1], [], []>} : vector<8x128xbf16>, vector<128x512xbf16>, vector<8x512xf32> -> vector<8x512xf32>
    %586 = arith.addf %581, %585 : vector<8x512xf32>
    %587 = vector.extract_strided_slice %586 {offsets = [0, 0], sizes = [8, 128], strides = [1, 1]} : vector<8x512xf32> to vector<8x128xf32>
    %588 = arith.negf %587 : vector<8x128xf32>
    %589 = math.exp %588 : vector<8x128xf32>
    %cst_228 = arith.constant 1.000000e+00 : f32
    %590 = vector.broadcast %cst_228 : f32 to vector<8x128xf32>
    %591 = arith.addf %590, %589 : vector<8x128xf32>
    %592 = arith.divf %590, %591 : vector<8x128xf32>
    %593 = vector.extract_strided_slice %586 {offsets = [0, 128], sizes = [8, 128], strides = [1, 1]} : vector<8x512xf32> to vector<8x128xf32>
    %594 = arith.negf %593 : vector<8x128xf32>
    %595 = math.exp %594 : vector<8x128xf32>
    %cst_229 = arith.constant 1.000000e+00 : f32
    %596 = vector.broadcast %cst_229 : f32 to vector<8x128xf32>
    %597 = arith.addf %596, %595 : vector<8x128xf32>
    %598 = arith.divf %596, %597 : vector<8x128xf32>
    %599 = vector.extract_strided_slice %586 {offsets = [0, 256], sizes = [8, 128], strides = [1, 1]} : vector<8x512xf32> to vector<8x128xf32>
    %600 = math.tanh %599 : vector<8x128xf32>
    %601 = vector.extract_strided_slice %586 {offsets = [0, 384], sizes = [8, 128], strides = [1, 1]} : vector<8x512xf32> to vector<8x128xf32>
    %602 = arith.negf %601 : vector<8x128xf32>
    %603 = math.exp %602 : vector<8x128xf32>
    %cst_230 = arith.constant 1.000000e+00 : f32
    %604 = vector.broadcast %cst_230 : f32 to vector<8x128xf32>
    %605 = arith.addf %604, %603 : vector<8x128xf32>
    %606 = arith.divf %604, %605 : vector<8x128xf32>
    %607 = arith.mulf %598, %575 : vector<8x128xf32>
    %608 = arith.mulf %592, %600 : vector<8x128xf32>
    %609 = arith.addf %607, %608 : vector<8x128xf32>
    %610 = math.tanh %609 : vector<8x128xf32>
    %611 = arith.mulf %606, %610 : vector<8x128xf32>
    %c7_i32_231 = arith.constant 7 : i32
    %c8_i32_232 = arith.constant 8 : i32
    %612 = arith.muli %c7_i32_231, %c8_i32_232 : i32
    %613 = tpu.assume_multiple %612, 8 : i32
    %614 = arith.index_cast %613 : i32 to index
    %c0_233 = arith.constant 0 : index
    %615 = vector.load %arg8[%614, %c0_233] : memref<64x512xf32, #tpu.memory_space<vmem>>, vector<8x512xf32>
    %616 = arith.truncf %611 : vector<8x128xf32> to vector<8x128xbf16>
    %c1_234 = arith.constant 1 : index
    %c0_235 = arith.constant 0 : index
    %c0_236 = arith.constant 0 : index
    %617 = vector.load %arg11[%c1_234, %c0_235, %c0_236] : memref<2x128x512xbf16, #tpu.memory_space<vmem>>, vector<1x128x512xbf16>
    %618 = vector.shape_cast %617 : vector<1x128x512xbf16> to vector<128x512xbf16>
    %cst_237 = arith.constant dense<0.000000e+00> : vector<8x512xf32>
    %619 = tpu.matmul %616, %618, %cst_237 {dimension_numbers = #tpu.dot_dimension_numbers<[1], [0], [0], [1], [0, 0, 1, 1], [], []>} : vector<8x128xbf16>, vector<128x512xbf16>, vector<8x512xf32> -> vector<8x512xf32>
    %620 = arith.addf %615, %619 : vector<8x512xf32>
    %621 = vector.extract_strided_slice %620 {offsets = [0, 0], sizes = [8, 128], strides = [1, 1]} : vector<8x512xf32> to vector<8x128xf32>
    %622 = arith.negf %621 : vector<8x128xf32>
    %623 = math.exp %622 : vector<8x128xf32>
    %cst_238 = arith.constant 1.000000e+00 : f32
    %624 = vector.broadcast %cst_238 : f32 to vector<8x128xf32>
    %625 = arith.addf %624, %623 : vector<8x128xf32>
    %626 = arith.divf %624, %625 : vector<8x128xf32>
    %627 = vector.extract_strided_slice %620 {offsets = [0, 128], sizes = [8, 128], strides = [1, 1]} : vector<8x512xf32> to vector<8x128xf32>
    %628 = arith.negf %627 : vector<8x128xf32>
    %629 = math.exp %628 : vector<8x128xf32>
    %cst_239 = arith.constant 1.000000e+00 : f32
    %630 = vector.broadcast %cst_239 : f32 to vector<8x128xf32>
    %631 = arith.addf %630, %629 : vector<8x128xf32>
    %632 = arith.divf %630, %631 : vector<8x128xf32>
    %633 = vector.extract_strided_slice %620 {offsets = [0, 256], sizes = [8, 128], strides = [1, 1]} : vector<8x512xf32> to vector<8x128xf32>
    %634 = math.tanh %633 : vector<8x128xf32>
    %635 = vector.extract_strided_slice %620 {offsets = [0, 384], sizes = [8, 128], strides = [1, 1]} : vector<8x512xf32> to vector<8x128xf32>
    %636 = arith.negf %635 : vector<8x128xf32>
    %637 = math.exp %636 : vector<8x128xf32>
    %cst_240 = arith.constant 1.000000e+00 : f32
    %638 = vector.broadcast %cst_240 : f32 to vector<8x128xf32>
    %639 = arith.addf %638, %637 : vector<8x128xf32>
    %640 = arith.divf %638, %639 : vector<8x128xf32>
    %641 = arith.mulf %632, %609 : vector<8x128xf32>
    %642 = arith.mulf %626, %634 : vector<8x128xf32>
    %643 = arith.addf %641, %642 : vector<8x128xf32>
    %644 = math.tanh %643 : vector<8x128xf32>
    %645 = arith.mulf %640, %644 : vector<8x128xf32>
    %c8_i32_241 = arith.constant 8 : i32
    %c1_i32_242 = arith.constant 1 : i32
    %c0_243 = arith.constant 0 : index
    %c1_244 = arith.constant 1 : index
    %c0_245 = arith.constant 0 : index
    %c0_246 = arith.constant 0 : index
    %646 = vector.load %arg6[%c0_243, %c1_244, %c0_245, %c0_246] : memref<1x2x8x128xf32, #tpu.memory_space<vmem>>, vector<1x1x8x128xf32>
    %647 = vector.shape_cast %646 : vector<1x1x8x128xf32> to vector<8x128xf32>
    %648 = vector.shape_cast %645 : vector<8x128xf32> to vector<1x1x8x128xf32>
    tpu.vector_store %arg6[%c0_243, %c1_244, %c0_245, %c0_246], %648 {strides = array<i32>} : memref<1x2x8x128xf32, #tpu.memory_space<vmem>>, vector<1x1x8x128xf32>,
    %c0_247 = arith.constant 0 : index
    %c1_248 = arith.constant 1 : index
    %c0_249 = arith.constant 0 : index
    %c0_250 = arith.constant 0 : index
    %649 = vector.load %arg7[%c0_247, %c1_248, %c0_249, %c0_250] : memref<1x2x8x128xf32, #tpu.memory_space<vmem>>, vector<1x1x8x128xf32>
    %650 = vector.shape_cast %649 : vector<1x1x8x128xf32> to vector<8x128xf32>
    %651 = vector.shape_cast %643 : vector<8x128xf32> to vector<1x1x8x128xf32>
    tpu.vector_store %arg7[%c0_247, %c1_248, %c0_249, %c0_250], %651 {strides = array<i32>} : memref<1x2x8x128xf32, #tpu.memory_space<vmem>>, vector<1x1x8x128xf32>,
    return
  }
  func.func @transform_0(%arg0: i32) -> (i32, i32, i32) {
    %c0_i32 = arith.constant 0 : i32
    %c0_i32_0 = arith.constant 0 : i32
    %c0_i32_1 = arith.constant 0 : i32
    return %arg0, %c0_i32, %c0_i32_0 : i32, i32, i32
  }
  func.func @transform_1(%arg0: i32) -> (i32, i32) {
    %c0_i32 = arith.constant 0 : i32
    %c0_i32_0 = arith.constant 0 : i32
    %c0_i32_1 = arith.constant 0 : i32
    return %c0_i32, %c0_i32_0 : i32, i32
  }
  func.func @transform_2(%arg0: i32) -> (i32, i32, i32) {
    %c0_i32 = arith.constant 0 : i32
    %c0_i32_0 = arith.constant 0 : i32
    %c0_i32_1 = arith.constant 0 : i32
    %c0_i32_2 = arith.constant 0 : i32
    return %c0_i32, %c0_i32_0, %c0_i32_1 : i32, i32, i32
  }
  func.func @transform_5(%arg0: i32) -> (i32, i32, i32, i32) {
    %c0_i32 = arith.constant 0 : i32
    %c0_i32_0 = arith.constant 0 : i32
    %c0_i32_1 = arith.constant 0 : i32
    %c0_i32_2 = arith.constant 0 : i32
    return %arg0, %c0_i32, %c0_i32_0, %c0_i32_1 : i32, i32, i32, i32
  }
  func.func @transform_6(%arg0: i32) -> (i32, i32, i32, i32) {
    %c0_i32 = arith.constant 0 : i32
    %c0_i32_0 = arith.constant 0 : i32
    %c0_i32_1 = arith.constant 0 : i32
    %c0_i32_2 = arith.constant 0 : i32
    return %arg0, %c0_i32, %c0_i32_0, %c0_i32_1 : i32, i32, i32, i32
  }
}

</mosaic_0001>

<bundles_post_ra>
// kernel: encoder_forward.1
= control target key start
LH: loop header
LB: loop body
LE: loop exit
PB: predicated region body
PF: predicated region fallthrough
CT: control target
= control target key end

     0   :  { %s8223_s0 = inlined_call_operand.vmem [shape: bf16[1,64,128], index: 0, kind: input, shape index: {}]   ;;  %s8224_s1 = inlined_call_operand.vmem [shape: bf16[128,512], index: 1, kind: input, shape index: {}]   ;;  %s8225_s2 = inlined_call_operand.vmem [shape: f32[2,1,512], index: 2, kind: input, shape index: {}]   ;;  %s8226_s3 = inlined_call_operand.vmem [shape: bf16[1,128,512], index: 3, kind: input, shape index: {}]   ;;  %s8227_s4 = inlined_call_operand.vmem [shape: bf16[2,128,512], index: 4, kind: input, shape index: {}]   ;;  %s8228_s5 = inlined_call_operand.vmem [shape: f32[1,2,8,128], index: 5, kind: output, shape index: {0}]   ;;  %s8229_s6 = inlined_call_operand.vmem [shape: f32[1,2,8,128], index: 6, kind: output, shape index: {1}]  }
   0x1   :  { %v30_v0 = vld [vmem:[%s8227_s4] sm:$0xff]  ;;  %v32_v1 = vld [vmem:[%s8227_s4 + $0x8] sm:$0xff]  ;;  %v34_v2 = vld [vmem:[%s8227_s4 + $0x10] sm:$0xff] }
   0x2   :  { %31 = vst [vmem:[#allocation5] sm:$0xff] %v30_v0  ;;  %v36_v3 = vld [vmem:[%s8227_s4 + $0x18] sm:$0xff]  ;;  %v38_v4 = vld [vmem:[%s8227_s4 + $0x20] sm:$0xff]  ;;  %v40_v5 = vld [vmem:[%s8227_s4 + $0x28] sm:$0xff] }
   0x3   :  { %33 = vst [vmem:[#allocation5 + $0x8] sm:$0xff] %v32_v1  ;;  %v42_v6 = vld [vmem:[%s8227_s4 + $0x30] sm:$0xff]  ;;  %v44_v7 = vld [vmem:[%s8227_s4 + $0x38] sm:$0xff]  ;;  %v46_v8 = vld [vmem:[%s8227_s4 + $0x40] sm:$0xff] }
   0x4   :  { %35 = vst [vmem:[#allocation5 + $0x10] sm:$0xff] %v34_v2  ;;  %v48_v9 = vld [vmem:[%s8227_s4 + $0x48] sm:$0xff]  ;;  %v50_v10 = vld [vmem:[%s8227_s4 + $0x50] sm:$0xff]  ;;  %v52_v11 = vld [vmem:[%s8227_s4 + $0x58] sm:$0xff] }
   0x5   :  { %37 = vst [vmem:[#allocation5 + $0x18] sm:$0xff] %v36_v3  ;;  %v54_v12 = vld [vmem:[%s8227_s4 + $0x60] sm:$0xff]  ;;  %v56_v13 = vld [vmem:[%s8227_s4 + $0x68] sm:$0xff]  ;;  %v58_v14 = vld [vmem:[%s8227_s4 + $0x70] sm:$0xff] }
   0x6   :  { %39 = vst [vmem:[#allocation5 + $0x20] sm:$0xff] %v38_v4  ;;  %v60_v15 = vld [vmem:[%s8227_s4 + $0x78] sm:$0xff]  ;;  %v62_v16 = vld [vmem:[%s8227_s4 + $0x80] sm:$0xff]  ;;  %v64_v17 = vld [vmem:[%s8227_s4 + $0x88] sm:$0xff] }
   0x7   :  { %41 = vst [vmem:[#allocation5 + $0x28] sm:$0xff] %v40_v5  ;;  %v66_v18 = vld [vmem:[%s8227_s4 + $0x90] sm:$0xff]  ;;  %v68_v19 = vld [vmem:[%s8227_s4 + $0x98] sm:$0xff]  ;;  %v70_v20 = vld [vmem:[%s8227_s4 + $0xa0] sm:$0xff] }
   0x8   :  { %43 = vst [vmem:[#allocation5 + $0x30] sm:$0xff] %v42_v6  ;;  %v72_v21 = vld [vmem:[%s8227_s4 + $0xa8] sm:$0xff]  ;;  %v74_v22 = vld [vmem:[%s8227_s4 + $0xb0] sm:$0xff]  ;;  %v76_v23 = vld [vmem:[%s8227_s4 + $0xb8] sm:$0xff] }
   0x9   :  { %45 = vst [vmem:[#allocation5 + $0x38] sm:$0xff] %v44_v7  ;;  %v78_v24 = vld [vmem:[%s8227_s4 + $0xc0] sm:$0xff]  ;;  %v80_v25 = vld [vmem:[%s8227_s4 + $0xc8] sm:$0xff]  ;;  %v82_v26 = vld [vmem:[%s8227_s4 + $0xd0] sm:$0xff] }
   0xa   :  { %47 = vst [vmem:[#allocation5 + $0x40] sm:$0xff] %v46_v8  ;;  %v84_v27 = vld [vmem:[%s8227_s4 + $0xd8] sm:$0xff]  ;;  %v86_v28 = vld [vmem:[%s8227_s4 + $0xe0] sm:$0xff]  ;;  %v88_v29 = vld [vmem:[%s8227_s4 + $0xe8] sm:$0xff] }
   0xb   :  { %49 = vst [vmem:[#allocation5 + $0x48] sm:$0xff] %v48_v9  ;;  %v90_v30 = vld [vmem:[%s8227_s4 + $0xf0] sm:$0xff]  ;;  %v92_v31 = vld [vmem:[%s8227_s4 + $0xf8] sm:$0xff] }
   0xc   :  { %51 = vst [vmem:[#allocation5 + $0x50] sm:$0xff] %v50_v10 }
   0xd   :  { %53 = vst [vmem:[#allocation5 + $0x58] sm:$0xff] %v52_v11 }
   0xe   :  { %55 = vst [vmem:[#allocation5 + $0x60] sm:$0xff] %v54_v12 }
   0xf   :  { %57 = vst [vmem:[#allocation5 + $0x68] sm:$0xff] %v56_v13 }
  0x10   :  { %59 = vst [vmem:[#allocation5 + $0x70] sm:$0xff] %v58_v14 }
  0x11   :  { %61 = vst [vmem:[#allocation5 + $0x78] sm:$0xff] %v60_v15 }
  0x12   :  { %63 = vst [vmem:[#allocation5 + $0x80] sm:$0xff] %v62_v16 }
  0x13   :  { %65 = vst [vmem:[#allocation5 + $0x88] sm:$0xff] %v64_v17 }
  0x14   :  { %67 = vst [vmem:[#allocation5 + $0x90] sm:$0xff] %v66_v18 }
  0x15   :  { %69 = vst [vmem:[#allocation5 + $0x98] sm:$0xff] %v68_v19 }
  0x16   :  { %71 = vst [vmem:[#allocation5 + $0xa0] sm:$0xff] %v70_v20 }
  0x17   :  { %73 = vst [vmem:[#allocation5 + $0xa8] sm:$0xff] %v72_v21 }
  0x18   :  { %75 = vst [vmem:[#allocation5 + $0xb0] sm:$0xff] %v74_v22 }
  0x19   :  { %77 = vst [vmem:[#allocation5 + $0xb8] sm:$0xff] %v76_v23 }
  0x1a   :  { %79 = vst [vmem:[#allocation5 + $0xc0] sm:$0xff] %v78_v24 }
  0x1b   :  { %81 = vst [vmem:[#allocation5 + $0xc8] sm:$0xff] %v80_v25 }
  0x1c   :  { %83 = vst [vmem:[#allocation5 + $0xd0] sm:$0xff] %v82_v26 }
  0x1d   :  { %85 = vst [vmem:[#allocation5 + $0xd8] sm:$0xff] %v84_v27 }
  0x1e   :  { %87 = vst [vmem:[#allocation5 + $0xe0] sm:$0xff] %v86_v28 }
  0x1f   :  { %89 = vst [vmem:[#allocation5 + $0xe8] sm:$0xff] %v88_v29 }
  0x20   :  { %91 = vst [vmem:[#allocation5 + $0xf0] sm:$0xff] %v90_v30 }
  0x21   :  { %93 = vst [vmem:[#allocation5 + $0xf8] sm:$0xff] %v92_v31 }
  0x22   :  { %99 = vsyncadd [#allocation6 + $0x2], 4096 }
  0x23   :  { %7041 = dma.done.wait [#allocation6 + $0x2], 4096 }
  0x24   :  { %7042 = vsyncadd [#allocation6 + $0x2], 4294963200  ;;  %v4897_v32 = vld [vmem:[%s8227_s4 + $0x100] sm:$0xff]  ;;  %v4898_v33 = vld [vmem:[%s8227_s4 + $0x108] sm:$0xff] }
  0x25   :  { %v4899_v34 = vld [vmem:[%s8227_s4 + $0x110] sm:$0xff]  ;;  %118 = vst [vmem:[#allocation5 + $0x100] sm:$0xff] %v4897_v32  ;;  %v4900_v35 = vld [vmem:[%s8227_s4 + $0x118] sm:$0xff]  ;;  %v4901_v36 = vld [vmem:[%s8227_s4 + $0x120] sm:$0xff] }
  0x26   :  { %120 = vst [vmem:[#allocation5 + $0x108] sm:$0xff] %v4898_v33  ;;  %v4902_v37 = vld [vmem:[%s8227_s4 + $0x128] sm:$0xff]  ;;  %v4903_v38 = vld [vmem:[%s8227_s4 + $0x130] sm:$0xff]  ;;  %v4904_v39 = vld [vmem:[%s8227_s4 + $0x138] sm:$0xff] }
  0x27   :  { %122 = vst [vmem:[#allocation5 + $0x110] sm:$0xff] %v4899_v34  ;;  %v4905_v40 = vld [vmem:[%s8227_s4 + $0x140] sm:$0xff]  ;;  %v4906_v41 = vld [vmem:[%s8227_s4 + $0x148] sm:$0xff]  ;;  %v4907_v42 = vld [vmem:[%s8227_s4 + $0x150] sm:$0xff] }
  0x28   :  { %124 = vst [vmem:[#allocation5 + $0x118] sm:$0xff] %v4900_v35  ;;  %v4908_v43 = vld [vmem:[%s8227_s4 + $0x158] sm:$0xff]  ;;  %v4909_v44 = vld [vmem:[%s8227_s4 + $0x160] sm:$0xff]  ;;  %v4910_v45 = vld [vmem:[%s8227_s4 + $0x168] sm:$0xff] }
  0x29   :  { %126 = vst [vmem:[#allocation5 + $0x120] sm:$0xff] %v4901_v36  ;;  %v4911_v46 = vld [vmem:[%s8227_s4 + $0x170] sm:$0xff]  ;;  %v4912_v47 = vld [vmem:[%s8227_s4 + $0x178] sm:$0xff]  ;;  %v4913_v48 = vld [vmem:[%s8227_s4 + $0x180] sm:$0xff] }
  0x2a   :  { %128 = vst [vmem:[#allocation5 + $0x128] sm:$0xff] %v4902_v37  ;;  %v4914_v49 = vld [vmem:[%s8227_s4 + $0x188] sm:$0xff]  ;;  %v4915_v50 = vld [vmem:[%s8227_s4 + $0x190] sm:$0xff]  ;;  %v4916_v51 = vld [vmem:[%s8227_s4 + $0x198] sm:$0xff] }
  0x2b   :  { %130 = vst [vmem:[#allocation5 + $0x130] sm:$0xff] %v4903_v38  ;;  %v4917_v52 = vld [vmem:[%s8227_s4 + $0x1a0] sm:$0xff]  ;;  %v4918_v53 = vld [vmem:[%s8227_s4 + $0x1a8] sm:$0xff]  ;;  %v4919_v54 = vld [vmem:[%s8227_s4 + $0x1b0] sm:$0xff] }
  0x2c   :  { %132 = vst [vmem:[#allocation5 + $0x138] sm:$0xff] %v4904_v39  ;;  %v4920_v55 = vld [vmem:[%s8227_s4 + $0x1b8] sm:$0xff]  ;;  %v4921_v56 = vld [vmem:[%s8227_s4 + $0x1c0] sm:$0xff]  ;;  %v4922_v57 = vld [vmem:[%s8227_s4 + $0x1c8] sm:$0xff] }
  0x2d   :  { %134 = vst [vmem:[#allocation5 + $0x140] sm:$0xff] %v4905_v40  ;;  %v4923_v58 = vld [vmem:[%s8227_s4 + $0x1d0] sm:$0xff]  ;;  %v4924_v59 = vld [vmem:[%s8227_s4 + $0x1d8] sm:$0xff]  ;;  %v4925_v60 = vld [vmem:[%s8227_s4 + $0x1e0] sm:$0xff] }
  0x2e   :  { %136 = vst [vmem:[#allocation5 + $0x148] sm:$0xff] %v4906_v41  ;;  %v4926_v61 = vld [vmem:[%s8227_s4 + $0x1e8] sm:$0xff]  ;;  %v4927_v62 = vld [vmem:[%s8227_s4 + $0x1f0] sm:$0xff]  ;;  %v4928_v63 = vld [vmem:[%s8227_s4 + $0x1f8] sm:$0xff] }
  0x2f   :  { %138 = vst [vmem:[#allocation5 + $0x150] sm:$0xff] %v4907_v42 }
  0x30   :  { %140 = vst [vmem:[#allocation5 + $0x158] sm:$0xff] %v4908_v43 }
  0x31   :  { %142 = vst [vmem:[#allocation5 + $0x160] sm:$0xff] %v4909_v44 }
  0x32   :  { %144 = vst [vmem:[#allocation5 + $0x168] sm:$0xff] %v4910_v45 }
  0x33   :  { %146 = vst [vmem:[#allocation5 + $0x170] sm:$0xff] %v4911_v46 }
  0x34   :  { %148 = vst [vmem:[#allocation5 + $0x178] sm:$0xff] %v4912_v47 }
  0x35   :  { %150 = vst [vmem:[#allocation5 + $0x180] sm:$0xff] %v4913_v48 }
  0x36   :  { %152 = vst [vmem:[#allocation5 + $0x188] sm:$0xff] %v4914_v49 }
  0x37   :  { %154 = vst [vmem:[#allocation5 + $0x190] sm:$0xff] %v4915_v50 }
  0x38   :  { %156 = vst [vmem:[#allocation5 + $0x198] sm:$0xff] %v4916_v51 }
  0x39   :  { %158 = vst [vmem:[#allocation5 + $0x1a0] sm:$0xff] %v4917_v52 }
  0x3a   :  { %160 = vst [vmem:[#allocation5 + $0x1a8] sm:$0xff] %v4918_v53 }
  0x3b   :  { %162 = vst [vmem:[#allocation5 + $0x1b0] sm:$0xff] %v4919_v54 }
  0x3c   :  { %164 = vst [vmem:[#allocation5 + $0x1b8] sm:$0xff] %v4920_v55 }
  0x3d   :  { %166 = vst [vmem:[#allocation5 + $0x1c0] sm:$0xff] %v4921_v56 }
  0x3e   :  { %168 = vst [vmem:[#allocation5 + $0x1c8] sm:$0xff] %v4922_v57 }
  0x3f   :  { %170 = vst [vmem:[#allocation5 + $0x1d0] sm:$0xff] %v4923_v58 }
  0x40   :  { %172 = vst [vmem:[#allocation5 + $0x1d8] sm:$0xff] %v4924_v59 }
  0x41   :  { %174 = vst [vmem:[#allocation5 + $0x1e0] sm:$0xff] %v4925_v60 }
  0x42   :  { %176 = vst [vmem:[#allocation5 + $0x1e8] sm:$0xff] %v4926_v61 }
  0x43   :  { %178 = vst [vmem:[#allocation5 + $0x1f0] sm:$0xff] %v4927_v62 }
  0x44   :  { %180 = vst [vmem:[#allocation5 + $0x1f8] sm:$0xff] %v4928_v63 }
  0x45   :  { %186 = vsyncadd [#allocation6 + $0x3], 4096  ;;  %v199_v0 = vld [vmem:[%s8226_s3] sm:$0xff]  ;;  %v201_v1 = vld [vmem:[%s8226_s3 + $0x8] sm:$0xff] }
  0x46   :  { %200 = vst [vmem:[#allocation4 + $0x100] sm:$0xff] %v199_v0  ;;  %v203_v2 = vld [vmem:[%s8226_s3 + $0x10] sm:$0xff]  ;;  %v205_v3 = vld [vmem:[%s8226_s3 + $0x18] sm:$0xff]  ;;  %v207_v4 = vld [vmem:[%s8226_s3 + $0x20] sm:$0xff] }
  0x47   :  { %202 = vst [vmem:[#allocation4 + $0x108] sm:$0xff] %v201_v1  ;;  %v209_v5 = vld [vmem:[%s8226_s3 + $0x28] sm:$0xff]  ;;  %v211_v6 = vld [vmem:[%s8226_s3 + $0x30] sm:$0xff]  ;;  %v213_v7 = vld [vmem:[%s8226_s3 + $0x38] sm:$0xff] }
  0x48   :  { %204 = vst [vmem:[#allocation4 + $0x110] sm:$0xff] %v203_v2  ;;  %v215_v8 = vld [vmem:[%s8226_s3 + $0x40] sm:$0xff]  ;;  %v217_v9 = vld [vmem:[%s8226_s3 + $0x48] sm:$0xff]  ;;  %v219_v10 = vld [vmem:[%s8226_s3 + $0x50] sm:$0xff] }
  0x49   :  { %206 = vst [vmem:[#allocation4 + $0x118] sm:$0xff] %v205_v3  ;;  %v221_v11 = vld [vmem:[%s8226_s3 + $0x58] sm:$0xff]  ;;  %v223_v12 = vld [vmem:[%s8226_s3 + $0x60] sm:$0xff]  ;;  %v225_v13 = vld [vmem:[%s8226_s3 + $0x68] sm:$0xff] }
  0x4a   :  { %208 = vst [vmem:[#allocation4 + $0x120] sm:$0xff] %v207_v4  ;;  %v227_v14 = vld [vmem:[%s8226_s3 + $0x70] sm:$0xff]  ;;  %v229_v15 = vld [vmem:[%s8226_s3 + $0x78] sm:$0xff]  ;;  %v231_v16 = vld [vmem:[%s8226_s3 + $0x80] sm:$0xff] }
  0x4b   :  { %210 = vst [vmem:[#allocation4 + $0x128] sm:$0xff] %v209_v5  ;;  %v233_v17 = vld [vmem:[%s8226_s3 + $0x88] sm:$0xff]  ;;  %v235_v18 = vld [vmem:[%s8226_s3 + $0x90] sm:$0xff]  ;;  %v237_v19 = vld [vmem:[%s8226_s3 + $0x98] sm:$0xff] }
  0x4c   :  { %212 = vst [vmem:[#allocation4 + $0x130] sm:$0xff] %v211_v6  ;;  %v239_v20 = vld [vmem:[%s8226_s3 + $0xa0] sm:$0xff]  ;;  %v241_v21 = vld [vmem:[%s8226_s3 + $0xa8] sm:$0xff]  ;;  %v243_v22 = vld [vmem:[%s8226_s3 + $0xb0] sm:$0xff] }
  0x4d   :  { %214 = vst [vmem:[#allocation4 + $0x138] sm:$0xff] %v213_v7  ;;  %v245_v23 = vld [vmem:[%s8226_s3 + $0xb8] sm:$0xff]  ;;  %v247_v24 = vld [vmem:[%s8226_s3 + $0xc0] sm:$0xff]  ;;  %v249_v25 = vld [vmem:[%s8226_s3 + $0xc8] sm:$0xff] }
  0x4e   :  { %216 = vst [vmem:[#allocation4 + $0x140] sm:$0xff] %v215_v8  ;;  %v251_v26 = vld [vmem:[%s8226_s3 + $0xd0] sm:$0xff]  ;;  %v253_v27 = vld [vmem:[%s8226_s3 + $0xd8] sm:$0xff]  ;;  %v255_v28 = vld [vmem:[%s8226_s3 + $0xe0] sm:$0xff] }
  0x4f   :  { %218 = vst [vmem:[#allocation4 + $0x148] sm:$0xff] %v217_v9  ;;  %v257_v29 = vld [vmem:[%s8226_s3 + $0xe8] sm:$0xff]  ;;  %v259_v30 = vld [vmem:[%s8226_s3 + $0xf0] sm:$0xff]  ;;  %v261_v31 = vld [vmem:[%s8226_s3 + $0xf8] sm:$0xff] }
  0x50   :  { %220 = vst [vmem:[#allocation4 + $0x150] sm:$0xff] %v219_v10 }
  0x51   :  { %222 = vst [vmem:[#allocation4 + $0x158] sm:$0xff] %v221_v11 }
  0x52   :  { %224 = vst [vmem:[#allocation4 + $0x160] sm:$0xff] %v223_v12 }
  0x53   :  { %226 = vst [vmem:[#allocation4 + $0x168] sm:$0xff] %v225_v13 }
  0x54   :  { %228 = vst [vmem:[#allocation4 + $0x170] sm:$0xff] %v227_v14 }
  0x55   :  { %230 = vst [vmem:[#allocation4 + $0x178] sm:$0xff] %v229_v15 }
  0x56   :  { %232 = vst [vmem:[#allocation4 + $0x180] sm:$0xff] %v231_v16 }
  0x57   :  { %234 = vst [vmem:[#allocation4 + $0x188] sm:$0xff] %v233_v17 }
  0x58   :  { %236 = vst [vmem:[#allocation4 + $0x190] sm:$0xff] %v235_v18 }
  0x59   :  { %238 = vst [vmem:[#allocation4 + $0x198] sm:$0xff] %v237_v19 }
  0x5a   :  { %240 = vst [vmem:[#allocation4 + $0x1a0] sm:$0xff] %v239_v20 }
  0x5b   :  { %242 = vst [vmem:[#allocation4 + $0x1a8] sm:$0xff] %v241_v21 }
  0x5c   :  { %244 = vst [vmem:[#allocation4 + $0x1b0] sm:$0xff] %v243_v22 }
  0x5d   :  { %246 = vst [vmem:[#allocation4 + $0x1b8] sm:$0xff] %v245_v23 }
  0x5e   :  { %248 = vst [vmem:[#allocation4 + $0x1c0] sm:$0xff] %v247_v24 }
  0x5f   :  { %250 = vst [vmem:[#allocation4 + $0x1c8] sm:$0xff] %v249_v25 }
  0x60   :  { %252 = vst [vmem:[#allocation4 + $0x1d0] sm:$0xff] %v251_v26 }
  0x61   :  { %254 = vst [vmem:[#allocation4 + $0x1d8] sm:$0xff] %v253_v27 }
  0x62   :  { %256 = vst [vmem:[#allocation4 + $0x1e0] sm:$0xff] %v255_v28 }
  0x63   :  { %258 = vst [vmem:[#allocation4 + $0x1e8] sm:$0xff] %v257_v29 }
  0x64   :  { %260 = vst [vmem:[#allocation4 + $0x1f0] sm:$0xff] %v259_v30 }
  0x65   :  { %262 = vst [vmem:[#allocation4 + $0x1f8] sm:$0xff] %v261_v31 }
  0x66   :  { %268 = vsyncadd [#allocation6 + $0x1], 4096  ;;  %v5059_v32 = vld [vmem:[%s8224_s1 + $0xe0] sm:$0xf]  ;;  %v6458_v33 = vld [vmem:[%s8224_s1 + $0xec] sm:$0xf0] }
  0x67   :  { %v5060_v34 = vor.u32 %v6458_v33, %v5059_v32  ;;  %v6456_v35 = vld [vmem:[%s8224_s1 + $0xe4] sm:$0xf]  ;;  %v5061_v36 = vld [vmem:[%s8224_s1 + $0xf0] sm:$0xf0]  ;;  %v5067_v37 = vld [vmem:[%s8224_s1 + $0xe8] sm:$0xf] }
  0x68   :  { %v5064_v38 = vor.u32 %v6456_v35, %v5061_v36  ;;  %v6459_v39 = vld [vmem:[%s8224_s1 + $0xf4] sm:$0xf0]  ;;  %v6457_v40 = vld [vmem:[%s8224_s1 + $0xec] sm:$0xf]  ;;  %v5069_v41 = vld [vmem:[%s8224_s1 + $0xf8] sm:$0xf0] }
  0x69   :  { %503 = vmatpush.bf16.msra.mxu0 %v5060_v34  ;;  %v5068_v42 = vor.u32 %v6459_v39, %v5067_v37  ;;  %v5072_v43 = vor.u32 %v6457_v40, %v5069_v41  ;;  %v5043_v44 = vld [vmem:[%s8224_s1 + $0xc0] sm:$0xf]  ;;  %v6454_v45 = vld [vmem:[%s8224_s1 + $0xcc] sm:$0xf0]  ;;  %v6452_v46 = vld [vmem:[%s8224_s1 + $0xc4] sm:$0xf] }
  0x6a   :  { %532 = vmatpush.bf16.msra.mxu1 %v5064_v38  ;;  %v5044_v47 = vor.u32 %v6454_v45, %v5043_v44  ;;  %v5045_v48 = vld [vmem:[%s8224_s1 + $0xd0] sm:$0xf0]  ;;  %v5051_v49 = vld [vmem:[%s8224_s1 + $0xc8] sm:$0xf]  ;;  %v6455_v50 = vld [vmem:[%s8224_s1 + $0xd4] sm:$0xf0] }
  0x6b   :  { %561 = vmatpush.bf16.msra.mxu2 %v5068_v42  ;;  %590 = vmatpush.bf16.msra.mxu3 %v5072_v43  ;;  %v5048_v51 = vor.u32 %v6452_v46, %v5045_v48  ;;  %v5052_v52 = vor.u32 %v6455_v50, %v5051_v49  ;;  %v6453_v53 = vld [vmem:[%s8224_s1 + $0xcc] sm:$0xf]  ;;  %v5053_v54 = vld [vmem:[%s8224_s1 + $0xd8] sm:$0xf0]  ;;  %v5027_v55 = vld [vmem:[%s8224_s1 + $0xa0] sm:$0xf] }
  0x6c   :  { %v5056_v56 = vor.u32 %v6453_v53, %v5053_v54  ;;  %v6450_v57 = vld [vmem:[%s8224_s1 + $0xac] sm:$0xf0]  ;;  %v6448_v58 = vld [vmem:[%s8224_s1 + $0xa4] sm:$0xf]  ;;  %v5029_v59 = vld [vmem:[%s8224_s1 + $0xb0] sm:$0xf0] }
  0x6d   :  { %504 = vmatpush.bf16.msra.mxu0 %v5044_v47  ;;  %v5028_v60 = vor.u32 %v6450_v57, %v5027_v55  ;;  %v5035_v61 = vld [vmem:[%s8224_s1 + $0xa8] sm:$0xf]  ;;  %v6451_v62 = vld [vmem:[%s8224_s1 + $0xb4] sm:$0xf0]  ;;  %v6449_v63 = vld [vmem:[%s8224_s1 + $0xac] sm:$0xf]  ;;  %v5032_v0 = vor.u32 %v6448_v58, %v5029_v59 }
  0x6e   :  { %533 = vmatpush.bf16.msra.mxu1 %v5048_v51  ;;  %v5037_v1 = vld [vmem:[%s8224_s1 + $0xb8] sm:$0xf0]  ;;  %v5011_v2 = vld [vmem:[%s8224_s1 + $0x80] sm:$0xf]  ;;  %v6446_v3 = vld [vmem:[%s8224_s1 + $0x8c] sm:$0xf0]  ;;  %v5036_v4 = vor.u32 %v6451_v62, %v5035_v61 }
  0x6f   :  { %562 = vmatpush.bf16.msra.mxu2 %v5052_v52  ;;  %591 = vmatpush.bf16.msra.mxu3 %v5056_v56  ;;  %v5040_v5 = vor.u32 %v6449_v63, %v5037_v1  ;;  %v6444_v6 = vld [vmem:[%s8224_s1 + $0x84] sm:$0xf]  ;;  %v5013_v7 = vld [vmem:[%s8224_s1 + $0x90] sm:$0xf0]  ;;  %v5019_v8 = vld [vmem:[%s8224_s1 + $0x88] sm:$0xf]  ;;  %v5012_v12 = vor.u32 %v6446_v3, %v5011_v2 }
  0x70   :  { %v6447_v9 = vld [vmem:[%s8224_s1 + $0x94] sm:$0xf0]  ;;  %v6445_v10 = vld [vmem:[%s8224_s1 + $0x8c] sm:$0xf]  ;;  %v5021_v11 = vld [vmem:[%s8224_s1 + $0x98] sm:$0xf0]  ;;  %v5016_v13 = vor.u32 %v6444_v6, %v5013_v7 }
  0x71   :  { %505 = vmatpush.bf16.msra.mxu0 %v5028_v60  ;;  %v4995_v14 = vld [vmem:[%s8224_s1 + $0x60] sm:$0xf]  ;;  %v6442_v15 = vld [vmem:[%s8224_s1 + $0x6c] sm:$0xf0]  ;;  %v5020_v16 = vor.u32 %v6447_v9, %v5019_v8  ;;  %v5024_v17 = vor.u32 %v6445_v10, %v5021_v11  ;;  %v6440_v18 = vld [vmem:[%s8224_s1 + $0x64] sm:$0xf] }
  0x72   :  { %534 = vmatpush.bf16.msra.mxu1 %v5032_v0  ;;  %v4997_v19 = vld [vmem:[%s8224_s1 + $0x70] sm:$0xf0]  ;;  %v5003_v20 = vld [vmem:[%s8224_s1 + $0x68] sm:$0xf]  ;;  %v6443_v21 = vld [vmem:[%s8224_s1 + $0x74] sm:$0xf0]  ;;  %v4996_v24 = vor.u32 %v6442_v15, %v4995_v14 }
  0x73   :  { %563 = vmatpush.bf16.msra.mxu2 %v5036_v4  ;;  %592 = vmatpush.bf16.msra.mxu3 %v5040_v5  ;;  %v6441_v22 = vld [vmem:[%s8224_s1 + $0x6c] sm:$0xf]  ;;  %v5005_v23 = vld [vmem:[%s8224_s1 + $0x78] sm:$0xf0]  ;;  %v5000_v25 = vor.u32 %v6440_v18, %v4997_v19  ;;  %v4979_v26 = vld [vmem:[%s8224_s1 + $0x40] sm:$0xf]  ;;  %v5004_v28 = vor.u32 %v6443_v21, %v5003_v20 }
  0x74   :  { %v6438_v27 = vld [vmem:[%s8224_s1 + $0x4c] sm:$0xf0]  ;;  %v5008_v29 = vor.u32 %v6441_v22, %v5005_v23  ;;  %v6436_v30 = vld [vmem:[%s8224_s1 + $0x44] sm:$0xf]  ;;  %v4981_v31 = vld [vmem:[%s8224_s1 + $0x50] sm:$0xf0] }
  0x75   :  { %506 = vmatpush.bf16.msra.mxu0 %v5012_v12  ;;  %v4987_v32 = vld [vmem:[%s8224_s1 + $0x48] sm:$0xf]  ;;  %v6439_v33 = vld [vmem:[%s8224_s1 + $0x54] sm:$0xf0]  ;;  %v6437_v34 = vld [vmem:[%s8224_s1 + $0x4c] sm:$0xf]  ;;  %v4980_v36 = vor.u32 %v6438_v27, %v4979_v26  ;;  %v4984_v37 = vor.u32 %v6436_v30, %v4981_v31 }
  0x76   :  { %535 = vmatpush.bf16.msra.mxu1 %v5016_v13  ;;  %v4989_v35 = vld [vmem:[%s8224_s1 + $0x58] sm:$0xf0]  ;;  %v4963_v38 = vld [vmem:[%s8224_s1 + $0x20] sm:$0xf]  ;;  %v6434_v39 = vld [vmem:[%s8224_s1 + $0x2c] sm:$0xf0]  ;;  %v4988_v40 = vor.u32 %v6439_v33, %v4987_v32 }
  0x77   :  { %564 = vmatpush.bf16.msra.mxu2 %v5020_v16  ;;  %593 = vmatpush.bf16.msra.mxu3 %v5024_v17  ;;  %v4992_v41 = vor.u32 %v6437_v34, %v4989_v35  ;;  %v6432_v42 = vld [vmem:[%s8224_s1 + $0x24] sm:$0xf]  ;;  %v4965_v43 = vld [vmem:[%s8224_s1 + $0x30] sm:$0xf0]  ;;  %v4971_v44 = vld [vmem:[%s8224_s1 + $0x28] sm:$0xf]  ;;  %v4964_v48 = vor.u32 %v6434_v39, %v4963_v38 }
  0x78   :  { %v6435_v45 = vld [vmem:[%s8224_s1 + $0x34] sm:$0xf0]  ;;  %v6433_v46 = vld [vmem:[%s8224_s1 + $0x2c] sm:$0xf]  ;;  %v4973_v47 = vld [vmem:[%s8224_s1 + $0x38] sm:$0xf0]  ;;  %v4968_v50 = vor.u32 %v6432_v42, %v4965_v43 }
  0x79   :  { %507 = vmatpush.bf16.msra.mxu0 %v4996_v24  ;;  %v4947_v49 = vld [vmem:[%s8224_s1] sm:$0xf]  ;;  %v6430_v51 = vld [vmem:[%s8224_s1 + $0xc] sm:$0xf0]  ;;  %v6428_v52 = vld [vmem:[%s8224_s1 + $0x4] sm:$0xf]  ;;  %v4972_v54 = vor.u32 %v6435_v45, %v4971_v44  ;;  %v4976_v55 = vor.u32 %v6433_v46, %v4973_v47 }
  0x7a   :  { %536 = vmatpush.bf16.msra.mxu1 %v5000_v25  ;;  %v4949_v53 = vld [vmem:[%s8224_s1 + $0x10] sm:$0xf0]  ;;  %v4955_v56 = vld [vmem:[%s8224_s1 + $0x8] sm:$0xf]  ;;  %v5187_v57 = vld [vmem:[#allocation5 + $0xe0] sm:$0xf]  ;;  %v4948_v62 = vor.u32 %v6430_v51, %v4947_v49 }
  0x7b   :  { %565 = vmatpush.bf16.msra.mxu2 %v5004_v28  ;;  %594 = vmatpush.bf16.msra.mxu3 %v5008_v29  ;;  %v6490_v58 = vld [vmem:[#allocation5 + $0xec] sm:$0xf0]  ;;  %v6431_v59 = vld [vmem:[%s8224_s1 + $0x14] sm:$0xf0]  ;;  %v6429_v60 = vld [vmem:[%s8224_s1 + $0xc] sm:$0xf]  ;;  %v4952_v1 = vor.u32 %v6428_v52, %v4949_v53 }
  0x7c   :  { %v4957_v61 = vld [vmem:[%s8224_s1 + $0x18] sm:$0xf0]  ;;  %v6488_v63 = vld [vmem:[#allocation5 + $0xe4] sm:$0xf]  ;;  %v5189_v0 = vld [vmem:[#allocation5 + $0xf0] sm:$0xf0]  ;;  %v5188_v2 = vor.u32 %v6490_v58, %v5187_v57  ;;  %v4956_v5 = vor.u32 %v6431_v59, %v4955_v56 }
  0x7d   :  { %508 = vmatpush.bf16.msra.mxu0 %v4980_v36  ;;  %v6489_v3 = vld [vmem:[#allocation5 + $0xec] sm:$0xf]  ;;  %v5197_v4 = vld [vmem:[#allocation5 + $0xf8] sm:$0xf0]  ;;  %v4960_v6 = vor.u32 %v6429_v60, %v4957_v61  ;;  %v6424_v7 = vld [vmem:[%s8223_s0] sm:$0xff]  ;;  %v5192_v9 = vor.u32 %v6488_v63, %v5189_v0 }
  0x7e   :  { %537 = vmatpush.bf16.msra.mxu1 %v4984_v37  ;;  %v5171_v8 = vld [vmem:[#allocation5 + $0xc0] sm:$0xf]  ;;  %v6486_v10 = vld [vmem:[#allocation5 + $0xcc] sm:$0xf0]  ;;  %v5195_v11 = vld [vmem:[#allocation5 + $0xe8] sm:$0xf]  ;;  %v5200_v13 = vor.u32 %v6489_v3, %v5197_v4 }
  0x7f   :  { %566 = vmatpush.bf16.msra.mxu2 %v4988_v40  ;;  %595 = vmatpush.bf16.msra.mxu3 %v4992_v41  ;;  %v6491_v12 = vld [vmem:[#allocation5 + $0xf4] sm:$0xf0]  ;;  %v6484_v14 = vld [vmem:[#allocation5 + $0xc4] sm:$0xf]  ;;  %v5173_v15 = vld [vmem:[#allocation5 + $0xd0] sm:$0xf0]  ;;  %v5172_v18 = vor.u32 %v6486_v10, %v5171_v8 }
  0x80   :  { %v6485_v16 = vld [vmem:[#allocation5 + $0xcc] sm:$0xf]  ;;  %v5181_v17 = vld [vmem:[#allocation5 + $0xd8] sm:$0xf0]  ;;  %v5196_v19 = vor.u32 %v6491_v12, %v5195_v11  ;;  %v5155_v20 = vld [vmem:[#allocation5 + $0xa0] sm:$0xf]  ;;  %v5176_v21 = vor.u32 %v6484_v14, %v5173_v15 }
  0x81   :  { %509 = vmatpush.bf16.msra.mxu0 %v4964_v48  ;;  %v6482_v22 = vld [vmem:[#allocation5 + $0xac] sm:$0xf0]  ;;  %v5179_v23 = vld [vmem:[#allocation5 + $0xc8] sm:$0xf]  ;;  %v6487_v24 = vld [vmem:[#allocation5 + $0xd4] sm:$0xf0]  ;;  %v5184_v25 = vor.u32 %v6485_v16, %v5181_v17 }
  0x82   :  { %538 = vmatpush.bf16.msra.mxu1 %v4968_v50  ;;  %v6480_v26 = vld [vmem:[#allocation5 + $0xa4] sm:$0xf]  ;;  %v5157_v27 = vld [vmem:[#allocation5 + $0xb0] sm:$0xf0]  ;;  %v6481_v28 = vld [vmem:[#allocation5 + $0xac] sm:$0xf]  ;;  %v5156_v30 = vor.u32 %v6482_v22, %v5155_v20  ;;  %v5180_v31 = vor.u32 %v6487_v24, %v5179_v23 }
  0x83   :  { %567 = vmatpush.bf16.msra.mxu2 %v4972_v54  ;;  %596 = vmatpush.bf16.msra.mxu3 %v4976_v55  ;;  %v5165_v29 = vld [vmem:[#allocation5 + $0xb8] sm:$0xf0]  ;;  %v5139_v32 = vld [vmem:[#allocation5 + $0x80] sm:$0xf]  ;;  %v5160_v33 = vor.u32 %v6480_v26, %v5157_v27  ;;  %v6478_v34 = vld [vmem:[#allocation5 + $0x8c] sm:$0xf0] }
  0x84   :  { %v5163_v35 = vld [vmem:[#allocation5 + $0xa8] sm:$0xf]  ;;  %v6483_v36 = vld [vmem:[#allocation5 + $0xb4] sm:$0xf0]  ;;  %v5168_v37 = vor.u32 %v6481_v28, %v5165_v29  ;;  %v6476_v38 = vld [vmem:[#allocation5 + $0x84] sm:$0xf]  ;;  %v5140_v42 = vor.u32 %v6478_v34, %v5139_v32 }
  0x85   :  { %510 = vmatpush.bf16.msra.mxu0 %v4948_v62  ;;  %v5141_v39 = vld [vmem:[#allocation5 + $0x90] sm:$0xf0]  ;;  %v6477_v40 = vld [vmem:[#allocation5 + $0x8c] sm:$0xf]  ;;  %v5149_v41 = vld [vmem:[#allocation5 + $0x98] sm:$0xf0]  ;;  %v5164_v43 = vor.u32 %v6483_v36, %v5163_v35 }
  0x86   :  { %539 = vmatpush.bf16.msra.mxu1 %v4952_v1  ;;  %v5123_v44 = vld [vmem:[#allocation5 + $0x60] sm:$0xf]  ;;  %v5144_v45 = vor.u32 %v6476_v38, %v5141_v39  ;;  %v6474_v46 = vld [vmem:[#allocation5 + $0x6c] sm:$0xf0]  ;;  %v5147_v47 = vld [vmem:[#allocation5 + $0x88] sm:$0xf]  ;;  %v5152_v49 = vor.u32 %v6477_v40, %v5149_v41 }
  0x87   :  { %568 = vmatpush.bf16.msra.mxu2 %v4956_v5  ;;  %597 = vmatpush.bf16.msra.mxu3 %v4960_v6  ;;  %v6479_v48 = vld [vmem:[#allocation5 + $0x94] sm:$0xf0]  ;;  %v6472_v50 = vld [vmem:[#allocation5 + $0x64] sm:$0xf]  ;;  %v5125_v51 = vld [vmem:[#allocation5 + $0x70] sm:$0xf0]  ;;  %v5124_v55 = vor.u32 %v6474_v46, %v5123_v44 }
  0x88   :  { %511 = vmatmul.bf16.vlgmr.msra.gmra.mxu0 %v6424_v7  ;;  %v6473_v52 = vld [vmem:[#allocation5 + $0x6c] sm:$0xf]  ;;  %v5133_v53 = vld [vmem:[#allocation5 + $0x78] sm:$0xf0]  ;;  %v5148_v56 = vor.u32 %v6479_v48, %v5147_v47  ;;  %v5107_v57 = vld [vmem:[#allocation5 + $0x40] sm:$0xf]  ;;  %v5128_v58 = vor.u32 %v6472_v50, %v5125_v51 }
  0x89   :  { %850 = vmatpush.bf16.msrb.mxu0 %v5188_v2  ;;  %540 = vmatmul.bf16.vlgmr.msra.gmra.mxu1 %v6424_v7  ;;  %v6425_v54 = vld [vmem:[%s8223_s0 + $0x8] sm:$0xff]  ;;  %v6470_v59 = vld [vmem:[#allocation5 + $0x4c] sm:$0xf0]  ;;  %v6475_v61 = vld [vmem:[#allocation5 + $0x74] sm:$0xf0]  ;;  %v5136_v62 = vor.u32 %v6473_v52, %v5133_v53  ;;  %v7047_v36 = vmov 0  }
  0x8a   :  { %863 = vmatpush.bf16.msrb.mxu1 %v5192_v9  ;;  %569 = vmatmul.bf16.vlgmr.msra.gmra.mxu2 %v6424_v7  ;;  %v5131_v60 = vld [vmem:[#allocation5 + $0x68] sm:$0xf]  ;;  %v6468_v63 = vld [vmem:[#allocation5 + $0x44] sm:$0xf]  ;;  %v5109_v0 = vld [vmem:[#allocation5 + $0x50] sm:$0xf0]  ;;  %v5108_v3 = vor.u32 %v6470_v59, %v5107_v57 }
  0x8b   :  { %889 = vmatpush.bf16.msrb.mxu3 %v5200_v13  ;;  %876 = vmatpush.bf16.msrb.mxu2 %v5196_v19  ;;  %v6469_v1 = vld [vmem:[#allocation5 + $0x4c] sm:$0xf]  ;;  %v5117_v2 = vld [vmem:[#allocation5 + $0x58] sm:$0xf0]  ;;  %v5132_v4 = vor.u32 %v6475_v61, %v5131_v60  ;;  %v5112_v5 = vor.u32 %v6468_v63, %v5109_v0  ;;  %v6466_v8 = vld [vmem:[#allocation5 + $0x2c] sm:$0xf0] }
  0x8c   :  { %598 = vmatmul.bf16.vlgmr.msra.gmra.mxu3 %v6424_v7  ;;  %v5120_v6 = vor.u32 %v6469_v1, %v5117_v2  ;;  %v5091_v7 = vld [vmem:[#allocation5 + $0x20] sm:$0xf]  ;;  %v6464_v9 = vld [vmem:[#allocation5 + $0x24] sm:$0xf]  ;;  %v5093_v11 = vld [vmem:[#allocation5 + $0x30] sm:$0xf0] }
  0x8d   :  { %851 = vmatpush.bf16.msrb.mxu0 %v5172_v18  ;;  %v5092_v10 = vor.u32 %v6466_v8, %v5091_v7  ;;  %v5115_v12 = vld [vmem:[#allocation5 + $0x48] sm:$0xf]  ;;  %v6471_v13 = vld [vmem:[#allocation5 + $0x54] sm:$0xf0]  ;;  %v5096_v14 = vor.u32 %v6464_v9, %v5093_v11  ;;  %v6465_v16 = vld [vmem:[#allocation5 + $0x2c] sm:$0xf] }
  0x8e   :  { %864 = vmatpush.bf16.msrb.mxu1 %v5176_v21  ;;  %v5116_v15 = vor.u32 %v6471_v13, %v5115_v12  ;;  %v5101_v17 = vld [vmem:[#allocation5 + $0x38] sm:$0xf0]  ;;  %v5075_v18 = vld [vmem:[#allocation5] sm:$0xf]  ;;  %v6462_v20 = vld [vmem:[#allocation5 + $0xc] sm:$0xf0] }
  0x8f   :  { %890 = vmatpush.bf16.msrb.mxu3 %v5184_v25  ;;  %877 = vmatpush.bf16.msrb.mxu2 %v5180_v31  ;;  %v5104_v19 = vor.u32 %v6465_v16, %v5101_v17  ;;  %v6460_v21 = vld [vmem:[#allocation5 + $0x4] sm:$0xf]  ;;  %v5077_v22 = vld [vmem:[#allocation5 + $0x10] sm:$0xf0]  ;;  %v5099_v23 = vld [vmem:[#allocation5 + $0x28] sm:$0xf]  ;;  %v5076_v25 = vor.u32 %v6462_v20, %v5075_v18 }
  0x90   :  { %v6467_v24 = vld [vmem:[#allocation5 + $0x34] sm:$0xf0]  ;;  %v6461_v27 = vld [vmem:[#allocation5 + $0xc] sm:$0xf]  ;;  %v5085_v28 = vld [vmem:[#allocation5 + $0x18] sm:$0xf0]  ;;  %v5080_v29 = vor.u32 %v6460_v21, %v5077_v22 }
  0x91   :  { %852 = vmatpush.bf16.msrb.mxu0 %v5156_v30  ;;  %v5100_v26 = vor.u32 %v6467_v24, %v5099_v23  ;;  %v5083_v30 = vld [vmem:[#allocation5 + $0x8] sm:$0xf]  ;;  %v6463_v31 = vld [vmem:[#allocation5 + $0x14] sm:$0xf0]  ;;  %v5088_v32 = vor.u32 %v6461_v27, %v5085_v28  ;;  %v6426_v34 = vld [vmem:[%s8223_s0 + $0x10] sm:$0xff] }
  0x92   :  { %865 = vmatpush.bf16.msrb.mxu1 %v5160_v33  ;;  %v5084_v33 = vor.u32 %v6463_v31, %v5083_v30  ;;  %v6427_v35 = vld [vmem:[%s8223_s0 + $0x18] sm:$0xff]  ;;  %v309_v39 = vld [vmem:[%s8225_s2] sm:$0xf]  ;;  %v6520_v20 = vld [vmem:[#allocation5 + $0xe4] sm:$0xf] }
  0x93   :  { %891 = vmatpush.bf16.msrb.mxu3 %v5168_v37  ;;  %878 = vmatpush.bf16.msrb.mxu2 %v5164_v43  ;;  %v7586_v40 = vperm.slane %v309_v39, 0  ;;  %v7588_v41 = vperm.slane %v309_v39, 1  ;;  %v7600_v48 = vperm.slane %v309_v39, 2  ;;  %v5318_v18 = vld [vmem:[#allocation5 + $0xe0] sm:$0xf] }
  0x94   :  { %v5320_v24 = vld [vmem:[#allocation5 + $0xf0] sm:$0xf0] }
  0x95   :  { %853 = vmatpush.bf16.msrb.mxu0 %v5140_v42  ;;  %v5323_v31 = vor.u32 %v6520_v20, %v5320_v24  ;;  %v5294_v20 = vld [vmem:[#allocation5 + $0xa8] sm:$0xf] }
  0x96   :  { %866 = vmatpush.bf16.msrb.mxu1 %v5144_v45 }
  0x97   :  { %892 = vmatpush.bf16.msrb.mxu3 %v5152_v49  ;;  %879 = vmatpush.bf16.msrb.mxu2 %v5148_v56  ;;  %v7602_v49 = vperm.slane %v309_v39, 3 }
  0x98   :  { %516 = vmatmul.bf16.gmra.mxu0 %v6425_v54 }
  0x99   :  { %854 = vmatpush.bf16.msrb.mxu0 %v5124_v55  ;;  %545 = vmatmul.bf16.gmra.mxu1 %v6425_v54 }
  0x9a   :  { %867 = vmatpush.bf16.msrb.mxu1 %v5128_v58  ;;  %574 = vmatmul.bf16.gmra.mxu2 %v6425_v54 }
  0x9b   :  { %893 = vmatpush.bf16.msrb.mxu3 %v5136_v62  ;;  %880 = vmatpush.bf16.msrb.mxu2 %v5132_v4 }
  0x9c   :  { %603 = vmatmul.bf16.gmra.mxu3 %v6425_v54 }
  0x9d   :  { %855 = vmatpush.bf16.msrb.mxu0 %v5108_v3 }
  0x9e   :  { %868 = vmatpush.bf16.msrb.mxu1 %v5112_v5 }
  0x9f   :  { %894 = vmatpush.bf16.msrb.mxu3 %v5120_v6  ;;  %881 = vmatpush.bf16.msrb.mxu2 %v5116_v15 }
  0xa1   :  { %856 = vmatpush.bf16.msrb.mxu0 %v5092_v10 }
  0xa2   :  { %869 = vmatpush.bf16.msrb.mxu1 %v5096_v14 }
  0xa3   :  { %895 = vmatpush.bf16.msrb.mxu3 %v5104_v19  ;;  %882 = vmatpush.bf16.msrb.mxu2 %v5100_v26  ;;  %v6522_v19 = vld [vmem:[#allocation5 + $0xec] sm:$0xf0]  ;;  %v6523_v26 = vld [vmem:[#allocation5 + $0xf4] sm:$0xf0] }
  0xa4   :  { %v5319_v23 = vor.u32 %v6522_v19, %v5318_v18  ;;  %v5288_v19 = vld [vmem:[#allocation5 + $0xb0] sm:$0xf0] }
  0xa5   :  { %857 = vmatpush.bf16.msrb.mxu0 %v5076_v25  ;;  %v5326_v25 = vld [vmem:[#allocation5 + $0xe8] sm:$0xf] }
  0xa6   :  { %870 = vmatpush.bf16.msrb.mxu1 %v5080_v29 }
  0xa7   :  { %896 = vmatpush.bf16.msrb.mxu3 %v5088_v32  ;;  %883 = vmatpush.bf16.msrb.mxu2 %v5084_v33  ;;  %v5327_v32 = vor.u32 %v6523_v26, %v5326_v25  ;;  %v6521_v33 = vld [vmem:[#allocation5 + $0xec] sm:$0xf] }
  0xa8   :  { %521 = vmatmul.bf16.gmra.mxu0 %v6426_v34 }
  0xa9   :  { %550 = vmatmul.bf16.gmra.mxu1 %v6426_v34  ;;  %1175 = vmatpush.bf16.msra.mxu0 %v5319_v23 }
  0xaa   :  { %579 = vmatmul.bf16.gmra.mxu2 %v6426_v34  ;;  %1188 = vmatpush.bf16.msra.mxu1 %v5323_v31  ;;  %v5296_v31 = vld [vmem:[#allocation5 + $0xb8] sm:$0xf0] }
  0xab   :  { %1201 = vmatpush.bf16.msra.mxu2 %v5327_v32 }
  0xac   :  { %608 = vmatmul.bf16.gmra.mxu3 %v6426_v34  ;;  %v5328_v34 = vld [vmem:[#allocation5 + $0xf8] sm:$0xf0] }
  0xb8   :  { %526 = vmatmul.bf16.gmra.mxu0 %v6427_v35 }
  0xb9   :  { %555 = vmatmul.bf16.gmra.mxu1 %v6427_v35 }
  0xba   :  { %584 = vmatmul.bf16.gmra.mxu2 %v6427_v35 }
  0xbc   :  { %613 = vmatmul.bf16.gmra.mxu3 %v6427_v35 }
  0xc8   :  { %858 = vmatmul.bf16.vlgmr.msrb.gmra.mxu0 %v7047_v36 }
  0xc9   :  { %871 = vmatmul.bf16.vlgmr.msrb.gmra.mxu1 %v7047_v36 }
  0xca   :  { %884 = vmatmul.bf16.vlgmr.msrb.gmra.mxu2 %v7047_v36 }
  0xcc   :  { %897 = vmatmul.bf16.vlgmr.msrb.gmra.mxu3 %v7047_v36 }
 0x105   :  { %v7579_v37 = vpop.f32.mrf.mxu0 }
 0x106   :  { %v7581_v38 = vpop.f32.mrf.mxu1 }
 0x10d   :  { %v7590_v42 = vpop.f32.mrf.mxu2  ;;  %v514_v44 = vpop.f32.mrf.mxu0 }
 0x10e   :  { %v543_v45 = vpop.f32.mrf.mxu1  ;;  %v7595_v46 = vadd.f32 %v514_v44, %v7586_v40  ;;  %v5331_v44 = vor.u32 %v6521_v33, %v5328_v34 }
 0x10f   :  { %v7592_v43 = vpop.f32.mrf.mxu3  ;;  %v7598_v47 = vadd.f32 %v543_v45, %v7588_v41  ;;  %v5302_v45 = vld [vmem:[#allocation5 + $0xc0] sm:$0xf] }
 0x110   :  { %1214 = vmatpush.bf16.msra.mxu3 %v5331_v44  ;;  %v5270_v44 = vld [vmem:[#allocation5 + $0x80] sm:$0xf] }
 0x115   :  { %v572_v50 = vpop.f32.mrf.mxu2  ;;  %v517_v54 = vpop.f32.mrf.mxu0 }
 0x116   :  { %v7605_v52 = vadd.f32 %v572_v50, %v7600_v48  ;;  %v546_v55 = vpop.f32.mrf.mxu1  ;;  %v7611_v56 = vadd.f32 %v517_v54, %v7586_v40  ;;  %v6518_v50 = vld [vmem:[#allocation5 + $0xcc] sm:$0xf0] }
 0x117   :  { %v601_v51 = vpop.f32.mrf.mxu3  ;;  %v7614_v57 = vadd.f32 %v546_v55, %v7588_v41  ;;  %v5303_v54 = vor.u32 %v6518_v50, %v5302_v45  ;;  %v5304_v55 = vld [vmem:[#allocation5 + $0xd0] sm:$0xf0]  ;;  %v6510_v45 = vld [vmem:[#allocation5 + $0x8c] sm:$0xf0]  ;;  %v6508_v50 = vld [vmem:[#allocation5 + $0x84] sm:$0xf] }
 0x118   :  { %v7608_v53 = vadd.f32 %v601_v51, %v7602_v49  ;;  %v6516_v51 = vld [vmem:[#allocation5 + $0xc4] sm:$0xf] }
 0x119   :  { %1176 = vmatpush.bf16.msra.mxu0 %v5303_v54  ;;  %v5272_v54 = vld [vmem:[#allocation5 + $0x90] sm:$0xf0] }
 0x11d   :  { %v575_v58 = vpop.f32.mrf.mxu2  ;;  %v519_v62 = vpop.f32.mrf.mxu0 }
 0x11e   :  { %v7617_v60 = vadd.f32 %v575_v58, %v7600_v48  ;;  %v548_v63 = vpop.f32.mrf.mxu1  ;;  %v7623_v0 = vadd.f32 %v519_v62, %v7586_v40  ;;  %v5310_v58 = vld [vmem:[#allocation5 + $0xc8] sm:$0xf]  ;;  %v5307_v62 = vor.u32 %v6516_v51, %v5304_v55  ;;  %v5271_v51 = vor.u32 %v6510_v45, %v5270_v44  ;;  %v5238_v45 = vld [vmem:[#allocation5 + $0x40] sm:$0xf] }
 0x11f   :  { %v604_v59 = vpop.f32.mrf.mxu3  ;;  %v7626_v1 = vadd.f32 %v548_v63, %v7588_v41  ;;  %v5278_v55 = vld [vmem:[#allocation5 + $0x88] sm:$0xf] }
 0x120   :  { %v7620_v61 = vadd.f32 %v604_v59, %v7602_v49  ;;  %v6519_v59 = vld [vmem:[#allocation5 + $0xd4] sm:$0xf0]  ;;  %1189 = vmatpush.bf16.msra.mxu1 %v5307_v62 }
 0x121   :  { %v5311_v63 = vor.u32 %v6519_v59, %v5310_v58  ;;  %v6511_v58 = vld [vmem:[#allocation5 + $0x94] sm:$0xf0]  ;;  %v5275_v59 = vor.u32 %v6508_v50, %v5272_v54  ;;  %v6502_v50 = vld [vmem:[#allocation5 + $0x4c] sm:$0xf0] }
 0x122   :  { %v5279_v62 = vor.u32 %v6511_v58, %v5278_v55  ;;  %v5239_v58 = vor.u32 %v6502_v50, %v5238_v45  ;;  %v6494_v45 = vld [vmem:[#allocation5 + $0xc] sm:$0xf0]  ;;  %v6492_v50 = vld [vmem:[#allocation5 + $0x4] sm:$0xf] }
 0x123   :  { %1202 = vmatpush.bf16.msra.mxu2 %v5311_v63  ;;  %v6509_v63 = vld [vmem:[#allocation5 + $0x8c] sm:$0xf] }
 0x125   :  { %v577_v2 = vpop.f32.mrf.mxu2  ;;  %v522_v6 = vpop.f32.mrf.mxu0 }
 0x126   :  { %v7629_v4 = vadd.f32 %v577_v2, %v7600_v48  ;;  %v551_v7 = vpop.f32.mrf.mxu1  ;;  %v7635_v8 = vadd.f32 %v522_v6, %v7586_v40  ;;  %v6517_v2 = vld [vmem:[#allocation5 + $0xcc] sm:$0xf] }
 0x127   :  { %v606_v3 = vpop.f32.mrf.mxu3  ;;  %v7638_v9 = vadd.f32 %v551_v7, %v7588_v41  ;;  %v5286_v7 = vld [vmem:[#allocation5 + $0xa0] sm:$0xf] }
 0x128   :  { %v7632_v5 = vadd.f32 %v606_v3, %v7602_v49  ;;  %v5312_v3 = vld [vmem:[#allocation5 + $0xd8] sm:$0xf0] }
 0x129   :  { %v5315_v6 = vor.u32 %v6517_v2, %v5312_v3  ;;  %v5280_v2 = vld [vmem:[#allocation5 + $0x98] sm:$0xf0] }
 0x12a   :  { %v5283_v3 = vor.u32 %v6509_v63, %v5280_v2  ;;  %v5246_v63 = vld [vmem:[#allocation5 + $0x48] sm:$0xf]  ;;  %v6503_v2 = vld [vmem:[#allocation5 + $0x54] sm:$0xf0] }
 0x12b   :  { %1215 = vmatpush.bf16.msra.mxu3 %v5315_v6  ;;  %v5254_v6 = vld [vmem:[#allocation5 + $0x60] sm:$0xf] }
 0x12d   :  { %v580_v10 = vpop.f32.mrf.mxu2  ;;  %v524_v14 = vpop.f32.mrf.mxu0 }
 0x12e   :  { %v7641_v12 = vadd.f32 %v580_v10, %v7600_v48  ;;  %v553_v15 = vpop.f32.mrf.mxu1  ;;  %v7647_v16 = vadd.f32 %v524_v14, %v7586_v40  ;;  %v6514_v10 = vld [vmem:[#allocation5 + $0xac] sm:$0xf0] }
 0x12f   :  { %v609_v11 = vpop.f32.mrf.mxu3  ;;  %v7650_v17 = vadd.f32 %v553_v15, %v7588_v41  ;;  %v5287_v18 = vor.u32 %v6514_v10, %v5286_v7  ;;  %v6506_v7 = vld [vmem:[#allocation5 + $0x6c] sm:$0xf0]  ;;  %v6504_v10 = vld [vmem:[#allocation5 + $0x64] sm:$0xf] }
 0x130   :  { %v7644_v13 = vadd.f32 %v609_v11, %v7602_v49  ;;  %v6512_v11 = vld [vmem:[#allocation5 + $0xa4] sm:$0xf] }
 0x131   :  { %v5291_v26 = vor.u32 %v6512_v11, %v5288_v19  ;;  %1177 = vmatpush.bf16.msra.mxu0 %v5287_v18  ;;  %v513_v11 = vadd.f32 %v7579_v37, %v7586_v40  ;;  %v5255_v19 = vor.u32 %v6506_v7, %v5254_v6  ;;  %v5247_v6 = vor.u32 %v6503_v2, %v5246_v63  ;;  %v5248_v7 = vld [vmem:[#allocation5 + $0x58] sm:$0xf0]  ;;  %v6493_v63 = vld [vmem:[#allocation5 + $0xc] sm:$0xf] }
 0x132   :  { %v5216_v2 = vld [vmem:[#allocation5 + $0x18] sm:$0xf0] }
 0x133   :  { %1190 = vmatpush.bf16.msra.mxu1 %v5291_v26 }
 0x135   :  { %v582_v21 = vpop.f32.mrf.mxu2  ;;  %v527_v29 = vpop.f32.mrf.mxu0  ;;  %1178 = vmatpush.bf16.msra.mxu0 %v5271_v51  ;;  %v6500_v51 = vld [vmem:[#allocation5 + $0x44] sm:$0xf] }
 0x136   :  { %v7653_v27 = vadd.f32 %v582_v21, %v7600_v48  ;;  %v556_v30 = vpop.f32.mrf.mxu1  ;;  %v7659_v35 = vadd.f32 %v527_v29, %v7586_v40  ;;  %v6515_v21 = vld [vmem:[#allocation5 + $0xb4] sm:$0xf0] }
 0x137   :  { %v611_v22 = vpop.f32.mrf.mxu3  ;;  %v7662_v39 = vadd.f32 %v556_v30, %v7588_v41  ;;  %v5295_v29 = vor.u32 %v6515_v21, %v5294_v20  ;;  %v6513_v30 = vld [vmem:[#allocation5 + $0xac] sm:$0xf]  ;;  %1191 = vmatpush.bf16.msra.mxu1 %v5275_v59  ;;  %v5256_v20 = vld [vmem:[#allocation5 + $0x70] sm:$0xf0]  ;;  %v5262_v21 = vld [vmem:[#allocation5 + $0x68] sm:$0xf] }
 0x138   :  { %v7656_v28 = vadd.f32 %v611_v22, %v7602_v49  ;;  %v5299_v34 = vor.u32 %v6513_v30, %v5296_v31  ;;  %v5259_v31 = vor.u32 %v6504_v10, %v5256_v20  ;;  %v5240_v59 = vld [vmem:[#allocation5 + $0x50] sm:$0xf0]  ;;  %v5222_v10 = vld [vmem:[#allocation5 + $0x20] sm:$0xf] }
 0x139   :  { %1203 = vmatpush.bf16.msra.mxu2 %v5295_v29  ;;  %1179 = vmatpush.bf16.msra.mxu0 %v5255_v19  ;;  %v6496_v19 = vld [vmem:[#allocation5 + $0x24] sm:$0xf]  ;;  %v5224_v20 = vld [vmem:[#allocation5 + $0x30] sm:$0xf0] }
 0x13a   :  { %1216 = vmatpush.bf16.msra.mxu3 %v5299_v34  ;;  %v5264_v34 = vld [vmem:[#allocation5 + $0x78] sm:$0xf0] }
 0x13b   :  { %1192 = vmatpush.bf16.msra.mxu1 %v5259_v31  ;;  %v6499_v31 = vld [vmem:[#allocation5 + $0x34] sm:$0xf0] }
 0x13d   :  { %v585_v14 = vpop.f32.mrf.mxu2  ;;  %v529_v24 = vpop.f32.mrf.mxu0  ;;  %1204 = vmatpush.bf16.msra.mxu2 %v5279_v62  ;;  %v5243_v62 = vor.u32 %v6500_v51, %v5240_v59  ;;  %1180 = vmatpush.bf16.msra.mxu0 %v5239_v58  ;;  %v6495_v58 = vld [vmem:[#allocation5 + $0x14] sm:$0xf0] }
 0x13e   :  { %v7665_v22 = vadd.f32 %v585_v14, %v7600_v48  ;;  %v558_v25 = vpop.f32.mrf.mxu1  ;;  %v7671_v32 = vadd.f32 %v529_v24, %v7586_v40  ;;  %v542_v14 = vadd.f32 %v7581_v38, %v7588_v41  ;;  %1217 = vmatpush.bf16.msra.mxu3 %v5283_v3  ;;  %v6507_v24 = vld [vmem:[#allocation5 + $0x74] sm:$0xf0]  ;;  %v6505_v40 = vld [vmem:[#allocation5 + $0x6c] sm:$0xf] }
 0x13f   :  { %v614_v15 = vpop.f32.mrf.mxu3  ;;  %v7674_v33 = vadd.f32 %v558_v25, %v7588_v41  ;;  %v5263_v37 = vor.u32 %v6507_v24, %v5262_v21  ;;  %v5267_v44 = vor.u32 %v6505_v40, %v5264_v34  ;;  %v6501_v3 = vld [vmem:[#allocation5 + $0x4c] sm:$0xf]  ;;  %1193 = vmatpush.bf16.msra.mxu1 %v5243_v62  ;;  %v5230_v21 = vld [vmem:[#allocation5 + $0x28] sm:$0xf]  ;;  %v5232_v40 = vld [vmem:[#allocation5 + $0x38] sm:$0xf0] }
 0x140   :  { %v7668_v23 = vadd.f32 %v614_v15, %v7602_v49 }
 0x141   :  { %1205 = vmatpush.bf16.msra.mxu2 %v5263_v37  ;;  %v6497_v37 = vld [vmem:[#allocation5 + $0x2c] sm:$0xf] }
 0x142   :  { %1218 = vmatpush.bf16.msra.mxu3 %v5267_v44  ;;  %v5231_v44 = vor.u32 %v6499_v31, %v5230_v21 }
 0x145   :  { %v587_v15 = vpop.f32.mrf.mxu2  ;;  %v859_v29 = vpop.f32.mrf.mxu0  ;;  %1206 = vmatpush.bf16.msra.mxu2 %v5247_v6 }
 0x146   :  { %v7681_v25 = vadd.f32 %v587_v15, %v7600_v48  ;;  %v872_v30 = vpop.f32.mrf.mxu1  ;;  %v902_v38 = vadd.f32 %v859_v29, %v513_v11  ;;  %v6498_v11 = vld [vmem:[#allocation5 + $0x2c] sm:$0xf0]  ;;  %v5251_v15 = vor.u32 %v6501_v3, %v5248_v7 }
 0x147   :  { %v616_v18 = vpop.f32.mrf.mxu3  ;;  %v903_v41 = vadd.f32 %v872_v30, %v542_v14  ;;  %v600_v14 = vadd.f32 %v7592_v43, %v7602_v49  ;;  %v5227_v30 = vor.u32 %v6496_v19, %v5224_v20  ;;  %v5235_v43 = vor.u32 %v6497_v37, %v5232_v40 }
 0x148   :  { %v7684_v26 = vadd.f32 %v616_v18, %v7602_v49  ;;  %v5201_v54 = vmul.f32 -1.442695, %v902_v38  ;;  %v5223_v18 = vor.u32 %v6498_v11, %v5222_v10  ;;  %1219 = vmatpush.bf16.msra.mxu3 %v5251_v15  ;;  %v5206_v49 = vld [vmem:[#allocation5] sm:$0xf]  ;;  %v5219_v11 = vor.u32 %v6493_v63, %v5216_v2 }
 0x149   :  { %v5202_v55 = vmul.f32 -1.442695, %v903_v41  ;;  %v5207_v51 = vor.u32 %v6494_v45, %v5206_v49  ;;  %1194 = vmatpush.bf16.msra.mxu1 %v5227_v30  ;;  %1207 = vmatpush.bf16.msra.mxu2 %v5231_v44  ;;  %v571_v20 = vadd.f32 %v7590_v42, %v7600_v48 }
 0x14a   :  { %6785 = vpow2.f32 %v5201_v54  ;;  %1181 = vmatpush.bf16.msra.mxu0 %v5223_v18  ;;  %v5208_v54 = vld [vmem:[#allocation5 + $0x10] sm:$0xf0] }
 0x14b   :  { %6787 = vpow2.f32 %v5202_v55  ;;  %v5214_v55 = vld [vmem:[#allocation5 + $0x8] sm:$0xf]  ;;  %v5211_v62 = vor.u32 %v6492_v50, %v5208_v54 }
 0x14c   :  { %v5215_v6 = vor.u32 %v6495_v58, %v5214_v55  ;;  %1220 = vmatpush.bf16.msra.mxu3 %v5235_v43 }
 0x14d   :  { %v885_v24 = vpop.f32.mrf.mxu2  ;;  %v861_v38 = vpop.f32.mrf.mxu0  ;;  %1195 = vmatpush.bf16.msra.mxu1 %v5211_v62 }
 0x14e   :  { %v874_v41 = vpop.f32.mrf.mxu1  ;;  %1182 = vmatpush.bf16.msra.mxu0 %v5207_v51  ;;  %1208 = vmatpush.bf16.msra.mxu2 %v5215_v6  ;;  %v904_v30 = vadd.f32 %v885_v24, %v571_v20 }
 0x14f   :  { %v898_v29 = vpop.f32.mrf.mxu3 }
 0x150   :  { %v905_v34 = vadd.f32 %v898_v29, %v600_v14  ;;  %v6786_v3 = vpop.eup %6785  ;;  %1221 = vmatpush.bf16.msra.mxu3 %v5219_v11 }
 0x151   :  { %v6788_v7 = vpop.eup %6787  ;;  %v909_v10 = vadd.f32 1.0, %v6786_v3 }
 0x152   :  { %v5203_v59 = vmul.f32 -1.442695, %v905_v34  ;;  %v928_v14 = vadd.f32 1.0, %v6788_v7 }
 0x153   :  { %v921_v41 = vand.u32 2147483648, %v909_v10  ;;  %v919_v49 = vand.u32 2147483647, %v909_v10  ;;  %vm915_vm2 = vweird.f32 %v909_v10 }
 0x154   :  { %6789 = vpow2.f32 %v5203_v59  ;;  %v940_v44 = vand.u32 2147483648, %v928_v14  ;;  %v938_v50 = vand.u32 2147483647, %v928_v14  ;;  %vm934_vm3 = vweird.f32 %v928_v14 }
 0x155   :  { %6791 = vrcp.f32 %v909_v10  ;;  %v887_v18 = vpop.f32.mrf.mxu2  ;;  %v922_v48 = vor.u32 1.1754944e-38, %v921_v41  ;;  %vm920_vm5 = vcmp.eq.f32.partialorder %v919_v49, 8.507059e+37 }
 0x156   :  { %6793 = vrcp.f32 %v928_v14  ;;  %v941_v55 = vor.u32 1.1754944e-38, %v940_v44  ;;  %vm939_vm7 = vcmp.eq.f32.partialorder %v938_v50, 8.507059e+37  ;;  %v5451_v44 = vld [vmem:[#allocation5 + $0xf0] sm:$0xf0]  ;;  %v6553_v50 = vld [vmem:[#allocation5 + $0xec] sm:$0xf] }
 0x157   :  { %v900_v15 = vpop.f32.mrf.mxu3 }
 0x15a   :  { %v6790_v19 = vpop.eup %6789 }
 0x15b   :  { %v948_v21 = vadd.f32 1.0, %v6790_v19  ;;  %v6792_v29 = vpop.eup %6791 }
 0x15c   :  { %v6794_v31 = vpop.eup %6793  ;;  %v911_v37 = vmul.f32 %v6792_v29, %v909_v10  ;;  %vm916_vm0 = vweird.f32 %v6792_v29 }
 0x15d   :  { %6795 = vrcp.f32 %v948_v21  ;;  %v930_v40 = vmul.f32 %v6794_v31, %v928_v14  ;;  %vm935_vm1 = vweird.f32 %v6794_v31  ;;  %vm917_vm4 = vmor %vm915_vm2, %vm916_vm0  ;;  %v960_v14 = vand.u32 2147483648, %v948_v21 }
 0x15e   :  { %v912_v34 = vsub.f32 1.0, %v911_v37  ;;  %6797 = vtanh.f32 %v904_v30  ;;  %vm936_vm6 = vmor %vm934_vm3, %vm935_vm1  ;;  %vm954_vm9 = vweird.f32 %v948_v21  ;;  %v958_v18 = vand.u32 2147483647, %v948_v21 }
 0x15f   :  { %v931_v38 = vsub.f32 1.0, %v930_v40  ;;  %v961_v20 = vor.u32 1.1754944e-38, %v960_v14  ;;  %v5449_v40 = vld [vmem:[#allocation5 + $0xe0] sm:$0xf]  ;;  %v6544_v14 = vld [vmem:[#allocation5 + $0xa4] sm:$0xf] }
 0x160   :  { %v913_v43 = vmul.f32 %v6792_v29, %v912_v34  ;;  %vm959_vm11 = vcmp.eq.f32.partialorder %v958_v18, 8.507059e+37  ;;  %v6554_v34 = vld [vmem:[#allocation5 + $0xec] sm:$0xf0] }
 0x161   :  { %v932_v45 = vmul.f32 %v6794_v31, %v931_v38  ;;  %v6552_v38 = vld [vmem:[#allocation5 + $0xe4] sm:$0xf]  ;;  %v5450_v41 = vor.u32 %v6554_v34, %v5449_v40  ;;  %v5427_v40 = vld [vmem:[#allocation5 + $0xb8] sm:$0xf0] }
 0x162   :  { %v914_v42 = vadd.f32 %v6792_v29, %v913_v43  ;;  %v5457_v43 = vld [vmem:[#allocation5 + $0xe8] sm:$0xf]  ;;  %v5454_v49 = vor.u32 %v6552_v38, %v5451_v44  ;;  %v5401_v38 = vld [vmem:[#allocation5 + $0x80] sm:$0xf]  ;;  %v6540_v44 = vld [vmem:[#allocation5 + $0x84] sm:$0xf] }
 0x163   :  { %v6796_v51 = vpop.eup %6795  ;;  %v933_v24 = vadd.f32 %v6794_v31, %v932_v45  ;;  %1500 = vmatpush.bf16.msrb.mxu0 %v5450_v41  ;;  %v6542_v41 = vld [vmem:[#allocation5 + $0x8c] sm:$0xf0] }
 0x164   :  { %v950_v54 = vmul.f32 %v6796_v51, %v948_v21  ;;  %v918_v58 = vsel %vm917_vm4, %v6792_v29, %v914_v42  ;;  %v6798_v59 = vpop.eup %6797  ;;  %vm955_vm8 = vweird.f32 %v6796_v51  ;;  %v6555_v21 = vld [vmem:[#allocation5 + $0xf4] sm:$0xf0]  ;;  %1513 = vmatpush.bf16.msrb.mxu1 %v5454_v49  ;;  %v5409_v49 = vld [vmem:[#allocation5 + $0x88] sm:$0xf] }
 0x165   :  { %v923_v62 = vsel %vm920_vm5, %v922_v48, %v918_v58  ;;  %v937_v63 = vsel %vm936_vm6, %v6794_v31, %v933_v24  ;;  %vm956_vm10 = vmor %vm954_vm9, %vm955_vm8  ;;  %v5458_v45 = vor.u32 %v6555_v21, %v5457_v43  ;;  %v5433_v48 = vld [vmem:[#allocation5 + $0xc0] sm:$0xf]  ;;  %v6550_v24 = vld [vmem:[#allocation5 + $0xcc] sm:$0xf0]  ;;  %v5402_v43 = vor.u32 %v6542_v41, %v5401_v38 }
 0x166   :  { %v951_v2 = vsub.f32 1.0, %v950_v54  ;;  %v942_v3 = vsel %vm939_vm7, %v941_v55, %v937_v63  ;;  %v965_v6 = vmul.f32 %v6798_v59, %v923_v62  ;;  %v6548_v54 = vld [vmem:[#allocation5 + $0xc4] sm:$0xf]  ;;  %v5434_v55 = vor.u32 %v6550_v24, %v5433_v48  ;;  %v5435_v58 = vld [vmem:[#allocation5 + $0xd0] sm:$0xf0] }
 0x167   :  { %v964_v7 = vmul.f32 0.0, %v942_v3  ;;  %1526 = vmatpush.bf16.msrb.mxu2 %v5458_v45  ;;  %v5441_v59 = vld [vmem:[#allocation5 + $0xc8] sm:$0xf]  ;;  %v6551_v62 = vld [vmem:[#allocation5 + $0xd4] sm:$0xf0]  ;;  %v5438_v63 = vor.u32 %v6548_v54, %v5435_v58 }
 0x168   :  { %v952_v11 = vmul.f32 %v6796_v51, %v951_v2  ;;  %v5442_v2 = vor.u32 %v6551_v62, %v5441_v59  ;;  %v6549_v3 = vld [vmem:[#allocation5 + $0xcc] sm:$0xf]  ;;  %1501 = vmatpush.bf16.msrb.mxu0 %v5434_v55  ;;  %v5403_v21 = vld [vmem:[#allocation5 + $0x90] sm:$0xf0]  ;;  %v6543_v45 = vld [vmem:[#allocation5 + $0x94] sm:$0xf0] }
 0x169   :  { %v7690_v15 = vadd.f32 %v965_v6, %v964_v7  ;;  %v5443_v6 = vld [vmem:[#allocation5 + $0xd8] sm:$0xf0]  ;;  %1514 = vmatpush.bf16.msrb.mxu1 %v5438_v63  ;;  %v5385_v54 = vld [vmem:[#allocation5 + $0x60] sm:$0xf]  ;;  %v6538_v55 = vld [vmem:[#allocation5 + $0x6c] sm:$0xf0] }
 0x16a   :  { %v953_v10 = vadd.f32 %v6796_v51, %v952_v11  ;;  %v5446_v7 = vor.u32 %v6549_v3, %v5443_v6  ;;  %v5417_v11 = vld [vmem:[#allocation5 + $0xa0] sm:$0xf]  ;;  %v5411_v48 = vld [vmem:[#allocation5 + $0x98] sm:$0xf0]  ;;  %v6536_v58 = vld [vmem:[#allocation5 + $0x64] sm:$0xf]  ;;  %v5386_v59 = vor.u32 %v6538_v55, %v5385_v54 }
 0x16b   :  { %6799 = vtanh.f32 %v7690_v15  ;;  %1527 = vmatpush.bf16.msrb.mxu2 %v5442_v2  ;;  %v5387_v62 = vld [vmem:[#allocation5 + $0x70] sm:$0xf0]  ;;  %v5393_v63 = vld [vmem:[#allocation5 + $0x68] sm:$0xf]  ;;  %v6539_v2 = vld [vmem:[#allocation5 + $0x74] sm:$0xf0] }
 0x16c   :  { %v957_v19 = vsel %vm956_vm10, %v6796_v51, %v953_v10  ;;  %v5459_v51 = vld [vmem:[#allocation5 + $0xf8] sm:$0xf0]  ;;  %v6546_v10 = vld [vmem:[#allocation5 + $0xac] sm:$0xf0]  ;;  %v5371_v38 = vld [vmem:[#allocation5 + $0x50] sm:$0xf0] }
 0x16d   :  { %v962_v30 = vsel %vm959_vm11, %v961_v20, %v957_v19  ;;  %v5462_v42 = vor.u32 %v6553_v50, %v5459_v51  ;;  %v5418_v18 = vor.u32 %v6546_v10, %v5417_v11  ;;  %v5419_v19 = vld [vmem:[#allocation5 + $0xb0] sm:$0xf0]  ;;  %v5425_v20 = vld [vmem:[#allocation5 + $0xa8] sm:$0xf]  ;;  %v5406_v50 = vor.u32 %v6540_v44, %v5403_v21  ;;  %v6537_v10 = vld [vmem:[#allocation5 + $0x6c] sm:$0xf] }
 0x16e   :  { %v5410_v51 = vor.u32 %v6543_v45, %v5409_v49  ;;  %v5394_v11 = vor.u32 %v6539_v2, %v5393_v63  ;;  %v5377_v44 = vld [vmem:[#allocation5 + $0x48] sm:$0xf]  ;;  %v6533_v21 = vld [vmem:[#allocation5 + $0x4c] sm:$0xf]  ;;  %v5353_v49 = vld [vmem:[#allocation5 + $0x20] sm:$0xf] }
 0x16f   :  { %1539 = vmatpush.bf16.msrb.mxu3 %v5462_v42  ;;  %1502 = vmatpush.bf16.msrb.mxu0 %v5418_v18  ;;  %v6541_v42 = vld [vmem:[#allocation5 + $0x8c] sm:$0xf]  ;;  %v6530_v45 = vld [vmem:[#allocation5 + $0x2c] sm:$0xf0]  ;;  %v5363_v63 = vld [vmem:[#allocation5 + $0x38] sm:$0xf0] }
 0x170   :  { %v5414_v24 = vor.u32 %v6541_v42, %v5411_v48  ;;  %v6528_v42 = vld [vmem:[#allocation5 + $0x24] sm:$0xf]  ;;  %v5355_v48 = vld [vmem:[#allocation5 + $0x30] sm:$0xf0] }
 0x171   :  { %v6800_v29 = vpop.eup %6799 }
 0x172   :  { %v968_v31 = vmul.f32 %v6800_v29, %v962_v30  ;;  %v6547_v29 = vld [vmem:[#allocation5 + $0xb4] sm:$0xf0]  ;;  %v5422_v30 = vor.u32 %v6544_v14, %v5419_v19  ;;  %v5395_v14 = vld [vmem:[#allocation5 + $0x78] sm:$0xf0] }
 0x173   :  { %1540 = vmatpush.bf16.msrb.mxu3 %v5446_v7  ;;  %1503 = vmatpush.bf16.msrb.mxu0 %v5402_v43  ;;  %v5390_v7 = vor.u32 %v6536_v58, %v5387_v62  ;;  %v6535_v43 = vld [vmem:[#allocation5 + $0x54] sm:$0xf0]  ;;  %v5358_v58 = vor.u32 %v6528_v42, %v5355_v48  ;;  %v6529_v62 = vld [vmem:[#allocation5 + $0x2c] sm:$0xf] }
 0x174   :  { %v969_v37 = vpack.c.bf16 %v968_v31, %v968_v31  ;;  %v5426_v31 = vor.u32 %v6547_v29, %v5425_v20  ;;  %1515 = vmatpush.bf16.msrb.mxu1 %v5422_v30  ;;  %v5398_v20 = vor.u32 %v6537_v10, %v5395_v14  ;;  %v5369_v29 = vld [vmem:[#allocation5 + $0x40] sm:$0xf]  ;;  %v6534_v30 = vld [vmem:[#allocation5 + $0x4c] sm:$0xf0] }
 0x175   :  { %v5337_v10 = vld [vmem:[#allocation5] sm:$0xf]  ;;  %v6526_v14 = vld [vmem:[#allocation5 + $0xc] sm:$0xf0] }
 0x176   :  { %975 = vst [vmem:[#allocation3] sm:$0xf] %v969_v37  ;;  %1183 = vmatmul.bf16.vlgmr.msra.gmra.mxu0 %v969_v37  ;;  %1196 = vmatmul.bf16.vlgmr.msra.gmra.mxu1 %v969_v37 }
 0x177   :  { %1209 = vmatmul.bf16.vlgmr.msra.gmra.mxu2 %v969_v37  ;;  %1222 = vmatmul.bf16.vlgmr.msra.gmra.mxu3 %v969_v37  ;;  %v6545_v37 = vld [vmem:[#allocation5 + $0xac] sm:$0xf] }
 0x178   :  { %v5430_v34 = vor.u32 %v6545_v37, %v5427_v40  ;;  %1528 = vmatpush.bf16.msrb.mxu2 %v5426_v31  ;;  %1516 = vmatpush.bf16.msrb.mxu1 %v5406_v50  ;;  %v6532_v31 = vld [vmem:[#allocation5 + $0x44] sm:$0xf] }
 0x179   :  { %1504 = vmatpush.bf16.msrb.mxu0 %v5386_v59  ;;  %v5374_v41 = vor.u32 %v6532_v31, %v5371_v38  ;;  %v6531_v59 = vld [vmem:[#allocation5 + $0x34] sm:$0xf0] }
 0x17a   :  { %1541 = vmatpush.bf16.msrb.mxu3 %v5430_v34  ;;  %v5370_v34 = vor.u32 %v6534_v30, %v5369_v29  ;;  %v5345_v29 = vld [vmem:[#allocation5 + $0x8] sm:$0xf]  ;;  %v6527_v30 = vld [vmem:[#allocation5 + $0x14] sm:$0xf0] }
 0x17c   :  { %1529 = vmatpush.bf16.msrb.mxu2 %v5410_v51  ;;  %1517 = vmatpush.bf16.msrb.mxu1 %v5390_v7  ;;  %v5354_v51 = vor.u32 %v6530_v45, %v5353_v49 }
 0x17d   :  { %1505 = vmatpush.bf16.msrb.mxu0 %v5370_v34  ;;  %v5347_v34 = vld [vmem:[#allocation5 + $0x18] sm:$0xf0] }
 0x17e   :  { %1542 = vmatpush.bf16.msrb.mxu3 %v5414_v24  ;;  %v5361_v24 = vld [vmem:[#allocation5 + $0x28] sm:$0xf] }
 0x17f   :  { %v5362_v7 = vor.u32 %v6531_v59, %v5361_v24 }
 0x180   :  { %1530 = vmatpush.bf16.msrb.mxu2 %v5394_v11  ;;  %1518 = vmatpush.bf16.msrb.mxu1 %v5374_v41  ;;  %v5366_v11 = vor.u32 %v6529_v62, %v5363_v63 }
 0x181   :  { %1506 = vmatpush.bf16.msrb.mxu0 %v5354_v51 }
 0x182   :  { %1543 = vmatpush.bf16.msrb.mxu3 %v5398_v20  ;;  %v5339_v20 = vld [vmem:[#allocation5 + $0x10] sm:$0xf0] }
 0x184   :  { %1519 = vmatpush.bf16.msrb.mxu1 %v5358_v58 }
 0x1f3   :  { %v1184_v3 = vpop.f32.mrf.mxu0  ;;  %v1197_v6 = vpop.f32.mrf.mxu1 }
 0x1f4   :  { %v1227_v18 = vadd.f32 %v1184_v3, %v7595_v46  ;;  %v1228_v19 = vadd.f32 %v1197_v6, %v7598_v47  ;;  %v5378_v46 = vor.u32 %v6535_v43, %v5377_v44  ;;  %v5379_v47 = vld [vmem:[#allocation5 + $0x58] sm:$0xf0] }
 0x1f5   :  { %v5382_v50 = vor.u32 %v6533_v21, %v5379_v47 }
 0x1f6   :  { %v5332_v37 = vmul.f32 -1.442695, %v1227_v18  ;;  %v5333_v40 = vmul.f32 -1.442695, %v1228_v19  ;;  %1531 = vmatpush.bf16.msrb.mxu2 %v5378_v46  ;;  %v6524_v18 = vld [vmem:[#allocation5 + $0x4] sm:$0xf]  ;;  %v5338_v19 = vor.u32 %v6526_v14, %v5337_v10 }
 0x1f7   :  { %1544 = vmatpush.bf16.msrb.mxu3 %v5382_v50 }
 0x1f8   :  { %6801 = vpow2.f32 %v5332_v37  ;;  %v5342_v37 = vor.u32 %v6524_v18, %v5339_v20  ;;  %1507 = vmatpush.bf16.msrb.mxu0 %v5338_v19 }
 0x1f9   :  { %6803 = vpow2.f32 %v5333_v40  ;;  %v6525_v40 = vld [vmem:[#allocation5 + $0xc] sm:$0xf] }
 0x1fa   :  { %v1210_v54 = vpop.f32.mrf.mxu2  ;;  %v1223_v55 = vpop.f32.mrf.mxu3  ;;  %1532 = vmatpush.bf16.msrb.mxu2 %v5362_v7  ;;  %v5350_v43 = vor.u32 %v6525_v40, %v5347_v34  ;;  %1520 = vmatpush.bf16.msrb.mxu1 %v5342_v37 }
 0x1fb   :  { %v1230_v2 = vadd.f32 %v1223_v55, %v7608_v53  ;;  %v1186_v3 = vpop.f32.mrf.mxu0  ;;  %v1199_v6 = vpop.f32.mrf.mxu1  ;;  %v5346_v53 = vor.u32 %v6527_v30, %v5345_v29  ;;  %1545 = vmatpush.bf16.msrb.mxu3 %v5366_v11  ;;  %v1229_v51 = vadd.f32 %v1210_v54, %v7605_v52 }
 0x1fd   :  { %v5334_v31 = vmul.f32 -1.442695, %v1230_v2 }
 0x1fe   :  { %v6802_v38 = vpop.eup %6801  ;;  %1533 = vmatpush.bf16.msrb.mxu2 %v5346_v53 }
 0x1ff   :  { %v6804_v41 = vpop.eup %6803  ;;  %v1234_v44 = vadd.f32 1.0, %v6802_v38  ;;  %6805 = vpow2.f32 %v5334_v31  ;;  %1546 = vmatpush.bf16.msrb.mxu3 %v5350_v43 }
 0x200   :  { %v1253_v21 = vadd.f32 1.0, %v6804_v41 }
 0x201   :  { %6807 = vrcp.f32 %v1234_v44  ;;  %v1246_v59 = vand.u32 2147483648, %v1234_v44  ;;  %v1244_v2 = vand.u32 2147483647, %v1234_v44  ;;  %vm1240_vm14 = vweird.f32 %v1234_v44 }
 0x202   :  { %6809 = vrcp.f32 %v1253_v21  ;;  %v1212_v46 = vpop.f32.mrf.mxu2  ;;  %v1225_v47 = vpop.f32.mrf.mxu3  ;;  %v1265_v62 = vand.u32 2147483648, %v1253_v21  ;;  %v1263_v6 = vand.u32 2147483647, %v1253_v21  ;;  %vm1259_vm15 = vweird.f32 %v1253_v21 }
 0x203   :  { %v1247_v52 = vor.u32 1.1754944e-38, %v1246_v59  ;;  %vm1245_vm2 = vcmp.eq.f32.partialorder %v1244_v2, 8.507059e+37 }
 0x204   :  { %v1266_v14 = vor.u32 1.1754944e-38, %v1265_v62  ;;  %vm1264_vm3 = vcmp.eq.f32.partialorder %v1263_v6, 8.507059e+37  ;;  %v6585_v62 = vld [vmem:[#allocation5 + $0xec] sm:$0xf]  ;;  %v6582_v6 = vld [vmem:[#allocation5 + $0xcc] sm:$0xf0] }
 0x205   :  { %v6806_v49 = vpop.eup %6805 }
 0x206   :  { %v1273_v45 = vadd.f32 1.0, %v6806_v49 }
 0x207   :  { %v6808_v50 = vpop.eup %6807 }
 0x208   :  { %v6810_v42 = vpop.eup %6809  ;;  %v1236_v48 = vmul.f32 %v6808_v50, %v1234_v44  ;;  %6811 = vrcp.f32 %v1273_v45  ;;  %vm1241_vm12 = vweird.f32 %v6808_v50  ;;  %v1285_v41 = vand.u32 2147483648, %v1273_v45 }
 0x209   :  { %v1255_v24 = vmul.f32 %v6810_v42, %v1253_v21  ;;  %6813 = vtanh.f32 %v1229_v51  ;;  %vm1260_vm13 = vweird.f32 %v6810_v42  ;;  %vm1242_vm0 = vmor %vm1240_vm14, %vm1241_vm12  ;;  %vm1279_vm5 = vweird.f32 %v1273_v45  ;;  %v6586_v51 = vld [vmem:[#allocation5 + $0xec] sm:$0xf0] }
 0x20a   :  { %v1237_v55 = vsub.f32 1.0, %v1236_v48  ;;  %vm1261_vm1 = vmor %vm1259_vm15, %vm1260_vm13  ;;  %v1283_v44 = vand.u32 2147483647, %v1273_v45  ;;  %v1286_v21 = vor.u32 1.1754944e-38, %v1285_v41  ;;  %v6579_v41 = vld [vmem:[#allocation5 + $0xb4] sm:$0xf0] }
 0x20b   :  { %v1256_v58 = vsub.f32 1.0, %v1255_v24  ;;  %v5582_v24 = vld [vmem:[#allocation5 + $0xf0] sm:$0xf0] }
 0x20c   :  { %v1238_v63 = vmul.f32 %v6808_v50, %v1237_v55  ;;  %vm1284_vm7 = vcmp.eq.f32.partialorder %v1283_v44, 8.507059e+37  ;;  %v5588_v55 = vld [vmem:[#allocation5 + $0xe8] sm:$0xf] }
 0x20d   :  { %v1257_v3 = vmul.f32 %v6810_v42, %v1256_v58 }
 0x20e   :  { %v6812_v7 = vpop.eup %6811  ;;  %v1239_v11 = vadd.f32 %v6808_v50, %v1238_v63  ;;  %v5590_v63 = vld [vmem:[#allocation5 + $0xf8] sm:$0xf0] }
 0x20f   :  { %v1258_v54 = vadd.f32 %v6810_v42, %v1257_v3  ;;  %v1275_v10 = vmul.f32 %v6812_v7, %v1273_v45  ;;  %v6814_v19 = vpop.eup %6813  ;;  %vm1280_vm4 = vweird.f32 %v6812_v7  ;;  %v6587_v45 = vld [vmem:[#allocation5 + $0xf4] sm:$0xf0]  ;;  %v5593_v2 = vor.u32 %v6585_v62, %v5590_v63  ;;  %v5564_v3 = vld [vmem:[#allocation5 + $0xc0] sm:$0xf] }
 0x210   :  { %v1243_v18 = vsel %vm1242_vm0, %v6808_v50, %v1239_v11  ;;  %vm1281_vm6 = vmor %vm1279_vm5, %vm1280_vm4  ;;  %v5589_v59 = vor.u32 %v6587_v45, %v5588_v55  ;;  %v5565_v11 = vor.u32 %v6582_v6, %v5564_v3  ;;  %v5516_v63 = vld [vmem:[#allocation5 + $0x60] sm:$0xf]  ;;  %v6568_v3 = vld [vmem:[#allocation5 + $0x64] sm:$0xf] }
 0x211   :  { %v1248_v20 = vsel %vm1245_vm2, %v1247_v52, %v1243_v18  ;;  %v1262_v29 = vsel %vm1261_vm1, %v6810_v42, %v1258_v54  ;;  %v1276_v30 = vsub.f32 1.0, %v1275_v10  ;;  %v6584_v42 = vld [vmem:[#allocation5 + $0xe4] sm:$0xf]  ;;  %1864 = vmatpush.bf16.msra.mxu3 %v5593_v2  ;;  %v5566_v52 = vld [vmem:[#allocation5 + $0xd0] sm:$0xf0] }
 0x212   :  { %v1267_v31 = vsel %vm1264_vm3, %v1266_v14, %v1262_v29  ;;  %v1290_v37 = vmul.f32 %v6814_v19, %v1248_v20  ;;  %v5585_v58 = vor.u32 %v6584_v42, %v5582_v24  ;;  %1851 = vmatpush.bf16.msra.mxu2 %v5589_v59  ;;  %v5572_v54 = vld [vmem:[#allocation5 + $0xc8] sm:$0xf]  ;;  %v6583_v10 = vld [vmem:[#allocation5 + $0xd4] sm:$0xf0]  ;;  %v6581_v19 = vld [vmem:[#allocation5 + $0xcc] sm:$0xf] }
 0x213   :  { %v1289_v40 = vmul.f32 %v1267_v31, %v7690_v15  ;;  %v1277_v34 = vmul.f32 %v6812_v7, %v1276_v30  ;;  %v5580_v15 = vld [vmem:[#allocation5 + $0xe0] sm:$0xf]  ;;  %v5573_v18 = vor.u32 %v6583_v10, %v5572_v54  ;;  %v5574_v20 = vld [vmem:[#allocation5 + $0xd8] sm:$0xf0]  ;;  %v6578_v31 = vld [vmem:[#allocation5 + $0xac] sm:$0xf0] }
 0x214   :  { %v5581_v48 = vor.u32 %v6586_v51, %v5580_v15  ;;  %1838 = vmatpush.bf16.msra.mxu1 %v5585_v58  ;;  %v5577_v29 = vor.u32 %v6581_v19, %v5574_v20  ;;  %v5548_v30 = vld [vmem:[#allocation5 + $0xa0] sm:$0xf]  ;;  %v6572_v15 = vld [vmem:[#allocation5 + $0x84] sm:$0xf]  ;;  %v5534_v42 = vld [vmem:[#allocation5 + $0x90] sm:$0xf0] }
 0x215   :  { %v7698_v38 = vadd.f32 %v1290_v37, %v1289_v40  ;;  %v1278_v53 = vadd.f32 %v6812_v7, %v1277_v34  ;;  %v6576_v37 = vld [vmem:[#allocation5 + $0xa4] sm:$0xf]  ;;  %v5549_v40 = vor.u32 %v6578_v31, %v5548_v30  ;;  %v5550_v34 = vld [vmem:[#allocation5 + $0xb0] sm:$0xf0]  ;;  %v6575_v24 = vld [vmem:[#allocation5 + $0x94] sm:$0xf0]  ;;  %v5537_v55 = vor.u32 %v6572_v15, %v5534_v42 }
 0x216   :  { %1825 = vmatpush.bf16.msra.mxu0 %v5581_v48  ;;  %1852 = vmatpush.bf16.msra.mxu2 %v5573_v18  ;;  %v5553_v44 = vor.u32 %v6576_v37, %v5550_v34  ;;  %v5540_v48 = vld [vmem:[#allocation5 + $0x88] sm:$0xf]  ;;  %v6573_v58 = vld [vmem:[#allocation5 + $0x8c] sm:$0xf]  ;;  %v5542_v59 = vld [vmem:[#allocation5 + $0x98] sm:$0xf0] }
 0x217   :  { %6815 = vtanh.f32 %v7698_v38  ;;  %v1282_v43 = vsel %vm1281_vm6, %v6812_v7, %v1278_v53  ;;  %v6580_v7 = vld [vmem:[#allocation5 + $0xc4] sm:$0xf]  ;;  %1865 = vmatpush.bf16.msra.mxu3 %v5577_v29  ;;  %v5556_v53 = vld [vmem:[#allocation5 + $0xa8] sm:$0xf]  ;;  %v5541_v45 = vor.u32 %v6575_v24, %v5540_v48  ;;  %v5545_v62 = vor.u32 %v6573_v58, %v5542_v59  ;;  %v6570_v2 = vld [vmem:[#allocation5 + $0x6c] sm:$0xf0] }
 0x218   :  { %v1287_v47 = vsel %vm1284_vm7, %v1286_v21, %v1282_v43  ;;  %v5569_v14 = vor.u32 %v6580_v7, %v5566_v52  ;;  %v5557_v43 = vor.u32 %v6579_v41, %v5556_v53  ;;  %v6577_v21 = vld [vmem:[#allocation5 + $0xac] sm:$0xf]  ;;  %v5517_v6 = vor.u32 %v6570_v2, %v5516_v63  ;;  %v5518_v7 = vld [vmem:[#allocation5 + $0x70] sm:$0xf0]  ;;  %v6571_v52 = vld [vmem:[#allocation5 + $0x74] sm:$0xf0] }
 0x219   :  { %v6569_v19 = vld [vmem:[#allocation5 + $0x6c] sm:$0xf]  ;;  %v5526_v20 = vld [vmem:[#allocation5 + $0x78] sm:$0xf0]  ;;  %v5500_v37 = vld [vmem:[#allocation5 + $0x40] sm:$0xf] }
 0x21a   :  { %1826 = vmatpush.bf16.msra.mxu0 %v5565_v11  ;;  %1839 = vmatpush.bf16.msra.mxu1 %v5569_v14  ;;  %v5524_v11 = vld [vmem:[#allocation5 + $0x68] sm:$0xf]  ;;  %v5521_v14 = vor.u32 %v6568_v3, %v5518_v7  ;;  %v5529_v31 = vor.u32 %v6569_v19, %v5526_v20  ;;  %v6564_v34 = vld [vmem:[#allocation5 + $0x44] sm:$0xf]  ;;  %v6562_v15 = vld [vmem:[#allocation5 + $0x2c] sm:$0xf0] }
 0x21b   :  { %1853 = vmatpush.bf16.msra.mxu2 %v5557_v43  ;;  %v5525_v18 = vor.u32 %v6571_v52, %v5524_v11  ;;  %v5502_v43 = vld [vmem:[#allocation5 + $0x50] sm:$0xf0]  ;;  %v6560_v48 = vld [vmem:[#allocation5 + $0x24] sm:$0xf]  ;;  %v6561_v63 = vld [vmem:[#allocation5 + $0x2c] sm:$0xf] }
 0x21c   :  { %v5486_v24 = vld [vmem:[#allocation5 + $0x30] sm:$0xf0]  ;;  %v5494_v2 = vld [vmem:[#allocation5 + $0x38] sm:$0xf0]  ;;  %v5476_v20 = vld [vmem:[#allocation5 + $0x8] sm:$0xf] }
 0x21d   :  { %v6816_v46 = vpop.eup %6815  ;;  %v5489_v59 = vor.u32 %v6560_v48, %v5486_v24  ;;  %v5497_v52 = vor.u32 %v6561_v63, %v5494_v2  ;;  %v5470_v19 = vld [vmem:[#allocation5 + $0x10] sm:$0xf0] }
 0x21e   :  { %v1293_v49 = vmul.f32 %v6816_v46, %v1287_v47  ;;  %v5558_v46 = vld [vmem:[#allocation5 + $0xb8] sm:$0xf0]  ;;  %1827 = vmatpush.bf16.msra.mxu0 %v5549_v40  ;;  %1840 = vmatpush.bf16.msra.mxu1 %v5553_v44  ;;  %v6566_v40 = vld [vmem:[#allocation5 + $0x4c] sm:$0xf0] }
 0x21f   :  { %v5561_v47 = vor.u32 %v6577_v21, %v5558_v46  ;;  %1854 = vmatpush.bf16.msra.mxu2 %v5541_v45  ;;  %v5501_v44 = vor.u32 %v6566_v40, %v5500_v37  ;;  %v5505_v21 = vor.u32 %v6564_v34, %v5502_v43  ;;  %v5508_v46 = vld [vmem:[#allocation5 + $0x48] sm:$0xf]  ;;  %v6557_v37 = vld [vmem:[#allocation5 + $0xc] sm:$0xf]  ;;  %v5478_v40 = vld [vmem:[#allocation5 + $0x18] sm:$0xf0] }
 0x220   :  { %v1294_v50 = vpack.c.bf16 %v1293_v49, %v1293_v49  ;;  %v5532_v49 = vld [vmem:[#allocation5 + $0x80] sm:$0xf] }
 0x221   :  { %1866 = vmatpush.bf16.msra.mxu3 %v5561_v47  ;;  %v6567_v47 = vld [vmem:[#allocation5 + $0x54] sm:$0xf0] }
 0x222   :  { %1300 = vst [vmem:[#allocation3 + $0x4] sm:$0xf] %v1294_v50  ;;  %1508 = vmatmul.bf16.vlgmr.msrb.gmra.mxu0 %v1294_v50  ;;  %1521 = vmatmul.bf16.vlgmr.msrb.gmra.mxu1 %v1294_v50 }
 0x223   :  { %1534 = vmatmul.bf16.vlgmr.msrb.gmra.mxu2 %v1294_v50  ;;  %1547 = vmatmul.bf16.vlgmr.msrb.gmra.mxu3 %v1294_v50  ;;  %v6574_v50 = vld [vmem:[#allocation5 + $0x8c] sm:$0xf0] }
 0x224   :  { %v5533_v51 = vor.u32 %v6574_v50, %v5532_v49  ;;  %1841 = vmatpush.bf16.msra.mxu1 %v5537_v55  ;;  %1855 = vmatpush.bf16.msra.mxu2 %v5525_v18  ;;  %v6565_v49 = vld [vmem:[#allocation5 + $0x4c] sm:$0xf]  ;;  %v5484_v50 = vld [vmem:[#allocation5 + $0x20] sm:$0xf]  ;;  %v5492_v55 = vld [vmem:[#allocation5 + $0x28] sm:$0xf] }
 0x225   :  { %1867 = vmatpush.bf16.msra.mxu3 %v5545_v62  ;;  %v5485_v42 = vor.u32 %v6562_v15, %v5484_v50  ;;  %v6563_v62 = vld [vmem:[#allocation5 + $0x34] sm:$0xf0] }
 0x226   :  { %1828 = vmatpush.bf16.msra.mxu0 %v5533_v51  ;;  %v5493_v11 = vor.u32 %v6563_v62, %v5492_v55 }
 0x228   :  { %1842 = vmatpush.bf16.msra.mxu1 %v5521_v14  ;;  %v6556_v14 = vld [vmem:[#allocation5 + $0x4] sm:$0xf] }
 0x229   :  { %1868 = vmatpush.bf16.msra.mxu3 %v5529_v31  ;;  %v5473_v31 = vor.u32 %v6556_v14, %v5470_v19 }
 0x22a   :  { %1829 = vmatpush.bf16.msra.mxu0 %v5517_v6 }
 0x22c   :  { %1843 = vmatpush.bf16.msra.mxu1 %v5505_v21 }
 0x22e   :  { %1830 = vmatpush.bf16.msra.mxu0 %v5501_v44  ;;  %v5481_v44 = vor.u32 %v6557_v37, %v5478_v40 }
 0x230   :  { %1844 = vmatpush.bf16.msra.mxu1 %v5489_v59 }
 0x232   :  { %1831 = vmatpush.bf16.msra.mxu0 %v5485_v42 }
 0x234   :  { %1845 = vmatpush.bf16.msra.mxu1 %v5473_v31 }
 0x29f   :  { %v1509_v54 = vpop.f32.mrf.mxu0  ;;  %v1522_v10 = vpop.f32.mrf.mxu1 }
 0x2a0   :  { %v1552_v29 = vadd.f32 %v1509_v54, %v7611_v56  ;;  %v1553_v30 = vadd.f32 %v1522_v10, %v7614_v57  ;;  %v5509_v56 = vor.u32 %v6567_v47, %v5508_v46  ;;  %v5510_v57 = vld [vmem:[#allocation5 + $0x58] sm:$0xf0]  ;;  %v5468_v54 = vld [vmem:[#allocation5] sm:$0xf]  ;;  %v6558_v10 = vld [vmem:[#allocation5 + $0xc] sm:$0xf0] }
 0x2a1   :  { %v5513_v51 = vor.u32 %v6565_v49, %v5510_v57  ;;  %v5469_v18 = vor.u32 %v6558_v10, %v5468_v54 }
 0x2a2   :  { %v5463_v53 = vmul.f32 -1.442695, %v1552_v29  ;;  %v5464_v41 = vmul.f32 -1.442695, %v1553_v30  ;;  %1856 = vmatpush.bf16.msra.mxu2 %v5509_v56  ;;  %v6559_v29 = vld [vmem:[#allocation5 + $0x14] sm:$0xf0] }
 0x2a3   :  { %1869 = vmatpush.bf16.msra.mxu3 %v5513_v51  ;;  %1832 = vmatpush.bf16.msra.mxu0 %v5469_v18 }
 0x2a4   :  { %6817 = vpow2.f32 %v5463_v53 }
 0x2a5   :  { %6819 = vpow2.f32 %v5464_v41 }
 0x2a6   :  { %v1535_v45 = vpop.f32.mrf.mxu2  ;;  %v1548_v58 = vpop.f32.mrf.mxu3  ;;  %1857 = vmatpush.bf16.msra.mxu2 %v5493_v11 }
 0x2a7   :  { %v1555_v3 = vadd.f32 %v1548_v58, %v7620_v61  ;;  %v1511_v6 = vpop.f32.mrf.mxu0  ;;  %v1524_v7 = vpop.f32.mrf.mxu1  ;;  %v5477_v61 = vor.u32 %v6559_v29, %v5476_v20  ;;  %1870 = vmatpush.bf16.msra.mxu3 %v5497_v52  ;;  %v1554_v57 = vadd.f32 %v1535_v45, %v7617_v60 }
 0x2a9   :  { %v5465_v30 = vmul.f32 -1.442695, %v1555_v3 }
 0x2aa   :  { %v6818_v34 = vpop.eup %6817  ;;  %1858 = vmatpush.bf16.msra.mxu2 %v5477_v61 }
 0x2ab   :  { %v6820_v53 = vpop.eup %6819  ;;  %v1559_v41 = vadd.f32 1.0, %v6818_v34  ;;  %6821 = vpow2.f32 %v5465_v30  ;;  %1871 = vmatpush.bf16.msra.mxu3 %v5481_v44 }
 0x2ac   :  { %v1578_v43 = vadd.f32 1.0, %v6820_v53 }
 0x2ad   :  { %6823 = vrcp.f32 %v1559_v41  ;;  %v1571_v24 = vand.u32 2147483648, %v1559_v41  ;;  %v1569_v59 = vand.u32 2147483647, %v1559_v41  ;;  %vm1565_vm10 = vweird.f32 %v1559_v41 }
 0x2ae   :  { %6825 = vrcp.f32 %v1578_v43  ;;  %v1537_v21 = vpop.f32.mrf.mxu2  ;;  %v1550_v46 = vpop.f32.mrf.mxu3  ;;  %v1590_v55 = vand.u32 2147483648, %v1578_v43  ;;  %v1588_v63 = vand.u32 2147483647, %v1578_v43  ;;  %vm1584_vm11 = vweird.f32 %v1578_v43 }
 0x2af   :  { %v1572_v60 = vor.u32 1.1754944e-38, %v1571_v24  ;;  %vm1570_vm14 = vcmp.eq.f32.partialorder %v1569_v59, 8.507059e+37  ;;  %v6618_v21 = vld [vmem:[#allocation5 + $0xec] sm:$0xf0]  ;;  %v6616_v46 = vld [vmem:[#allocation5 + $0xe4] sm:$0xf] }
 0x2b0   :  { %v1591_v7 = vor.u32 1.1754944e-38, %v1590_v55  ;;  %vm1589_vm15 = vcmp.eq.f32.partialorder %v1588_v63, 8.507059e+37  ;;  %v5695_v24 = vld [vmem:[#allocation5 + $0xc0] sm:$0xf]  ;;  %v6614_v55 = vld [vmem:[#allocation5 + $0xcc] sm:$0xf0] }
 0x2b1   :  { %v6822_v47 = vpop.eup %6821  ;;  %v5696_v59 = vor.u32 %v6614_v55, %v5695_v24  ;;  %v5703_v63 = vld [vmem:[#allocation5 + $0xc8] sm:$0xf]  ;;  %v6603_v24 = vld [vmem:[#allocation5 + $0x74] sm:$0xf0] }
 0x2b2   :  { %v1598_v49 = vadd.f32 1.0, %v6822_v47 }
 0x2b3   :  { %v6824_v56 = vpop.eup %6823 }
 0x2b4   :  { %v6826_v50 = vpop.eup %6825  ;;  %v1561_v15 = vmul.f32 %v6824_v56, %v1559_v41  ;;  %6827 = vrcp.f32 %v1598_v49  ;;  %vm1566_vm8 = vweird.f32 %v6824_v56  ;;  %v1610_v37 = vand.u32 2147483648, %v1598_v49 }
 0x2b5   :  { %v1580_v51 = vmul.f32 %v6826_v50, %v1578_v43  ;;  %6829 = vtanh.f32 %v1554_v57  ;;  %vm1585_vm9 = vweird.f32 %v6826_v50  ;;  %vm1567_vm12 = vmor %vm1565_vm10, %vm1566_vm8  ;;  %vm1604_vm1 = vweird.f32 %v1598_v49  ;;  %v5719_v57 = vld [vmem:[#allocation5 + $0xe8] sm:$0xf] }
 0x2b6   :  { %v1562_v42 = vsub.f32 1.0, %v1561_v15  ;;  %vm1586_vm13 = vmor %vm1584_vm11, %vm1585_vm9  ;;  %v1608_v40 = vand.u32 2147483647, %v1598_v49  ;;  %v1611_v61 = vor.u32 1.1754944e-38, %v1610_v37  ;;  %v5689_v37 = vld [vmem:[#allocation5 + $0xb8] sm:$0xf0] }
 0x2b7   :  { %v1581_v48 = vsub.f32 1.0, %v1580_v51  ;;  %v6617_v51 = vld [vmem:[#allocation5 + $0xec] sm:$0xf] }
 0x2b8   :  { %v1563_v58 = vmul.f32 %v6824_v56, %v1562_v42  ;;  %vm1609_vm3 = vcmp.eq.f32.partialorder %v1608_v40, 8.507059e+37  ;;  %v5721_v42 = vld [vmem:[#allocation5 + $0xf8] sm:$0xf0] }
 0x2b9   :  { %v1582_v62 = vmul.f32 %v6826_v50, %v1581_v48  ;;  %v5724_v48 = vor.u32 %v6617_v51, %v5721_v42  ;;  %v5649_v42 = vld [vmem:[#allocation5 + $0x70] sm:$0xf0] }
 0x2ba   :  { %v6828_v2 = vpop.eup %6827  ;;  %v1564_v3 = vadd.f32 %v6824_v56, %v1563_v58  ;;  %v6612_v58 = vld [vmem:[#allocation5 + $0xc4] sm:$0xf] }
 0x2bb   :  { %v1583_v45 = vadd.f32 %v6826_v50, %v1582_v62  ;;  %v1600_v6 = vmul.f32 %v6828_v2, %v1598_v49  ;;  %v6830_v52 = vpop.eup %6829  ;;  %vm1605_vm0 = vweird.f32 %v6828_v2  ;;  %v6619_v49 = vld [vmem:[#allocation5 + $0xf4] sm:$0xf0]  ;;  %2189 = vmatpush.bf16.msrb.mxu3 %v5724_v48  ;;  %v5697_v62 = vld [vmem:[#allocation5 + $0xd0] sm:$0xf0]  ;;  %v5655_v48 = vld [vmem:[#allocation5 + $0x68] sm:$0xf] }
 0x2bc   :  { %v1568_v11 = vsel %vm1567_vm12, %v6824_v56, %v1564_v3  ;;  %vm1606_vm2 = vmor %vm1604_vm1, %vm1605_vm0  ;;  %v5713_v56 = vld [vmem:[#allocation5 + $0xf0] sm:$0xf0]  ;;  %v5720_v15 = vor.u32 %v6619_v49, %v5719_v57  ;;  %v5700_v3 = vor.u32 %v6612_v58, %v5697_v62  ;;  %v5647_v49 = vld [vmem:[#allocation5 + $0x60] sm:$0xf]  ;;  %v5656_v62 = vor.u32 %v6603_v24, %v5655_v48 }
 0x2bd   :  { %v1573_v54 = vsel %vm1570_vm14, %v1572_v60, %v1568_v11  ;;  %v1587_v10 = vsel %vm1586_vm13, %v6826_v50, %v1583_v45  ;;  %v1601_v14 = vsub.f32 1.0, %v1600_v6  ;;  %v5716_v50 = vor.u32 %v6616_v46, %v5713_v56  ;;  %v6613_v45 = vld [vmem:[#allocation5 + $0xcc] sm:$0xf]  ;;  %v5705_v6 = vld [vmem:[#allocation5 + $0xd8] sm:$0xf0] }
 0x2be   :  { %v1592_v18 = vsel %vm1589_vm15, %v1591_v7, %v1587_v10  ;;  %v1615_v19 = vmul.f32 %v6830_v52, %v1573_v54  ;;  %2176 = vmatpush.bf16.msrb.mxu2 %v5720_v15  ;;  %v5708_v7 = vor.u32 %v6613_v45, %v5705_v6  ;;  %v5679_v11 = vld [vmem:[#allocation5 + $0xa0] sm:$0xf]  ;;  %v6610_v52 = vld [vmem:[#allocation5 + $0xac] sm:$0xf0]  ;;  %v6608_v54 = vld [vmem:[#allocation5 + $0xa4] sm:$0xf] }
 0x2bf   :  { %v1614_v20 = vmul.f32 %v1592_v18, %v7698_v38  ;;  %v1602_v29 = vmul.f32 %v6828_v2, %v1601_v14  ;;  %v5711_v38 = vld [vmem:[#allocation5 + $0xe0] sm:$0xf]  ;;  %2163 = vmatpush.bf16.msrb.mxu1 %v5716_v50  ;;  %v5680_v10 = vor.u32 %v6610_v52, %v5679_v11  ;;  %v5681_v14 = vld [vmem:[#allocation5 + $0xb0] sm:$0xf0]  ;;  %v5687_v18 = vld [vmem:[#allocation5 + $0xa8] sm:$0xf] }
 0x2c0   :  { %v5712_v47 = vor.u32 %v6618_v21, %v5711_v38  ;;  %2190 = vmatpush.bf16.msrb.mxu3 %v5708_v7  ;;  %v6607_v38 = vld [vmem:[#allocation5 + $0x94] sm:$0xf0]  ;;  %v5673_v56 = vld [vmem:[#allocation5 + $0x98] sm:$0xf0]  ;;  %v6602_v50 = vld [vmem:[#allocation5 + $0x6c] sm:$0xf0] }
 0x2c1   :  { %v7706_v30 = vadd.f32 %v1615_v19, %v1614_v20  ;;  %v1603_v31 = vadd.f32 %v6828_v2, %v1602_v29  ;;  %v6611_v19 = vld [vmem:[#allocation5 + $0xb4] sm:$0xf0]  ;;  %v5684_v20 = vor.u32 %v6608_v54, %v5681_v14  ;;  %v6600_v15 = vld [vmem:[#allocation5 + $0x64] sm:$0xf]  ;;  %v5648_v51 = vor.u32 %v6602_v50, %v5647_v49  ;;  %v5631_v6 = vld [vmem:[#allocation5 + $0x40] sm:$0xf] }
 0x2c2   :  { %2150 = vmatpush.bf16.msrb.mxu0 %v5712_v47  ;;  %v5688_v29 = vor.u32 %v6611_v19, %v5687_v18  ;;  %v6605_v47 = vld [vmem:[#allocation5 + $0x8c] sm:$0xf]  ;;  %v6598_v7 = vld [vmem:[#allocation5 + $0x4c] sm:$0xf0]  ;;  %v6596_v11 = vld [vmem:[#allocation5 + $0x44] sm:$0xf] }
 0x2c3   :  { %6831 = vtanh.f32 %v7706_v30  ;;  %v1607_v34 = vsel %vm1606_vm2, %v6828_v2, %v1603_v31  ;;  %v6615_v2 = vld [vmem:[#allocation5 + $0xd4] sm:$0xf0]  ;;  %2164 = vmatpush.bf16.msrb.mxu1 %v5700_v3  ;;  %v6609_v31 = vld [vmem:[#allocation5 + $0xac] sm:$0xf]  ;;  %v5676_v57 = vor.u32 %v6605_v47, %v5673_v56  ;;  %v5633_v14 = vld [vmem:[#allocation5 + $0x50] sm:$0xf0] }
 0x2c4   :  { %v1612_v41 = vsel %vm1609_vm3, %v1611_v61, %v1607_v34  ;;  %v5704_v60 = vor.u32 %v6615_v2, %v5703_v63  ;;  %v5692_v40 = vor.u32 %v6609_v31, %v5689_v37  ;;  %v5663_v34 = vld [vmem:[#allocation5 + $0x80] sm:$0xf]  ;;  %v6606_v61 = vld [vmem:[#allocation5 + $0x8c] sm:$0xf0]  ;;  %v6601_v63 = vld [vmem:[#allocation5 + $0x6c] sm:$0xf]  ;;  %v5636_v18 = vor.u32 %v6596_v11, %v5633_v14 }
 0x2c5   :  { %v5657_v2 = vld [vmem:[#allocation5 + $0x78] sm:$0xf0]  ;;  %v5639_v19 = vld [vmem:[#allocation5 + $0x48] sm:$0xf]  ;;  %v5615_v31 = vld [vmem:[#allocation5 + $0x20] sm:$0xf] }
 0x2c6   :  { %2151 = vmatpush.bf16.msrb.mxu0 %v5696_v59  ;;  %2177 = vmatpush.bf16.msrb.mxu2 %v5704_v60  ;;  %v5652_v59 = vor.u32 %v6600_v15, %v5649_v42  ;;  %v5660_v45 = vor.u32 %v6601_v63, %v5657_v2  ;;  %v6594_v37 = vld [vmem:[#allocation5 + $0x2c] sm:$0xf0]  ;;  %v5625_v47 = vld [vmem:[#allocation5 + $0x38] sm:$0xf0]  ;;  %v6588_v48 = vld [vmem:[#allocation5 + $0x4] sm:$0xf] }
 0x2c7   :  { %2165 = vmatpush.bf16.msrb.mxu1 %v5684_v20  ;;  %2191 = vmatpush.bf16.msrb.mxu3 %v5692_v40  ;;  %v6599_v20 = vld [vmem:[#allocation5 + $0x54] sm:$0xf0]  ;;  %v6590_v42 = vld [vmem:[#allocation5 + $0xc] sm:$0xf0]  ;;  %v6589_v2 = vld [vmem:[#allocation5 + $0xc] sm:$0xf] }
 0x2c9   :  { %v6832_v53 = vpop.eup %6831 }
 0x2ca   :  { %v1618_v44 = vmul.f32 %v6832_v53, %v1612_v41  ;;  %2152 = vmatpush.bf16.msrb.mxu0 %v5680_v10  ;;  %2178 = vmatpush.bf16.msrb.mxu2 %v5688_v29  ;;  %v6604_v53 = vld [vmem:[#allocation5 + $0x84] sm:$0xf]  ;;  %v5664_v41 = vor.u32 %v6606_v61, %v5663_v34  ;;  %v5632_v10 = vor.u32 %v6598_v7, %v5631_v6  ;;  %v6597_v29 = vld [vmem:[#allocation5 + $0x4c] sm:$0xf] }
 0x2cb   :  { %2192 = vmatpush.bf16.msrb.mxu3 %v5676_v57  ;;  %v5616_v34 = vor.u32 %v6594_v37, %v5615_v31  ;;  %v6592_v61 = vld [vmem:[#allocation5 + $0x24] sm:$0xf] }
 0x2cc   :  { %v1619_v43 = vpack.c.bf16 %v1618_v44, %v1618_v44  ;;  %v5665_v44 = vld [vmem:[#allocation5 + $0x90] sm:$0xf0] }
 0x2cd   :  { %v5668_v21 = vor.u32 %v6604_v53, %v5665_v44  ;;  %v5617_v53 = vld [vmem:[#allocation5 + $0x30] sm:$0xf0] }
 0x2ce   :  { %1625 = vst [vmem:[#allocation3 + $0x8] sm:$0xf] %v1619_v43  ;;  %1833 = vmatmul.bf16.vlgmr.msra.gmra.mxu0 %v1619_v43  ;;  %1846 = vmatmul.bf16.vlgmr.msra.gmra.mxu1 %v1619_v43 }
 0x2cf   :  { %1859 = vmatmul.bf16.vlgmr.msra.gmra.mxu2 %v1619_v43  ;;  %1872 = vmatmul.bf16.vlgmr.msra.gmra.mxu3 %v1619_v43  ;;  %v5671_v43 = vld [vmem:[#allocation5 + $0x88] sm:$0xf] }
 0x2d0   :  { %v5672_v46 = vor.u32 %v6607_v38, %v5671_v43  ;;  %2153 = vmatpush.bf16.msrb.mxu0 %v5664_v41  ;;  %2166 = vmatpush.bf16.msrb.mxu1 %v5668_v21  ;;  %v5623_v41 = vld [vmem:[#allocation5 + $0x28] sm:$0xf]  ;;  %v5620_v38 = vor.u32 %v6592_v61, %v5617_v53  ;;  %v6595_v21 = vld [vmem:[#allocation5 + $0x34] sm:$0xf0] }
 0x2d1   :  { %2193 = vmatpush.bf16.msrb.mxu3 %v5660_v45  ;;  %v5624_v50 = vor.u32 %v6595_v21, %v5623_v41 }
 0x2d2   :  { %2179 = vmatpush.bf16.msrb.mxu2 %v5672_v46  ;;  %v6593_v46 = vld [vmem:[#allocation5 + $0x2c] sm:$0xf] }
 0x2d3   :  { %v5628_v15 = vor.u32 %v6593_v46, %v5625_v47 }
 0x2d4   :  { %2154 = vmatpush.bf16.msrb.mxu0 %v5648_v51  ;;  %2167 = vmatpush.bf16.msrb.mxu1 %v5652_v59  ;;  %v5599_v51 = vld [vmem:[#allocation5] sm:$0xf]  ;;  %v6591_v59 = vld [vmem:[#allocation5 + $0x14] sm:$0xf0] }
 0x2d5   :  { %v5600_v24 = vor.u32 %v6590_v42, %v5599_v51 }
 0x2d6   :  { %2180 = vmatpush.bf16.msrb.mxu2 %v5656_v62 }
 0x2d8   :  { %2155 = vmatpush.bf16.msrb.mxu0 %v5632_v10  ;;  %2168 = vmatpush.bf16.msrb.mxu1 %v5636_v18 }
 0x2dc   :  { %2156 = vmatpush.bf16.msrb.mxu0 %v5616_v34  ;;  %2169 = vmatpush.bf16.msrb.mxu1 %v5620_v38 }
 0x2e0   :  { %2157 = vmatpush.bf16.msrb.mxu0 %v5600_v24 }
 0x34b   :  { %v1834_v55 = vpop.f32.mrf.mxu0  ;;  %v1847_v58 = vpop.f32.mrf.mxu1 }
 0x34c   :  { %v1877_v3 = vadd.f32 %v1834_v55, %v7623_v0  ;;  %v1878_v60 = vadd.f32 %v1847_v58, %v7626_v1  ;;  %v5640_v0 = vor.u32 %v6599_v20, %v5639_v19  ;;  %v5641_v1 = vld [vmem:[#allocation5 + $0x58] sm:$0xf0]  ;;  %v5601_v55 = vld [vmem:[#allocation5 + $0x10] sm:$0xf0]  ;;  %v5607_v58 = vld [vmem:[#allocation5 + $0x8] sm:$0xf] }
 0x34d   :  { %v5644_v40 = vor.u32 %v6597_v29, %v5641_v1  ;;  %v5604_v63 = vor.u32 %v6588_v48, %v5601_v55 }
 0x34e   :  { %v5594_v52 = vmul.f32 -1.442695, %v1877_v3  ;;  %v5595_v54 = vmul.f32 -1.442695, %v1878_v60  ;;  %2181 = vmatpush.bf16.msrb.mxu2 %v5640_v0  ;;  %v5609_v3 = vld [vmem:[#allocation5 + $0x18] sm:$0xf0] }
 0x34f   :  { %2194 = vmatpush.bf16.msrb.mxu3 %v5644_v40  ;;  %v5612_v7 = vor.u32 %v6589_v2, %v5609_v3  ;;  %2170 = vmatpush.bf16.msrb.mxu1 %v5604_v63 }
 0x350   :  { %6833 = vpow2.f32 %v5594_v52 }
 0x351   :  { %6835 = vpow2.f32 %v5595_v54 }
 0x352   :  { %v1860_v44 = vpop.f32.mrf.mxu2  ;;  %v1873_v43 = vpop.f32.mrf.mxu3  ;;  %2182 = vmatpush.bf16.msrb.mxu2 %v5624_v50 }
 0x353   :  { %v1880_v56 = vadd.f32 %v1873_v43, %v7632_v5  ;;  %v1836_v57 = vpop.f32.mrf.mxu0  ;;  %v1849_v49 = vpop.f32.mrf.mxu1  ;;  %v5608_v5 = vor.u32 %v6591_v59, %v5607_v58  ;;  %2195 = vmatpush.bf16.msrb.mxu3 %v5628_v15  ;;  %v1879_v19 = vadd.f32 %v1860_v44, %v7629_v4 }
 0x355   :  { %v5596_v62 = vmul.f32 -1.442695, %v1880_v56 }
 0x356   :  { %v6834_v60 = vpop.eup %6833  ;;  %2183 = vmatpush.bf16.msrb.mxu2 %v5608_v5 }
 0x357   :  { %v6836_v45 = vpop.eup %6835  ;;  %v1884_v6 = vadd.f32 1.0, %v6834_v60  ;;  %6837 = vpow2.f32 %v5596_v62  ;;  %2196 = vmatpush.bf16.msrb.mxu3 %v5612_v7 }
 0x358   :  { %v1903_v11 = vadd.f32 1.0, %v6836_v45  ;;  %v6650_v45 = vld [vmem:[#allocation5 + $0xec] sm:$0xf0] }
 0x359   :  { %6839 = vrcp.f32 %v1884_v6  ;;  %v1896_v37 = vand.u32 2147483648, %v1884_v6  ;;  %v1894_v61 = vand.u32 2147483647, %v1884_v6  ;;  %vm1890_vm6 = vweird.f32 %v1884_v6 }
 0x35a   :  { %6841 = vrcp.f32 %v1903_v11  ;;  %v1862_v52 = vpop.f32.mrf.mxu2  ;;  %v1875_v54 = vpop.f32.mrf.mxu3  ;;  %v1915_v40 = vand.u32 2147483648, %v1903_v11  ;;  %v1913_v41 = vand.u32 2147483647, %v1903_v11  ;;  %vm1909_vm7 = vweird.f32 %v1903_v11 }
 0x35b   :  { %v1897_v4 = vor.u32 1.1754944e-38, %v1896_v37  ;;  %vm1895_vm10 = vcmp.eq.f32.partialorder %v1894_v61, 8.507059e+37  ;;  %v5850_v52 = vld [vmem:[#allocation5 + $0xe8] sm:$0xf]  ;;  %v6651_v54 = vld [vmem:[#allocation5 + $0xf4] sm:$0xf0] }
 0x35c   :  { %v1916_v46 = vor.u32 1.1754944e-38, %v1915_v40  ;;  %vm1914_vm11 = vcmp.eq.f32.partialorder %v1913_v41, 8.507059e+37  ;;  %v5828_v37 = vld [vmem:[#allocation5 + $0xd0] sm:$0xf0]  ;;  %v5834_v40 = vld [vmem:[#allocation5 + $0xc8] sm:$0xf] }
 0x35d   :  { %v6838_v10 = vpop.eup %6837  ;;  %v6645_v41 = vld [vmem:[#allocation5 + $0xcc] sm:$0xf] }
 0x35e   :  { %v1923_v14 = vadd.f32 1.0, %v6838_v10 }
 0x35f   :  { %v6840_v18 = vpop.eup %6839 }
 0x360   :  { %v6842_v20 = vpop.eup %6841  ;;  %v1886_v29 = vmul.f32 %v6840_v18, %v1884_v6  ;;  %6843 = vrcp.f32 %v1923_v14  ;;  %vm1891_vm4 = vweird.f32 %v6840_v18  ;;  %v1935_v58 = vand.u32 2147483648, %v1923_v14  ;;  %v6648_v6 = vld [vmem:[#allocation5 + $0xe4] sm:$0xf] }
 0x361   :  { %v1905_v0 = vmul.f32 %v6842_v20, %v1903_v11  ;;  %6845 = vtanh.f32 %v1879_v19  ;;  %vm1910_vm5 = vweird.f32 %v6842_v20  ;;  %vm1892_vm8 = vmor %vm1890_vm6, %vm1891_vm4  ;;  %vm1929_vm13 = vweird.f32 %v1923_v14  ;;  %v5844_v11 = vld [vmem:[#allocation5 + $0xf0] sm:$0xf0]  ;;  %v5852_v19 = vld [vmem:[#allocation5 + $0xf8] sm:$0xf0] }
 0x362   :  { %v1887_v1 = vsub.f32 1.0, %v1886_v29  ;;  %vm1911_vm9 = vmor %vm1909_vm7, %vm1910_vm5  ;;  %v1933_v59 = vand.u32 2147483647, %v1923_v14  ;;  %v1936_v63 = vor.u32 1.1754944e-38, %v1935_v58  ;;  %v5847_v10 = vor.u32 %v6648_v6, %v5844_v11  ;;  %v5826_v29 = vld [vmem:[#allocation5 + $0xc0] sm:$0xf] }
 0x363   :  { %v1906_v31 = vsub.f32 1.0, %v1905_v0  ;;  %v6646_v0 = vld [vmem:[#allocation5 + $0xcc] sm:$0xf0]  ;;  %v6636_v58 = vld [vmem:[#allocation5 + $0x84] sm:$0xf] }
 0x364   :  { %v1888_v34 = vmul.f32 %v6840_v18, %v1887_v1  ;;  %vm1934_vm15 = vcmp.eq.f32.partialorder %v1933_v59, 8.507059e+37  ;;  %2488 = vmatpush.bf16.msra.mxu1 %v5847_v10  ;;  %v6644_v1 = vld [vmem:[#allocation5 + $0xc4] sm:$0xf]  ;;  %v5778_v6 = vld [vmem:[#allocation5 + $0x60] sm:$0xf] }
 0x365   :  { %v1907_v53 = vmul.f32 %v6842_v20, %v1906_v31  ;;  %v5827_v31 = vor.u32 %v6646_v0, %v5826_v29  ;;  %v5831_v61 = vor.u32 %v6644_v1, %v5828_v37  ;;  %v6632_v11 = vld [vmem:[#allocation5 + $0x64] sm:$0xf]  ;;  %v5786_v10 = vld [vmem:[#allocation5 + $0x68] sm:$0xf]  ;;  %v6633_v0 = vld [vmem:[#allocation5 + $0x6c] sm:$0xf] }
 0x366   :  { %v6844_v43 = vpop.eup %6843  ;;  %v1889_v38 = vadd.f32 %v6840_v18, %v1888_v34  ;;  %v6647_v34 = vld [vmem:[#allocation5 + $0xd4] sm:$0xf0]  ;;  %v5788_v1 = vld [vmem:[#allocation5 + $0x78] sm:$0xf0] }
 0x367   :  { %v1908_v44 = vadd.f32 %v6842_v20, %v1907_v53  ;;  %v1925_v21 = vmul.f32 %v6844_v43, %v1923_v14  ;;  %v6846_v56 = vpop.eup %6845  ;;  %vm1930_vm12 = vweird.f32 %v6844_v43  ;;  %v5851_v14 = vor.u32 %v6651_v54, %v5850_v52  ;;  %v5780_v54 = vld [vmem:[#allocation5 + $0x70] sm:$0xf0] }
 0x368   :  { %v1893_v47 = vsel %vm1892_vm8, %v6840_v18, %v1889_v38  ;;  %vm1931_vm14 = vmor %vm1929_vm13, %vm1930_vm12  ;;  %v6649_v18 = vld [vmem:[#allocation5 + $0xec] sm:$0xf]  ;;  %v5835_v53 = vor.u32 %v6647_v34, %v5834_v40  ;;  %2489 = vmatpush.bf16.msra.mxu1 %v5831_v61  ;;  %v5791_v40 = vor.u32 %v6633_v0, %v5788_v1  ;;  %v5762_v34 = vld [vmem:[#allocation5 + $0x40] sm:$0xf] }
 0x369   :  { %v1898_v57 = vsel %vm1895_vm10, %v1897_v4, %v1893_v47  ;;  %v1912_v49 = vsel %vm1911_vm9, %v6842_v20, %v1908_v44  ;;  %v1926_v50 = vsub.f32 1.0, %v1925_v21  ;;  %v5855_v20 = vor.u32 %v6649_v18, %v5852_v19  ;;  %2501 = vmatpush.bf16.msra.mxu2 %v5851_v14  ;;  %v5810_v4 = vld [vmem:[#allocation5 + $0xa0] sm:$0xf]  ;;  %v6642_v44 = vld [vmem:[#allocation5 + $0xac] sm:$0xf0] }
 0x36a   :  { %v1917_v15 = vsel %vm1914_vm11, %v1916_v46, %v1912_v49  ;;  %v1940_v51 = vmul.f32 %v6846_v56, %v1898_v57  ;;  %v6640_v21 = vld [vmem:[#allocation5 + $0xa4] sm:$0xf]  ;;  %v5811_v46 = vor.u32 %v6642_v44, %v5810_v4  ;;  %v5812_v47 = vld [vmem:[#allocation5 + $0xb0] sm:$0xf0]  ;;  %v5818_v56 = vld [vmem:[#allocation5 + $0xa8] sm:$0xf] }
 0x36b   :  { %v1939_v42 = vmul.f32 %v1917_v15, %v7706_v30  ;;  %v1927_v48 = vmul.f32 %v6844_v43, %v1926_v50  ;;  %v5842_v30 = vld [vmem:[#allocation5 + $0xe0] sm:$0xf]  ;;  %2514 = vmatpush.bf16.msra.mxu3 %v5855_v20  ;;  %v6643_v57 = vld [vmem:[#allocation5 + $0xb4] sm:$0xf0]  ;;  %v5815_v49 = vor.u32 %v6640_v21, %v5812_v47  ;;  %v6641_v15 = vld [vmem:[#allocation5 + $0xac] sm:$0xf]  ;;  %v5783_v20 = vor.u32 %v6632_v11, %v5780_v54 }
 0x36c   :  { %v5843_v7 = vor.u32 %v6650_v45, %v5842_v30  ;;  %v5819_v50 = vor.u32 %v6643_v57, %v5818_v56  ;;  %v5804_v30 = vld [vmem:[#allocation5 + $0x98] sm:$0xf0]  ;;  %v6635_v14 = vld [vmem:[#allocation5 + $0x74] sm:$0xf0]  ;;  %v6630_v61 = vld [vmem:[#allocation5 + $0x4c] sm:$0xf0] }
 0x36d   :  { %v7714_v24 = vadd.f32 %v1940_v51, %v1939_v42  ;;  %v1928_v55 = vadd.f32 %v6844_v43, %v1927_v48  ;;  %2502 = vmatpush.bf16.msra.mxu2 %v5835_v53  ;;  %v5820_v51 = vld [vmem:[#allocation5 + $0xb8] sm:$0xf0]  ;;  %2490 = vmatpush.bf16.msra.mxu1 %v5815_v49  ;;  %v5794_v48 = vld [vmem:[#allocation5 + $0x80] sm:$0xf]  ;;  %v5787_v29 = vor.u32 %v6635_v14, %v5786_v10  ;;  %v6628_v53 = vld [vmem:[#allocation5 + $0x44] sm:$0xf] }
 0x36e   :  { %2475 = vmatpush.bf16.msra.mxu0 %v5843_v7  ;;  %v5823_v42 = vor.u32 %v6641_v15, %v5820_v51  ;;  %v6634_v7 = vld [vmem:[#allocation5 + $0x6c] sm:$0xf0]  ;;  %v5764_v4 = vld [vmem:[#allocation5 + $0x50] sm:$0xf0]  ;;  %v5770_v21 = vld [vmem:[#allocation5 + $0x48] sm:$0xf] }
 0x36f   :  { %6847 = vtanh.f32 %v7714_v24  ;;  %v1932_v62 = vsel %vm1931_vm14, %v6844_v43, %v1928_v55  ;;  %v5836_v43 = vld [vmem:[#allocation5 + $0xd8] sm:$0xf0]  ;;  %v6638_v55 = vld [vmem:[#allocation5 + $0x8c] sm:$0xf0]  ;;  %v5779_v52 = vor.u32 %v6634_v7, %v5778_v6  ;;  %v5767_v44 = vor.u32 %v6628_v53, %v5764_v4  ;;  %v6629_v47 = vld [vmem:[#allocation5 + $0x4c] sm:$0xf] }
 0x370   :  { %v1937_v3 = vsel %vm1934_vm15, %v1936_v63, %v1932_v62  ;;  %v5839_v38 = vor.u32 %v6645_v41, %v5836_v43  ;;  %v5795_v59 = vor.u32 %v6638_v55, %v5794_v48  ;;  %v5796_v62 = vld [vmem:[#allocation5 + $0x90] sm:$0xf0]  ;;  %v5802_v63 = vld [vmem:[#allocation5 + $0x88] sm:$0xf]  ;;  %v5746_v56 = vld [vmem:[#allocation5 + $0x20] sm:$0xf] }
 0x371   :  { %2503 = vmatpush.bf16.msra.mxu2 %v5819_v50  ;;  %v6626_v57 = vld [vmem:[#allocation5 + $0x2c] sm:$0xf0]  ;;  %v6624_v15 = vld [vmem:[#allocation5 + $0x24] sm:$0xf]  ;;  %v5748_v51 = vld [vmem:[#allocation5 + $0x30] sm:$0xf0] }
 0x372   :  { %2476 = vmatpush.bf16.msra.mxu0 %v5827_v31  ;;  %2515 = vmatpush.bf16.msra.mxu3 %v5839_v38  ;;  %v5763_v38 = vor.u32 %v6630_v61, %v5762_v34  ;;  %v5747_v50 = vor.u32 %v6626_v57, %v5746_v56  ;;  %v6622_v6 = vld [vmem:[#allocation5 + $0xc] sm:$0xf0]  ;;  %v6620_v7 = vld [vmem:[#allocation5 + $0x4] sm:$0xf]  ;;  %v5738_v54 = vld [vmem:[#allocation5 + $0x8] sm:$0xf] }
 0x373   :  { %v6623_v10 = vld [vmem:[#allocation5 + $0x14] sm:$0xf0] }
 0x375   :  { %v6848_v2 = vpop.eup %6847 }
 0x376   :  { %v1943_v60 = vmul.f32 %v6848_v2, %v1937_v3  ;;  %2477 = vmatpush.bf16.msra.mxu0 %v5811_v46  ;;  %2516 = vmatpush.bf16.msra.mxu3 %v5823_v42  ;;  %v6639_v2 = vld [vmem:[#allocation5 + $0x94] sm:$0xf0]  ;;  %v5799_v3 = vor.u32 %v6636_v58, %v5796_v62  ;;  %v5754_v42 = vld [vmem:[#allocation5 + $0x28] sm:$0xf]  ;;  %v5751_v58 = vor.u32 %v6624_v15, %v5748_v51  ;;  %v6625_v62 = vld [vmem:[#allocation5 + $0x2c] sm:$0xf] }
 0x377   :  { %v6631_v46 = vld [vmem:[#allocation5 + $0x54] sm:$0xf0] }
 0x378   :  { %v1944_v5 = vpack.c.bf16 %v1943_v60, %v1943_v60  ;;  %v5803_v60 = vor.u32 %v6639_v2, %v5802_v63  ;;  %2491 = vmatpush.bf16.msra.mxu1 %v5799_v3  ;;  %v5756_v63 = vld [vmem:[#allocation5 + $0x38] sm:$0xf0] }
 0x37a   :  { %1950 = vst [vmem:[#allocation3 + $0xc] sm:$0xf] %v1944_v5  ;;  %2158 = vmatmul.bf16.vlgmr.msrb.gmra.mxu0 %v1944_v5  ;;  %2171 = vmatmul.bf16.vlgmr.msrb.gmra.mxu1 %v1944_v5 }
 0x37b   :  { %2184 = vmatmul.bf16.vlgmr.msrb.gmra.mxu2 %v1944_v5  ;;  %2197 = vmatmul.bf16.vlgmr.msrb.gmra.mxu3 %v1944_v5  ;;  %v6637_v5 = vld [vmem:[#allocation5 + $0x8c] sm:$0xf] }
 0x37c   :  { %2478 = vmatpush.bf16.msra.mxu0 %v5795_v59  ;;  %v5807_v45 = vor.u32 %v6637_v5, %v5804_v30  ;;  %2504 = vmatpush.bf16.msra.mxu2 %v5803_v60  ;;  %v6627_v59 = vld [vmem:[#allocation5 + $0x34] sm:$0xf0]  ;;  %v5759_v30 = vor.u32 %v6625_v62, %v5756_v63 }
 0x37d   :  { %2492 = vmatpush.bf16.msra.mxu1 %v5783_v20  ;;  %v5755_v5 = vor.u32 %v6627_v59, %v5754_v42  ;;  %v5740_v20 = vld [vmem:[#allocation5 + $0x18] sm:$0xf0] }
 0x37e   :  { %2517 = vmatpush.bf16.msra.mxu3 %v5807_v45  ;;  %v5730_v45 = vld [vmem:[#allocation5] sm:$0xf] }
 0x37f   :  { %v5731_v11 = vor.u32 %v6622_v6, %v5730_v45 }
 0x380   :  { %2479 = vmatpush.bf16.msra.mxu0 %v5779_v52  ;;  %2505 = vmatpush.bf16.msra.mxu2 %v5787_v29  ;;  %v5732_v52 = vld [vmem:[#allocation5 + $0x10] sm:$0xf0] }
 0x381   :  { %2493 = vmatpush.bf16.msra.mxu1 %v5767_v44 }
 0x382   :  { %2518 = vmatpush.bf16.msra.mxu3 %v5791_v40 }
 0x384   :  { %2480 = vmatpush.bf16.msra.mxu0 %v5763_v38 }
 0x385   :  { %2494 = vmatpush.bf16.msra.mxu1 %v5751_v58 }
 0x388   :  { %2481 = vmatpush.bf16.msra.mxu0 %v5747_v50 }
 0x38c   :  { %2482 = vmatpush.bf16.msra.mxu0 %v5731_v11 }
 0x3f7   :  { %v2159_v18 = vpop.f32.mrf.mxu0  ;;  %v2172_v19 = vpop.f32.mrf.mxu1 }
 0x3f8   :  { %v2202_v31 = vadd.f32 %v2159_v18, %v7635_v8  ;;  %v2203_v37 = vadd.f32 %v2172_v19, %v7638_v9  ;;  %v5771_v8 = vor.u32 %v6631_v46, %v5770_v21  ;;  %v5772_v9 = vld [vmem:[#allocation5 + $0x58] sm:$0xf0]  ;;  %v5735_v18 = vor.u32 %v6620_v7, %v5732_v52  ;;  %v6621_v19 = vld [vmem:[#allocation5 + $0xc] sm:$0xf] }
 0x3f9   :  { %v5775_v49 = vor.u32 %v6629_v47, %v5772_v9 }
 0x3fa   :  { %v5725_v41 = vmul.f32 -1.442695, %v2202_v31  ;;  %v5726_v43 = vmul.f32 -1.442695, %v2203_v37  ;;  %2506 = vmatpush.bf16.msra.mxu2 %v5771_v8  ;;  %v5743_v31 = vor.u32 %v6621_v19, %v5740_v20  ;;  %2495 = vmatpush.bf16.msra.mxu1 %v5735_v18  ;;  %v6682_v19 = vld [vmem:[#allocation5 + $0xec] sm:$0xf0] }
 0x3fb   :  { %2519 = vmatpush.bf16.msra.mxu3 %v5775_v49  ;;  %v6680_v20 = vld [vmem:[#allocation5 + $0xe4] sm:$0xf] }
 0x3fc   :  { %6849 = vpow2.f32 %v5725_v41 }
 0x3fd   :  { %6851 = vpow2.f32 %v5726_v43 }
 0x3fe   :  { %v2185_v48 = vpop.f32.mrf.mxu2  ;;  %v2198_v55 = vpop.f32.mrf.mxu3  ;;  %2507 = vmatpush.bf16.msra.mxu2 %v5755_v5 }
 0x3ff   :  { %v2205_v2 = vadd.f32 %v2198_v55, %v7644_v13  ;;  %v2161_v3 = vpop.f32.mrf.mxu0  ;;  %v2174_v60 = vpop.f32.mrf.mxu1  ;;  %v5739_v13 = vor.u32 %v6623_v10, %v5738_v54  ;;  %2520 = vmatpush.bf16.msra.mxu3 %v5759_v30  ;;  %v2204_v43 = vadd.f32 %v2185_v48, %v7641_v12 }
 0x401   :  { %v5727_v14 = vmul.f32 -1.442695, %v2205_v2 }
 0x402   :  { %v6850_v29 = vpop.eup %6849  ;;  %2508 = vmatpush.bf16.msra.mxu2 %v5739_v13  ;;  %v5975_v13 = vld [vmem:[#allocation5 + $0xf0] sm:$0xf0] }
 0x403   :  { %v6852_v0 = vpop.eup %6851  ;;  %v2209_v1 = vadd.f32 1.0, %v6850_v29  ;;  %6853 = vpow2.f32 %v5727_v14  ;;  %2521 = vmatpush.bf16.msra.mxu3 %v5743_v31  ;;  %v5978_v31 = vor.u32 %v6680_v20, %v5975_v13  ;;  %v5911_v20 = vld [vmem:[#allocation5 + $0x70] sm:$0xf0]  ;;  %v6667_v13 = vld [vmem:[#allocation5 + $0x74] sm:$0xf0] }
 0x404   :  { %v2228_v37 = vadd.f32 1.0, %v6852_v0  ;;  %v5981_v0 = vld [vmem:[#allocation5 + $0xe8] sm:$0xf] }
 0x405   :  { %6855 = vrcp.f32 %v2209_v1  ;;  %v2221_v47 = vand.u32 2147483648, %v2209_v1  ;;  %v2219_v56 = vand.u32 2147483647, %v2209_v1  ;;  %vm2215_vm2 = vweird.f32 %v2209_v1  ;;  %2813 = vmatpush.bf16.msrb.mxu1 %v5978_v31 }
 0x406   :  { %6857 = vrcp.f32 %v2228_v37  ;;  %v2187_v40 = vpop.f32.mrf.mxu2  ;;  %v2200_v34 = vpop.f32.mrf.mxu3  ;;  %v2240_v8 = vand.u32 2147483648, %v2228_v37  ;;  %v2238_v49 = vand.u32 2147483647, %v2228_v37  ;;  %vm2234_vm3 = vweird.f32 %v2228_v37 }
 0x407   :  { %v2222_v12 = vor.u32 1.1754944e-38, %v2221_v47  ;;  %vm2220_vm6 = vcmp.eq.f32.partialorder %v2219_v56, 8.507059e+37  ;;  %v6681_v40 = vld [vmem:[#allocation5 + $0xec] sm:$0xf]  ;;  %v5983_v34 = vld [vmem:[#allocation5 + $0xf8] sm:$0xf0] }
 0x408   :  { %v2241_v48 = vor.u32 1.1754944e-38, %v2240_v8  ;;  %vm2239_vm7 = vcmp.eq.f32.partialorder %v2238_v49, 8.507059e+37  ;;  %v6677_v8 = vld [vmem:[#allocation5 + $0xcc] sm:$0xf]  ;;  %v6674_v49 = vld [vmem:[#allocation5 + $0xac] sm:$0xf0] }
 0x409   :  { %v6854_v61 = vpop.eup %6853 }
 0x40a   :  { %v2248_v53 = vadd.f32 1.0, %v6854_v61  ;;  %v5986_v61 = vor.u32 %v6681_v40, %v5983_v34  ;;  %v6665_v40 = vld [vmem:[#allocation5 + $0x6c] sm:$0xf]  ;;  %v5919_v34 = vld [vmem:[#allocation5 + $0x78] sm:$0xf0] }
 0x40b   :  { %v6856_v41 = vpop.eup %6855 }
 0x40c   :  { %v6858_v38 = vpop.eup %6857  ;;  %v2211_v4 = vmul.f32 %v6856_v41, %v2209_v1  ;;  %6859 = vrcp.f32 %v2248_v53  ;;  %vm2216_vm0 = vweird.f32 %v6856_v41  ;;  %v2260_v6 = vand.u32 2147483648, %v2248_v53  ;;  %v6683_v1 = vld [vmem:[#allocation5 + $0xf4] sm:$0xf0]  ;;  %2839 = vmatpush.bf16.msrb.mxu3 %v5986_v61 }
 0x40d   :  { %v2230_v44 = vmul.f32 %v6858_v38, %v2228_v37  ;;  %6861 = vtanh.f32 %v2204_v43  ;;  %vm2235_vm1 = vweird.f32 %v6858_v38  ;;  %vm2217_vm4 = vmor %vm2215_vm2, %vm2216_vm0  ;;  %vm2254_vm9 = vweird.f32 %v2248_v53  ;;  %v6676_v43 = vld [vmem:[#allocation5 + $0xc4] sm:$0xf] }
 0x40e   :  { %v2212_v21 = vsub.f32 1.0, %v2211_v4  ;;  %vm2236_vm5 = vmor %vm2234_vm3, %vm2235_vm1  ;;  %v2258_v7 = vand.u32 2147483647, %v2248_v53  ;;  %v2261_v52 = vor.u32 1.1754944e-38, %v2260_v6  ;;  %v5982_v37 = vor.u32 %v6683_v1, %v5981_v0  ;;  %v5959_v4 = vld [vmem:[#allocation5 + $0xd0] sm:$0xf0] }
 0x40f   :  { %v2231_v46 = vsub.f32 1.0, %v2230_v44  ;;  %v5965_v44 = vld [vmem:[#allocation5 + $0xc8] sm:$0xf]  ;;  %v6671_v6 = vld [vmem:[#allocation5 + $0x94] sm:$0xf0] }
 0x410   :  { %v2213_v9 = vmul.f32 %v6856_v41, %v2212_v21  ;;  %vm2259_vm11 = vcmp.eq.f32.partialorder %v2258_v7, 8.507059e+37  ;;  %2826 = vmatpush.bf16.msrb.mxu2 %v5982_v37  ;;  %v6679_v21 = vld [vmem:[#allocation5 + $0xd4] sm:$0xf0] }
 0x411   :  { %v2232_v57 = vmul.f32 %v6858_v38, %v2231_v46  ;;  %v5962_v46 = vor.u32 %v6676_v43, %v5959_v4  ;;  %v5966_v47 = vor.u32 %v6679_v21, %v5965_v44  ;;  %v5893_v43 = vld [vmem:[#allocation5 + $0x40] sm:$0xf]  ;;  %v6660_v4 = vld [vmem:[#allocation5 + $0x44] sm:$0xf] }
 0x412   :  { %v6860_v50 = vpop.eup %6859  ;;  %v2214_v15 = vadd.f32 %v6856_v41, %v2213_v9  ;;  %v5967_v9 = vld [vmem:[#allocation5 + $0xd8] sm:$0xf0] }
 0x413   :  { %v2233_v51 = vadd.f32 %v6858_v38, %v2232_v57  ;;  %v2250_v42 = vmul.f32 %v6860_v50, %v2248_v53  ;;  %v6862_v58 = vpop.eup %6861  ;;  %vm2255_vm8 = vweird.f32 %v6860_v50  ;;  %v5957_v53 = vld [vmem:[#allocation5 + $0xc0] sm:$0xf]  ;;  %v5970_v56 = vor.u32 %v6677_v8, %v5967_v9  ;;  %2814 = vmatpush.bf16.msrb.mxu1 %v5962_v46  ;;  %v5901_v9 = vld [vmem:[#allocation5 + $0x48] sm:$0xf] }
 0x414   :  { %v2218_v55 = vsel %vm2217_vm4, %v6856_v41, %v2214_v15  ;;  %vm2256_vm10 = vmor %vm2254_vm9, %vm2255_vm8  ;;  %v6678_v41 = vld [vmem:[#allocation5 + $0xcc] sm:$0xf0]  ;;  %2827 = vmatpush.bf16.msrb.mxu2 %v5966_v47  ;;  %v5941_v57 = vld [vmem:[#allocation5 + $0xa0] sm:$0xf] }
 0x415   :  { %v2223_v59 = vsel %vm2220_vm6, %v2222_v12, %v2218_v55  ;;  %v2237_v62 = vsel %vm2236_vm5, %v6858_v38, %v2233_v51  ;;  %v2251_v63 = vsub.f32 1.0, %v2250_v42  ;;  %v5958_v38 = vor.u32 %v6678_v41, %v5957_v53  ;;  %2840 = vmatpush.bf16.msrb.mxu3 %v5970_v56  ;;  %v5943_v12 = vld [vmem:[#allocation5 + $0xb0] sm:$0xf0]  ;;  %v5949_v51 = vld [vmem:[#allocation5 + $0xa8] sm:$0xf] }
 0x416   :  { %v2242_v2 = vsel %vm2239_vm7, %v2241_v48, %v2237_v62  ;;  %v2265_v3 = vmul.f32 %v6862_v58, %v2223_v59  ;;  %v5942_v15 = vor.u32 %v6674_v49, %v5941_v57  ;;  %v6675_v42 = vld [vmem:[#allocation5 + $0xb4] sm:$0xf0]  ;;  %v6673_v58 = vld [vmem:[#allocation5 + $0xac] sm:$0xf]  ;;  %v5951_v59 = vld [vmem:[#allocation5 + $0xb8] sm:$0xf0]  ;;  %v5922_v41 = vor.u32 %v6665_v40, %v5919_v34 }
 0x417   :  { %v2264_v60 = vmul.f32 %v2242_v2, %v7714_v24  ;;  %v2252_v5 = vmul.f32 %v6860_v50, %v2251_v63  ;;  %v5973_v24 = vld [vmem:[#allocation5 + $0xe0] sm:$0xf]  ;;  %v5950_v55 = vor.u32 %v6675_v42, %v5949_v51  ;;  %v5954_v62 = vor.u32 %v6673_v58, %v5951_v59  ;;  %v6670_v2 = vld [vmem:[#allocation5 + $0x8c] sm:$0xf0]  ;;  %v5895_v47 = vld [vmem:[#allocation5 + $0x50] sm:$0xf0] }
 0x418   :  { %v5974_v29 = vor.u32 %v6682_v19, %v5973_v24  ;;  %v5925_v63 = vld [vmem:[#allocation5 + $0x80] sm:$0xf]  ;;  %v6664_v24 = vld [vmem:[#allocation5 + $0x64] sm:$0xf]  ;;  %v5898_v8 = vor.u32 %v6660_v4, %v5895_v47  ;;  %v6663_v56 = vld [vmem:[#allocation5 + $0x54] sm:$0xf0] }
 0x419   :  { %v7722_v30 = vadd.f32 %v2265_v3, %v2264_v60  ;;  %v2253_v45 = vadd.f32 %v6860_v50, %v2252_v5  ;;  %2828 = vmatpush.bf16.msrb.mxu2 %v5950_v55  ;;  %v6668_v3 = vld [vmem:[#allocation5 + $0x84] sm:$0xf]  ;;  %2841 = vmatpush.bf16.msrb.mxu3 %v5954_v62  ;;  %v5926_v60 = vor.u32 %v6670_v2, %v5925_v63  ;;  %v5927_v5 = vld [vmem:[#allocation5 + $0x90] sm:$0xf0]  ;;  %v6661_v57 = vld [vmem:[#allocation5 + $0x4c] sm:$0xf] }
 0x41a   :  { %2800 = vmatpush.bf16.msrb.mxu0 %v5974_v29  ;;  %v5930_v7 = vor.u32 %v6668_v3, %v5927_v5  ;;  %v5917_v29 = vld [vmem:[#allocation5 + $0x68] sm:$0xf]  ;;  %v5914_v31 = vor.u32 %v6664_v24, %v5911_v20  ;;  %v5877_v49 = vld [vmem:[#allocation5 + $0x20] sm:$0xf]  ;;  %v6656_v51 = vld [vmem:[#allocation5 + $0x24] sm:$0xf] }
 0x41b   :  { %6863 = vtanh.f32 %v7722_v30  ;;  %v2257_v11 = vsel %vm2256_vm10, %v6860_v50, %v2253_v45  ;;  %v6672_v50 = vld [vmem:[#allocation5 + $0xa4] sm:$0xf]  ;;  %v5933_v45 = vld [vmem:[#allocation5 + $0x88] sm:$0xf]  ;;  %v5918_v37 = vor.u32 %v6667_v13, %v5917_v29  ;;  %v5879_v42 = vld [vmem:[#allocation5 + $0x30] sm:$0xf0] }
 0x41c   :  { %v2262_v10 = vsel %vm2259_vm11, %v2261_v52, %v2257_v11  ;;  %v5946_v48 = vor.u32 %v6672_v50, %v5943_v12  ;;  %v5934_v11 = vor.u32 %v6671_v6, %v5933_v45  ;;  %v6669_v52 = vld [vmem:[#allocation5 + $0x8c] sm:$0xf]  ;;  %v6658_v50 = vld [vmem:[#allocation5 + $0x2c] sm:$0xf0]  ;;  %v5882_v59 = vor.u32 %v6656_v51, %v5879_v42  ;;  %v6659_v62 = vld [vmem:[#allocation5 + $0x34] sm:$0xf0] }
 0x41d   :  { %v5878_v12 = vor.u32 %v6658_v50, %v5877_v49  ;;  %v6657_v63 = vld [vmem:[#allocation5 + $0x2c] sm:$0xf]  ;;  %v5887_v2 = vld [vmem:[#allocation5 + $0x38] sm:$0xf0] }
 0x41e   :  { %2801 = vmatpush.bf16.msrb.mxu0 %v5958_v38  ;;  %2815 = vmatpush.bf16.msrb.mxu1 %v5946_v48  ;;  %v6662_v38 = vld [vmem:[#allocation5 + $0x4c] sm:$0xf0]  ;;  %v5885_v48 = vld [vmem:[#allocation5 + $0x28] sm:$0xf]  ;;  %v5890_v6 = vor.u32 %v6657_v63, %v5887_v2  ;;  %v6653_v20 = vld [vmem:[#allocation5 + $0xc] sm:$0xf] }
 0x41f   :  { %2829 = vmatpush.bf16.msrb.mxu2 %v5934_v11  ;;  %v5894_v46 = vor.u32 %v6662_v38, %v5893_v43  ;;  %v5886_v45 = vor.u32 %v6659_v62, %v5885_v48  ;;  %v6654_v11 = vld [vmem:[#allocation5 + $0xc] sm:$0xf0]  ;;  %v5871_v29 = vld [vmem:[#allocation5 + $0x18] sm:$0xf0] }
 0x421   :  { %v6864_v54 = vpop.eup %6863 }
 0x422   :  { %v2268_v14 = vmul.f32 %v6864_v54, %v2262_v10  ;;  %2802 = vmatpush.bf16.msrb.mxu0 %v5942_v15  ;;  %v5935_v54 = vld [vmem:[#allocation5 + $0x98] sm:$0xf0]  ;;  %2816 = vmatpush.bf16.msrb.mxu1 %v5930_v7  ;;  %v5861_v7 = vld [vmem:[#allocation5] sm:$0xf] }
 0x423   :  { %v5938_v10 = vor.u32 %v6669_v52, %v5935_v54  ;;  %2830 = vmatpush.bf16.msrb.mxu2 %v5918_v37  ;;  %v6652_v52 = vld [vmem:[#allocation5 + $0x4] sm:$0xf]  ;;  %v5862_v54 = vor.u32 %v6654_v11, %v5861_v7 }
 0x424   :  { %v2269_v18 = vpack.c.bf16 %v2268_v14, %v2268_v14  ;;  %v5909_v14 = vld [vmem:[#allocation5 + $0x60] sm:$0xf] }
 0x425   :  { %2842 = vmatpush.bf16.msrb.mxu3 %v5938_v10  ;;  %v5863_v10 = vld [vmem:[#allocation5 + $0x10] sm:$0xf0] }
 0x426   :  { %2275 = vst [vmem:[#allocation3 + $0x10] sm:$0xf] %v2269_v18  ;;  %2483 = vmatmul.bf16.vlgmr.msra.gmra.mxu0 %v2269_v18  ;;  %2496 = vmatmul.bf16.vlgmr.msra.gmra.mxu1 %v2269_v18 }
 0x427   :  { %2509 = vmatmul.bf16.vlgmr.msra.gmra.mxu2 %v2269_v18  ;;  %2522 = vmatmul.bf16.vlgmr.msra.gmra.mxu3 %v2269_v18  ;;  %v6666_v18 = vld [vmem:[#allocation5 + $0x6c] sm:$0xf0] }
 0x428   :  { %2803 = vmatpush.bf16.msrb.mxu0 %v5926_v60  ;;  %v5910_v19 = vor.u32 %v6666_v18, %v5909_v14  ;;  %2817 = vmatpush.bf16.msrb.mxu1 %v5914_v31  ;;  %v5869_v14 = vld [vmem:[#allocation5 + $0x8] sm:$0xf]  ;;  %v6655_v18 = vld [vmem:[#allocation5 + $0x14] sm:$0xf0]  ;;  %v5874_v31 = vor.u32 %v6653_v20, %v5871_v29 }
 0x429   :  { %2843 = vmatpush.bf16.msrb.mxu3 %v5922_v41  ;;  %v6112_v20 = vld [vmem:[#allocation5 + $0xe8] sm:$0xf]  ;;  %v6715_v29 = vld [vmem:[#allocation5 + $0xf4] sm:$0xf0] }
 0x42c   :  { %2804 = vmatpush.bf16.msrb.mxu0 %v5910_v19  ;;  %2818 = vmatpush.bf16.msrb.mxu1 %v5898_v8  ;;  %v5866_v19 = vor.u32 %v6652_v52, %v5863_v10 }
 0x430   :  { %2805 = vmatpush.bf16.msrb.mxu0 %v5894_v46  ;;  %2819 = vmatpush.bf16.msrb.mxu1 %v5882_v59 }
 0x434   :  { %2806 = vmatpush.bf16.msrb.mxu0 %v5878_v12  ;;  %2820 = vmatpush.bf16.msrb.mxu1 %v5866_v19  ;;  %v6106_v19 = vld [vmem:[#allocation5 + $0xf0] sm:$0xf0] }
 0x438   :  { %2807 = vmatpush.bf16.msrb.mxu0 %v5862_v54 }
 0x4a3   :  { %v2484_v0 = vpop.f32.mrf.mxu0  ;;  %v2497_v1 = vpop.f32.mrf.mxu1 }
 0x4a4   :  { %v2527_v61 = vadd.f32 %v2484_v0, %v7647_v16  ;;  %v2528_v53 = vadd.f32 %v2497_v1, %v7650_v17  ;;  %v5902_v16 = vor.u32 %v6663_v56, %v5901_v9  ;;  %v5903_v17 = vld [vmem:[#allocation5 + $0x58] sm:$0xf0] }
 0x4a5   :  { %v5906_v15 = vor.u32 %v6661_v57, %v5903_v17 }
 0x4a6   :  { %v5856_v44 = vmul.f32 -1.442695, %v2527_v61  ;;  %v5857_v21 = vmul.f32 -1.442695, %v2528_v53  ;;  %2831 = vmatpush.bf16.msrb.mxu2 %v5902_v16 }
 0x4a7   :  { %2844 = vmatpush.bf16.msrb.mxu3 %v5906_v15 }
 0x4a8   :  { %6865 = vpow2.f32 %v5856_v44 }
 0x4a9   :  { %6867 = vpow2.f32 %v5857_v21 }
 0x4aa   :  { %v2510_v55 = vpop.f32.mrf.mxu2  ;;  %v2523_v58 = vpop.f32.mrf.mxu3  ;;  %2832 = vmatpush.bf16.msrb.mxu2 %v5886_v45 }
 0x4ab   :  { %v2530_v3 = vadd.f32 %v2523_v58, %v7656_v28  ;;  %v2486_v60 = vpop.f32.mrf.mxu0  ;;  %v2499_v5 = vpop.f32.mrf.mxu1  ;;  %v5870_v28 = vor.u32 %v6655_v18, %v5869_v14  ;;  %2845 = vmatpush.bf16.msrb.mxu3 %v5890_v6  ;;  %v2529_v43 = vadd.f32 %v2510_v55, %v7653_v27  ;;  %v6714_v14 = vld [vmem:[#allocation5 + $0xec] sm:$0xf0]  ;;  %v6712_v18 = vld [vmem:[#allocation5 + $0xe4] sm:$0xf] }
 0x4ad   :  { %v5858_v24 = vmul.f32 -1.442695, %v2530_v3 }
 0x4ae   :  { %v6866_v13 = vpop.eup %6865  ;;  %2833 = vmatpush.bf16.msrb.mxu2 %v5870_v28  ;;  %v6113_v28 = vor.u32 %v6715_v29, %v6112_v20  ;;  %v6697_v20 = vld [vmem:[#allocation5 + $0x6c] sm:$0xf]  ;;  %v6050_v29 = vld [vmem:[#allocation5 + $0x78] sm:$0xf0] }
 0x4af   :  { %v6868_v0 = vpop.eup %6867  ;;  %v2534_v1 = vadd.f32 1.0, %v6866_v13  ;;  %6869 = vpow2.f32 %v5858_v24  ;;  %2846 = vmatpush.bf16.msrb.mxu3 %v5874_v31  ;;  %v6109_v13 = vor.u32 %v6712_v18, %v6106_v19 }
 0x4b0   :  { %v2553_v37 = vadd.f32 1.0, %v6868_v0  ;;  %v6713_v0 = vld [vmem:[#allocation5 + $0xec] sm:$0xf] }
 0x4b1   :  { %6871 = vrcp.f32 %v2534_v1  ;;  %v2546_v47 = vand.u32 2147483648, %v2534_v1  ;;  %v2544_v56 = vand.u32 2147483647, %v2534_v1  ;;  %vm2540_vm14 = vweird.f32 %v2534_v1  ;;  %3138 = vmatpush.bf16.msra.mxu1 %v6109_v13 }
 0x4b2   :  { %6873 = vrcp.f32 %v2553_v37  ;;  %v2512_v40 = vpop.f32.mrf.mxu2  ;;  %v2525_v34 = vpop.f32.mrf.mxu3  ;;  %v2565_v8 = vand.u32 2147483648, %v2553_v37  ;;  %v2563_v16 = vand.u32 2147483647, %v2553_v37  ;;  %vm2559_vm15 = vweird.f32 %v2553_v37  ;;  %3151 = vmatpush.bf16.msra.mxu2 %v6113_v28 }
 0x4b3   :  { %v2547_v27 = vor.u32 1.1754944e-38, %v2546_v47  ;;  %vm2545_vm2 = vcmp.eq.f32.partialorder %v2544_v56, 8.507059e+37  ;;  %v6710_v40 = vld [vmem:[#allocation5 + $0xcc] sm:$0xf0]  ;;  %v6708_v34 = vld [vmem:[#allocation5 + $0xc4] sm:$0xf] }
 0x4b4   :  { %v2566_v12 = vor.u32 1.1754944e-38, %v2565_v8  ;;  %vm2564_vm3 = vcmp.eq.f32.partialorder %v2563_v16, 8.507059e+37  ;;  %v6072_v47 = vld [vmem:[#allocation5 + $0xa0] sm:$0xf]  ;;  %v6706_v8 = vld [vmem:[#allocation5 + $0xac] sm:$0xf0] }
 0x4b5   :  { %v6870_v61 = vpop.eup %6869  ;;  %v6073_v56 = vor.u32 %v6706_v8, %v6072_v47  ;;  %v6080_v16 = vld [vmem:[#allocation5 + $0xa8] sm:$0xf]  ;;  %v6688_v8 = vld [vmem:[#allocation5 + $0x24] sm:$0xf] }
 0x4b6   :  { %v2573_v53 = vadd.f32 1.0, %v6870_v61 }
 0x4b7   :  { %v6872_v41 = vpop.eup %6871 }
 0x4b8   :  { %v6874_v38 = vpop.eup %6873  ;;  %v2536_v4 = vmul.f32 %v6872_v41, %v2534_v1  ;;  %6875 = vrcp.f32 %v2573_v53  ;;  %vm2541_vm12 = vweird.f32 %v6872_v41  ;;  %v2585_v5 = vand.u32 2147483648, %v2573_v53  ;;  %v6114_v1 = vld [vmem:[#allocation5 + $0xf8] sm:$0xf0] }
 0x4b9   :  { %v2555_v44 = vmul.f32 %v6874_v38, %v2553_v37  ;;  %6877 = vtanh.f32 %v2529_v43  ;;  %vm2560_vm13 = vweird.f32 %v6874_v38  ;;  %vm2542_vm0 = vmor %vm2540_vm14, %vm2541_vm12  ;;  %vm2579_vm5 = vweird.f32 %v2573_v53  ;;  %v6088_v37 = vld [vmem:[#allocation5 + $0xc0] sm:$0xf]  ;;  %v6711_v43 = vld [vmem:[#allocation5 + $0xd4] sm:$0xf0] }
 0x4ba   :  { %v2537_v21 = vsub.f32 1.0, %v2536_v4  ;;  %vm2561_vm1 = vmor %vm2559_vm15, %vm2560_vm13  ;;  %v2583_v45 = vand.u32 2147483647, %v2573_v53  ;;  %v2586_v7 = vor.u32 1.1754944e-38, %v2585_v5  ;;  %v6117_v31 = vor.u32 %v6713_v0, %v6114_v1  ;;  %v6066_v5 = vld [vmem:[#allocation5 + $0x98] sm:$0xf0] }
 0x4bb   :  { %v2556_v46 = vsub.f32 1.0, %v2555_v44  ;;  %v6089_v61 = vor.u32 %v6710_v40, %v6088_v37  ;;  %v6709_v44 = vld [vmem:[#allocation5 + $0xcc] sm:$0xf]  ;;  %v6053_v0 = vor.u32 %v6697_v20, %v6050_v29  ;;  %v6024_v1 = vld [vmem:[#allocation5 + $0x40] sm:$0xf] }
 0x4bc   :  { %v2538_v9 = vmul.f32 %v6872_v41, %v2537_v21  ;;  %vm2584_vm7 = vcmp.eq.f32.partialorder %v2583_v45, 8.507059e+37  ;;  %3164 = vmatpush.bf16.msra.mxu3 %v6117_v31  ;;  %v6098_v21 = vld [vmem:[#allocation5 + $0xd8] sm:$0xf0]  ;;  %v6694_v31 = vld [vmem:[#allocation5 + $0x4c] sm:$0xf0] }
 0x4bd   :  { %v2557_v57 = vmul.f32 %v6874_v38, %v2556_v46  ;;  %v6101_v46 = vor.u32 %v6709_v44, %v6098_v21  ;;  %v6692_v37 = vld [vmem:[#allocation5 + $0x44] sm:$0xf]  ;;  %v6008_v44 = vld [vmem:[#allocation5 + $0x20] sm:$0xf]  ;;  %v6690_v21 = vld [vmem:[#allocation5 + $0x2c] sm:$0xf0] }
 0x4be   :  { %v6876_v17 = vpop.eup %6875  ;;  %v2539_v49 = vadd.f32 %v6872_v41, %v2538_v9  ;;  %v6704_v9 = vld [vmem:[#allocation5 + $0xa4] sm:$0xf]  ;;  %v6009_v47 = vor.u32 %v6690_v21, %v6008_v44 }
 0x4bf   :  { %v2558_v50 = vadd.f32 %v6874_v38, %v2557_v57  ;;  %v2575_v15 = vmul.f32 %v6876_v17, %v2573_v53  ;;  %v6878_v42 = vpop.eup %6877  ;;  %vm2580_vm4 = vweird.f32 %v6876_v17  ;;  %v6090_v53 = vld [vmem:[#allocation5 + $0xd0] sm:$0xf0] }
 0x4c0   :  { %v2543_v51 = vsel %vm2542_vm0, %v6872_v41, %v2539_v49  ;;  %vm2581_vm6 = vmor %vm2579_vm5, %vm2580_vm4  ;;  %v6096_v41 = vld [vmem:[#allocation5 + $0xc8] sm:$0xf]  ;;  %3165 = vmatpush.bf16.msra.mxu3 %v6101_v46  ;;  %v6074_v57 = vld [vmem:[#allocation5 + $0xb0] sm:$0xf0] }
 0x4c1   :  { %v2548_v48 = vsel %vm2545_vm2, %v2547_v27, %v2543_v51  ;;  %v2562_v55 = vsel %vm2561_vm1, %v6874_v38, %v2558_v50  ;;  %v2576_v58 = vsub.f32 1.0, %v2575_v15  ;;  %v6093_v38 = vor.u32 %v6708_v34, %v6090_v53  ;;  %v6705_v50 = vld [vmem:[#allocation5 + $0xac] sm:$0xf]  ;;  %v6082_v15 = vld [vmem:[#allocation5 + $0xb8] sm:$0xf0] }
 0x4c2   :  { %v2567_v59 = vsel %vm2564_vm3, %v2566_v12, %v2562_v55  ;;  %v2590_v62 = vmul.f32 %v6878_v42, %v2548_v48  ;;  %v6097_v4 = vor.u32 %v6711_v43, %v6096_v41  ;;  %v6077_v49 = vor.u32 %v6704_v9, %v6074_v57  ;;  %v6056_v51 = vld [vmem:[#allocation5 + $0x80] sm:$0xf]  ;;  %v6702_v42 = vld [vmem:[#allocation5 + $0x8c] sm:$0xf0]  ;;  %v6700_v48 = vld [vmem:[#allocation5 + $0x84] sm:$0xf] }
 0x4c3   :  { %v2589_v63 = vmul.f32 %v2567_v59, %v7722_v30  ;;  %v2577_v2 = vmul.f32 %v6876_v17, %v2576_v58  ;;  %v6104_v30 = vld [vmem:[#allocation5 + $0xe0] sm:$0xf]  ;;  %3139 = vmatpush.bf16.msra.mxu1 %v6093_v38  ;;  %v6085_v12 = vor.u32 %v6705_v50, %v6082_v15  ;;  %v6057_v55 = vor.u32 %v6702_v42, %v6056_v51  ;;  %v6058_v58 = vld [vmem:[#allocation5 + $0x90] sm:$0xf0]  ;;  %v6064_v59 = vld [vmem:[#allocation5 + $0x88] sm:$0xf] }
 0x4c4   :  { %v6105_v24 = vor.u32 %v6714_v14, %v6104_v30  ;;  %3152 = vmatpush.bf16.msra.mxu2 %v6097_v4  ;;  %v6699_v30 = vld [vmem:[#allocation5 + $0x74] sm:$0xf0]  ;;  %v6026_v53 = vld [vmem:[#allocation5 + $0x50] sm:$0xf0]  ;;  %v6032_v43 = vld [vmem:[#allocation5 + $0x48] sm:$0xf] }
 0x4c5   :  { %v7730_v3 = vadd.f32 %v2590_v62, %v2589_v63  ;;  %v2578_v60 = vadd.f32 %v6876_v17, %v2577_v2  ;;  %3166 = vmatpush.bf16.msra.mxu3 %v6085_v12  ;;  %v6703_v62 = vld [vmem:[#allocation5 + $0x94] sm:$0xf0]  ;;  %v6061_v63 = vor.u32 %v6700_v48, %v6058_v58  ;;  %v6029_v41 = vor.u32 %v6692_v37, %v6026_v53  ;;  %v6693_v4 = vld [vmem:[#allocation5 + $0x4c] sm:$0xf]  ;;  %v6010_v9 = vld [vmem:[#allocation5 + $0x30] sm:$0xf0] }
 0x4c6   :  { %3125 = vmatpush.bf16.msra.mxu0 %v6105_v24  ;;  %v6065_v2 = vor.u32 %v6703_v62, %v6064_v59  ;;  %v6695_v38 = vld [vmem:[#allocation5 + $0x54] sm:$0xf0]  ;;  %v6018_v50 = vld [vmem:[#allocation5 + $0x38] sm:$0xf0]  ;;  %v6686_v58 = vld [vmem:[#allocation5 + $0xc] sm:$0xf0] }
 0x4c7   :  { %6879 = vtanh.f32 %v7730_v3  ;;  %v2582_v6 = vsel %vm2581_vm6, %v6876_v17, %v2578_v60  ;;  %v6707_v17 = vld [vmem:[#allocation5 + $0xb4] sm:$0xf0]  ;;  %3140 = vmatpush.bf16.msra.mxu1 %v6077_v49  ;;  %v6701_v60 = vld [vmem:[#allocation5 + $0x8c] sm:$0xf]  ;;  %v6684_v59 = vld [vmem:[#allocation5 + $0x4] sm:$0xf] }
 0x4c8   :  { %v2587_v52 = vsel %vm2584_vm7, %v2586_v7, %v2582_v6  ;;  %v6081_v27 = vor.u32 %v6707_v17, %v6080_v16  ;;  %v6069_v45 = vor.u32 %v6701_v60, %v6066_v5  ;;  %v6040_v6 = vld [vmem:[#allocation5 + $0x60] sm:$0xf]  ;;  %v6698_v7 = vld [vmem:[#allocation5 + $0x6c] sm:$0xf0]  ;;  %v6013_v17 = vor.u32 %v6688_v8, %v6010_v9  ;;  %v6691_v49 = vld [vmem:[#allocation5 + $0x34] sm:$0xf0] }
 0x4c9   :  { %v6687_v60 = vld [vmem:[#allocation5 + $0x14] sm:$0xf0] }
 0x4ca   :  { %3126 = vmatpush.bf16.msra.mxu0 %v6089_v61  ;;  %3153 = vmatpush.bf16.msra.mxu2 %v6081_v27  ;;  %v6025_v61 = vor.u32 %v6694_v31, %v6024_v1  ;;  %v6689_v27 = vld [vmem:[#allocation5 + $0x2c] sm:$0xf] }
 0x4cb   :  { %3141 = vmatpush.bf16.msra.mxu1 %v6061_v63  ;;  %3167 = vmatpush.bf16.msra.mxu3 %v6069_v45  ;;  %v6021_v48 = vor.u32 %v6689_v27, %v6018_v50  ;;  %v5994_v63 = vld [vmem:[#allocation5 + $0x10] sm:$0xf0] }
 0x4cc   :  { %v5997_v45 = vor.u32 %v6684_v59, %v5994_v63 }
 0x4cd   :  { %v6880_v11 = vpop.eup %6879 }
 0x4ce   :  { %v2593_v54 = vmul.f32 %v6880_v11, %v2587_v52  ;;  %3127 = vmatpush.bf16.msra.mxu0 %v6073_v56  ;;  %3154 = vmatpush.bf16.msra.mxu2 %v6065_v2  ;;  %v6696_v11 = vld [vmem:[#allocation5 + $0x64] sm:$0xf]  ;;  %v6041_v52 = vor.u32 %v6698_v7, %v6040_v6  ;;  %v6016_v56 = vld [vmem:[#allocation5 + $0x28] sm:$0xf]  ;;  %v6685_v6 = vld [vmem:[#allocation5 + $0xc] sm:$0xf] }
 0x4cf   :  { %3168 = vmatpush.bf16.msra.mxu3 %v6053_v0  ;;  %v6017_v42 = vor.u32 %v6691_v49, %v6016_v56  ;;  %v6000_v2 = vld [vmem:[#allocation5 + $0x8] sm:$0xf]  ;;  %v6002_v7 = vld [vmem:[#allocation5 + $0x18] sm:$0xf0] }
 0x4d0   :  { %v2594_v10 = vpack.c.bf16 %v2593_v54, %v2593_v54  ;;  %v6042_v54 = vld [vmem:[#allocation5 + $0x70] sm:$0xf0] }
 0x4d1   :  { %v6045_v24 = vor.u32 %v6696_v11, %v6042_v54 }
 0x4d2   :  { %2600 = vst [vmem:[#allocation3 + $0x14] sm:$0xf] %v2594_v10  ;;  %2808 = vmatmul.bf16.vlgmr.msrb.gmra.mxu0 %v2594_v10  ;;  %2821 = vmatmul.bf16.vlgmr.msrb.gmra.mxu1 %v2594_v10 }
 0x4d3   :  { %2834 = vmatmul.bf16.vlgmr.msrb.gmra.mxu2 %v2594_v10  ;;  %2847 = vmatmul.bf16.vlgmr.msrb.gmra.mxu3 %v2594_v10  ;;  %v6048_v10 = vld [vmem:[#allocation5 + $0x68] sm:$0xf] }
 0x4d4   :  { %3128 = vmatpush.bf16.msra.mxu0 %v6057_v55  ;;  %v6049_v19 = vor.u32 %v6699_v30, %v6048_v10  ;;  %3142 = vmatpush.bf16.msra.mxu1 %v6045_v24  ;;  %v5992_v55 = vld [vmem:[#allocation5] sm:$0xf]  ;;  %v6005_v10 = vor.u32 %v6685_v6, %v6002_v7 }
 0x4d5   :  { %v5993_v62 = vor.u32 %v6686_v58, %v5992_v55 }
 0x4d6   :  { %3155 = vmatpush.bf16.msra.mxu2 %v6049_v19 }
 0x4d8   :  { %3129 = vmatpush.bf16.msra.mxu0 %v6041_v52  ;;  %3143 = vmatpush.bf16.msra.mxu1 %v6029_v41 }
 0x4dc   :  { %3130 = vmatpush.bf16.msra.mxu0 %v6025_v61  ;;  %3144 = vmatpush.bf16.msra.mxu1 %v6013_v17 }
 0x4e0   :  { %3131 = vmatpush.bf16.msra.mxu0 %v6009_v47  ;;  %3145 = vmatpush.bf16.msra.mxu1 %v5997_v45 }
 0x4e4   :  { %3132 = vmatpush.bf16.msra.mxu0 %v5993_v62 }
 0x54f   :  { %v2809_v14 = vpop.f32.mrf.mxu0  ;;  %v2822_v18 = vpop.f32.mrf.mxu1 }
 0x550   :  { %v2852_v13 = vadd.f32 %v2809_v14, %v7659_v35  ;;  %v2853_v28 = vadd.f32 %v2822_v18, %v7662_v39  ;;  %v6033_v35 = vor.u32 %v6695_v38, %v6032_v43  ;;  %v6034_v39 = vld [vmem:[#allocation5 + $0x58] sm:$0xf0] }
 0x551   :  { %v6037_v46 = vor.u32 %v6693_v4, %v6034_v39 }
 0x552   :  { %v5987_v40 = vmul.f32 -1.442695, %v2852_v13  ;;  %v5988_v34 = vmul.f32 -1.442695, %v2853_v28  ;;  %3156 = vmatpush.bf16.msra.mxu2 %v6033_v35 }
 0x553   :  { %3169 = vmatpush.bf16.msra.mxu3 %v6037_v46 }
 0x554   :  { %6881 = vpow2.f32 %v5987_v40 }
 0x555   :  { %6883 = vpow2.f32 %v5988_v34 }
 0x556   :  { %v2835_v57 = vpop.f32.mrf.mxu2  ;;  %v2848_v16 = vpop.f32.mrf.mxu3  ;;  %3157 = vmatpush.bf16.msra.mxu2 %v6017_v42 }
 0x557   :  { %v2855_v15 = vadd.f32 %v2848_v16, %v7668_v23  ;;  %v2811_v12 = vpop.f32.mrf.mxu0  ;;  %v2824_v51 = vpop.f32.mrf.mxu1  ;;  %v6001_v23 = vor.u32 %v6687_v60, %v6000_v2  ;;  %3170 = vmatpush.bf16.msra.mxu3 %v6021_v48  ;;  %v2854_v29 = vadd.f32 %v2835_v57, %v7665_v22 }
 0x559   :  { %v5989_v5 = vmul.f32 -1.442695, %v2855_v15 }
 0x55a   :  { %v6882_v11 = vpop.eup %6881  ;;  %3158 = vmatpush.bf16.msra.mxu2 %v6001_v23 }
 0x55b   :  { %v6884_v52 = vpop.eup %6883  ;;  %v2859_v54 = vadd.f32 1.0, %v6882_v11  ;;  %6885 = vpow2.f32 %v5989_v5  ;;  %3171 = vmatpush.bf16.msra.mxu3 %v6005_v10 }
 0x55c   :  { %v2878_v30 = vadd.f32 1.0, %v6884_v52 }
 0x55d   :  { %6887 = vrcp.f32 %v2859_v54  ;;  %v2871_v37 = vand.u32 2147483648, %v2859_v54  ;;  %v2869_v61 = vand.u32 2147483647, %v2859_v54  ;;  %vm2865_vm10 = vweird.f32 %v2859_v54 }
 0x55e   :  { %6889 = vrcp.f32 %v2878_v30  ;;  %v2837_v14 = vpop.f32.mrf.mxu2  ;;  %v2850_v18 = vpop.f32.mrf.mxu3  ;;  %v2890_v40 = vand.u32 2147483648, %v2878_v30  ;;  %v2888_v41 = vand.u32 2147483647, %v2878_v30  ;;  %vm2884_vm11 = vweird.f32 %v2878_v30 }
 0x55f   :  { %v2872_v22 = vor.u32 1.1754944e-38, %v2871_v37  ;;  %vm2870_vm14 = vcmp.eq.f32.partialorder %v2869_v61, 8.507059e+37 }
 0x560   :  { %v2891_v39 = vor.u32 1.1754944e-38, %v2890_v40  ;;  %vm2889_vm15 = vcmp.eq.f32.partialorder %v2888_v41, 8.507059e+37 }
 0x561   :  { %v6886_v24 = vpop.eup %6885 }
 0x562   :  { %v2898_v19 = vadd.f32 1.0, %v6886_v24 }
 0x563   :  { %v6888_v20 = vpop.eup %6887 }
 0x564   :  { %v6890_v13 = vpop.eup %6889  ;;  %v2861_v28 = vmul.f32 %v6888_v20, %v2859_v54  ;;  %6891 = vrcp.f32 %v2898_v19  ;;  %vm2866_vm8 = vweird.f32 %v6888_v20  ;;  %v2910_v27 = vand.u32 2147483648, %v2898_v19 }
 0x565   :  { %v2880_v0 = vmul.f32 %v6890_v13, %v2878_v30  ;;  %6893 = vtanh.f32 %v2854_v29  ;;  %vm2885_vm9 = vweird.f32 %v6890_v13  ;;  %vm2867_vm12 = vmor %vm2865_vm10, %vm2866_vm8  ;;  %vm2904_vm1 = vweird.f32 %v2898_v19 }
 0x566   :  { %v2862_v1 = vsub.f32 1.0, %v2861_v28  ;;  %vm2886_vm13 = vmor %vm2884_vm11, %vm2885_vm9  ;;  %v2908_v50 = vand.u32 2147483647, %v2898_v19  ;;  %v2911_v12 = vor.u32 1.1754944e-38, %v2910_v27 }
 0x567   :  { %v2881_v31 = vsub.f32 1.0, %v2880_v0 }
 0x568   :  { %v2863_v34 = vmul.f32 %v6888_v20, %v2862_v1  ;;  %vm2909_vm3 = vcmp.eq.f32.partialorder %v2908_v50, 8.507059e+37 }
 0x569   :  { %v2882_v53 = vmul.f32 %v6890_v13, %v2881_v31 }
 0x56a   :  { %v6892_v43 = vpop.eup %6891  ;;  %v2864_v38 = vadd.f32 %v6888_v20, %v2863_v34 }
 0x56b   :  { %v2883_v4 = vadd.f32 %v6890_v13, %v2882_v53  ;;  %v2900_v35 = vmul.f32 %v6892_v43, %v2898_v19  ;;  %v6894_v21 = vpop.eup %6893  ;;  %vm2905_vm0 = vweird.f32 %v6892_v43 }
 0x56c   :  { %v2868_v44 = vsel %vm2867_vm12, %v6888_v20, %v2864_v38  ;;  %vm2906_vm2 = vmor %vm2904_vm1, %vm2905_vm0 }
 0x56d   :  { %v2873_v46 = vsel %vm2870_vm14, %v2872_v22, %v2868_v44  ;;  %v2887_v47 = vsel %vm2886_vm13, %v6890_v13, %v2883_v4  ;;  %v2901_v8 = vsub.f32 1.0, %v2900_v35 }
 0x56e   :  { %v2892_v9 = vsel %vm2889_vm15, %v2891_v39, %v2887_v47  ;;  %v2915_v56 = vmul.f32 %v6894_v21, %v2873_v46 }
 0x56f   :  { %v2914_v57 = vmul.f32 %v2892_v9, %v7730_v3  ;;  %v2902_v16 = vmul.f32 %v6892_v43, %v2901_v8 }
 0x571   :  { %v7738_v17 = vadd.f32 %v2915_v56, %v2914_v57  ;;  %v2903_v49 = vadd.f32 %v6892_v43, %v2902_v16 }
 0x573   :  { %6895 = vtanh.f32 %v7738_v17  ;;  %v2907_v15 = vsel %vm2906_vm2, %v6892_v43, %v2903_v49 }
 0x574   :  { %v2912_v42 = vsel %vm2909_vm3, %v2911_v12, %v2907_v15 }
 0x579   :  { %v6896_v51 = vpop.eup %6895 }
 0x57a   :  { %v2918_v48 = vmul.f32 %v6896_v51, %v2912_v42 }
 0x57c   :  { %v2919_v55 = vpack.c.bf16 %v2918_v48, %v2918_v48 }
 0x57e   :  { %2925 = vst [vmem:[#allocation3 + $0x18] sm:$0xf] %v2919_v55  ;;  %3133 = vmatmul.bf16.vlgmr.msra.gmra.mxu0 %v2919_v55  ;;  %3146 = vmatmul.bf16.vlgmr.msra.gmra.mxu1 %v2919_v55 }
 0x57f   :  { %3159 = vmatmul.bf16.vlgmr.msra.gmra.mxu2 %v2919_v55  ;;  %3172 = vmatmul.bf16.vlgmr.msra.gmra.mxu3 %v2919_v55 }
 0x5fb   :  { %v3134_v3 = vpop.f32.mrf.mxu0  ;;  %v3147_v58 = vpop.f32.mrf.mxu1 }
 0x5fc   :  { %v3177_v59 = vadd.f32 %v3134_v3, %v7671_v32  ;;  %v3178_v62 = vadd.f32 %v3147_v58, %v7674_v33 }
 0x5fe   :  { %v6118_v63 = vmul.f32 -1.442695, %v3177_v59  ;;  %v6119_v2 = vmul.f32 -1.442695, %v3178_v62 }
 0x600   :  { %6897 = vpow2.f32 %v6118_v63 }
 0x601   :  { %6899 = vpow2.f32 %v6119_v2 }
 0x602   :  { %v3160_v60 = vpop.f32.mrf.mxu2  ;;  %v3173_v5 = vpop.f32.mrf.mxu3 }
 0x603   :  { %v3180_v45 = vadd.f32 %v3173_v5, %v7684_v26  ;;  %v3136_v6 = vpop.f32.mrf.mxu0  ;;  %v3149_v7 = vpop.f32.mrf.mxu1  ;;  %v3179_v24 = vadd.f32 %v3160_v60, %v7681_v25 }
 0x605   :  { %v6120_v11 = vmul.f32 -1.442695, %v3180_v45 }
 0x606   :  { %v6898_v23 = vpop.eup %6897 }
 0x607   :  { %v6900_v52 = vpop.eup %6899  ;;  %v3184_v54 = vadd.f32 1.0, %v6898_v23  ;;  %6901 = vpow2.f32 %v6120_v11 }
 0x608   :  { %v3203_v10 = vadd.f32 1.0, %v6900_v52 }
 0x609   :  { %6903 = vrcp.f32 %v3184_v54  ;;  %v3196_v28 = vand.u32 2147483648, %v3184_v54  ;;  %v3194_v31 = vand.u32 2147483647, %v3184_v54  ;;  %vm3190_vm6 = vweird.f32 %v3184_v54 }
 0x60a   :  { %6905 = vrcp.f32 %v3203_v10  ;;  %v3162_v32 = vpop.f32.mrf.mxu2  ;;  %v3175_v33 = vpop.f32.mrf.mxu3  ;;  %v3215_v0 = vand.u32 2147483648, %v3203_v10  ;;  %v3213_v40 = vand.u32 2147483647, %v3203_v10  ;;  %vm3209_vm7 = vweird.f32 %v3203_v10 }
 0x60b   :  { %v3197_v25 = vor.u32 1.1754944e-38, %v3196_v28  ;;  %vm3195_vm10 = vcmp.eq.f32.partialorder %v3194_v31, 8.507059e+37 }
 0x60c   :  { %v3216_v43 = vor.u32 1.1754944e-38, %v3215_v0  ;;  %vm3214_vm11 = vcmp.eq.f32.partialorder %v3213_v40, 8.507059e+37 }
 0x60d   :  { %v6902_v30 = vpop.eup %6901 }
 0x60e   :  { %v3223_v14 = vadd.f32 1.0, %v6902_v30 }
 0x60f   :  { %v6904_v18 = vpop.eup %6903 }
 0x610   :  { %v6906_v19 = vpop.eup %6905  ;;  %v3186_v20 = vmul.f32 %v6904_v18, %v3184_v54  ;;  %6907 = vrcp.f32 %v3223_v14  ;;  %vm3191_vm4 = vweird.f32 %v6904_v18  ;;  %v3235_v56 = vand.u32 2147483648, %v3223_v14 }
 0x611   :  { %v3205_v26 = vmul.f32 %v6906_v19, %v3203_v10  ;;  %6909 = vtanh.f32 %v3179_v24  ;;  %vm3210_vm5 = vweird.f32 %v6906_v19  ;;  %vm3192_vm8 = vmor %vm3190_vm6, %vm3191_vm4  ;;  %vm3229_vm13 = vweird.f32 %v3223_v14 }
 0x612   :  { %v3187_v29 = vsub.f32 1.0, %v3186_v20  ;;  %vm3211_vm9 = vmor %vm3209_vm7, %vm3210_vm5  ;;  %v3233_v57 = vand.u32 2147483647, %v3223_v14  ;;  %v3236_v49 = vor.u32 1.1754944e-38, %v3235_v56 }
 0x613   :  { %v3206_v13 = vsub.f32 1.0, %v3205_v26 }
 0x614   :  { %v3188_v1 = vmul.f32 %v6904_v18, %v3187_v29  ;;  %vm3234_vm15 = vcmp.eq.f32.partialorder %v3233_v57, 8.507059e+37 }
 0x615   :  { %v3207_v37 = vmul.f32 %v6906_v19, %v3206_v13 }
 0x616   :  { %v6908_v34 = vpop.eup %6907  ;;  %v3189_v61 = vadd.f32 %v6904_v18, %v3188_v1 }
 0x617   :  { %v3208_v53 = vadd.f32 %v6906_v19, %v3207_v37  ;;  %v3225_v41 = vmul.f32 %v6908_v34, %v3223_v14  ;;  %v6910_v22 = vpop.eup %6909  ;;  %vm3230_vm12 = vweird.f32 %v6908_v34 }
 0x618   :  { %v3193_v38 = vsel %vm3192_vm8, %v6904_v18, %v3189_v61  ;;  %vm3231_vm14 = vmor %vm3229_vm13, %vm3230_vm12 }
 0x619   :  { %v3198_v4 = vsel %vm3195_vm10, %v3197_v25, %v3193_v38  ;;  %v3212_v35 = vsel %vm3211_vm9, %v6906_v19, %v3208_v53  ;;  %v3226_v39 = vsub.f32 1.0, %v3225_v41 }
 0x61a   :  { %v3217_v44 = vsel %vm3214_vm11, %v3216_v43, %v3212_v35  ;;  %v3240_v21 = vmul.f32 %v6910_v22, %v3198_v4 }
 0x61b   :  { %v3239_v46 = vmul.f32 %v3217_v44, %v7738_v17  ;;  %v3227_v47 = vmul.f32 %v6908_v34, %v3226_v39 }
 0x61d   :  { %v3241_v8 = vadd.f32 %v3240_v21, %v3239_v46  ;;  %v3228_v9 = vadd.f32 %v6908_v34, %v3227_v47 }
 0x61f   :  { %6911 = vtanh.f32 %v3241_v8  ;;  %3252 = vst [vmem:[%s8229_s6] sm:$0xff] %v3241_v8  ;;  %v3232_v16 = vsel %vm3231_vm14, %v6908_v34, %v3228_v9 }
 0x620   :  { %v3237_v50 = vsel %vm3234_vm15, %v3236_v49, %v3232_v16 }
 0x625   :  { %v6912_v27 = vpop.eup %6911 }
 0x626   :  { %v3243_v15 = vmul.f32 %v6912_v27, %v3237_v50 }
 0x628   :  { %v3244_v17 = vpack.c.bf16 %v3243_v15, %v3243_v15  ;;  %3251 = vst [vmem:[%s8228_s5] sm:$0xff] %v3243_v15 }
 0x62a   :  { %3250 = vst [vmem:[#allocation3 + $0x1c] sm:$0xf] %v3244_v17 }
 0x62b   :  { %7043 = dma.done.wait [#allocation6 + $0x3], 4096 }
 0x62c   :  { %7044 = vsyncadd [#allocation6 + $0x3], 4294963200 }
 0x62d   :  { %7045 = dma.done.wait [#allocation6 + $0x1], 4096 }
 0x62e   :  { %7046 = vsyncadd [#allocation6 + $0x1], 4294963200  ;;  %v6252_v12 = vld [vmem:[#allocation4 + $0x1e0] sm:$0xf]  ;;  %v6750_v51 = vld [vmem:[#allocation4 + $0x1ec] sm:$0xf0] }
 0x62f   :  { %v6748_v42 = vld [vmem:[#allocation4 + $0x1e4] sm:$0xf]  ;;  %v6253_v48 = vor.u32 %v6750_v51, %v6252_v12  ;;  %v6254_v55 = vld [vmem:[#allocation4 + $0x1f0] sm:$0xf0]  ;;  %v6260_v3 = vld [vmem:[#allocation4 + $0x1e8] sm:$0xf] }
 0x630   :  { %v6751_v58 = vld [vmem:[#allocation4 + $0x1f4] sm:$0xf0]  ;;  %v6257_v59 = vor.u32 %v6748_v42, %v6254_v55  ;;  %v6749_v63 = vld [vmem:[#allocation4 + $0x1ec] sm:$0xf]  ;;  %v6262_v2 = vld [vmem:[#allocation4 + $0x1f8] sm:$0xf0] }
 0x631   :  { %v6261_v62 = vor.u32 %v6751_v58, %v6260_v3  ;;  %v6236_v60 = vld [vmem:[#allocation4 + $0x1c0] sm:$0xf]  ;;  %3492 = vmatpush.bf16.msrb.mxu0 %v6253_v48  ;;  %v6265_v5 = vor.u32 %v6749_v63, %v6262_v2  ;;  %v6746_v45 = vld [vmem:[#allocation4 + $0x1cc] sm:$0xf0]  ;;  %v6744_v6 = vld [vmem:[#allocation4 + $0x1c4] sm:$0xf] }
 0x632   :  { %v6238_v7 = vld [vmem:[#allocation4 + $0x1d0] sm:$0xf0]  ;;  %3521 = vmatpush.bf16.msrb.mxu1 %v6257_v59  ;;  %v6237_v11 = vor.u32 %v6746_v45, %v6236_v60  ;;  %v6244_v52 = vld [vmem:[#allocation4 + $0x1c8] sm:$0xf]  ;;  %v6747_v54 = vld [vmem:[#allocation4 + $0x1d4] sm:$0xf0] }
 0x633   :  { %3550 = vmatpush.bf16.msrb.mxu2 %v6261_v62  ;;  %v6241_v23 = vor.u32 %v6744_v6, %v6238_v7  ;;  %v6745_v10 = vld [vmem:[#allocation4 + $0x1cc] sm:$0xf]  ;;  %3579 = vmatpush.bf16.msrb.mxu3 %v6265_v5  ;;  %v6245_v32 = vor.u32 %v6747_v54, %v6244_v52  ;;  %v6246_v33 = vld [vmem:[#allocation4 + $0x1d8] sm:$0xf0]  ;;  %v6220_v30 = vld [vmem:[#allocation4 + $0x1a0] sm:$0xf] }
 0x634   :  { %v6742_v14 = vld [vmem:[#allocation4 + $0x1ac] sm:$0xf0]  ;;  %v6249_v18 = vor.u32 %v6745_v10, %v6246_v33  ;;  %v6740_v24 = vld [vmem:[#allocation4 + $0x1a4] sm:$0xf]  ;;  %v6222_v19 = vld [vmem:[#allocation4 + $0x1b0] sm:$0xf0] }
 0x635   :  { %v6228_v20 = vld [vmem:[#allocation4 + $0x1a8] sm:$0xf]  ;;  %3493 = vmatpush.bf16.msrb.mxu0 %v6237_v11  ;;  %v6221_v26 = vor.u32 %v6742_v14, %v6220_v30  ;;  %v6743_v29 = vld [vmem:[#allocation4 + $0x1b4] sm:$0xf0]  ;;  %v6741_v13 = vld [vmem:[#allocation4 + $0x1ac] sm:$0xf]  ;;  %v6225_v0 = vor.u32 %v6740_v24, %v6222_v19 }
 0x636   :  { %v6230_v28 = vld [vmem:[#allocation4 + $0x1b8] sm:$0xf0]  ;;  %3522 = vmatpush.bf16.msrb.mxu1 %v6241_v23  ;;  %v6229_v1 = vor.u32 %v6743_v29, %v6228_v20  ;;  %v6204_v31 = vld [vmem:[#allocation4 + $0x180] sm:$0xf]  ;;  %v6738_v37 = vld [vmem:[#allocation4 + $0x18c] sm:$0xf0] }
 0x637   :  { %3551 = vmatpush.bf16.msrb.mxu2 %v6245_v32  ;;  %v6736_v40 = vld [vmem:[#allocation4 + $0x184] sm:$0xf]  ;;  %3580 = vmatpush.bf16.msrb.mxu3 %v6249_v18  ;;  %v6233_v34 = vor.u32 %v6741_v13, %v6230_v28  ;;  %v6206_v61 = vld [vmem:[#allocation4 + $0x190] sm:$0xf0]  ;;  %v6212_v25 = vld [vmem:[#allocation4 + $0x188] sm:$0xf]  ;;  %v6205_v38 = vor.u32 %v6738_v37, %v6204_v31 }
 0x638   :  { %v6739_v53 = vld [vmem:[#allocation4 + $0x194] sm:$0xf0]  ;;  %v6737_v41 = vld [vmem:[#allocation4 + $0x18c] sm:$0xf]  ;;  %v6214_v43 = vld [vmem:[#allocation4 + $0x198] sm:$0xf0]  ;;  %v6209_v22 = vor.u32 %v6736_v40, %v6206_v61 }
 0x639   :  { %3494 = vmatpush.bf16.msrb.mxu0 %v6221_v26  ;;  %v6213_v4 = vor.u32 %v6739_v53, %v6212_v25  ;;  %v6188_v35 = vld [vmem:[#allocation4 + $0x160] sm:$0xf]  ;;  %v6734_v39 = vld [vmem:[#allocation4 + $0x16c] sm:$0xf0]  ;;  %v6732_v44 = vld [vmem:[#allocation4 + $0x164] sm:$0xf]  ;;  %v6217_v21 = vor.u32 %v6737_v41, %v6214_v43 }
 0x63a   :  { %3523 = vmatpush.bf16.msrb.mxu1 %v6225_v0  ;;  %v6190_v46 = vld [vmem:[#allocation4 + $0x170] sm:$0xf0]  ;;  %v6196_v47 = vld [vmem:[#allocation4 + $0x168] sm:$0xf]  ;;  %v6735_v8 = vld [vmem:[#allocation4 + $0x174] sm:$0xf0]  ;;  %v6189_v57 = vor.u32 %v6734_v39, %v6188_v35 }
 0x63b   :  { %3552 = vmatpush.bf16.msrb.mxu2 %v6229_v1  ;;  %3581 = vmatpush.bf16.msrb.mxu3 %v6233_v34  ;;  %v6733_v9 = vld [vmem:[#allocation4 + $0x16c] sm:$0xf]  ;;  %v6198_v56 = vld [vmem:[#allocation4 + $0x178] sm:$0xf0]  ;;  %v6193_v16 = vor.u32 %v6732_v44, %v6190_v46  ;;  %v6197_v49 = vor.u32 %v6735_v8, %v6196_v47  ;;  %v6172_v27 = vld [vmem:[#allocation4 + $0x140] sm:$0xf] }
 0x63c   :  { %v6730_v50 = vld [vmem:[#allocation4 + $0x14c] sm:$0xf0]  ;;  %v6728_v15 = vld [vmem:[#allocation4 + $0x144] sm:$0xf]  ;;  %v6201_v17 = vor.u32 %v6733_v9, %v6198_v56  ;;  %v6174_v12 = vld [vmem:[#allocation4 + $0x150] sm:$0xf0] }
 0x63d   :  { %3495 = vmatpush.bf16.msrb.mxu0 %v6205_v38  ;;  %v6180_v51 = vld [vmem:[#allocation4 + $0x148] sm:$0xf]  ;;  %v6731_v42 = vld [vmem:[#allocation4 + $0x154] sm:$0xf0]  ;;  %v6729_v48 = vld [vmem:[#allocation4 + $0x14c] sm:$0xf]  ;;  %v6173_v3 = vor.u32 %v6730_v50, %v6172_v27  ;;  %v6177_v58 = vor.u32 %v6728_v15, %v6174_v12 }
 0x63e   :  { %3524 = vmatpush.bf16.msrb.mxu1 %v6209_v22  ;;  %v6182_v55 = vld [vmem:[#allocation4 + $0x158] sm:$0xf0]  ;;  %v6181_v59 = vor.u32 %v6731_v42, %v6180_v51  ;;  %v6156_v62 = vld [vmem:[#allocation4 + $0x120] sm:$0xf]  ;;  %v6726_v63 = vld [vmem:[#allocation4 + $0x12c] sm:$0xf0] }
 0x63f   :  { %3553 = vmatpush.bf16.msrb.mxu2 %v6213_v4  ;;  %3582 = vmatpush.bf16.msrb.mxu3 %v6217_v21  ;;  %v6724_v2 = vld [vmem:[#allocation4 + $0x124] sm:$0xf]  ;;  %v6185_v60 = vor.u32 %v6729_v48, %v6182_v55  ;;  %v6158_v5 = vld [vmem:[#allocation4 + $0x130] sm:$0xf0]  ;;  %v6164_v45 = vld [vmem:[#allocation4 + $0x128] sm:$0xf]  ;;  %v6157_v23 = vor.u32 %v6726_v63, %v6156_v62 }
 0x640   :  { %v6727_v6 = vld [vmem:[#allocation4 + $0x134] sm:$0xf0]  ;;  %v6725_v7 = vld [vmem:[#allocation4 + $0x12c] sm:$0xf]  ;;  %v6166_v11 = vld [vmem:[#allocation4 + $0x138] sm:$0xf0]  ;;  %v6161_v54 = vor.u32 %v6724_v2, %v6158_v5 }
 0x641   :  { %3496 = vmatpush.bf16.msrb.mxu0 %v6189_v57  ;;  %v6140_v52 = vld [vmem:[#allocation4 + $0x100] sm:$0xf]  ;;  %v6165_v10 = vor.u32 %v6727_v6, %v6164_v45  ;;  %v6722_v32 = vld [vmem:[#allocation4 + $0x10c] sm:$0xf0]  ;;  %v6720_v33 = vld [vmem:[#allocation4 + $0x104] sm:$0xf]  ;;  %v6169_v14 = vor.u32 %v6725_v7, %v6166_v11 }
 0x642   :  { %3525 = vmatpush.bf16.msrb.mxu1 %v6193_v16  ;;  %v6142_v30 = vld [vmem:[#allocation4 + $0x110] sm:$0xf0]  ;;  %v6148_v18 = vld [vmem:[#allocation4 + $0x108] sm:$0xf]  ;;  %v6723_v24 = vld [vmem:[#allocation4 + $0x114] sm:$0xf0]  ;;  %v6141_v13 = vor.u32 %v6722_v32, %v6140_v52 }
 0x643   :  { %3554 = vmatpush.bf16.msrb.mxu2 %v6197_v49  ;;  %3583 = vmatpush.bf16.msrb.mxu3 %v6201_v17  ;;  %v6721_v19 = vld [vmem:[#allocation4 + $0x10c] sm:$0xf]  ;;  %v6150_v20 = vld [vmem:[#allocation4 + $0x118] sm:$0xf0]  ;;  %v6380_v26 = vld [vmem:[#allocation5 + $0x1e0] sm:$0xf]  ;;  %v6145_v1 = vor.u32 %v6720_v33, %v6142_v30  ;;  %v6149_v31 = vor.u32 %v6723_v24, %v6148_v18 }
 0x644   :  { %v6782_v29 = vld [vmem:[#allocation5 + $0x1ec] sm:$0xf0]  ;;  %v6780_v28 = vld [vmem:[#allocation5 + $0x1e4] sm:$0xf]  ;;  %v6382_v0 = vld [vmem:[#allocation5 + $0x1f0] sm:$0xf0]  ;;  %v6153_v40 = vor.u32 %v6721_v19, %v6150_v20 }
 0x645   :  { %3497 = vmatpush.bf16.msrb.mxu0 %v6173_v3  ;;  %v6716_v37 = vld [vmem:[#allocation3] sm:$0xff]  ;;  %v7752_v34 = vor.u32 %v6782_v29, %v6380_v26  ;;  %v6781_v61 = vld [vmem:[#allocation5 + $0x1ec] sm:$0xf]  ;;  %v6388_v25 = vld [vmem:[#allocation5 + $0x1e8] sm:$0xf]  ;;  %v7754_v41 = vor.u32 %v6780_v28, %v6382_v0 }
 0x646   :  { %3526 = vmatpush.bf16.msrb.mxu1 %v6177_v58  ;;  %v6783_v53 = vld [vmem:[#allocation5 + $0x1f4] sm:$0xf0]  ;;  %v6390_v43 = vld [vmem:[#allocation5 + $0x1f8] sm:$0xf0]  ;;  %v6364_v38 = vld [vmem:[#allocation5 + $0x1c0] sm:$0xf] }
 0x647   :  { %3555 = vmatpush.bf16.msrb.mxu2 %v6181_v59  ;;  %3584 = vmatpush.bf16.msrb.mxu3 %v6185_v60  ;;  %v6778_v22 = vld [vmem:[#allocation5 + $0x1cc] sm:$0xf0]  ;;  %v6776_v4 = vld [vmem:[#allocation5 + $0x1c4] sm:$0xf]  ;;  %v6366_v35 = vld [vmem:[#allocation5 + $0x1d0] sm:$0xf0]  ;;  %v7756_v39 = vor.u32 %v6783_v53, %v6388_v25  ;;  %v7759_v44 = vor.u32 %v6781_v61, %v6390_v43 }
 0x648   :  { %v7761_v21 = vor.u32 %v6778_v22, %v6364_v38  ;;  %v6777_v46 = vld [vmem:[#allocation5 + $0x1cc] sm:$0xf]  ;;  %v6372_v47 = vld [vmem:[#allocation5 + $0x1c8] sm:$0xf]  ;;  %v6779_v8 = vld [vmem:[#allocation5 + $0x1d4] sm:$0xf0]  ;;  %v7764_v9 = vor.u32 %v6776_v4, %v6366_v35 }
 0x649   :  { %3498 = vmatpush.bf16.msrb.mxu0 %v6157_v23  ;;  %v6374_v56 = vld [vmem:[#allocation5 + $0x1d8] sm:$0xf0]  ;;  %v6348_v57 = vld [vmem:[#allocation5 + $0x1a0] sm:$0xf]  ;;  %v6774_v16 = vld [vmem:[#allocation5 + $0x1ac] sm:$0xf0]  ;;  %v7767_v50 = vor.u32 %v6779_v8, %v6372_v47 }
 0x64a   :  { %3527 = vmatpush.bf16.msrb.mxu1 %v6161_v54  ;;  %v6772_v49 = vld [vmem:[#allocation5 + $0x1a4] sm:$0xf]  ;;  %v6350_v27 = vld [vmem:[#allocation5 + $0x1b0] sm:$0xf0]  ;;  %v7771_v15 = vor.u32 %v6777_v46, %v6374_v56  ;;  %v7773_v17 = vor.u32 %v6774_v16, %v6348_v57  ;;  %v6773_v12 = vld [vmem:[#allocation5 + $0x1ac] sm:$0xf] }
 0x64b   :  { %3556 = vmatpush.bf16.msrb.mxu2 %v6165_v10  ;;  %3585 = vmatpush.bf16.msrb.mxu3 %v6169_v14  ;;  %v6356_v51 = vld [vmem:[#allocation5 + $0x1a8] sm:$0xf]  ;;  %v6775_v42 = vld [vmem:[#allocation5 + $0x1b4] sm:$0xf0]  ;;  %v7776_v48 = vor.u32 %v6772_v49, %v6350_v27  ;;  %v6358_v55 = vld [vmem:[#allocation5 + $0x1b8] sm:$0xf0] }
 0x64c   :  { %v6332_v3 = vld [vmem:[#allocation5 + $0x180] sm:$0xf]  ;;  %v6770_v58 = vld [vmem:[#allocation5 + $0x18c] sm:$0xf0]  ;;  %v6768_v59 = vld [vmem:[#allocation5 + $0x184] sm:$0xf]  ;;  %v7779_v63 = vor.u32 %v6775_v42, %v6356_v51  ;;  %v7783_v2 = vor.u32 %v6773_v12, %v6358_v55 }
 0x64d   :  { %3499 = vmatpush.bf16.msrb.mxu0 %v6141_v13  ;;  %v6334_v62 = vld [vmem:[#allocation5 + $0x190] sm:$0xf0]  ;;  %v7785_v60 = vor.u32 %v6770_v58, %v6332_v3  ;;  %v6769_v5 = vld [vmem:[#allocation5 + $0x18c] sm:$0xf]  ;;  %v6340_v45 = vld [vmem:[#allocation5 + $0x188] sm:$0xf] }
 0x64e   :  { %3528 = vmatpush.bf16.msrb.mxu1 %v6145_v1  ;;  %v6771_v6 = vld [vmem:[#allocation5 + $0x194] sm:$0xf0]  ;;  %v7788_v7 = vor.u32 %v6768_v59, %v6334_v62  ;;  %v6342_v11 = vld [vmem:[#allocation5 + $0x198] sm:$0xf0]  ;;  %v6316_v23 = vld [vmem:[#allocation5 + $0x160] sm:$0xf] }
 0x64f   :  { %3557 = vmatpush.bf16.msrb.mxu2 %v6149_v31  ;;  %3586 = vmatpush.bf16.msrb.mxu3 %v6153_v40  ;;  %v6766_v52 = vld [vmem:[#allocation5 + $0x16c] sm:$0xf0]  ;;  %v6764_v54 = vld [vmem:[#allocation5 + $0x164] sm:$0xf]  ;;  %v6318_v10 = vld [vmem:[#allocation5 + $0x170] sm:$0xf0]  ;;  %v7791_v33 = vor.u32 %v6771_v6, %v6340_v45  ;;  %v7795_v30 = vor.u32 %v6769_v5, %v6342_v11 }
 0x650   :  { %3500 = vmatmul.bf16.vlgmr.msrb.gmra.mxu0 %v6716_v37  ;;  %v6717_v32 = vld [vmem:[#allocation3 + $0x8] sm:$0xff]  ;;  %v7797_v14 = vor.u32 %v6766_v52, %v6316_v23  ;;  %v6767_v19 = vld [vmem:[#allocation5 + $0x174] sm:$0xf0]  ;;  %v7800_v20 = vor.u32 %v6764_v54, %v6318_v10  ;;  %v6326_v26 = vld [vmem:[#allocation5 + $0x178] sm:$0xf0] }
 0x651   :  { %3836 = vmatpush.bf16.msra.mxu0 %v7752_v34  ;;  %3529 = vmatmul.bf16.vlgmr.msrb.gmra.mxu1 %v6716_v37  ;;  %v6765_v18 = vld [vmem:[#allocation5 + $0x16c] sm:$0xf]  ;;  %v6324_v24 = vld [vmem:[#allocation5 + $0x168] sm:$0xf]  ;;  %v6300_v29 = vld [vmem:[#allocation5 + $0x140] sm:$0xf] }
 0x652   :  { %3849 = vmatpush.bf16.msra.mxu1 %v7754_v41  ;;  %3558 = vmatmul.bf16.vlgmr.msrb.gmra.mxu2 %v6716_v37  ;;  %v6762_v13 = vld [vmem:[#allocation5 + $0x14c] sm:$0xf0]  ;;  %v6760_v28 = vld [vmem:[#allocation5 + $0x144] sm:$0xf]  ;;  %v6302_v0 = vld [vmem:[#allocation5 + $0x150] sm:$0xf0]  ;;  %v7803_v1 = vor.u32 %v6767_v19, %v6324_v24  ;;  %v7807_v31 = vor.u32 %v6765_v18, %v6326_v26 }
 0x653   :  { %3587 = vmatmul.bf16.vlgmr.msrb.gmra.mxu3 %v6716_v37  ;;  %3862 = vmatpush.bf16.msra.mxu2 %v7756_v39  ;;  %v7809_v37 = vor.u32 %v6762_v13, %v6300_v29  ;;  %v7812_v40 = vor.u32 %v6760_v28, %v6302_v0  ;;  %v6761_v61 = vld [vmem:[#allocation5 + $0x14c] sm:$0xf]  ;;  %v6310_v25 = vld [vmem:[#allocation5 + $0x158] sm:$0xf0]  ;;  %v6284_v53 = vld [vmem:[#allocation5 + $0x120] sm:$0xf] }
 0x654   :  { %3875 = vmatpush.bf16.msra.mxu3 %v7759_v44  ;;  %v6758_v43 = vld [vmem:[#allocation5 + $0x12c] sm:$0xf0]  ;;  %v6756_v38 = vld [vmem:[#allocation5 + $0x124] sm:$0xf]  ;;  %v7817_v22 = vor.u32 %v6761_v61, %v6310_v25  ;;  %v6286_v35 = vld [vmem:[#allocation5 + $0x130] sm:$0xf0] }
 0x655   :  { %3837 = vmatpush.bf16.msra.mxu0 %v7761_v21  ;;  %v7819_v4 = vor.u32 %v6758_v43, %v6284_v53  ;;  %v6308_v46 = vld [vmem:[#allocation5 + $0x148] sm:$0xf]  ;;  %v6763_v47 = vld [vmem:[#allocation5 + $0x154] sm:$0xf0]  ;;  %v7822_v8 = vor.u32 %v6756_v38, %v6286_v35  ;;  %v6757_v57 = vld [vmem:[#allocation5 + $0x12c] sm:$0xf] }
 0x656   :  { %3850 = vmatpush.bf16.msra.mxu1 %v7764_v9  ;;  %v7824_v56 = vor.u32 %v6763_v47, %v6308_v46  ;;  %v6294_v16 = vld [vmem:[#allocation5 + $0x138] sm:$0xf0]  ;;  %v6268_v49 = vld [vmem:[#allocation5 + $0x100] sm:$0xf]  ;;  %v6754_v27 = vld [vmem:[#allocation5 + $0x10c] sm:$0xf0] }
 0x657   :  { %3863 = vmatpush.bf16.msra.mxu2 %v7767_v50  ;;  %v6752_v12 = vld [vmem:[#allocation5 + $0x104] sm:$0xf]  ;;  %v6270_v51 = vld [vmem:[#allocation5 + $0x110] sm:$0xf0]  ;;  %v6292_v42 = vld [vmem:[#allocation5 + $0x128] sm:$0xf]  ;;  %v7829_v3 = vor.u32 %v6757_v57, %v6294_v16  ;;  %v7831_v58 = vor.u32 %v6754_v27, %v6268_v49 }
 0x658   :  { %3876 = vmatpush.bf16.msra.mxu3 %v7771_v15  ;;  %v6759_v55 = vld [vmem:[#allocation5 + $0x134] sm:$0xf0]  ;;  %v6276_v62 = vld [vmem:[#allocation5 + $0x108] sm:$0xf]  ;;  %v7836_v45 = vor.u32 %v6752_v12, %v6270_v51  ;;  %v6753_v6 = vld [vmem:[#allocation5 + $0x10c] sm:$0xf] }
 0x659   :  { %3838 = vmatpush.bf16.msra.mxu0 %v7773_v17  ;;  %v7833_v59 = vor.u32 %v6759_v55, %v6292_v42  ;;  %v6755_v5 = vld [vmem:[#allocation5 + $0x114] sm:$0xf0]  ;;  %v6278_v11 = vld [vmem:[#allocation5 + $0x118] sm:$0xf0]  ;;  %v6718_v54 = vld [vmem:[#allocation3 + $0x10] sm:$0xff] }
 0x65a   :  { %3851 = vmatpush.bf16.msra.mxu1 %v7776_v48  ;;  %v7839_v23 = vor.u32 %v6755_v5, %v6276_v62  ;;  %v7843_v52 = vor.u32 %v6753_v6, %v6278_v11  ;;  %v6719_v10 = vld [vmem:[#allocation3 + $0x18] sm:$0xff]  ;;  %v6121_v18 = vld [vmem:[%s8225_s2 + $0x4] sm:$0xf] }
 0x65b   :  { %3864 = vmatpush.bf16.msra.mxu2 %v7779_v63  ;;  %v3300_v24 = vperm.slane %v6121_v18, 0  ;;  %v3301_v26 = vperm.slane %v6121_v18, 1  ;;  %v7927_v25 = vperm.slane %v6121_v18, 2  ;;  %v7929_v53 = vperm.slane %v6121_v18, 3 }
 0x65c   :  { %3877 = vmatpush.bf16.msra.mxu3 %v7783_v2 }
 0x65d   :  { %3839 = vmatpush.bf16.msra.mxu0 %v7785_v60 }
 0x65e   :  { %3852 = vmatpush.bf16.msra.mxu1 %v7788_v7 }
 0x65f   :  { %3865 = vmatpush.bf16.msra.mxu2 %v7791_v33 }
 0x660   :  { %3878 = vmatpush.bf16.msra.mxu3 %v7795_v30  ;;  %3505 = vmatmul.bf16.gmra.mxu0 %v6717_v32 }
 0x661   :  { %3840 = vmatpush.bf16.msra.mxu0 %v7797_v14  ;;  %3534 = vmatmul.bf16.gmra.mxu1 %v6717_v32 }
 0x662   :  { %3853 = vmatpush.bf16.msra.mxu1 %v7800_v20  ;;  %3563 = vmatmul.bf16.gmra.mxu2 %v6717_v32 }
 0x663   :  { %3592 = vmatmul.bf16.gmra.mxu3 %v6717_v32  ;;  %3866 = vmatpush.bf16.msra.mxu2 %v7803_v1 }
 0x664   :  { %3879 = vmatpush.bf16.msra.mxu3 %v7807_v31 }
 0x665   :  { %3841 = vmatpush.bf16.msra.mxu0 %v7809_v37 }
 0x666   :  { %3854 = vmatpush.bf16.msra.mxu1 %v7812_v40 }
 0x667   :  { %3867 = vmatpush.bf16.msra.mxu2 %v7824_v56 }
 0x668   :  { %3880 = vmatpush.bf16.msra.mxu3 %v7817_v22 }
 0x669   :  { %3842 = vmatpush.bf16.msra.mxu0 %v7819_v4 }
 0x66a   :  { %3855 = vmatpush.bf16.msra.mxu1 %v7822_v8 }
 0x66b   :  { %3868 = vmatpush.bf16.msra.mxu2 %v7833_v59 }
 0x66c   :  { %3881 = vmatpush.bf16.msra.mxu3 %v7829_v3 }
 0x66d   :  { %3843 = vmatpush.bf16.msra.mxu0 %v7831_v58 }
 0x66e   :  { %3856 = vmatpush.bf16.msra.mxu1 %v7836_v45 }
 0x66f   :  { %3869 = vmatpush.bf16.msra.mxu2 %v7839_v23 }
 0x670   :  { %3882 = vmatpush.bf16.msra.mxu3 %v7843_v52  ;;  %3510 = vmatmul.bf16.gmra.mxu0 %v6718_v54 }
 0x671   :  { %3960 = vmatpush.bf16.msrb.mxu0 %v7752_v34  ;;  %3539 = vmatmul.bf16.gmra.mxu1 %v6718_v54 }
 0x672   :  { %3973 = vmatpush.bf16.msrb.mxu1 %v7754_v41  ;;  %3568 = vmatmul.bf16.gmra.mxu2 %v6718_v54 }
 0x673   :  { %3986 = vmatpush.bf16.msrb.mxu2 %v7756_v39  ;;  %3597 = vmatmul.bf16.gmra.mxu3 %v6718_v54 }
 0x674   :  { %3999 = vmatpush.bf16.msrb.mxu3 %v7759_v44 }
 0x675   :  { %3961 = vmatpush.bf16.msrb.mxu0 %v7761_v21 }
 0x676   :  { %3974 = vmatpush.bf16.msrb.mxu1 %v7764_v9 }
 0x677   :  { %3987 = vmatpush.bf16.msrb.mxu2 %v7767_v50 }
 0x678   :  { %4000 = vmatpush.bf16.msrb.mxu3 %v7771_v15 }
 0x679   :  { %3962 = vmatpush.bf16.msrb.mxu0 %v7773_v17 }
 0x67a   :  { %3975 = vmatpush.bf16.msrb.mxu1 %v7776_v48 }
 0x67b   :  { %3988 = vmatpush.bf16.msrb.mxu2 %v7779_v63 }
 0x67c   :  { %4001 = vmatpush.bf16.msrb.mxu3 %v7783_v2 }
 0x67d   :  { %3963 = vmatpush.bf16.msrb.mxu0 %v7785_v60 }
 0x67e   :  { %3976 = vmatpush.bf16.msrb.mxu1 %v7788_v7 }
 0x67f   :  { %3989 = vmatpush.bf16.msrb.mxu2 %v7791_v33 }
 0x680   :  { %4002 = vmatpush.bf16.msrb.mxu3 %v7795_v30  ;;  %3515 = vmatmul.bf16.gmra.mxu0 %v6719_v10 }
 0x681   :  { %3964 = vmatpush.bf16.msrb.mxu0 %v7797_v14  ;;  %3544 = vmatmul.bf16.gmra.mxu1 %v6719_v10 }
 0x682   :  { %3977 = vmatpush.bf16.msrb.mxu1 %v7800_v20  ;;  %3573 = vmatmul.bf16.gmra.mxu2 %v6719_v10 }
 0x683   :  { %3990 = vmatpush.bf16.msrb.mxu2 %v7803_v1  ;;  %3602 = vmatmul.bf16.gmra.mxu3 %v6719_v10 }
 0x684   :  { %4003 = vmatpush.bf16.msrb.mxu3 %v7807_v31 }
 0x685   :  { %3965 = vmatpush.bf16.msrb.mxu0 %v7809_v37 }
 0x686   :  { %3978 = vmatpush.bf16.msrb.mxu1 %v7812_v40 }
 0x687   :  { %3991 = vmatpush.bf16.msrb.mxu2 %v7824_v56 }
 0x688   :  { %4004 = vmatpush.bf16.msrb.mxu3 %v7817_v22 }
 0x689   :  { %3966 = vmatpush.bf16.msrb.mxu0 %v7819_v4 }
 0x68a   :  { %3979 = vmatpush.bf16.msrb.mxu1 %v7822_v8 }
 0x68b   :  { %3992 = vmatpush.bf16.msrb.mxu2 %v7833_v59 }
 0x68c   :  { %4005 = vmatpush.bf16.msrb.mxu3 %v7829_v3 }
 0x68d   :  { %3967 = vmatpush.bf16.msrb.mxu0 %v7831_v58 }
 0x68e   :  { %3980 = vmatpush.bf16.msrb.mxu1 %v7836_v45 }
 0x68f   :  { %3993 = vmatpush.bf16.msrb.mxu2 %v7839_v23 }
 0x690   :  { %4006 = vmatpush.bf16.msrb.mxu3 %v7843_v52  ;;  %3844 = vmatmul.bf16.vlgmr.msra.gmra.mxu0 %v7047_v36 }
 0x691   :  { %3857 = vmatmul.bf16.vlgmr.msra.gmra.mxu1 %v7047_v36  ;;  %4084 = vmatpush.bf16.msra.mxu0 %v7752_v34 }
 0x692   :  { %3870 = vmatmul.bf16.vlgmr.msra.gmra.mxu2 %v7047_v36  ;;  %4097 = vmatpush.bf16.msra.mxu1 %v7754_v41 }
 0x693   :  { %3883 = vmatmul.bf16.vlgmr.msra.gmra.mxu3 %v7047_v36  ;;  %4110 = vmatpush.bf16.msra.mxu2 %v7756_v39 }
 0x694   :  { %4123 = vmatpush.bf16.msra.mxu3 %v7759_v44 }
 0x695   :  { %4085 = vmatpush.bf16.msra.mxu0 %v7761_v21 }
 0x696   :  { %4098 = vmatpush.bf16.msra.mxu1 %v7764_v9 }
 0x697   :  { %4111 = vmatpush.bf16.msra.mxu2 %v7767_v50 }
 0x698   :  { %4124 = vmatpush.bf16.msra.mxu3 %v7771_v15 }
 0x699   :  { %4086 = vmatpush.bf16.msra.mxu0 %v7773_v17 }
 0x69a   :  { %4099 = vmatpush.bf16.msra.mxu1 %v7776_v48 }
 0x69b   :  { %4112 = vmatpush.bf16.msra.mxu2 %v7779_v63 }
 0x69c   :  { %4125 = vmatpush.bf16.msra.mxu3 %v7783_v2 }
 0x69d   :  { %4087 = vmatpush.bf16.msra.mxu0 %v7785_v60 }
 0x69e   :  { %4100 = vmatpush.bf16.msra.mxu1 %v7788_v7 }
 0x69f   :  { %4113 = vmatpush.bf16.msra.mxu2 %v7791_v33 }
 0x6a0   :  { %4126 = vmatpush.bf16.msra.mxu3 %v7795_v30 }
 0x6a1   :  { %4088 = vmatpush.bf16.msra.mxu0 %v7797_v14 }
 0x6a2   :  { %4101 = vmatpush.bf16.msra.mxu1 %v7800_v20 }
 0x6a3   :  { %4114 = vmatpush.bf16.msra.mxu2 %v7803_v1 }
 0x6a4   :  { %4127 = vmatpush.bf16.msra.mxu3 %v7807_v31 }
 0x6a5   :  { %4089 = vmatpush.bf16.msra.mxu0 %v7809_v37 }
 0x6a6   :  { %4102 = vmatpush.bf16.msra.mxu1 %v7812_v40 }
 0x6a7   :  { %4115 = vmatpush.bf16.msra.mxu2 %v7824_v56 }
 0x6a8   :  { %4128 = vmatpush.bf16.msra.mxu3 %v7817_v22 }
 0x6a9   :  { %4090 = vmatpush.bf16.msra.mxu0 %v7819_v4 }
 0x6aa   :  { %4103 = vmatpush.bf16.msra.mxu1 %v7822_v8 }
 0x6ab   :  { %4116 = vmatpush.bf16.msra.mxu2 %v7833_v59 }
 0x6ac   :  { %4129 = vmatpush.bf16.msra.mxu3 %v7829_v3 }
 0x6ad   :  { %4091 = vmatpush.bf16.msra.mxu0 %v7831_v58 }
 0x6ae   :  { %4104 = vmatpush.bf16.msra.mxu1 %v7836_v45 }
 0x6af   :  { %4117 = vmatpush.bf16.msra.mxu2 %v7839_v23 }
 0x6b0   :  { %4130 = vmatpush.bf16.msra.mxu3 %v7843_v52 }
 0x6cd   :  { %v3501_v36 = vpop.f32.mrf.mxu0 }
 0x6ce   :  { %v3530_v32 = vpop.f32.mrf.mxu1 }
 0x6d5   :  { %v7919_v19 = vpop.f32.mrf.mxu2  ;;  %v3503_v13 = vpop.f32.mrf.mxu0 }
 0x6d6   :  { %v7921_v29 = vpop.f32.mrf.mxu3  ;;  %v7923_v28 = vadd.f32 %v3503_v13, %v3300_v24  ;;  %v3532_v0 = vpop.f32.mrf.mxu1 }
 0x6d7   :  { %v7925_v61 = vadd.f32 %v3532_v0, %v3301_v26 }
 0x6dd   :  { %v3561_v43 = vpop.f32.mrf.mxu2  ;;  %v3506_v46 = vpop.f32.mrf.mxu0 }
 0x6de   :  { %v7932_v38 = vadd.f32 %v3561_v43, %v7927_v25  ;;  %v3590_v35 = vpop.f32.mrf.mxu3  ;;  %v7937_v57 = vadd.f32 %v3506_v46, %v3300_v24  ;;  %v3535_v16 = vpop.f32.mrf.mxu1 }
 0x6df   :  { %v7935_v47 = vadd.f32 %v3590_v35, %v7929_v53  ;;  %v7939_v49 = vadd.f32 %v3535_v16, %v3301_v26 }
 0x6e5   :  { %v3564_v27 = vpop.f32.mrf.mxu2  ;;  %v3508_v42 = vpop.f32.mrf.mxu0 }
 0x6e6   :  { %v7942_v12 = vadd.f32 %v3564_v27, %v7927_v25  ;;  %v3593_v51 = vpop.f32.mrf.mxu3  ;;  %v7947_v62 = vadd.f32 %v3508_v42, %v3300_v24  ;;  %v3537_v5 = vpop.f32.mrf.mxu1 }
 0x6e7   :  { %v7945_v55 = vadd.f32 %v3593_v51, %v7929_v53  ;;  %v7949_v6 = vadd.f32 %v3537_v5, %v3301_v26 }
 0x6e8   :  { %8230 = vst [vmem:[#allocation13_spill] sm:$0xff] %v7942_v12 }
 0x6e9   :  { %8231 = vst [vmem:[#allocation14_spill] sm:$0xff] %v7947_v62 }
 0x6ea   :  { %8232 = vst [vmem:[#allocation15_spill] sm:$0xff] %v7949_v6 }
 0x6ed   :  { %v3566_v11 = vpop.f32.mrf.mxu2  ;;  %v3511_v18 = vpop.f32.mrf.mxu0 }
 0x6ee   :  { %v7952_v54 = vadd.f32 %v3566_v11, %v7927_v25  ;;  %v3595_v10 = vpop.f32.mrf.mxu3  ;;  %v7957_v0 = vadd.f32 %v3511_v18, %v3300_v24  ;;  %v3540_v43 = vpop.f32.mrf.mxu1 }
 0x6ef   :  { %v7955_v13 = vadd.f32 %v3595_v10, %v7929_v53  ;;  %v7959_v35 = vadd.f32 %v3540_v43, %v3301_v26 }
 0x6f0   :  { %8233 = vst [vmem:[#allocation16_spill] sm:$0xff] %v7952_v54 }
 0x6f1   :  { %8234 = vst [vmem:[#allocation17_spill] sm:$0xff] %v7955_v13 }
 0x6f2   :  { %8235 = vst [vmem:[#allocation18_spill] sm:$0xff] %v7957_v0 }
 0x6f3   :  { %8236 = vst [vmem:[#allocation19_spill] sm:$0xff] %v7959_v35 }
 0x6f5   :  { %v3569_v46 = vpop.f32.mrf.mxu2  ;;  %v3513_v51 = vpop.f32.mrf.mxu0 }
 0x6f6   :  { %v7962_v16 = vadd.f32 %v3569_v46, %v7927_v25  ;;  %v3598_v27 = vpop.f32.mrf.mxu3  ;;  %v7967_v5 = vadd.f32 %v3513_v51, %v3300_v24  ;;  %v3542_v11 = vpop.f32.mrf.mxu1 }
 0x6f7   :  { %v7965_v42 = vadd.f32 %v3598_v27, %v7929_v53  ;;  %v7969_v54 = vadd.f32 %v3542_v11, %v3301_v26 }
 0x6f8   :  { %8237 = vst [vmem:[#allocation20_spill] sm:$0xff] %v7962_v16 }
 0x6f9   :  { %8238 = vst [vmem:[#allocation21_spill] sm:$0xff] %v7965_v42 }
 0x6fa   :  { %8239 = vst [vmem:[#allocation22_spill] sm:$0xff] %v7967_v5 }
 0x6fb   :  { %8240 = vst [vmem:[#allocation23_spill] sm:$0xff] %v7969_v54 }
 0x6fd   :  { %v3571_v10 = vpop.f32.mrf.mxu2  ;;  %v3516_v35 = vpop.f32.mrf.mxu0 }
 0x6fe   :  { %v7972_v18 = vadd.f32 %v3571_v10, %v7927_v25  ;;  %v3600_v43 = vpop.f32.mrf.mxu3  ;;  %v7977_v46 = vadd.f32 %v3516_v35, %v3300_v24  ;;  %v3545_v16 = vpop.f32.mrf.mxu1 }
 0x6ff   :  { %v7975_v0 = vadd.f32 %v3600_v43, %v7929_v53  ;;  %v7979_v13 = vadd.f32 %v3545_v16, %v3301_v26  ;;  %v3502_v43 = vadd.f32 %v3501_v36, %v3300_v24  ;;  %v3589_v36 = vadd.f32 %v7921_v29, %v7929_v53 }
 0x700   :  { %8241 = vst [vmem:[#allocation24_spill] sm:$0xff] %v7972_v18 }
 0x701   :  { %8242 = vst [vmem:[#allocation25_spill] sm:$0xff] %v7975_v0 }
 0x702   :  { %8243 = vst [vmem:[#allocation26_spill] sm:$0xff] %v7977_v46  ;;  %v3531_v46 = vadd.f32 %v3530_v32, %v3301_v26 }
 0x703   :  { %8244 = vst [vmem:[#allocation27_spill] sm:$0xff] %v7979_v13 }
 0x705   :  { %v3574_v27 = vpop.f32.mrf.mxu2  ;;  %v3518_v54 = vpop.f32.mrf.mxu0 }
 0x706   :  { %v7982_v51 = vadd.f32 %v3574_v27, %v7927_v25  ;;  %v3603_v11 = vpop.f32.mrf.mxu3  ;;  %v7987_v10 = vadd.f32 %v3518_v54, %v3300_v24  ;;  %v3547_v18 = vpop.f32.mrf.mxu1 }
 0x707   :  { %v7985_v5 = vadd.f32 %v3603_v11, %v7929_v53  ;;  %v7989_v42 = vadd.f32 %v3547_v18, %v3301_v26 }
 0x708   :  { %8245 = vst [vmem:[#allocation28_spill] sm:$0xff] %v7982_v51 }
 0x709   :  { %8246 = vst [vmem:[#allocation29_spill] sm:$0xff] %v7985_v5 }
 0x70a   :  { %8247 = vst [vmem:[#allocation30_spill] sm:$0xff] %v7987_v10 }
 0x70b   :  { %8248 = vst [vmem:[#allocation31_spill] sm:$0xff] %v7989_v42 }
 0x70d   :  { %v3576_v35 = vpop.f32.mrf.mxu2  ;;  %v3845_v0 = vpop.f32.mrf.mxu0 }
 0x70e   :  { %v7992_v16 = vadd.f32 %v3576_v35, %v7927_v25  ;;  %v3605_v13 = vpop.f32.mrf.mxu3  ;;  %v3888_v51 = vadd.f32 %v3845_v0, %v3502_v43  ;;  %v3858_v6 = vpop.f32.mrf.mxu1 }
 0x70f   :  { %v7995_v27 = vadd.f32 %v3605_v13, %v7929_v53  ;;  %v3889_v11 = vadd.f32 %v3858_v6, %v3531_v46 }
 0x710   :  { %8249 = vst [vmem:[#allocation32_spill] sm:$0xff] %v7992_v16  ;;  %v6394_v5 = vmul.f32 -1.442695, %v3888_v51 }
 0x711   :  { %8250 = vst [vmem:[#allocation33_spill] sm:$0xff] %v7995_v27  ;;  %v6395_v54 = vmul.f32 -1.442695, %v3889_v11 }
 0x712   :  { %6913 = vpow2.f32 %v6394_v5  ;;  %v3560_v5 = vadd.f32 %v7919_v19, %v7927_v25 }
 0x713   :  { %6915 = vpow2.f32 %v6395_v54 }
 0x715   :  { %v3871_v24 = vpop.f32.mrf.mxu2  ;;  %v3847_v26 = vpop.f32.mrf.mxu0 }
 0x716   :  { %v3884_v32 = vpop.f32.mrf.mxu3  ;;  %v3860_v35 = vpop.f32.mrf.mxu1  ;;  %v3890_v53 = vadd.f32 %v3871_v24, %v3560_v5 }
 0x717   :  { %v3891_v18 = vadd.f32 %v3884_v32, %v3589_v36 }
 0x718   :  { %v6914_v16 = vpop.eup %6913 }
 0x719   :  { %v6396_v42 = vmul.f32 -1.442695, %v3891_v18  ;;  %v6916_v10 = vpop.eup %6915  ;;  %v3895_v13 = vadd.f32 1.0, %v6914_v16 }
 0x71a   :  { %v3914_v27 = vadd.f32 1.0, %v6916_v10 }
 0x71b   :  { %6917 = vpow2.f32 %v6396_v42  ;;  %v3907_v16 = vand.u32 2147483648, %v3895_v13  ;;  %v3905_v26 = vand.u32 2147483647, %v3895_v13  ;;  %vm3901_vm2 = vweird.f32 %v3895_v13 }
 0x71c   :  { %6919 = vrcp.f32 %v3895_v13  ;;  %v3926_v42 = vand.u32 2147483648, %v3914_v27  ;;  %v3924_v35 = vand.u32 2147483647, %v3914_v27  ;;  %vm3920_vm3 = vweird.f32 %v3914_v27 }
 0x71d   :  { %6921 = vrcp.f32 %v3914_v27  ;;  %v3873_v6 = vpop.f32.mrf.mxu2  ;;  %v3908_v24 = vor.u32 1.1754944e-38, %v3907_v16  ;;  %vm3906_vm5 = vcmp.eq.f32.partialorder %v3905_v26, 8.507059e+37 }
 0x71e   :  { %v3886_v0 = vpop.f32.mrf.mxu3  ;;  %vm3925_vm7 = vcmp.eq.f32.partialorder %v3924_v35, 8.507059e+37 }
 0x71f   :  { %v3927_v0 = vor.u32 1.1754944e-38, %v3926_v42 }
 0x721   :  { %v6918_v46 = vpop.eup %6917 }
 0x722   :  { %v6920_v29 = vpop.eup %6919  ;;  %v3934_v51 = vadd.f32 1.0, %v6918_v46 }
 0x723   :  { %v6922_v43 = vpop.eup %6921  ;;  %v3897_v11 = vmul.f32 %v6920_v29, %v3895_v13  ;;  %vm3902_vm0 = vweird.f32 %v6920_v29 }
 0x724   :  { %v3916_v54 = vmul.f32 %v6922_v43, %v3914_v27  ;;  %6923 = vrcp.f32 %v3934_v51  ;;  %vm3921_vm1 = vweird.f32 %v6922_v43  ;;  %vm3903_vm4 = vmor %vm3901_vm2, %vm3902_vm0  ;;  %v3946_v16 = vand.u32 2147483648, %v3934_v51 }
 0x725   :  { %v3898_v36 = vsub.f32 1.0, %v3897_v11  ;;  %6925 = vtanh.f32 %v3890_v53  ;;  %vm3922_vm6 = vmor %vm3920_vm3, %vm3921_vm1  ;;  %vm3940_vm9 = vweird.f32 %v3934_v51 }
 0x726   :  { %v3917_v32 = vsub.f32 1.0, %v3916_v54  ;;  %v3947_v26 = vor.u32 1.1754944e-38, %v3946_v16 }
 0x727   :  { %v3899_v10 = vmul.f32 %v6920_v29, %v3898_v36 }
 0x728   :  { %v3918_v18 = vmul.f32 %v6922_v43, %v3917_v32 }
 0x729   :  { %v3900_v19 = vadd.f32 %v6920_v29, %v3899_v10 }
 0x72a   :  { %v6924_v25 = vpop.eup %6923  ;;  %v3919_v6 = vadd.f32 %v6922_v43, %v3918_v18 }
 0x72b   :  { %v3904_v5 = vsel %vm3903_vm4, %v6920_v29, %v3900_v19  ;;  %v3936_v46 = vmul.f32 %v6924_v25, %v3934_v51  ;;  %v6926_v53 = vpop.eup %6925  ;;  %vm3941_vm8 = vweird.f32 %v6924_v25  ;;  %v3944_v29 = vand.u32 2147483647, %v3934_v51 }
 0x72c   :  { %v3909_v11 = vsel %vm3906_vm5, %v3908_v24, %v3904_v5  ;;  %v3923_v54 = vsel %vm3922_vm6, %v6922_v43, %v3919_v6  ;;  %vm3942_vm10 = vmor %vm3940_vm9, %vm3941_vm8 }
 0x72d   :  { %v3928_v36 = vsel %vm3925_vm7, %v3927_v0, %v3923_v54  ;;  %v3951_v32 = vmul.f32 %v6926_v53, %v3909_v11  ;;  %v3937_v62 = vsub.f32 1.0, %v3936_v46  ;;  %vm3945_vm11 = vcmp.eq.f32.partialorder %v3944_v29, 8.507059e+37 }
 0x72e   :  { %v3950_v12 = vmul.f32 0.0, %v3928_v36 }
 0x72f   :  { %v3938_v10 = vmul.f32 %v6924_v25, %v3937_v62 }
 0x730   :  { %v8001_v13 = vadd.f32 %v3951_v32, %v3950_v12 }
 0x731   :  { %v3939_v27 = vadd.f32 %v6924_v25, %v3938_v10 }
 0x732   :  { %6927 = vtanh.f32 %v8001_v13 }
 0x733   :  { %v3943_v42 = vsel %vm3942_vm10, %v6924_v25, %v3939_v27 }
 0x734   :  { %v3948_v18 = vsel %vm3945_vm11, %v3947_v26, %v3943_v42 }
 0x738   :  { %v6928_v43 = vpop.eup %6927 }
 0x739   :  { %v3954_v35 = vmul.f32 %v6928_v43, %v3948_v18 }
 0x73b   :  { %v3959_v19 = vpack.c.bf16 %v3954_v35, %v3954_v35 }
 0x73d   :  { %3968 = vmatmul.bf16.vlgmr.msrb.gmra.mxu0 %v3959_v19  ;;  %3981 = vmatmul.bf16.vlgmr.msrb.gmra.mxu1 %v3959_v19 }
 0x73e   :  { %3994 = vmatmul.bf16.vlgmr.msrb.gmra.mxu2 %v3959_v19  ;;  %4007 = vmatmul.bf16.vlgmr.msrb.gmra.mxu3 %v3959_v19 }
 0x73f   :  { %4208 = vmatpush.bf16.msrb.mxu0 %v7752_v34  ;;  %4221 = vmatpush.bf16.msrb.mxu1 %v7754_v41 }
 0x740   :  { %4234 = vmatpush.bf16.msrb.mxu2 %v7756_v39  ;;  %4247 = vmatpush.bf16.msrb.mxu3 %v7759_v44 }
 0x743   :  { %4209 = vmatpush.bf16.msrb.mxu0 %v7761_v21  ;;  %4222 = vmatpush.bf16.msrb.mxu1 %v7764_v9 }
 0x744   :  { %4235 = vmatpush.bf16.msrb.mxu2 %v7767_v50  ;;  %4248 = vmatpush.bf16.msrb.mxu3 %v7771_v15 }
 0x747   :  { %4210 = vmatpush.bf16.msrb.mxu0 %v7773_v17  ;;  %4223 = vmatpush.bf16.msrb.mxu1 %v7776_v48 }
 0x748   :  { %4236 = vmatpush.bf16.msrb.mxu2 %v7779_v63  ;;  %4249 = vmatpush.bf16.msrb.mxu3 %v7783_v2 }
 0x74b   :  { %4211 = vmatpush.bf16.msrb.mxu0 %v7785_v60  ;;  %4224 = vmatpush.bf16.msrb.mxu1 %v7788_v7 }
 0x74c   :  { %4237 = vmatpush.bf16.msrb.mxu2 %v7791_v33  ;;  %4250 = vmatpush.bf16.msrb.mxu3 %v7795_v30 }
 0x74f   :  { %4212 = vmatpush.bf16.msrb.mxu0 %v7797_v14  ;;  %4225 = vmatpush.bf16.msrb.mxu1 %v7800_v20 }
 0x750   :  { %4238 = vmatpush.bf16.msrb.mxu2 %v7803_v1  ;;  %4251 = vmatpush.bf16.msrb.mxu3 %v7807_v31 }
 0x753   :  { %4213 = vmatpush.bf16.msrb.mxu0 %v7809_v37  ;;  %4226 = vmatpush.bf16.msrb.mxu1 %v7812_v40 }
 0x754   :  { %4239 = vmatpush.bf16.msrb.mxu2 %v7824_v56  ;;  %4252 = vmatpush.bf16.msrb.mxu3 %v7817_v22 }
 0x757   :  { %4214 = vmatpush.bf16.msrb.mxu0 %v7819_v4  ;;  %4227 = vmatpush.bf16.msrb.mxu1 %v7822_v8 }
 0x758   :  { %4240 = vmatpush.bf16.msrb.mxu2 %v7833_v59  ;;  %4253 = vmatpush.bf16.msrb.mxu3 %v7829_v3 }
 0x75b   :  { %4215 = vmatpush.bf16.msrb.mxu0 %v7831_v58  ;;  %4228 = vmatpush.bf16.msrb.mxu1 %v7836_v45 }
 0x75c   :  { %4241 = vmatpush.bf16.msrb.mxu2 %v7839_v23  ;;  %4254 = vmatpush.bf16.msrb.mxu3 %v7843_v52 }
 0x7ba   :  { %v3969_v12 = vpop.f32.mrf.mxu0  ;;  %v3982_v62 = vpop.f32.mrf.mxu1 }
 0x7bb   :  { %v4012_v51 = vadd.f32 %v3969_v12, %v7923_v28  ;;  %v4013_v25 = vadd.f32 %v3982_v62, %v7925_v61 }
 0x7bd   :  { %v6397_v24 = vmul.f32 -1.442695, %v4012_v51  ;;  %v6398_v6 = vmul.f32 -1.442695, %v4013_v25 }
 0x7bf   :  { %6929 = vpow2.f32 %v6397_v24 }
 0x7c0   :  { %6931 = vpow2.f32 %v6398_v6 }
 0x7c1   :  { %v3995_v0 = vpop.f32.mrf.mxu2  ;;  %v4008_v5 = vpop.f32.mrf.mxu3 }
 0x7c2   :  { %v4015_v46 = vadd.f32 %v4008_v5, %v7935_v47  ;;  %v3971_v53 = vpop.f32.mrf.mxu0  ;;  %v3984_v11 = vpop.f32.mrf.mxu1  ;;  %v4014_v26 = vadd.f32 %v3995_v0, %v7932_v38 }
 0x7c4   :  { %v6399_v54 = vmul.f32 -1.442695, %v4015_v46 }
 0x7c5   :  { %v6930_v36 = vpop.eup %6929 }
 0x7c6   :  { %v6932_v32 = vpop.eup %6931  ;;  %v4019_v10 = vadd.f32 1.0, %v6930_v36  ;;  %6933 = vpow2.f32 %v6399_v54 }
 0x7c7   :  { %v4038_v27 = vadd.f32 1.0, %v6932_v32 }
 0x7c8   :  { %6935 = vrcp.f32 %v4019_v10  ;;  %v4031_v12 = vand.u32 2147483648, %v4019_v10  ;;  %v4029_v25 = vand.u32 2147483647, %v4019_v10  ;;  %vm4025_vm14 = vweird.f32 %v4019_v10 }
 0x7c9   :  { %6937 = vrcp.f32 %v4038_v27  ;;  %v3997_v28 = vpop.f32.mrf.mxu2  ;;  %v4010_v61 = vpop.f32.mrf.mxu3  ;;  %v4050_v62 = vand.u32 2147483648, %v4038_v27  ;;  %v4048_v6 = vand.u32 2147483647, %v4038_v27  ;;  %vm4044_vm15 = vweird.f32 %v4038_v27 }
 0x7ca   :  { %v4032_v38 = vor.u32 1.1754944e-38, %v4031_v12  ;;  %vm4030_vm2 = vcmp.eq.f32.partialorder %v4029_v25, 8.507059e+37 }
 0x7cb   :  { %v4051_v11 = vor.u32 1.1754944e-38, %v4050_v62  ;;  %vm4049_vm3 = vcmp.eq.f32.partialorder %v4048_v6, 8.507059e+37 }
 0x7cc   :  { %v6934_v16 = vpop.eup %6933 }
 0x7cd   :  { %v4058_v29 = vadd.f32 1.0, %v6934_v16 }
 0x7ce   :  { %v6936_v42 = vpop.eup %6935 }
 0x7cf   :  { %v6938_v43 = vpop.eup %6937  ;;  %v4021_v18 = vmul.f32 %v6936_v42, %v4019_v10  ;;  %6939 = vrcp.f32 %v4058_v29  ;;  %vm4026_vm12 = vweird.f32 %v6936_v42  ;;  %vm4064_vm5 = vweird.f32 %v4058_v29 }
 0x7d0   :  { %v4040_v47 = vmul.f32 %v6938_v43, %v4038_v27  ;;  %6941 = vtanh.f32 %v4014_v26  ;;  %vm4045_vm13 = vweird.f32 %v6938_v43  ;;  %vm4027_vm0 = vmor %vm4025_vm14, %vm4026_vm12 }
 0x7d1   :  { %v4022_v35 = vsub.f32 1.0, %v4021_v18  ;;  %vm4046_vm1 = vmor %vm4044_vm15, %vm4045_vm13 }
 0x7d2   :  { %v4041_v19 = vsub.f32 1.0, %v4040_v47 }
 0x7d3   :  { %v4023_v51 = vmul.f32 %v6936_v42, %v4022_v35  ;;  %v4070_v35 = vand.u32 2147483648, %v4058_v29 }
 0x7d4   :  { %v4042_v24 = vmul.f32 %v6938_v43, %v4041_v19 }
 0x7d5   :  { %v6940_v5 = vpop.eup %6939  ;;  %v4024_v46 = vadd.f32 %v6936_v42, %v4023_v51  ;;  %v4071_v12 = vor.u32 1.1754944e-38, %v4070_v35 }
 0x7d6   :  { %v4043_v0 = vadd.f32 %v6938_v43, %v4042_v24  ;;  %v4060_v53 = vmul.f32 %v6940_v5, %v4058_v29  ;;  %v6942_v36 = vpop.eup %6941  ;;  %vm4065_vm4 = vweird.f32 %v6940_v5 }
 0x7d7   :  { %v4028_v54 = vsel %vm4027_vm0, %v6936_v42, %v4024_v46  ;;  %v4068_v42 = vand.u32 2147483647, %v4058_v29  ;;  %vm4066_vm6 = vmor %vm4064_vm5, %vm4065_vm4 }
 0x7d8   :  { %v4033_v32 = vsel %vm4030_vm2, %v4032_v38, %v4028_v54  ;;  %v4047_v28 = vsel %vm4046_vm1, %v6938_v43, %v4043_v0  ;;  %v4061_v61 = vsub.f32 1.0, %v4060_v53 }
 0x7d9   :  { %v4052_v16 = vsel %vm4049_vm3, %v4051_v11, %v4047_v28  ;;  %v4075_v26 = vmul.f32 %v6942_v36, %v4033_v32  ;;  %vm4069_vm7 = vcmp.eq.f32.partialorder %v4068_v42, 8.507059e+37 }
 0x7da   :  { %v4074_v18 = vmul.f32 %v4052_v16, %v8001_v13  ;;  %v4062_v47 = vmul.f32 %v6940_v5, %v4061_v61 }
 0x7dc   :  { %v8041_v10 = vadd.f32 %v4075_v26, %v4074_v18  ;;  %v4063_v27 = vadd.f32 %v6940_v5, %v4062_v47 }
 0x7de   :  { %6943 = vtanh.f32 %v8041_v10  ;;  %v4067_v19 = vsel %vm4066_vm6, %v6940_v5, %v4063_v27  ;;  %v8251_v27 = vld [vmem:[#allocation13_spill] sm:$0xff] }
 0x7df   :  { %v4072_v62 = vsel %vm4069_vm7, %v4071_v12, %v4067_v19 }
 0x7e4   :  { %v6944_v43 = vpop.eup %6943 }
 0x7e5   :  { %v4078_v51 = vmul.f32 %v6944_v43, %v4072_v62 }
 0x7e7   :  { %v4083_v25 = vpack.c.bf16 %v4078_v51, %v4078_v51 }
 0x7e9   :  { %4092 = vmatmul.bf16.vlgmr.msra.gmra.mxu0 %v4083_v25  ;;  %4105 = vmatmul.bf16.vlgmr.msra.gmra.mxu1 %v4083_v25 }
 0x7ea   :  { %4118 = vmatmul.bf16.vlgmr.msra.gmra.mxu2 %v4083_v25  ;;  %4131 = vmatmul.bf16.vlgmr.msra.gmra.mxu3 %v4083_v25 }
 0x7eb   :  { %4332 = vmatpush.bf16.msra.mxu0 %v7752_v34  ;;  %4345 = vmatpush.bf16.msra.mxu1 %v7754_v41 }
 0x7ec   :  { %4358 = vmatpush.bf16.msra.mxu2 %v7756_v39  ;;  %4371 = vmatpush.bf16.msra.mxu3 %v7759_v44 }
 0x7ef   :  { %4333 = vmatpush.bf16.msra.mxu0 %v7761_v21  ;;  %4346 = vmatpush.bf16.msra.mxu1 %v7764_v9 }
 0x7f0   :  { %4359 = vmatpush.bf16.msra.mxu2 %v7767_v50  ;;  %4372 = vmatpush.bf16.msra.mxu3 %v7771_v15 }
 0x7f3   :  { %4334 = vmatpush.bf16.msra.mxu0 %v7773_v17  ;;  %4347 = vmatpush.bf16.msra.mxu1 %v7776_v48 }
 0x7f4   :  { %4360 = vmatpush.bf16.msra.mxu2 %v7779_v63  ;;  %4373 = vmatpush.bf16.msra.mxu3 %v7783_v2 }
 0x7f7   :  { %4335 = vmatpush.bf16.msra.mxu0 %v7785_v60  ;;  %4348 = vmatpush.bf16.msra.mxu1 %v7788_v7 }
 0x7f8   :  { %4361 = vmatpush.bf16.msra.mxu2 %v7791_v33  ;;  %4374 = vmatpush.bf16.msra.mxu3 %v7795_v30 }
 0x7fb   :  { %4336 = vmatpush.bf16.msra.mxu0 %v7797_v14  ;;  %4349 = vmatpush.bf16.msra.mxu1 %v7800_v20 }
 0x7fc   :  { %4362 = vmatpush.bf16.msra.mxu2 %v7803_v1  ;;  %4375 = vmatpush.bf16.msra.mxu3 %v7807_v31 }
 0x7ff   :  { %4337 = vmatpush.bf16.msra.mxu0 %v7809_v37  ;;  %4350 = vmatpush.bf16.msra.mxu1 %v7812_v40 }
 0x800   :  { %4363 = vmatpush.bf16.msra.mxu2 %v7824_v56  ;;  %4376 = vmatpush.bf16.msra.mxu3 %v7817_v22 }
 0x803   :  { %4338 = vmatpush.bf16.msra.mxu0 %v7819_v4  ;;  %4351 = vmatpush.bf16.msra.mxu1 %v7822_v8 }
 0x804   :  { %4364 = vmatpush.bf16.msra.mxu2 %v7833_v59  ;;  %4377 = vmatpush.bf16.msra.mxu3 %v7829_v3 }
 0x807   :  { %4339 = vmatpush.bf16.msra.mxu0 %v7831_v58  ;;  %4352 = vmatpush.bf16.msra.mxu1 %v7836_v45 }
 0x808   :  { %4365 = vmatpush.bf16.msra.mxu2 %v7839_v23  ;;  %4378 = vmatpush.bf16.msra.mxu3 %v7843_v52 }
 0x866   :  { %v4093_v13 = vpop.f32.mrf.mxu0  ;;  %v4106_v29 = vpop.f32.mrf.mxu1 }
 0x867   :  { %v4136_v24 = vadd.f32 %v4093_v13, %v7937_v57  ;;  %v4137_v6 = vadd.f32 %v4106_v29, %v7939_v49 }
 0x869   :  { %v6400_v5 = vmul.f32 -1.442695, %v4136_v24  ;;  %v6401_v46 = vmul.f32 -1.442695, %v4137_v6 }
 0x86b   :  { %6945 = vpow2.f32 %v6400_v5 }
 0x86c   :  { %6947 = vpow2.f32 %v6401_v46 }
 0x86d   :  { %v4119_v38 = vpop.f32.mrf.mxu2  ;;  %v4132_v0 = vpop.f32.mrf.mxu3 }
 0x86e   :  { %v4139_v53 = vadd.f32 %v4132_v0, %v7945_v55  ;;  %v4095_v11 = vpop.f32.mrf.mxu0  ;;  %v4108_v54 = vpop.f32.mrf.mxu1  ;;  %v4138_v35 = vadd.f32 %v4119_v38, %v8251_v27 }
 0x870   :  { %v6402_v36 = vmul.f32 -1.442695, %v4139_v53 }
 0x871   :  { %v6946_v32 = vpop.eup %6945 }
 0x872   :  { %v6948_v28 = vpop.eup %6947  ;;  %v4143_v61 = vadd.f32 1.0, %v6946_v32  ;;  %6949 = vpow2.f32 %v6402_v36 }
 0x873   :  { %v4162_v16 = vadd.f32 1.0, %v6948_v28 }
 0x874   :  { %6951 = vrcp.f32 %v4143_v61  ;;  %v4155_v62 = vand.u32 2147483648, %v4143_v61  ;;  %v4153_v13 = vand.u32 2147483647, %v4143_v61  ;;  %vm4149_vm10 = vweird.f32 %v4143_v61 }
 0x875   :  { %6953 = vrcp.f32 %v4162_v16  ;;  %v4121_v57 = vpop.f32.mrf.mxu2  ;;  %v4134_v49 = vpop.f32.mrf.mxu3  ;;  %v4174_v51 = vand.u32 2147483648, %v4162_v16  ;;  %v4172_v24 = vand.u32 2147483647, %v4162_v16  ;;  %vm4168_vm11 = vweird.f32 %v4162_v16 }
 0x876   :  { %v4156_v46 = vor.u32 1.1754944e-38, %v4155_v62  ;;  %vm4154_vm14 = vcmp.eq.f32.partialorder %v4153_v13, 8.507059e+37  ;;  %v8253_v13 = vld [vmem:[#allocation15_spill] sm:$0xff] }
 0x877   :  { %v4175_v53 = vor.u32 1.1754944e-38, %v4174_v51  ;;  %vm4173_vm15 = vcmp.eq.f32.partialorder %v4172_v24, 8.507059e+37  ;;  %v8252_v51 = vld [vmem:[#allocation14_spill] sm:$0xff] }
 0x878   :  { %v6950_v26 = vpop.eup %6949 }
 0x879   :  { %v4182_v18 = vadd.f32 1.0, %v6950_v26 }
 0x87a   :  { %v6952_v47 = vpop.eup %6951 }
 0x87b   :  { %v6954_v42 = vpop.eup %6953  ;;  %v4145_v19 = vmul.f32 %v6952_v47, %v4143_v61  ;;  %6955 = vrcp.f32 %v4182_v18  ;;  %vm4150_vm8 = vweird.f32 %v6952_v47  ;;  %vm4188_vm1 = vweird.f32 %v4182_v18 }
 0x87c   :  { %v4164_v55 = vmul.f32 %v6954_v42, %v4162_v16  ;;  %6957 = vtanh.f32 %v4138_v35  ;;  %vm4169_vm9 = vweird.f32 %v6954_v42  ;;  %vm4151_vm12 = vmor %vm4149_vm10, %vm4150_vm8  ;;  %v4194_v35 = vand.u32 2147483648, %v4182_v18 }
 0x87d   :  { %v4146_v12 = vsub.f32 1.0, %v4145_v19  ;;  %vm4170_vm13 = vmor %vm4168_vm11, %vm4169_vm9 }
 0x87e   :  { %v4165_v43 = vsub.f32 1.0, %v4164_v55  ;;  %v4195_v55 = vor.u32 1.1754944e-38, %v4194_v35 }
 0x87f   :  { %v4147_v25 = vmul.f32 %v6952_v47, %v4146_v12 }
 0x880   :  { %v4166_v29 = vmul.f32 %v6954_v42, %v4165_v43 }
 0x881   :  { %v6956_v6 = vpop.eup %6955  ;;  %v4148_v5 = vadd.f32 %v6952_v47, %v4147_v25 }
 0x882   :  { %v4167_v38 = vadd.f32 %v6954_v42, %v4166_v29  ;;  %v4184_v0 = vmul.f32 %v6956_v6, %v4182_v18  ;;  %v6958_v54 = vpop.eup %6957  ;;  %vm4189_vm0 = vweird.f32 %v6956_v6 }
 0x883   :  { %v4152_v11 = vsel %vm4151_vm12, %v6952_v47, %v4148_v5  ;;  %v4192_v47 = vand.u32 2147483647, %v4182_v18  ;;  %vm4190_vm2 = vmor %vm4188_vm1, %vm4189_vm0 }
 0x884   :  { %v4157_v36 = vsel %vm4154_vm14, %v4156_v46, %v4152_v11  ;;  %v4171_v32 = vsel %vm4170_vm13, %v6954_v42, %v4167_v38  ;;  %v4185_v28 = vsub.f32 1.0, %v4184_v0  ;;  %v8254_v38 = vld [vmem:[#allocation17_spill] sm:$0xff] }
 0x885   :  { %v4176_v57 = vsel %vm4173_vm15, %v4175_v53, %v4171_v32  ;;  %v4199_v49 = vmul.f32 %v6958_v54, %v4157_v36  ;;  %vm4193_vm3 = vcmp.eq.f32.partialorder %v4192_v47, 8.507059e+37  ;;  %v8255_v47 = vld [vmem:[#allocation16_spill] sm:$0xff] }
 0x886   :  { %v4198_v26 = vmul.f32 %v4176_v57, %v8041_v10  ;;  %v4186_v27 = vmul.f32 %v6956_v6, %v4185_v28 }
 0x888   :  { %v8081_v61 = vadd.f32 %v4199_v49, %v4198_v26  ;;  %v4187_v16 = vadd.f32 %v6956_v6, %v4186_v27 }
 0x88a   :  { %6959 = vtanh.f32 %v8081_v61  ;;  %v4191_v19 = vsel %vm4190_vm2, %v6956_v6, %v4187_v16 }
 0x88b   :  { %v4196_v12 = vsel %vm4193_vm3, %v4195_v55, %v4191_v19 }
 0x890   :  { %v6960_v42 = vpop.eup %6959 }
 0x891   :  { %v4202_v43 = vmul.f32 %v6960_v42, %v4196_v12 }
 0x893   :  { %v4207_v62 = vpack.c.bf16 %v4202_v43, %v4202_v43 }
 0x895   :  { %4216 = vmatmul.bf16.vlgmr.msrb.gmra.mxu0 %v4207_v62  ;;  %4229 = vmatmul.bf16.vlgmr.msrb.gmra.mxu1 %v4207_v62 }
 0x896   :  { %4242 = vmatmul.bf16.vlgmr.msrb.gmra.mxu2 %v4207_v62  ;;  %4255 = vmatmul.bf16.vlgmr.msrb.gmra.mxu3 %v4207_v62 }
 0x897   :  { %4456 = vmatpush.bf16.msrb.mxu0 %v7752_v34  ;;  %4469 = vmatpush.bf16.msrb.mxu1 %v7754_v41 }
 0x898   :  { %4482 = vmatpush.bf16.msrb.mxu2 %v7756_v39  ;;  %4495 = vmatpush.bf16.msrb.mxu3 %v7759_v44 }
 0x89b   :  { %4457 = vmatpush.bf16.msrb.mxu0 %v7761_v21  ;;  %4470 = vmatpush.bf16.msrb.mxu1 %v7764_v9 }
 0x89c   :  { %4483 = vmatpush.bf16.msrb.mxu2 %v7767_v50  ;;  %4496 = vmatpush.bf16.msrb.mxu3 %v7771_v15 }
 0x89f   :  { %4458 = vmatpush.bf16.msrb.mxu0 %v7773_v17  ;;  %4471 = vmatpush.bf16.msrb.mxu1 %v7776_v48 }
 0x8a0   :  { %4484 = vmatpush.bf16.msrb.mxu2 %v7779_v63  ;;  %4497 = vmatpush.bf16.msrb.mxu3 %v7783_v2 }
 0x8a3   :  { %4459 = vmatpush.bf16.msrb.mxu0 %v7785_v60  ;;  %4472 = vmatpush.bf16.msrb.mxu1 %v7788_v7 }
 0x8a4   :  { %4485 = vmatpush.bf16.msrb.mxu2 %v7791_v33  ;;  %4498 = vmatpush.bf16.msrb.mxu3 %v7795_v30 }
 0x8a7   :  { %4460 = vmatpush.bf16.msrb.mxu0 %v7797_v14  ;;  %4473 = vmatpush.bf16.msrb.mxu1 %v7800_v20 }
 0x8a8   :  { %4486 = vmatpush.bf16.msrb.mxu2 %v7803_v1  ;;  %4499 = vmatpush.bf16.msrb.mxu3 %v7807_v31 }
 0x8ab   :  { %4461 = vmatpush.bf16.msrb.mxu0 %v7809_v37  ;;  %4474 = vmatpush.bf16.msrb.mxu1 %v7812_v40 }
 0x8ac   :  { %4487 = vmatpush.bf16.msrb.mxu2 %v7824_v56  ;;  %4500 = vmatpush.bf16.msrb.mxu3 %v7817_v22 }
 0x8af   :  { %4462 = vmatpush.bf16.msrb.mxu0 %v7819_v4  ;;  %4475 = vmatpush.bf16.msrb.mxu1 %v7822_v8 }
 0x8b0   :  { %4488 = vmatpush.bf16.msrb.mxu2 %v7833_v59  ;;  %4501 = vmatpush.bf16.msrb.mxu3 %v7829_v3 }
 0x8b3   :  { %4463 = vmatpush.bf16.msrb.mxu0 %v7831_v58  ;;  %4476 = vmatpush.bf16.msrb.mxu1 %v7836_v45 }
 0x8b4   :  { %4489 = vmatpush.bf16.msrb.mxu2 %v7839_v23  ;;  %4502 = vmatpush.bf16.msrb.mxu3 %v7843_v52 }
 0x912   :  { %v4217_v10 = vpop.f32.mrf.mxu0  ;;  %v4230_v18 = vpop.f32.mrf.mxu1 }
 0x913   :  { %v4260_v25 = vadd.f32 %v4217_v10, %v8252_v51  ;;  %v4261_v29 = vadd.f32 %v4230_v18, %v8253_v13 }
 0x915   :  { %v6403_v24 = vmul.f32 -1.442695, %v4260_v25  ;;  %v6404_v6 = vmul.f32 -1.442695, %v4261_v29 }
 0x917   :  { %6961 = vpow2.f32 %v6403_v24 }
 0x918   :  { %6963 = vpow2.f32 %v6404_v6 }
 0x919   :  { %v4243_v5 = vpop.f32.mrf.mxu2  ;;  %v4256_v46 = vpop.f32.mrf.mxu3 }
 0x91a   :  { %v4263_v0 = vadd.f32 %v4256_v46, %v8254_v38  ;;  %v4219_v53 = vpop.f32.mrf.mxu0  ;;  %v4232_v11 = vpop.f32.mrf.mxu1  ;;  %v4262_v19 = vadd.f32 %v4243_v5, %v8255_v47 }
 0x91c   :  { %v6405_v54 = vmul.f32 -1.442695, %v4263_v0 }
 0x91d   :  { %v6962_v36 = vpop.eup %6961 }
 0x91e   :  { %v6964_v32 = vpop.eup %6963  ;;  %v4267_v28 = vadd.f32 1.0, %v6962_v36  ;;  %6965 = vpow2.f32 %v6405_v54 }
 0x91f   :  { %v4286_v57 = vadd.f32 1.0, %v6964_v32 }
 0x920   :  { %6967 = vrcp.f32 %v4267_v28  ;;  %v4279_v10 = vand.u32 2147483648, %v4267_v28  ;;  %v4277_v25 = vand.u32 2147483647, %v4267_v28  ;;  %vm4273_vm6 = vweird.f32 %v4267_v28 }
 0x921   :  { %6969 = vrcp.f32 %v4286_v57  ;;  %v4245_v49 = vpop.f32.mrf.mxu2  ;;  %v4258_v26 = vpop.f32.mrf.mxu3  ;;  %v4298_v18 = vand.u32 2147483648, %v4286_v57  ;;  %v4296_v29 = vand.u32 2147483647, %v4286_v57  ;;  %vm4292_vm7 = vweird.f32 %v4286_v57 }
 0x922   :  { %v4280_v5 = vor.u32 1.1754944e-38, %v4279_v10  ;;  %vm4278_vm10 = vcmp.eq.f32.partialorder %v4277_v25, 8.507059e+37  ;;  %v8257_v25 = vld [vmem:[#allocation19_spill] sm:$0xff] }
 0x923   :  { %v4299_v0 = vor.u32 1.1754944e-38, %v4298_v18  ;;  %vm4297_vm11 = vcmp.eq.f32.partialorder %v4296_v29, 8.507059e+37  ;;  %v8256_v18 = vld [vmem:[#allocation18_spill] sm:$0xff] }
 0x924   :  { %v6966_v27 = vpop.eup %6965 }
 0x925   :  { %v4306_v16 = vadd.f32 1.0, %v6966_v27 }
 0x926   :  { %v6968_v35 = vpop.eup %6967 }
 0x927   :  { %v6970_v55 = vpop.eup %6969  ;;  %v4269_v42 = vmul.f32 %v6968_v35, %v4267_v28  ;;  %6971 = vrcp.f32 %v4306_v16  ;;  %vm4274_vm4 = vweird.f32 %v6968_v35  ;;  %vm4312_vm13 = vweird.f32 %v4306_v16 }
 0x928   :  { %v4288_v12 = vmul.f32 %v6970_v55, %v4286_v57  ;;  %6973 = vtanh.f32 %v4262_v19  ;;  %vm4293_vm5 = vweird.f32 %v6970_v55  ;;  %vm4275_vm8 = vmor %vm4273_vm6, %vm4274_vm4  ;;  %v4318_v19 = vand.u32 2147483648, %v4306_v16 }
 0x929   :  { %v4270_v43 = vsub.f32 1.0, %v4269_v42  ;;  %vm4294_vm9 = vmor %vm4292_vm7, %vm4293_vm5 }
 0x92a   :  { %v4289_v62 = vsub.f32 1.0, %v4288_v12  ;;  %v4319_v12 = vor.u32 1.1754944e-38, %v4318_v19 }
 0x92b   :  { %v4271_v51 = vmul.f32 %v6968_v35, %v4270_v43 }
 0x92c   :  { %v4290_v13 = vmul.f32 %v6970_v55, %v4289_v62 }
 0x92d   :  { %v6972_v24 = vpop.eup %6971  ;;  %v4272_v6 = vadd.f32 %v6968_v35, %v4271_v51 }
 0x92e   :  { %v4291_v46 = vadd.f32 %v6970_v55, %v4290_v13  ;;  %v4308_v38 = vmul.f32 %v6972_v24, %v4306_v16  ;;  %v6974_v11 = vpop.eup %6973  ;;  %vm4313_vm12 = vweird.f32 %v6972_v24 }
 0x92f   :  { %v4276_v53 = vsel %vm4275_vm8, %v6968_v35, %v4272_v6  ;;  %v4316_v35 = vand.u32 2147483647, %v4306_v16  ;;  %vm4314_vm14 = vmor %vm4312_vm13, %vm4313_vm12 }
 0x930   :  { %v4281_v54 = vsel %vm4278_vm10, %v4280_v5, %v4276_v53  ;;  %v4295_v36 = vsel %vm4294_vm9, %v6970_v55, %v4291_v46  ;;  %v4309_v32 = vsub.f32 1.0, %v4308_v38  ;;  %v8258_v46 = vld [vmem:[#allocation21_spill] sm:$0xff] }
 0x931   :  { %v4300_v49 = vsel %vm4297_vm11, %v4299_v0, %v4295_v36  ;;  %v4323_v26 = vmul.f32 %v6974_v11, %v4281_v54  ;;  %vm4317_vm15 = vcmp.eq.f32.partialorder %v4316_v35, 8.507059e+37  ;;  %v8259_v35 = vld [vmem:[#allocation20_spill] sm:$0xff] }
 0x932   :  { %v4322_v27 = vmul.f32 %v4300_v49, %v8081_v61  ;;  %v4310_v47 = vmul.f32 %v6972_v24, %v4309_v32 }
 0x934   :  { %v8121_v28 = vadd.f32 %v4323_v26, %v4322_v27  ;;  %v4311_v57 = vadd.f32 %v6972_v24, %v4310_v47 }
 0x936   :  { %6975 = vtanh.f32 %v8121_v28  ;;  %v4315_v42 = vsel %vm4314_vm14, %v6972_v24, %v4311_v57 }
 0x937   :  { %v4320_v43 = vsel %vm4317_vm15, %v4319_v12, %v4315_v42 }
 0x93c   :  { %v6976_v55 = vpop.eup %6975 }
 0x93d   :  { %v4326_v62 = vmul.f32 %v6976_v55, %v4320_v43 }
 0x93f   :  { %v4331_v10 = vpack.c.bf16 %v4326_v62, %v4326_v62 }
 0x941   :  { %4340 = vmatmul.bf16.vlgmr.msra.gmra.mxu0 %v4331_v10  ;;  %4353 = vmatmul.bf16.vlgmr.msra.gmra.mxu1 %v4331_v10 }
 0x942   :  { %4366 = vmatmul.bf16.vlgmr.msra.gmra.mxu2 %v4331_v10  ;;  %4379 = vmatmul.bf16.vlgmr.msra.gmra.mxu3 %v4331_v10 }
 0x943   :  { %4580 = vmatpush.bf16.msra.mxu0 %v7752_v34  ;;  %4593 = vmatpush.bf16.msra.mxu1 %v7754_v41 }
 0x944   :  { %4606 = vmatpush.bf16.msra.mxu2 %v7756_v39  ;;  %4619 = vmatpush.bf16.msra.mxu3 %v7759_v44 }
 0x947   :  { %4581 = vmatpush.bf16.msra.mxu0 %v7761_v21  ;;  %4594 = vmatpush.bf16.msra.mxu1 %v7764_v9 }
 0x948   :  { %4607 = vmatpush.bf16.msra.mxu2 %v7767_v50  ;;  %4620 = vmatpush.bf16.msra.mxu3 %v7771_v15 }
 0x94b   :  { %4582 = vmatpush.bf16.msra.mxu0 %v7773_v17  ;;  %4595 = vmatpush.bf16.msra.mxu1 %v7776_v48 }
 0x94c   :  { %4608 = vmatpush.bf16.msra.mxu2 %v7779_v63  ;;  %4621 = vmatpush.bf16.msra.mxu3 %v7783_v2 }
 0x94f   :  { %4583 = vmatpush.bf16.msra.mxu0 %v7785_v60  ;;  %4596 = vmatpush.bf16.msra.mxu1 %v7788_v7 }
 0x950   :  { %4609 = vmatpush.bf16.msra.mxu2 %v7791_v33  ;;  %4622 = vmatpush.bf16.msra.mxu3 %v7795_v30 }
 0x953   :  { %4584 = vmatpush.bf16.msra.mxu0 %v7797_v14  ;;  %4597 = vmatpush.bf16.msra.mxu1 %v7800_v20 }
 0x954   :  { %4610 = vmatpush.bf16.msra.mxu2 %v7803_v1  ;;  %4623 = vmatpush.bf16.msra.mxu3 %v7807_v31 }
 0x957   :  { %4585 = vmatpush.bf16.msra.mxu0 %v7809_v37  ;;  %4598 = vmatpush.bf16.msra.mxu1 %v7812_v40 }
 0x958   :  { %4611 = vmatpush.bf16.msra.mxu2 %v7824_v56  ;;  %4624 = vmatpush.bf16.msra.mxu3 %v7817_v22 }
 0x95b   :  { %4586 = vmatpush.bf16.msra.mxu0 %v7819_v4  ;;  %4599 = vmatpush.bf16.msra.mxu1 %v7822_v8 }
 0x95c   :  { %4612 = vmatpush.bf16.msra.mxu2 %v7833_v59  ;;  %4625 = vmatpush.bf16.msra.mxu3 %v7829_v3 }
 0x95f   :  { %4587 = vmatpush.bf16.msra.mxu0 %v7831_v58  ;;  %4600 = vmatpush.bf16.msra.mxu1 %v7836_v45 }
 0x960   :  { %4613 = vmatpush.bf16.msra.mxu2 %v7839_v23  ;;  %4626 = vmatpush.bf16.msra.mxu3 %v7843_v52 }
 0x9be   :  { %v4341_v61 = vpop.f32.mrf.mxu0  ;;  %v4354_v16 = vpop.f32.mrf.mxu1 }
 0x9bf   :  { %v4384_v51 = vadd.f32 %v4341_v61, %v8256_v18  ;;  %v4385_v13 = vadd.f32 %v4354_v16, %v8257_v25 }
 0x9c1   :  { %v6406_v29 = vmul.f32 -1.442695, %v4384_v51  ;;  %v6407_v24 = vmul.f32 -1.442695, %v4385_v13 }
 0x9c3   :  { %6977 = vpow2.f32 %v6406_v29 }
 0x9c4   :  { %6979 = vpow2.f32 %v6407_v24 }
 0x9c5   :  { %v4367_v6 = vpop.f32.mrf.mxu2  ;;  %v4380_v5 = vpop.f32.mrf.mxu3 }
 0x9c6   :  { %v4387_v38 = vadd.f32 %v4380_v5, %v8258_v46  ;;  %v4343_v0 = vpop.f32.mrf.mxu0  ;;  %v4356_v53 = vpop.f32.mrf.mxu1  ;;  %v4386_v42 = vadd.f32 %v4367_v6, %v8259_v35 }
 0x9c8   :  { %v6408_v11 = vmul.f32 -1.442695, %v4387_v38 }
 0x9c9   :  { %v6978_v54 = vpop.eup %6977 }
 0x9ca   :  { %v6980_v36 = vpop.eup %6979  ;;  %v4391_v32 = vadd.f32 1.0, %v6978_v54  ;;  %6981 = vpow2.f32 %v6408_v11 }
 0x9cb   :  { %v4410_v49 = vadd.f32 1.0, %v6980_v36 }
 0x9cc   :  { %6983 = vrcp.f32 %v4391_v32  ;;  %v4403_v61 = vand.u32 2147483648, %v4391_v32  ;;  %v4401_v51 = vand.u32 2147483647, %v4391_v32  ;;  %vm4397_vm2 = vweird.f32 %v4391_v32 }
 0x9cd   :  { %6985 = vrcp.f32 %v4410_v49  ;;  %v4369_v26 = vpop.f32.mrf.mxu2  ;;  %v4382_v27 = vpop.f32.mrf.mxu3  ;;  %v4422_v16 = vand.u32 2147483648, %v4410_v49  ;;  %v4420_v13 = vand.u32 2147483647, %v4410_v49  ;;  %vm4416_vm3 = vweird.f32 %v4410_v49 }
 0x9ce   :  { %v4404_v6 = vor.u32 1.1754944e-38, %v4403_v61  ;;  %vm4402_vm6 = vcmp.eq.f32.partialorder %v4401_v51, 8.507059e+37 }
 0x9cf   :  { %v4423_v38 = vor.u32 1.1754944e-38, %v4422_v16  ;;  %vm4421_vm7 = vcmp.eq.f32.partialorder %v4420_v13, 8.507059e+37 }
 0x9d0   :  { %v6982_v47 = vpop.eup %6981 }
 0x9d1   :  { %v4430_v57 = vadd.f32 1.0, %v6982_v47 }
 0x9d2   :  { %v6984_v19 = vpop.eup %6983 }
 0x9d3   :  { %v6986_v12 = vpop.eup %6985  ;;  %v4393_v55 = vmul.f32 %v6984_v19, %v4391_v32  ;;  %6987 = vrcp.f32 %v4430_v57  ;;  %vm4398_vm0 = vweird.f32 %v6984_v19  ;;  %vm4436_vm9 = vweird.f32 %v4430_v57 }
 0x9d4   :  { %v4412_v43 = vmul.f32 %v6986_v12, %v4410_v49  ;;  %6989 = vtanh.f32 %v4386_v42  ;;  %vm4417_vm1 = vweird.f32 %v6986_v12  ;;  %vm4399_vm4 = vmor %vm4397_vm2, %vm4398_vm0  ;;  %v4442_v42 = vand.u32 2147483648, %v4430_v57 }
 0x9d5   :  { %v4394_v62 = vsub.f32 1.0, %v4393_v55  ;;  %vm4418_vm5 = vmor %vm4416_vm3, %vm4417_vm1 }
 0x9d6   :  { %v4413_v10 = vsub.f32 1.0, %v4412_v43  ;;  %v4443_v43 = vor.u32 1.1754944e-38, %v4442_v42 }
 0x9d7   :  { %v4395_v18 = vmul.f32 %v6984_v19, %v4394_v62 }
 0x9d8   :  { %v4414_v25 = vmul.f32 %v6986_v12, %v4413_v10 }
 0x9d9   :  { %v6988_v29 = vpop.eup %6987  ;;  %v4396_v24 = vadd.f32 %v6984_v19, %v4395_v18 }
 0x9da   :  { %v4415_v5 = vadd.f32 %v6986_v12, %v4414_v25  ;;  %v4432_v46 = vmul.f32 %v6988_v29, %v4430_v57  ;;  %v6990_v53 = vpop.eup %6989  ;;  %vm4437_vm8 = vweird.f32 %v6988_v29 }
 0x9db   :  { %v4400_v0 = vsel %vm4399_vm4, %v6984_v19, %v4396_v24  ;;  %v4440_v19 = vand.u32 2147483647, %v4430_v57  ;;  %vm4438_vm10 = vmor %vm4436_vm9, %vm4437_vm8 }
 0x9dc   :  { %v4405_v11 = vsel %vm4402_vm6, %v4404_v6, %v4400_v0  ;;  %v4419_v54 = vsel %vm4418_vm5, %v6986_v12, %v4415_v5  ;;  %v4433_v36 = vsub.f32 1.0, %v4432_v46 }
 0x9dd   :  { %v4424_v26 = vsel %vm4421_vm7, %v4423_v38, %v4419_v54  ;;  %v4447_v27 = vmul.f32 %v6990_v53, %v4405_v11  ;;  %vm4441_vm11 = vcmp.eq.f32.partialorder %v4440_v19, 8.507059e+37 }
 0x9de   :  { %v4446_v47 = vmul.f32 %v4424_v26, %v8121_v28  ;;  %v4434_v35 = vmul.f32 %v6988_v29, %v4433_v36 }
 0x9e0   :  { %v8161_v32 = vadd.f32 %v4447_v27, %v4446_v47  ;;  %v4435_v49 = vadd.f32 %v6988_v29, %v4434_v35 }
 0x9e2   :  { %6991 = vtanh.f32 %v8161_v32  ;;  %v4439_v55 = vsel %vm4438_vm10, %v6988_v29, %v4435_v49 }
 0x9e3   :  { %v4444_v62 = vsel %vm4441_vm11, %v4443_v43, %v4439_v55 }
 0x9e8   :  { %v6992_v12 = vpop.eup %6991 }
 0x9e9   :  { %v4450_v10 = vmul.f32 %v6992_v12, %v4444_v62 }
 0x9eb   :  { %v4455_v61 = vpack.c.bf16 %v4450_v10, %v4450_v10 }
 0x9ed   :  { %4464 = vmatmul.bf16.vlgmr.msrb.gmra.mxu0 %v4455_v61  ;;  %4477 = vmatmul.bf16.vlgmr.msrb.gmra.mxu1 %v4455_v61 }
 0x9ee   :  { %4490 = vmatmul.bf16.vlgmr.msrb.gmra.mxu2 %v4455_v61  ;;  %4503 = vmatmul.bf16.vlgmr.msrb.gmra.mxu3 %v4455_v61 }
 0x9ef   :  { %4704 = vmatpush.bf16.msrb.mxu0 %v7752_v34  ;;  %4717 = vmatpush.bf16.msrb.mxu1 %v7754_v41 }
 0x9f0   :  { %4730 = vmatpush.bf16.msrb.mxu2 %v7756_v39  ;;  %4743 = vmatpush.bf16.msrb.mxu3 %v7759_v44  ;;  %v8260_v39 = vld [vmem:[#allocation22_spill] sm:$0xff] }
 0x9f3   :  { %4705 = vmatpush.bf16.msrb.mxu0 %v7761_v21  ;;  %4718 = vmatpush.bf16.msrb.mxu1 %v7764_v9  ;;  %v8261_v21 = vld [vmem:[#allocation23_spill] sm:$0xff] }
 0x9f4   :  { %4731 = vmatpush.bf16.msrb.mxu2 %v7767_v50  ;;  %4744 = vmatpush.bf16.msrb.mxu3 %v7771_v15 }
 0x9f7   :  { %4706 = vmatpush.bf16.msrb.mxu0 %v7773_v17  ;;  %4719 = vmatpush.bf16.msrb.mxu1 %v7776_v48 }
 0x9f8   :  { %4732 = vmatpush.bf16.msrb.mxu2 %v7779_v63  ;;  %4745 = vmatpush.bf16.msrb.mxu3 %v7783_v2  ;;  %v8262_v63 = vld [vmem:[#allocation25_spill] sm:$0xff] }
 0x9fb   :  { %4707 = vmatpush.bf16.msrb.mxu0 %v7785_v60  ;;  %4720 = vmatpush.bf16.msrb.mxu1 %v7788_v7 }
 0x9fc   :  { %4733 = vmatpush.bf16.msrb.mxu2 %v7791_v33  ;;  %4746 = vmatpush.bf16.msrb.mxu3 %v7795_v30 }
 0x9ff   :  { %4708 = vmatpush.bf16.msrb.mxu0 %v7797_v14  ;;  %4721 = vmatpush.bf16.msrb.mxu1 %v7800_v20 }
 0xa00   :  { %4734 = vmatpush.bf16.msrb.mxu2 %v7803_v1  ;;  %4747 = vmatpush.bf16.msrb.mxu3 %v7807_v31 }
 0xa03   :  { %4709 = vmatpush.bf16.msrb.mxu0 %v7809_v37  ;;  %4722 = vmatpush.bf16.msrb.mxu1 %v7812_v40 }
 0xa04   :  { %4735 = vmatpush.bf16.msrb.mxu2 %v7824_v56  ;;  %4748 = vmatpush.bf16.msrb.mxu3 %v7817_v22 }
 0xa07   :  { %4710 = vmatpush.bf16.msrb.mxu0 %v7819_v4  ;;  %4723 = vmatpush.bf16.msrb.mxu1 %v7822_v8  ;;  %v8263_v8 = vld [vmem:[#allocation24_spill] sm:$0xff] }
 0xa08   :  { %4736 = vmatpush.bf16.msrb.mxu2 %v7833_v59  ;;  %4749 = vmatpush.bf16.msrb.mxu3 %v7829_v3 }
 0xa0b   :  { %4711 = vmatpush.bf16.msrb.mxu0 %v7831_v58  ;;  %4724 = vmatpush.bf16.msrb.mxu1 %v7836_v45 }
 0xa0c   :  { %4737 = vmatpush.bf16.msrb.mxu2 %v7839_v23  ;;  %4750 = vmatpush.bf16.msrb.mxu3 %v7843_v52 }
 0xa6a   :  { %v4465_v34 = vpop.f32.mrf.mxu0  ;;  %v4478_v41 = vpop.f32.mrf.mxu1 }
 0xa6b   :  { %v4508_v44 = vadd.f32 %v4465_v34, %v8260_v39  ;;  %v4509_v9 = vadd.f32 %v4478_v41, %v8261_v21  ;;  %v8264_v34 = vld [vmem:[#allocation26_spill] sm:$0xff]  ;;  %v8265_v39 = vld [vmem:[#allocation27_spill] sm:$0xff] }
 0xa6d   :  { %v6409_v50 = vmul.f32 -1.442695, %v4508_v44  ;;  %v6410_v15 = vmul.f32 -1.442695, %v4509_v9 }
 0xa6f   :  { %6993 = vpow2.f32 %v6409_v50 }
 0xa70   :  { %6995 = vpow2.f32 %v6410_v15 }
 0xa71   :  { %v4491_v17 = vpop.f32.mrf.mxu2  ;;  %v4504_v48 = vpop.f32.mrf.mxu3 }
 0xa72   :  { %v4511_v2 = vadd.f32 %v4504_v48, %v8262_v63  ;;  %v4467_v60 = vpop.f32.mrf.mxu0  ;;  %v4480_v7 = vpop.f32.mrf.mxu1  ;;  %v4510_v56 = vadd.f32 %v4491_v17, %v8263_v8  ;;  %v8266_v17 = vld [vmem:[#allocation29_spill] sm:$0xff] }
 0xa74   :  { %v6411_v33 = vmul.f32 -1.442695, %v4511_v2 }
 0xa75   :  { %v6994_v30 = vpop.eup %6993 }
 0xa76   :  { %v6996_v14 = vpop.eup %6995  ;;  %v4515_v20 = vadd.f32 1.0, %v6994_v30  ;;  %6997 = vpow2.f32 %v6411_v33 }
 0xa77   :  { %v4534_v1 = vadd.f32 1.0, %v6996_v14 }
 0xa78   :  { %6999 = vrcp.f32 %v4515_v20  ;;  %v4527_v52 = vand.u32 2147483648, %v4515_v20  ;;  %v4525_v16 = vand.u32 2147483647, %v4515_v20  ;;  %vm4521_vm14 = vweird.f32 %v4515_v20 }
 0xa79   :  { %7001 = vrcp.f32 %v4534_v1  ;;  %v4493_v31 = vpop.f32.mrf.mxu2  ;;  %v4506_v37 = vpop.f32.mrf.mxu3  ;;  %v4546_v28 = vand.u32 2147483648, %v4534_v1  ;;  %v4544_v51 = vand.u32 2147483647, %v4534_v1  ;;  %vm4540_vm15 = vweird.f32 %v4534_v1 }
 0xa7a   :  { %v4528_v29 = vor.u32 1.1754944e-38, %v4527_v52  ;;  %vm4526_vm2 = vcmp.eq.f32.partialorder %v4525_v16, 8.507059e+37 }
 0xa7b   :  { %v4547_v5 = vor.u32 1.1754944e-38, %v4546_v28  ;;  %vm4545_vm3 = vcmp.eq.f32.partialorder %v4544_v51, 8.507059e+37 }
 0xa7c   :  { %v6998_v40 = vpop.eup %6997 }
 0xa7d   :  { %v4554_v22 = vadd.f32 1.0, %v6998_v40 }
 0xa7e   :  { %v7000_v4 = vpop.eup %6999 }
 0xa7f   :  { %v7002_v3 = vpop.eup %7001  ;;  %v4517_v58 = vmul.f32 %v7000_v4, %v4515_v20  ;;  %7003 = vrcp.f32 %v4554_v22  ;;  %vm4522_vm12 = vweird.f32 %v7000_v4  ;;  %v4566_v49 = vand.u32 2147483648, %v4554_v22 }
 0xa80   :  { %v4536_v59 = vmul.f32 %v7002_v3, %v4534_v1  ;;  %7005 = vtanh.f32 %v4510_v56  ;;  %vm4541_vm13 = vweird.f32 %v7002_v3  ;;  %vm4523_vm0 = vmor %vm4521_vm14, %vm4522_vm12  ;;  %vm4560_vm5 = vweird.f32 %v4554_v22 }
 0xa81   :  { %v4518_v45 = vsub.f32 1.0, %v4517_v58  ;;  %vm4542_vm1 = vmor %vm4540_vm15, %vm4541_vm13  ;;  %v4564_v42 = vand.u32 2147483647, %v4554_v22  ;;  %v4567_v55 = vor.u32 1.1754944e-38, %v4566_v49 }
 0xa82   :  { %v4537_v23 = vsub.f32 1.0, %v4536_v59 }
 0xa83   :  { %v4519_v57 = vmul.f32 %v7000_v4, %v4518_v45  ;;  %vm4565_vm7 = vcmp.eq.f32.partialorder %v4564_v42, 8.507059e+37 }
 0xa84   :  { %v4538_v18 = vmul.f32 %v7002_v3, %v4537_v23 }
 0xa85   :  { %v7004_v25 = vpop.eup %7003  ;;  %v4520_v13 = vadd.f32 %v7000_v4, %v4519_v57 }
 0xa86   :  { %v4539_v24 = vadd.f32 %v7002_v3, %v4538_v18  ;;  %v4556_v6 = vmul.f32 %v7004_v25, %v4554_v22  ;;  %v7006_v38 = vpop.eup %7005  ;;  %vm4561_vm4 = vweird.f32 %v7004_v25  ;;  %v8267_v22 = vld [vmem:[#allocation28_spill] sm:$0xff] }
 0xa87   :  { %v4524_v46 = vsel %vm4523_vm0, %v7000_v4, %v4520_v13  ;;  %vm4562_vm6 = vmor %vm4560_vm5, %vm4561_vm4 }
 0xa88   :  { %v4529_v0 = vsel %vm4526_vm2, %v4528_v29, %v4524_v46  ;;  %v4543_v53 = vsel %vm4542_vm1, %v7002_v3, %v4539_v24  ;;  %v4557_v11 = vsub.f32 1.0, %v4556_v6 }
 0xa89   :  { %v4548_v54 = vsel %vm4545_vm3, %v4547_v5, %v4543_v53  ;;  %v4571_v36 = vmul.f32 %v7006_v38, %v4529_v0 }
 0xa8a   :  { %v4570_v26 = vmul.f32 %v4548_v54, %v8161_v32  ;;  %v4558_v27 = vmul.f32 %v7004_v25, %v4557_v11 }
 0xa8c   :  { %v8201_v47 = vadd.f32 %v4571_v36, %v4570_v26  ;;  %v4559_v35 = vadd.f32 %v7004_v25, %v4558_v27 }
 0xa8e   :  { %7007 = vtanh.f32 %v8201_v47  ;;  %v4563_v19 = vsel %vm4562_vm6, %v7004_v25, %v4559_v35 }
 0xa8f   :  { %v4568_v12 = vsel %vm4565_vm7, %v4567_v55, %v4563_v19 }
 0xa94   :  { %v7008_v43 = vpop.eup %7007 }
 0xa95   :  { %v4574_v62 = vmul.f32 %v7008_v43, %v4568_v12 }
 0xa97   :  { %v4579_v10 = vpack.c.bf16 %v4574_v62, %v4574_v62 }
 0xa99   :  { %4588 = vmatmul.bf16.vlgmr.msra.gmra.mxu0 %v4579_v10  ;;  %4601 = vmatmul.bf16.vlgmr.msra.gmra.mxu1 %v4579_v10 }
 0xa9a   :  { %4614 = vmatmul.bf16.vlgmr.msra.gmra.mxu2 %v4579_v10  ;;  %4627 = vmatmul.bf16.vlgmr.msra.gmra.mxu3 %v4579_v10 }
 0xb16   :  { %v4589_v32 = vpop.f32.mrf.mxu0  ;;  %v4602_v61 = vpop.f32.mrf.mxu1 }
 0xb17   :  { %v4632_v41 = vadd.f32 %v4589_v32, %v8264_v34  ;;  %v4633_v44 = vadd.f32 %v4602_v61, %v8265_v39  ;;  %v8268_v32 = vld [vmem:[#allocation30_spill] sm:$0xff]  ;;  %v8269_v34 = vld [vmem:[#allocation31_spill] sm:$0xff] }
 0xb19   :  { %v6412_v21 = vmul.f32 -1.442695, %v4632_v41  ;;  %v6413_v9 = vmul.f32 -1.442695, %v4633_v44 }
 0xb1b   :  { %7009 = vpow2.f32 %v6412_v21 }
 0xb1c   :  { %7011 = vpow2.f32 %v6413_v9 }
 0xb1d   :  { %v4615_v50 = vpop.f32.mrf.mxu2  ;;  %v4628_v15 = vpop.f32.mrf.mxu3 }
 0xb1e   :  { %v4635_v48 = vadd.f32 %v4628_v15, %v8266_v17  ;;  %v4591_v63 = vpop.f32.mrf.mxu0  ;;  %v4604_v2 = vpop.f32.mrf.mxu1  ;;  %v4634_v4 = vadd.f32 %v4615_v50, %v8267_v22  ;;  %v8270_v50 = vld [vmem:[#allocation33_spill] sm:$0xff] }
 0xb20   :  { %v6414_v60 = vmul.f32 -1.442695, %v4635_v48 }
 0xb21   :  { %v7010_v7 = vpop.eup %7009 }
 0xb22   :  { %v7012_v33 = vpop.eup %7011  ;;  %v4639_v30 = vadd.f32 1.0, %v7010_v7  ;;  %7013 = vpow2.f32 %v6414_v60 }
 0xb23   :  { %v4658_v14 = vadd.f32 1.0, %v7012_v33 }
 0xb24   :  { %7015 = vrcp.f32 %v4639_v30  ;;  %v4651_v45 = vand.u32 2147483648, %v4639_v30  ;;  %v4649_v28 = vand.u32 2147483647, %v4639_v30  ;;  %vm4645_vm10 = vweird.f32 %v4639_v30 }
 0xb25   :  { %7017 = vrcp.f32 %v4658_v14  ;;  %v4617_v20 = vpop.f32.mrf.mxu2  ;;  %v4630_v1 = vpop.f32.mrf.mxu3  ;;  %v4670_v23 = vand.u32 2147483648, %v4658_v14  ;;  %v4668_v16 = vand.u32 2147483647, %v4658_v14  ;;  %vm4664_vm11 = vweird.f32 %v4658_v14 }
 0xb26   :  { %v4652_v25 = vor.u32 1.1754944e-38, %v4651_v45  ;;  %vm4650_vm14 = vcmp.eq.f32.partialorder %v4649_v28, 8.507059e+37 }
 0xb27   :  { %v4671_v24 = vor.u32 1.1754944e-38, %v4670_v23  ;;  %vm4669_vm15 = vcmp.eq.f32.partialorder %v4668_v16, 8.507059e+37 }
 0xb28   :  { %v7014_v31 = vpop.eup %7013 }
 0xb29   :  { %v4678_v37 = vadd.f32 1.0, %v7014_v31 }
 0xb2a   :  { %v7016_v40 = vpop.eup %7015 }
 0xb2b   :  { %v7018_v8 = vpop.eup %7017  ;;  %v4641_v56 = vmul.f32 %v7016_v40, %v4639_v30  ;;  %7019 = vrcp.f32 %v4678_v37  ;;  %vm4646_vm8 = vweird.f32 %v7016_v40  ;;  %v4690_v35 = vand.u32 2147483648, %v4678_v37 }
 0xb2c   :  { %v4660_v3 = vmul.f32 %v7018_v8, %v4658_v14  ;;  %7021 = vtanh.f32 %v4634_v4  ;;  %vm4665_vm9 = vweird.f32 %v7018_v8  ;;  %vm4647_vm12 = vmor %vm4645_vm10, %vm4646_vm8  ;;  %vm4684_vm1 = vweird.f32 %v4678_v37 }
 0xb2d   :  { %v4642_v58 = vsub.f32 1.0, %v4641_v56  ;;  %vm4666_vm13 = vmor %vm4664_vm11, %vm4665_vm9  ;;  %v4688_v49 = vand.u32 2147483647, %v4678_v37  ;;  %v4691_v19 = vor.u32 1.1754944e-38, %v4690_v35 }
 0xb2e   :  { %v4661_v59 = vsub.f32 1.0, %v4660_v3 }
 0xb2f   :  { %v4643_v52 = vmul.f32 %v7016_v40, %v4642_v58  ;;  %vm4689_vm3 = vcmp.eq.f32.partialorder %v4688_v49, 8.507059e+37 }
 0xb30   :  { %v4662_v57 = vmul.f32 %v7018_v8, %v4661_v59 }
 0xb31   :  { %v7020_v18 = vpop.eup %7019  ;;  %v4644_v51 = vadd.f32 %v7016_v40, %v4643_v52 }
 0xb32   :  { %v4663_v13 = vadd.f32 %v7018_v8, %v4662_v57  ;;  %v4680_v29 = vmul.f32 %v7020_v18, %v4678_v37  ;;  %v7022_v5 = vpop.eup %7021  ;;  %vm4685_vm0 = vweird.f32 %v7020_v18  ;;  %v8271_v37 = vld [vmem:[#allocation32_spill] sm:$0xff] }
 0xb33   :  { %v4648_v6 = vsel %vm4647_vm12, %v7016_v40, %v4644_v51  ;;  %vm4686_vm2 = vmor %vm4684_vm1, %vm4685_vm0 }
 0xb34   :  { %v4653_v46 = vsel %vm4650_vm14, %v4652_v25, %v4648_v6  ;;  %v4667_v38 = vsel %vm4666_vm13, %v7018_v8, %v4663_v13  ;;  %v4681_v0 = vsub.f32 1.0, %v4680_v29 }
 0xb35   :  { %v4672_v53 = vsel %vm4669_vm15, %v4671_v24, %v4667_v38  ;;  %v4695_v11 = vmul.f32 %v7022_v5, %v4653_v46 }
 0xb36   :  { %v4694_v54 = vmul.f32 %v4672_v53, %v8201_v47  ;;  %v4682_v36 = vmul.f32 %v7020_v18, %v4681_v0 }
 0xb38   :  { %v8209_v26 = vadd.f32 %v4695_v11, %v4694_v54  ;;  %v4683_v27 = vadd.f32 %v7020_v18, %v4682_v36 }
 0xb3a   :  { %7023 = vtanh.f32 %v8209_v26  ;;  %v4687_v42 = vsel %vm4686_vm2, %v7020_v18, %v4683_v27 }
 0xb3b   :  { %v4692_v43 = vsel %vm4689_vm3, %v4691_v19, %v4687_v42 }
 0xb40   :  { %v7024_v55 = vpop.eup %7023 }
 0xb41   :  { %v4698_v12 = vmul.f32 %v7024_v55, %v4692_v43 }
 0xb43   :  { %v4703_v62 = vpack.c.bf16 %v4698_v12, %v4698_v12 }
 0xb45   :  { %4712 = vmatmul.bf16.vlgmr.msrb.gmra.mxu0 %v4703_v62  ;;  %4725 = vmatmul.bf16.vlgmr.msrb.gmra.mxu1 %v4703_v62 }
 0xb46   :  { %4738 = vmatmul.bf16.vlgmr.msrb.gmra.mxu2 %v4703_v62  ;;  %4751 = vmatmul.bf16.vlgmr.msrb.gmra.mxu3 %v4703_v62 }
 0xbc2   :  { %v4713_v47 = vpop.f32.mrf.mxu0  ;;  %v4726_v10 = vpop.f32.mrf.mxu1 }
 0xbc3   :  { %v4756_v61 = vadd.f32 %v4713_v47, %v8268_v32  ;;  %v4757_v41 = vadd.f32 %v4726_v10, %v8269_v34 }
 0xbc5   :  { %v6415_v39 = vmul.f32 -1.442695, %v4756_v61  ;;  %v6416_v44 = vmul.f32 -1.442695, %v4757_v41 }
 0xbc7   :  { %7025 = vpow2.f32 %v6415_v39 }
 0xbc8   :  { %7027 = vpow2.f32 %v6416_v44 }
 0xbc9   :  { %v4739_v21 = vpop.f32.mrf.mxu2  ;;  %v4752_v9 = vpop.f32.mrf.mxu3 }
 0xbca   :  { %v4759_v15 = vadd.f32 %v4752_v9, %v8270_v50  ;;  %v4715_v17 = vpop.f32.mrf.mxu0  ;;  %v4728_v48 = vpop.f32.mrf.mxu1  ;;  %v4758_v40 = vadd.f32 %v4739_v21, %v8271_v37 }
 0xbcc   :  { %v6417_v63 = vmul.f32 -1.442695, %v4759_v15 }
 0xbcd   :  { %v7026_v2 = vpop.eup %7025 }
 0xbce   :  { %v7028_v60 = vpop.eup %7027  ;;  %v4763_v7 = vadd.f32 1.0, %v7026_v2  ;;  %7029 = vpow2.f32 %v6417_v63 }
 0xbcf   :  { %v4782_v33 = vadd.f32 1.0, %v7028_v60 }
 0xbd0   :  { %7031 = vrcp.f32 %v4763_v7  ;;  %v4775_v58 = vand.u32 2147483648, %v4763_v7  ;;  %v4773_v23 = vand.u32 2147483647, %v4763_v7  ;;  %vm4769_vm6 = vweird.f32 %v4763_v7 }
 0xbd1   :  { %7033 = vrcp.f32 %v4782_v33  ;;  %v4741_v30 = vpop.f32.mrf.mxu2  ;;  %v4754_v14 = vpop.f32.mrf.mxu3  ;;  %v4794_v59 = vand.u32 2147483648, %v4782_v33  ;;  %v4792_v28 = vand.u32 2147483647, %v4782_v33  ;;  %vm4788_vm7 = vweird.f32 %v4782_v33 }
 0xbd2   :  { %v4776_v18 = vor.u32 1.1754944e-38, %v4775_v58  ;;  %vm4774_vm10 = vcmp.eq.f32.partialorder %v4773_v23, 8.507059e+37 }
 0xbd3   :  { %v4795_v13 = vor.u32 1.1754944e-38, %v4794_v59  ;;  %vm4793_vm11 = vcmp.eq.f32.partialorder %v4792_v28, 8.507059e+37 }
 0xbd4   :  { %v7030_v20 = vpop.eup %7029 }
 0xbd5   :  { %v4802_v1 = vadd.f32 1.0, %v7030_v20 }
 0xbd6   :  { %v7032_v31 = vpop.eup %7031 }
 0xbd7   :  { %v7034_v22 = vpop.eup %7033  ;;  %v4765_v4 = vmul.f32 %v7032_v31, %v4763_v7  ;;  %7035 = vrcp.f32 %v4802_v1  ;;  %vm4770_vm4 = vweird.f32 %v7032_v31  ;;  %v4814_v27 = vand.u32 2147483648, %v4802_v1 }
 0xbd8   :  { %v4784_v8 = vmul.f32 %v7034_v22, %v4782_v33  ;;  %7037 = vtanh.f32 %v4758_v40  ;;  %vm4789_vm5 = vweird.f32 %v7034_v22  ;;  %vm4771_vm8 = vmor %vm4769_vm6, %vm4770_vm4  ;;  %vm4808_vm13 = vweird.f32 %v4802_v1 }
 0xbd9   :  { %v4766_v56 = vsub.f32 1.0, %v4765_v4  ;;  %vm4790_vm9 = vmor %vm4788_vm7, %vm4789_vm5  ;;  %v4812_v35 = vand.u32 2147483647, %v4802_v1  ;;  %v4815_v42 = vor.u32 1.1754944e-38, %v4814_v27 }
 0xbda   :  { %v4785_v3 = vsub.f32 1.0, %v4784_v8 }
 0xbdb   :  { %v4767_v45 = vmul.f32 %v7032_v31, %v4766_v56  ;;  %vm4813_vm15 = vcmp.eq.f32.partialorder %v4812_v35, 8.507059e+37 }
 0xbdc   :  { %v4786_v52 = vmul.f32 %v7034_v22, %v4785_v3 }
 0xbdd   :  { %v7036_v57 = vpop.eup %7035  ;;  %v4768_v16 = vadd.f32 %v7032_v31, %v4767_v45 }
 0xbde   :  { %v4787_v51 = vadd.f32 %v7034_v22, %v4786_v52  ;;  %v4804_v25 = vmul.f32 %v7036_v57, %v4802_v1  ;;  %v7038_v24 = vpop.eup %7037  ;;  %vm4809_vm12 = vweird.f32 %v7036_v57 }
 0xbdf   :  { %v4772_v29 = vsel %vm4771_vm8, %v7032_v31, %v4768_v16  ;;  %vm4810_vm14 = vmor %vm4808_vm13, %vm4809_vm12 }
 0xbe0   :  { %v4777_v6 = vsel %vm4774_vm10, %v4776_v18, %v4772_v29  ;;  %v4791_v5 = vsel %vm4790_vm9, %v7034_v22, %v4787_v51  ;;  %v4805_v46 = vsub.f32 1.0, %v4804_v25 }
 0xbe1   :  { %v4796_v38 = vsel %vm4793_vm11, %v4795_v13, %v4791_v5  ;;  %v4819_v0 = vmul.f32 %v7038_v24, %v4777_v6 }
 0xbe2   :  { %v4818_v53 = vmul.f32 %v4796_v38, %v8209_v26  ;;  %v4806_v11 = vmul.f32 %v7036_v57, %v4805_v46 }
 0xbe4   :  { %v4820_v54 = vadd.f32 %v4819_v0, %v4818_v53  ;;  %v4807_v36 = vadd.f32 %v7036_v57, %v4806_v11 }
 0xbe6   :  { %7039 = vtanh.f32 %v4820_v54  ;;  %6419 = vst [vmem:[%s8229_s6 + $0x8] sm:$0xff] %v4820_v54  ;;  %v4811_v49 = vsel %vm4810_vm14, %v7036_v57, %v4807_v36 }
 0xbe7   :  { %v4816_v55 = vsel %vm4813_vm15, %v4815_v42, %v4811_v49 }
 0xbec   :  { %v7040_v19 = vpop.eup %7039 }
 0xbed   :  { %v4822_v43 = vmul.f32 %v7040_v19, %v4816_v55 }
 0xbef   :  { %6418 = vst [vmem:[%s8228_s5 + $0x8] sm:$0xff] %v4822_v43 }
 0xbf0   :  { %4835 = vsyncmov [#allocation6] }
 0xbf3   :  { %s4836_s8 = vpop.sfrf %4835 }
 0xbf4   :  { %p6420_p0 = scmp.ne.s32.totalorder %s4836_s8, 0 }
 0xbf6   :  { %4840 = shalt.err (%p6420_p0)  }
 0xbf7   :  { %4842 = vsyncmov [#allocation6 + $0x1] }
 0xbfa   :  { %s4843_s6 = vpop.sfrf %4842 }
 0xbfb   :  { %p6421_p1 = scmp.ne.s32.totalorder %s4843_s6, 0 }
 0xbfd   :  { %4847 = shalt.err (%p6421_p1)  }
 0xbfe   :  { %4849 = vsyncmov [#allocation6 + $0x2] }
 0xc01   :  { %s4850_s9 = vpop.sfrf %4849 }
 0xc02   :  { %p6422_p2 = scmp.ne.s32.totalorder %s4850_s9, 0 }
 0xc04   :  { %4854 = shalt.err (%p6422_p2)  }
 0xc05   :  { %4856 = vsyncmov [#allocation6 + $0x3] }
 0xc08   :  { %s4857_s10 = vpop.sfrf %4856 }
 0xc09   :  { %p6423_p3 = scmp.ne.s32.totalorder %s4857_s10, 0 }
 0xc0b   :  { %4861 = shalt.err (%p6423_p3)  }

</bundles_post_ra>
